<compile_context>
chip_gen: v7x
topology: tpu7x:2x2x1
jax: 0.10.0
libtpu: 0.0.40
codegen_flags: <defaults>
</compile_context>

<pallas_src>
import jax
import jax.numpy as jnp
from jax import lax
from jax.experimental import pallas as pl
from jax.experimental.pallas import tpu as pltpu

LANE = 128


def _round_up(x, m):
    return ((x + m - 1) // m) * m


# ---------------------------------------------------------------------------
# Kernel
# ---------------------------------------------------------------------------
def _double_conv_kernel(x_ref, w1_ref, s1_ref, b1_ref, w2_ref, s2_ref, b2_ref,
                        o_ref, mid_ref):
    # x_ref   : (B, H+2, W+2, Cip) bf16  spatially pre-padded input block
    # w1_ref  : (9*Cip, Cop)       bf16  conv1 weights, im2col layout
    # s1/b1   : (1, Cop)           f32   folded BN1 scale / bias
    # w2_ref  : (9*Cop, Cop)       bf16  conv2 weights, im2col layout
    # s2/b2   : (1, Cop)           f32   folded BN2 scale / bias
    # o_ref   : (B, H, W, Cop)     bf16  output block (lane-dense last dim)
    # mid_ref : (B, H+2, W+2, Cop) bf16  VMEM staging for conv2's padded input
    B = o_ref.shape[0]
    H = o_ref.shape[1]
    W = o_ref.shape[2]
    Cop = o_ref.shape[3]

    def im2col(buf, C):
        # buf: (B, H+2, W+2, C) bf16 ref. Tap order (dy, dx, c) matches the
        # (3, 3, C, Cop) -> (9*C, Cop) weight reshape. One lane-axis concat,
        # taps are already bf16 so no extra f32 bytes move through it.
        taps = [buf[:, dy:dy + H, dx:dx + W, :]
                for dy in range(3) for dx in range(3)]
        return jnp.concatenate(taps, axis=-1).reshape(B * H * W, 9 * C)

    # ---- conv1 + folded BN1 + ReLU (single bf16 MXU matmul, f32 accumulate) --
    Cip = x_ref.shape[3]
    y1 = jnp.dot(im2col(x_ref, Cip), w1_ref[...],
                 preferred_element_type=jnp.float32)
    y1 = jnp.maximum(y1 * s1_ref[...] + b1_ref[...], 0.0)

    # Stage y1 (bf16) into the spatially padded scratch. The W halo is merged
    # into the value so the interior write is ONE aligned full-width row store;
    # only the top/bottom halo rows need explicit zero stores.
    y1 = y1.reshape(B, H, W, Cop).astype(jnp.bfloat16)
    zcol = jnp.zeros((B, H, 1, Cop), jnp.bfloat16)
    mid_ref[:, 1:H + 1, :, :] = jnp.concatenate([zcol, y1, zcol], axis=2)
    zrow = jnp.zeros((B, 1, W + 2, Cop), jnp.bfloat16)
    mid_ref[:, 0:1, :, :] = zrow
    mid_ref[:, H + 1:H + 2, :, :] = zrow

    # ---- conv2 + folded BN2 + ReLU ------------------------------------------
    y2 = jnp.dot(im2col(mid_ref, Cop), w2_ref[...],
                 preferred_element_type=jnp.float32)
    y2 = jnp.maximum(y2 * s2_ref[...] + b2_ref[...], 0.0)
    o_ref[...] = y2.reshape(B, H, W, Cop).astype(o_ref.dtype)


# ---------------------------------------------------------------------------
# VMEM budgeting / batch-block selection
# ---------------------------------------------------------------------------
def _vmem_bytes_estimate(B, H, W, Cip, Cop):
    bf16, f32 = 2, 4
    x_blk = 2 * B * (H + 2) * (W + 2) * Cip * bf16      # double-buffered input
    o_blk = 2 * B * H * W * Cop * bf16                   # double-buffered output
    wgt = 2 * (9 * Cip * Cop + 9 * Cop * Cop) * bf16     # weights (double-buffered)
    mid = B * (H + 2) * (W + 2) * Cop * bf16             # staging scratch
    patch = B * H * W * 9 * max(Cip, Cop) * bf16         # im2col temporary
    acc = B * H * W * Cop * f32                          # f32 matmul result
    return x_blk + o_blk + wgt + mid + 2 * (patch + acc)


def _pick_batch_block(N, H, W, Cip, Cop, budget_bytes=40 << 20):
    # Largest divisor of N that fits a conservative (v7x-safe) VMEM budget while
    # keeping >= 2 grid steps (when N >= 2) so both megacore cores get work.
    best = 1
    for B in range(1, N + 1):
        if N % B:
            continue
        if N >= 2 and (N // B) < 2:
            continue
        if _vmem_bytes_estimate(B, H, W, Cip, Cop) <= budget_bytes:
            best = B
    return best


# ---------------------------------------------------------------------------
# Parameter preparation
# ---------------------------------------------------------------------------
def _fold_bn(gamma, beta, mean, var, Cout, Cop, eps):
    # Eval-mode BN folded into per-channel scale/bias (f32). Padded channels get
    # scale=1 / bias=0 so they stay exactly zero through both stages.
    s = gamma / jnp.sqrt(var + eps)
    b = beta - mean * s
    s = jnp.pad(s.astype(jnp.float32), (0, Cop - Cout), constant_values=1.0)
    b = jnp.pad(b.astype(jnp.float32), (0, Cop - Cout))
    return s.reshape(1, Cop), b.reshape(1, Cop)


def _prep_weight(w_oihw, Ci, Co, Cipad, Copad):
    # OIHW -> HWIO, zero-pad I/O channels, flatten to im2col layout (9*I, O), bf16.
    w = jnp.transpose(w_oihw, (2, 3, 1, 0)).astype(jnp.float32)   # (3,3,Ci,Co)
    w = jnp.pad(w, ((0, 0), (0, 0), (0, Cipad - Ci), (0, Copad - Co)))
    return w.reshape(9 * Cipad, Copad).astype(jnp.bfloat16)


# ---------------------------------------------------------------------------
# Layout helpers (network-boundary conversions only)
# ---------------------------------------------------------------------------
def nchw_to_padded_nhwc(x_nchw, lane=LANE):
    N, C, H, W = x_nchw.shape
    Cp = _round_up(C, lane)
    x = jnp.transpose(x_nchw, (0, 2, 3, 1))
    x = jnp.pad(x, ((0, 0), (0, 0), (0, 0), (0, Cp - C)))
    return x.astype(jnp.bfloat16)


def padded_nhwc_to_nchw(x_nhwc, C):
    return jnp.transpose(x_nhwc[..., :C].astype(jnp.float32), (0, 3, 1, 2))


# ---------------------------------------------------------------------------
# Pallas wrappers
# ---------------------------------------------------------------------------
def double_conv_pallas_nhwc(x_nhwc, w1_oihw, g1, be1, m1, v1,
                            w2_oihw, g2, be2, m2, v2, eps=1e-5):
    """Chained-layer entry point.

    x_nhwc: (N, H, W, Cip) bf16, channels zero-padded to a multiple of 128.
    Returns (N, H, W, Cop) bf16 in the same padded NHWC layout, so stacked
    DoubleConv layers never pay NCHW<->NHWC conversions.
    """
    N, H, W, Cip = x_nhwc.shape
    Cin = w1_oihw.shape[1]
    Cout = w1_oihw.shape[0]
    Cop = _round_up(Cout, LANE)
    assert Cip == _round_up(Cin, LANE) and Cip % LANE == 0

    w1 = _prep_weight(w1_oihw, Cin, Cout, Cip, Cop)
    w2 = _prep_weight(w2_oihw, Cout, Cout, Cop, Cop)
    s1, b1 = _fold_bn(g1, be1, m1, v1, Cout, Cop, eps)
    s2, b2 = _fold_bn(g2, be2, m2, v2, Cout, Cop, eps)

    # One-time spatial SAME-halo pad: conv1 reads an already-padded block, so no
    # in-kernel staging copy / halo zeroing is needed for the first conv.
    x_pad = jnp.pad(x_nhwc, ((0, 0), (1, 1), (1, 1), (0, 0))).astype(jnp.bfloat16)

    B = _pick_batch_block(N, H, W, Cip, Cop)
    grid = (N // B,)

    # NOTE: weights / BN scale+bias have constant index maps; they could be
    # single-buffered (pipeline_mode=pl.Buffered(1)) to reclaim VMEM headroom
    # once spatial tiles are enlarged -- left default-buffered here for
    # compatibility.
    out = pl.pallas_call(
        _double_conv_kernel,
        out_shape=jax.ShapeDtypeStruct((N, H, W, Cop), jnp.bfloat16),
        grid_spec=pltpu.PrefetchScalarGridSpec(
            num_scalar_prefetch=0,
            grid=grid,
            in_specs=[
                pl.BlockSpec((B, H + 2, W + 2, Cip), lambda n: (n, 0, 0, 0)),
                pl.BlockSpec((9 * Cip, Cop), lambda n: (0, 0)),
                pl.BlockSpec((1, Cop), lambda n: (0, 0)),
                pl.BlockSpec((1, Cop), lambda n: (0, 0)),
                pl.BlockSpec((9 * Cop, Cop), lambda n: (0, 0)),
                pl.BlockSpec((1, Cop), lambda n: (0, 0)),
                pl.BlockSpec((1, Cop), lambda n: (0, 0)),
            ],
            out_specs=pl.BlockSpec((B, H, W, Cop), lambda n: (n, 0, 0, 0)),
            scratch_shapes=[
                pltpu.VMEM((B, H + 2, W + 2, Cop), jnp.bfloat16),
            ],
        ),
        compiler_params=pltpu.CompilerParams(
            dimension_semantics=("parallel",),
            vmem_limit_bytes=64 * 1024 * 1024),
    )(x_pad, w1, s1, b1, w2, s2, b2)
    return out


def double_conv_pallas(x_nchw, w1_oihw, g1, be1, m1, v1,
                       w2_oihw, g2, be2, m2, v2, eps=1e-5):
    """PyTorch-compatible entry: NCHW f32 in, NCHW f32 out.

    For stacked layers, call nchw_to_padded_nhwc once and chain
    double_conv_pallas_nhwc instead (avoids per-layer layout conversions)."""
    Cout = w1_oihw.shape[0]
    x_nhwc = nchw_to_padded_nhwc(x_nchw)
    y = double_conv_pallas_nhwc(x_nhwc, w1_oihw, g1, be1, m1, v1,
                                w2_oihw, g2, be2, m2, v2, eps)
    return padded_nhwc_to_nchw(y, Cout)


# ---------------------------------------------------------------------------
# Pure-JAX reference (eval-mode BN), NCHW throughout, f32 math
# ---------------------------------------------------------------------------
def double_conv_reference(x_nchw, w1_oihw, g1, be1, m1, v1,
                          w2_oihw, g2, be2, m2, v2, eps=1e-5):
    def bn_relu(y, g, b, m, v):
        y = (y - m[None, :, None, None]) / jnp.sqrt(v + eps)[None, :, None, None]
        y = y * g[None, :, None, None] + b[None, :, None, None]
        return jnp.maximum(y, 0.0)

    dn = ('NCHW', 'OIHW', 'NCHW')
    y = lax.conv_general_dilated(x_nchw, w1_oihw, (1, 1), 'SAME',
                                 dimension_numbers=dn)
    y = bn_relu(y, g1, be1, m1, v1)
    y = lax.conv_general_dilated(y, w2_oihw, (1, 1), 'SAME',
                                 dimension_numbers=dn)
    y = bn_relu(y, g2, be2, m2, v2)
    return y


if __name__ == "__main__":
    key = jax.random.PRNGKey(0)
    N, Cin, Cout, H, W = 2, 4, 8, 16, 16

    ks = jax.random.split(key, 11)
    x = jax.random.normal(ks[0], (N, Cin, H, W), jnp.float32)

    # Conv weights (PyTorch OIHW shapes), deterministic synthetic init.
    w1 = jax.random.normal(ks[1], (Cout, Cin, 3, 3), jnp.float32) * 0.1
    w2 = jax.random.normal(ks[2], (Cout, Cout, 3, 3), jnp.float32) * 0.1

    # BatchNorm params / running stats (eval mode).
    g1 = 1.0 + 0.1 * jax.random.normal(ks[3], (Cout,), jnp.float32)
    b1 = 0.1 * jax.random.normal(ks[4], (Cout,), jnp.float32)
    m1 = 0.1 * jax.random.normal(ks[5], (Cout,), jnp.float32)
    v1 = 1.0 + 0.1 * jnp.abs(jax.random.normal(ks[6], (Cout,), jnp.float32))
    g2 = 1.0 + 0.1 * jax.random.normal(ks[7], (Cout,), jnp.float32)
    b2 = 0.1 * jax.random.normal(ks[8], (Cout,), jnp.float32)
    m2 = 0.1 * jax.random.normal(ks[9], (Cout,), jnp.float32)
    v2 = 1.0 + 0.1 * jnp.abs(jax.random.normal(ks[10], (Cout,), jnp.float32))

    out = double_conv_pallas(x, w1, g1, b1, m1, v1, w2, g2, b2, m2, v2)
    out = jax.block_until_ready(out)

    ref = double_conv_reference(x, w1, g1, b1, m1, v1, w2, g2, b2, m2, v2)
    ref = jax.block_until_ready(ref)

    assert out.shape == (N, Cout, H, W), out.shape
    # Tolerance accounts for bf16 activations + bf16 MXU matmuls (f32 accumulate).
    max_err = float(jnp.max(jnp.abs(out - ref)))
    assert jnp.allclose(out, ref, atol=5e-2, rtol=5e-2), max_err

    print("KERNEL_OK")
</pallas_src>

<mosaic_0001>
module attributes {stable_mosaic.version = 11 : i64} {
  func.func @_double_conv_kernel(%arg0: i32, %arg1: memref<1x18x18x128xbf16, #tpu.memory_space<vmem>>, %arg2: memref<1152x128xbf16, #tpu.memory_space<vmem>>, %arg3: memref<1x128xf32, #tpu.memory_space<vmem>>, %arg4: memref<1x128xf32, #tpu.memory_space<vmem>>, %arg5: memref<1152x128xbf16, #tpu.memory_space<vmem>>, %arg6: memref<1x128xf32, #tpu.memory_space<vmem>>, %arg7: memref<1x128xf32, #tpu.memory_space<vmem>>, %arg8: memref<1x16x16x128xbf16, #tpu.memory_space<vmem>>, %arg9: memref<1x18x18x128xbf16, #tpu.memory_space<vmem>>) attributes {dimension_semantics = [#tpu.dimension_semantics<parallel>], iteration_bounds = array<i64: 2>, scalar_prefetch = 0 : i64, scratch_operands = 1 : i64, tpu.core_type = #tpu.core_type<tc>, window_params = [{transform_indices = @transform_0, window_bounds = array<i64: 1, 18, 18, 128>}, {pipeline_mode = #tpu.pipeline_mode<synchronous>, transform_indices = @transform_1, window_bounds = array<i64: 1152, 128>}, {pipeline_mode = #tpu.pipeline_mode<synchronous>, transform_indices = @transform_2, window_bounds = array<i64: 1, 128>}, {pipeline_mode = #tpu.pipeline_mode<synchronous>, transform_indices = @transform_3, window_bounds = array<i64: 1, 128>}, {pipeline_mode = #tpu.pipeline_mode<synchronous>, transform_indices = @transform_4, window_bounds = array<i64: 1152, 128>}, {pipeline_mode = #tpu.pipeline_mode<synchronous>, transform_indices = @transform_5, window_bounds = array<i64: 1, 128>}, {pipeline_mode = #tpu.pipeline_mode<synchronous>, transform_indices = @transform_6, window_bounds = array<i64: 1, 128>}, {transform_indices = @transform_7, window_bounds = array<i64: 1, 16, 16, 128>}]} {
    %c0 = arith.constant 0 : index
    %c0_0 = arith.constant 0 : index
    %c0_1 = arith.constant 0 : index
    %c0_2 = arith.constant 0 : index
    %0 = vector.load %arg1[%c0, %c0_0, %c0_1, %c0_2] : memref<1x18x18x128xbf16, #tpu.memory_space<vmem>>, vector<1x16x16x128xbf16>
    %c0_3 = arith.constant 0 : index
    %c0_4 = arith.constant 0 : index
    %c1 = arith.constant 1 : index
    %c0_5 = arith.constant 0 : index
    %1 = vector.load %arg1[%c0_3, %c0_4, %c1, %c0_5] : memref<1x18x18x128xbf16, #tpu.memory_space<vmem>>, vector<1x16x16x128xbf16>
    %c0_6 = arith.constant 0 : index
    %c0_7 = arith.constant 0 : index
    %c2 = arith.constant 2 : index
    %c0_8 = arith.constant 0 : index
    %2 = vector.load %arg1[%c0_6, %c0_7, %c2, %c0_8] : memref<1x18x18x128xbf16, #tpu.memory_space<vmem>>, vector<1x16x16x128xbf16>
    %c0_9 = arith.constant 0 : index
    %c1_10 = arith.constant 1 : index
    %c0_11 = arith.constant 0 : index
    %c0_12 = arith.constant 0 : index
    %3 = vector.load %arg1[%c0_9, %c1_10, %c0_11, %c0_12] : memref<1x18x18x128xbf16, #tpu.memory_space<vmem>>, vector<1x16x16x128xbf16>
    %c0_13 = arith.constant 0 : index
    %c1_14 = arith.constant 1 : index
    %c1_15 = arith.constant 1 : index
    %c0_16 = arith.constant 0 : index
    %4 = vector.load %arg1[%c0_13, %c1_14, %c1_15, %c0_16] : memref<1x18x18x128xbf16, #tpu.memory_space<vmem>>, vector<1x16x16x128xbf16>
    %c0_17 = arith.constant 0 : index
    %c1_18 = arith.constant 1 : index
    %c2_19 = arith.constant 2 : index
    %c0_20 = arith.constant 0 : index
    %5 = vector.load %arg1[%c0_17, %c1_18, %c2_19, %c0_20] : memref<1x18x18x128xbf16, #tpu.memory_space<vmem>>, vector<1x16x16x128xbf16>
    %c0_21 = arith.constant 0 : index
    %c2_22 = arith.constant 2 : index
    %c0_23 = arith.constant 0 : index
    %c0_24 = arith.constant 0 : index
    %6 = vector.load %arg1[%c0_21, %c2_22, %c0_23, %c0_24] : memref<1x18x18x128xbf16, #tpu.memory_space<vmem>>, vector<1x16x16x128xbf16>
    %c0_25 = arith.constant 0 : index
    %c2_26 = arith.constant 2 : index
    %c1_27 = arith.constant 1 : index
    %c0_28 = arith.constant 0 : index
    %7 = vector.load %arg1[%c0_25, %c2_26, %c1_27, %c0_28] : memref<1x18x18x128xbf16, #tpu.memory_space<vmem>>, vector<1x16x16x128xbf16>
    %c0_29 = arith.constant 0 : index
    %c2_30 = arith.constant 2 : index
    %c2_31 = arith.constant 2 : index
    %c0_32 = arith.constant 0 : index
    %8 = vector.load %arg1[%c0_29, %c2_30, %c2_31, %c0_32] : memref<1x18x18x128xbf16, #tpu.memory_space<vmem>>, vector<1x16x16x128xbf16>
    %9 = tpu.concatenate %0, %1, %2, %3, %4, %5, %6, %7, %8 in 3 : vector<1x16x16x128xbf16>, vector<1x16x16x128xbf16>, vector<1x16x16x128xbf16>, vector<1x16x16x128xbf16>, vector<1x16x16x128xbf16>, vector<1x16x16x128xbf16>, vector<1x16x16x128xbf16>, vector<1x16x16x128xbf16>, vector<1x16x16x128xbf16> -> vector<1x16x16x1152xbf16>
    %10 = vector.shape_cast %9 : vector<1x16x16x1152xbf16> to vector<256x1152xbf16>
    %c0_33 = arith.constant 0 : index
    %c0_34 = arith.constant 0 : index
    %11 = vector.load %arg2[%c0_33, %c0_34] : memref<1152x128xbf16, #tpu.memory_space<vmem>>, vector<1152x128xbf16>
    %cst = arith.constant dense<0.000000e+00> : vector<256x128xf32>
    %12 = tpu.matmul %10, %11, %cst {dimension_numbers = #tpu.dot_dimension_numbers<[1], [0], [0], [1], [0, 0, 1, 1], [], []>} : vector<256x1152xbf16>, vector<1152x128xbf16>, vector<256x128xf32> -> vector<256x128xf32>
    %c0_35 = arith.constant 0 : index
    %c0_36 = arith.constant 0 : index
    %13 = vector.load %arg3[%c0_35, %c0_36] : memref<1x128xf32, #tpu.memory_space<vmem>>, vector<1x128xf32>
    %14 = vector.broadcast %13 : vector<1x128xf32> to vector<256x128xf32>
    %15 = arith.mulf %12, %14 : vector<256x128xf32>
    %c0_37 = arith.constant 0 : index
    %c0_38 = arith.constant 0 : index
    %16 = vector.load %arg4[%c0_37, %c0_38] : memref<1x128xf32, #tpu.memory_space<vmem>>, vector<1x128xf32>
    %17 = vector.broadcast %16 : vector<1x128xf32> to vector<256x128xf32>
    %18 = arith.addf %15, %17 : vector<256x128xf32>
    %cst_39 = arith.constant 0.000000e+00 : f32
    %19 = vector.broadcast %cst_39 : f32 to vector<256x128xf32>
    %20 = arith.maximumf %18, %19 : vector<256x128xf32>
    %21 = vector.shape_cast %20 : vector<256x128xf32> to vector<1x16x16x128xf32>
    %22 = arith.truncf %21 : vector<1x16x16x128xf32> to vector<1x16x16x128xbf16>
    %cst_40 = arith.constant 0.000000e+00 : bf16
    %23 = vector.broadcast %cst_40 : bf16 to vector<1x16x1x128xbf16>
    %24 = tpu.concatenate %23, %22, %23 in 2 : vector<1x16x1x128xbf16>, vector<1x16x16x128xbf16>, vector<1x16x1x128xbf16> -> vector<1x16x18x128xbf16>
    %c0_41 = arith.constant 0 : index
    %c1_42 = arith.constant 1 : index
    %c0_43 = arith.constant 0 : index
    %c0_44 = arith.constant 0 : index
    %25 = vector.load %arg9[%c0_41, %c1_42, %c0_43, %c0_44] : memref<1x18x18x128xbf16, #tpu.memory_space<vmem>>, vector<1x16x18x128xbf16>
    tpu.vector_store %arg9[%c0_41, %c1_42, %c0_43, %c0_44], %24 {strides = array<i32>} : memref<1x18x18x128xbf16, #tpu.memory_space<vmem>>, vector<1x16x18x128xbf16>,
    %cst_45 = arith.constant 0.000000e+00 : bf16
    %26 = vector.broadcast %cst_45 : bf16 to vector<1x1x18x128xbf16>
    %c0_46 = arith.constant 0 : index
    %c0_47 = arith.constant 0 : index
    %c0_48 = arith.constant 0 : index
    %c0_49 = arith.constant 0 : index
    %27 = vector.load %arg9[%c0_46, %c0_47, %c0_48, %c0_49] : memref<1x18x18x128xbf16, #tpu.memory_space<vmem>>, vector<1x1x18x128xbf16>
    tpu.vector_store %arg9[%c0_46, %c0_47, %c0_48, %c0_49], %26 {strides = array<i32>} : memref<1x18x18x128xbf16, #tpu.memory_space<vmem>>, vector<1x1x18x128xbf16>,
    %c0_50 = arith.constant 0 : index
    %c17 = arith.constant 17 : index
    %c0_51 = arith.constant 0 : index
    %c0_52 = arith.constant 0 : index
    %28 = vector.load %arg9[%c0_50, %c17, %c0_51, %c0_52] : memref<1x18x18x128xbf16, #tpu.memory_space<vmem>>, vector<1x1x18x128xbf16>
    tpu.vector_store %arg9[%c0_50, %c17, %c0_51, %c0_52], %26 {strides = array<i32>} : memref<1x18x18x128xbf16, #tpu.memory_space<vmem>>, vector<1x1x18x128xbf16>,
    %c0_53 = arith.constant 0 : index
    %c0_54 = arith.constant 0 : index
    %c0_55 = arith.constant 0 : index
    %c0_56 = arith.constant 0 : index
    %29 = vector.load %arg9[%c0_53, %c0_54, %c0_55, %c0_56] : memref<1x18x18x128xbf16, #tpu.memory_space<vmem>>, vector<1x16x16x128xbf16>
    %c0_57 = arith.constant 0 : index
    %c0_58 = arith.constant 0 : index
    %c1_59 = arith.constant 1 : index
    %c0_60 = arith.constant 0 : index
    %30 = vector.load %arg9[%c0_57, %c0_58, %c1_59, %c0_60] : memref<1x18x18x128xbf16, #tpu.memory_space<vmem>>, vector<1x16x16x128xbf16>
    %c0_61 = arith.constant 0 : index
    %c0_62 = arith.constant 0 : index
    %c2_63 = arith.constant 2 : index
    %c0_64 = arith.constant 0 : index
    %31 = vector.load %arg9[%c0_61, %c0_62, %c2_63, %c0_64] : memref<1x18x18x128xbf16, #tpu.memory_space<vmem>>, vector<1x16x16x128xbf16>
    %c0_65 = arith.constant 0 : index
    %c1_66 = arith.constant 1 : index
    %c0_67 = arith.constant 0 : index
    %c0_68 = arith.constant 0 : index
    %32 = vector.load %arg9[%c0_65, %c1_66, %c0_67, %c0_68] : memref<1x18x18x128xbf16, #tpu.memory_space<vmem>>, vector<1x16x16x128xbf16>
    %c0_69 = arith.constant 0 : index
    %c1_70 = arith.constant 1 : index
    %c1_71 = arith.constant 1 : index
    %c0_72 = arith.constant 0 : index
    %33 = vector.load %arg9[%c0_69, %c1_70, %c1_71, %c0_72] : memref<1x18x18x128xbf16, #tpu.memory_space<vmem>>, vector<1x16x16x128xbf16>
    %c0_73 = arith.constant 0 : index
    %c1_74 = arith.constant 1 : index
    %c2_75 = arith.constant 2 : index
    %c0_76 = arith.constant 0 : index
    %34 = vector.load %arg9[%c0_73, %c1_74, %c2_75, %c0_76] : memref<1x18x18x128xbf16, #tpu.memory_space<vmem>>, vector<1x16x16x128xbf16>
    %c0_77 = arith.constant 0 : index
    %c2_78 = arith.constant 2 : index
    %c0_79 = arith.constant 0 : index
    %c0_80 = arith.constant 0 : index
    %35 = vector.load %arg9[%c0_77, %c2_78, %c0_79, %c0_80] : memref<1x18x18x128xbf16, #tpu.memory_space<vmem>>, vector<1x16x16x128xbf16>
    %c0_81 = arith.constant 0 : index
    %c2_82 = arith.constant 2 : index
    %c1_83 = arith.constant 1 : index
    %c0_84 = arith.constant 0 : index
    %36 = vector.load %arg9[%c0_81, %c2_82, %c1_83, %c0_84] : memref<1x18x18x128xbf16, #tpu.memory_space<vmem>>, vector<1x16x16x128xbf16>
    %c0_85 = arith.constant 0 : index
    %c2_86 = arith.constant 2 : index
    %c2_87 = arith.constant 2 : index
    %c0_88 = arith.constant 0 : index
    %37 = vector.load %arg9[%c0_85, %c2_86, %c2_87, %c0_88] : memref<1x18x18x128xbf16, #tpu.memory_space<vmem>>, vector<1x16x16x128xbf16>
    %38 = tpu.concatenate %29, %30, %31, %32, %33, %34, %35, %36, %37 in 3 : vector<1x16x16x128xbf16>, vector<1x16x16x128xbf16>, vector<1x16x16x128xbf16>, vector<1x16x16x128xbf16>, vector<1x16x16x128xbf16>, vector<1x16x16x128xbf16>, vector<1x16x16x128xbf16>, vector<1x16x16x128xbf16>, vector<1x16x16x128xbf16> -> vector<1x16x16x1152xbf16>
    %39 = vector.shape_cast %38 : vector<1x16x16x1152xbf16> to vector<256x1152xbf16>
    %c0_89 = arith.constant 0 : index
    %c0_90 = arith.constant 0 : index
    %40 = vector.load %arg5[%c0_89, %c0_90] : memref<1152x128xbf16, #tpu.memory_space<vmem>>, vector<1152x128xbf16>
    %cst_91 = arith.constant dense<0.000000e+00> : vector<256x128xf32>
    %41 = tpu.matmul %39, %40, %cst_91 {dimension_numbers = #tpu.dot_dimension_numbers<[1], [0], [0], [1], [0, 0, 1, 1], [], []>} : vector<256x1152xbf16>, vector<1152x128xbf16>, vector<256x128xf32> -> vector<256x128xf32>
    %c0_92 = arith.constant 0 : index
    %c0_93 = arith.constant 0 : index
    %42 = vector.load %arg6[%c0_92, %c0_93] : memref<1x128xf32, #tpu.memory_space<vmem>>, vector<1x128xf32>
    %43 = vector.broadcast %42 : vector<1x128xf32> to vector<256x128xf32>
    %44 = arith.mulf %41, %43 : vector<256x128xf32>
    %c0_94 = arith.constant 0 : index
    %c0_95 = arith.constant 0 : index
    %45 = vector.load %arg7[%c0_94, %c0_95] : memref<1x128xf32, #tpu.memory_space<vmem>>, vector<1x128xf32>
    %46 = vector.broadcast %45 : vector<1x128xf32> to vector<256x128xf32>
    %47 = arith.addf %44, %46 : vector<256x128xf32>
    %cst_96 = arith.constant 0.000000e+00 : f32
    %48 = vector.broadcast %cst_96 : f32 to vector<256x128xf32>
    %49 = arith.maximumf %47, %48 : vector<256x128xf32>
    %50 = vector.shape_cast %49 : vector<256x128xf32> to vector<1x16x16x128xf32>
    %51 = arith.truncf %50 : vector<1x16x16x128xf32> to vector<1x16x16x128xbf16>
    %c0_97 = arith.constant 0 : index
    %c0_98 = arith.constant 0 : index
    %c0_99 = arith.constant 0 : index
    %c0_100 = arith.constant 0 : index
    %52 = vector.load %arg8[%c0_97, %c0_98, %c0_99, %c0_100] : memref<1x16x16x128xbf16, #tpu.memory_space<vmem>>, vector<1x16x16x128xbf16>
    tpu.vector_store %arg8[%c0_97, %c0_98, %c0_99, %c0_100], %51 {strides = array<i32>} : memref<1x16x16x128xbf16, #tpu.memory_space<vmem>>, vector<1x16x16x128xbf16>,
    return
  }
  func.func @transform_0(%arg0: i32) -> (i32, i32, i32, i32) {
    %c0_i32 = arith.constant 0 : i32
    %c0_i32_0 = arith.constant 0 : i32
    %c0_i32_1 = arith.constant 0 : i32
    %c0_i32_2 = arith.constant 0 : i32
    return %arg0, %c0_i32, %c0_i32_0, %c0_i32_1 : i32, i32, i32, i32
  }
  func.func @transform_1(%arg0: i32) -> (i32, i32) {
    %c0_i32 = arith.constant 0 : i32
    %c0_i32_0 = arith.constant 0 : i32
    %c0_i32_1 = arith.constant 0 : i32
    return %c0_i32, %c0_i32_0 : i32, i32
  }
  func.func @transform_2(%arg0: i32) -> (i32, i32) {
    %c0_i32 = arith.constant 0 : i32
    %c0_i32_0 = arith.constant 0 : i32
    %c0_i32_1 = arith.constant 0 : i32
    return %c0_i32, %c0_i32_0 : i32, i32
  }
  func.func @transform_3(%arg0: i32) -> (i32, i32) {
    %c0_i32 = arith.constant 0 : i32
    %c0_i32_0 = arith.constant 0 : i32
    %c0_i32_1 = arith.constant 0 : i32
    return %c0_i32, %c0_i32_0 : i32, i32
  }
  func.func @transform_4(%arg0: i32) -> (i32, i32) {
    %c0_i32 = arith.constant 0 : i32
    %c0_i32_0 = arith.constant 0 : i32
    %c0_i32_1 = arith.constant 0 : i32
    return %c0_i32, %c0_i32_0 : i32, i32
  }
  func.func @transform_5(%arg0: i32) -> (i32, i32) {
    %c0_i32 = arith.constant 0 : i32
    %c0_i32_0 = arith.constant 0 : i32
    %c0_i32_1 = arith.constant 0 : i32
    return %c0_i32, %c0_i32_0 : i32, i32
  }
  func.func @transform_6(%arg0: i32) -> (i32, i32) {
    %c0_i32 = arith.constant 0 : i32
    %c0_i32_0 = arith.constant 0 : i32
    %c0_i32_1 = arith.constant 0 : i32
    return %c0_i32, %c0_i32_0 : i32, i32
  }
  func.func @transform_7(%arg0: i32) -> (i32, i32, i32, i32) {
    %c0_i32 = arith.constant 0 : i32
    %c0_i32_0 = arith.constant 0 : i32
    %c0_i32_1 = arith.constant 0 : i32
    %c0_i32_2 = arith.constant 0 : i32
    return %arg0, %c0_i32, %c0_i32_0, %c0_i32_1 : i32, i32, i32, i32
  }
}

</mosaic_0001>

<bundles_post_ra>
// kernel: tpu_custom_call.1
= control target key start
LH: loop header
LB: loop body
LE: loop exit
PB: predicated region body
PF: predicated region fallthrough
CT: control target
= control target key end

     0   :  { %s12789_s0 = inlined_call_operand.hbm [shape: bf16[2,18,18,128], index: 0, kind: input, shape index: {}]   ;;  %s12790_s1 = inlined_call_operand.hbm [shape: bf16[1152,128], index: 1, kind: input, shape index: {}]   ;;  %s12791_s2 = inlined_call_operand.hbm [shape: f32[1,128], index: 2, kind: input, shape index: {}]   ;;  %s12792_s3 = inlined_call_operand.hbm [shape: f32[1,128], index: 3, kind: input, shape index: {}]   ;;  %s12793_s4 = inlined_call_operand.hbm [shape: bf16[1152,128], index: 4, kind: input, shape index: {}]   ;;  %s12794_s5 = inlined_call_operand.hbm [shape: f32[1,128], index: 5, kind: input, shape index: {}]   ;;  %s12795_s6 = inlined_call_operand.hbm [shape: f32[1,128], index: 6, kind: input, shape index: {}]   ;;  %s12796_s7 = inlined_call_operand.hbm [shape: bf16[2,16,16,128], index: 7, kind: output, shape index: {}]  }
   0x1   :  { %12841 = sst [smem:[#allocation66_spill]] %s12790_s1 }
   0x2   :  { %12 = vsyncpa [#allocation4], 0 }
   0x3   :  { %14 = vsyncpa [#allocation4 + $0x1], 0 }
   0x4   :  { %15 = vsyncpa [#allocation7], 0 }
   0x5   :  { %16 = vsyncpa [#allocation10], 0 }
   0x6   :  { %17 = vsyncpa [#allocation13], 0 }
   0x7   :  { %18 = vsyncpa [#allocation5], 0 }
   0x8   :  { %20 = vsyncpa [#allocation5 + $0x1], 0  ;;  %s9995_s24 = smov 0   ;;  %s9997_s25 = smov 0  }
   0x9   :  { %s9999_s26 = smov 0   ;;  %s10001_s27 = smov 0  }
   0xa LB: > { %s9942_s28 = smov [#allocation6]   ;;  %s10016_s30 = sadd.s32 4294967295, %s9940_s27   ;;  %s9940_s27 = sphi %s10001_s27, %s13034_s27   ;;  %s9936_s26 = sphi %s9999_s26, %s13033_s26   ;;  %s9932_s25 = sphi %s9997_s25, %s13032_s25   ;;  %s9928_s24 = sphi %s9995_s24, %s13031_s24  }
   0xb   : > { %s221_s29 = sshll.u32 %s9942_s28, 4  ;;  %p7264_p0 = scmp.ge.s32.totalorder %s9940_s27, 1  ;;  %s10021_s29 = int_to_ptr.vmem [resolvable:$true] %s221_s29 }
   0xc   : > { %p12797_p1 = scmp.eq.s32.totalorder %s10016_s30, 0  ;;  %p209_p2 = scmp.lt.s32.totalorder %s9940_s27, 3 }
   0xd   : > { %s9943_s9 = smov [#allocation9]   ;;  %s9944_s12 = smov [#allocation12]  }
   0xe   : > { %p10023_p3 = pnand %p7264_p0, %p209_p2  ;;  %s246_s10 = sshll.u32 %s9943_s9, 4  ;;  %s10036_s10 = int_to_ptr.vmem [resolvable:$true] %s246_s10 }
   0xf   : > { %s270_s13 = sshll.u32 %s9944_s12, 4  ;;  %s12844_s1 = sld [smem:[#allocation66_spill]]  ;;  %s10038_s13 = int_to_ptr.vmem [resolvable:$true] %s270_s13 }
  0x10   : > { %s12842_s8 = scalar_select %p10023_p3, 1, 0 }
  0x11   : > { %p9129_p5 = pneg %p10023_p3 }
  0x13   : > { %p10032_p6 = pnand %p9129_p5, %p12797_p1 }
  0x15   : > { %s9664_s16 = scalar_lea.hbm %s12844_s1, 9216  ;;  %p10048_p8 = pneg %p10032_p6 }
  0x16   : > { %p9665_p7 = scmp.ne.s32.totalorder %s12844_s1, %s9664_s16  ;;  %p9671_p11 = scmp.lt.u32.totalorder %s9664_s16, %s12844_s1 }
  0x18   : > { %p9667_p9 = pnand %p10048_p8, %p9665_p7 }
  0x1a   : > { %p9668_p10 = pneg %p9667_p9 }
  0x1c   : > { %p9673_p12 = pnand %p9671_p11, %p9668_p10 }
  0x1e   : > { %9676 = shalt.err (!%p9673_p12)
}
  0x1f   : > { %s9677_s22 = scalar_lea.vmem %s10021_s29, 9216  ;;  %p9685_p5 = scmp.lt.s32.totalorder %s10021_s29, %s10021_s29 }
  0x20   : > { %p9678_p13 = scmp.ne.s32.totalorder %s10021_s29, %s9677_s22  ;;  %p9686_p4 = scmp.lt.s32.totalorder %s9677_s22, %s9677_s22 }
  0x22   : > { %p9680_p0 = pnand %p9678_p13, %p10048_p8  ;;  %p9687_p7 = por %p9686_p4, %p9685_p5 }
  0x24   : > { %p9681_p2 = pneg %p9680_p0 }
  0x26   : > { %p9688_p9 = pnand %p9687_p7, %p9681_p2 }
  0x28   : > { %9691 = shalt.err (!%p9688_p9)
}
  0x29   : > { %s12799_s23 = smov 64   ;;  %s12800_s28 = smov 4  }
  0x2a   : > { %9132 = dma.hbm_to_vmem [thread:$0]  (!%p10032_p6), %s12844_s1, 9216, %s10021_s29, [#allocation7], %s12799_s23, %s12799_s23, %s12800_s28  }
  0x2b   : > { %s9692_s16 = scalar_lea.hbm %s12792_s3, 16 }
  0x2c   : > { %p9693_p4 = scmp.ne.s32.totalorder %s12792_s3, %s9692_s16  ;;  %p9699_p12 = scmp.lt.u32.totalorder %s9692_s16, %s12792_s3 }
  0x2e   : > { %p9695_p10 = pnand %p9693_p4, %p10048_p8 }
  0x30   : > { %p9696_p11 = pneg %p9695_p10 }
  0x32   : > { %p9701_p13 = pnand %p9699_p12, %p9696_p11 }
  0x34   : > { %9704 = shalt.err (!%p9701_p13)
}
  0x35   : > { %s9705_s29 = scalar_lea.vmem %s10036_s10, 16  ;;  %s9712_s22 = scalar_lea.vmem %s10036_s10, 32 }
  0x36   : > { %p9706_p0 = scmp.ne.s32.totalorder %s10036_s10, %s9705_s29  ;;  %p9713_p7 = scmp.lt.s32.totalorder %s10036_s10, %s10036_s10 }
  0x37   : > { %p9714_p9 = scmp.lt.s32.totalorder %s9712_s22, %s9705_s29 }
  0x38   : > { %p9708_p2 = pnand %p9706_p0, %p10048_p8 }
  0x39   : > { %p9715_p4 = por %p9714_p9, %p9713_p7 }
  0x3a   : > { %p9709_p5 = pneg %p9708_p2 }
  0x3c   : > { %p9716_p10 = pnand %p9715_p4, %p9709_p5 }
  0x3e   : > { %9719 = shalt.err (!%p9716_p10)
}
  0x3f   : > { %9138 = dma.hbm_to_vmem [thread:$0]  (!%p10032_p6), %s12792_s3, 16, %s10036_s10, [#allocation10]  }
  0x40   : > { %s9720_s16 = scalar_lea.hbm %s12794_s5, 16 }
  0x41   : > { %p9721_p11 = scmp.ne.s32.totalorder %s12794_s5, %s9720_s16  ;;  %p9727_p0 = scmp.lt.u32.totalorder %s9720_s16, %s12794_s5 }
  0x43   : > { %p9723_p12 = pnand %p9721_p11, %p10048_p8 }
  0x45   : > { %p9724_p13 = pneg %p9723_p12 }
  0x47   : > { %p9729_p2 = pnand %p9727_p0, %p9724_p13 }
  0x49   : > { %9732 = shalt.err (!%p9729_p2)
}
  0x4a   : > { %s9733_s10 = scalar_lea.vmem %s10038_s13, 16  ;;  %s9740_s29 = scalar_lea.vmem %s10038_s13, 32 }
  0x4b   : > { %p9734_p5 = scmp.ne.s32.totalorder %s10038_s13, %s9733_s10  ;;  %p9741_p4 = scmp.lt.s32.totalorder %s10038_s13, %s10038_s13 }
  0x4c   : > { %p9742_p10 = scmp.lt.s32.totalorder %s9740_s29, %s9733_s10 }
  0x4d   : > { %p9736_p7 = pnand %p9734_p5, %p10048_p8 }
  0x4e   : > { %p9743_p11 = por %p9742_p10, %p9741_p4 }
  0x4f   : > { %p9737_p9 = pneg %p9736_p7 }
  0x51   : > { %p9744_p12 = pnand %p9743_p11, %p9737_p9 }
  0x53   : > { %9747 = shalt.err (!%p9744_p12)
}
  0x54   : > { %9144 = dma.hbm_to_vmem [thread:$0]  (!%p10032_p6), %s12794_s5, 16, %s10038_s13, [#allocation13]  }
  0x55   : > { %s9947_s12 = smov [#allocation8]   ;;  %s9948_s15 = smov [#allocation11]  }
  0x56   : > { %s235_s14 = sshll.u32 %s9947_s12, 4  ;;  %s256_s16 = sshll.u32 %s9948_s15, 4  ;;  %s236_s14 = int_to_ptr.vmem [resolvable:$true] %s235_s14  ;;  %s257_s16 = int_to_ptr.vmem [resolvable:$true] %s256_s16 }
  0x57   : > { %s9748_s20 = scalar_lea.hbm %s12791_s2, 16 }
  0x58   : > { %p9749_p13 = scmp.ne.s32.totalorder %s12791_s2, %s9748_s20  ;;  %p9755_p5 = scmp.lt.u32.totalorder %s9748_s20, %s12791_s2 }
  0x5a   : > { %p9751_p0 = pnand %p9749_p13, %p10048_p8 }
  0x5c   : > { %p9752_p2 = pneg %p9751_p0 }
  0x5e   : > { %p9757_p7 = pnand %p9755_p5, %p9752_p2 }
  0x60   : > { %9760 = shalt.err (!%p9757_p7)
}
  0x61   : > { %s9761_s13 = scalar_lea.vmem %s236_s14, 16  ;;  %s9768_s9 = scalar_lea.vmem %s236_s14, 32 }
  0x62   : > { %p9762_p9 = scmp.ne.s32.totalorder %s236_s14, %s9761_s13  ;;  %p9769_p11 = scmp.lt.s32.totalorder %s236_s14, %s236_s14 }
  0x63   : > { %p9770_p12 = scmp.lt.s32.totalorder %s9768_s9, %s9761_s13 }
  0x64   : > { %p9764_p4 = pnand %p9762_p9, %p10048_p8 }
  0x65   : > { %p9771_p1 = por %p9770_p12, %p9769_p11 }
  0x66   : > { %p9765_p10 = pneg %p9764_p4 }
  0x68   : > { %p9772_p3 = pnand %p9771_p1, %p9765_p10 }
  0x6a   : > { %9775 = shalt.err (!%p9772_p3)
}
  0x6b   : > { %9135 = dma.hbm_to_vmem [thread:$0]  (!%p10032_p6), %s12791_s2, 16, %s236_s14, [#allocation7]  }
  0x6c   : > { %s9776_s20 = scalar_lea.hbm %s12793_s4, 9216 }
  0x6d   : > { %p9777_p13 = scmp.ne.s32.totalorder %s12793_s4, %s9776_s20  ;;  %p9783_p3 = scmp.lt.u32.totalorder %s9776_s20, %s12793_s4 }
  0x6f   : > { %p9779_p0 = pnand %p9777_p13, %p10048_p8 }
  0x71   : > { %p9780_p1 = pneg %p9779_p0 }
  0x73   : > { %p9785_p2 = pnand %p9783_p3, %p9780_p1 }
  0x75   : > { %9788 = shalt.err (!%p9785_p2)
}
  0x76   : > { %s9789_s13 = scalar_lea.vmem %s257_s16, 9216  ;;  %p9797_p4 = scmp.lt.s32.totalorder %s257_s16, %s257_s16 }
  0x77   : > { %p9790_p5 = scmp.ne.s32.totalorder %s257_s16, %s9789_s13  ;;  %p9798_p10 = scmp.lt.s32.totalorder %s9789_s13, %s9789_s13 }
  0x79   : > { %p9792_p7 = pnand %p9790_p5, %p10048_p8  ;;  %p9799_p11 = por %p9798_p10, %p9797_p4 }
  0x7b   : > { %p9793_p9 = pneg %p9792_p7 }
  0x7d   : > { %p9800_p12 = pnand %p9799_p11, %p9793_p9 }
  0x7f   : > { %9803 = shalt.err (!%p9800_p12)
}
  0x80   : > { %9141 = dma.hbm_to_vmem [thread:$0]  (!%p10032_p6), %s12793_s4, 9216, %s257_s16, [#allocation10], %s12799_s23, %s12799_s23, %s12800_s28  }
  0x81   : > { %s9949_s12 = smov [#allocation14]   ;;  %s9804_s20 = scalar_lea.hbm %s12795_s6, 16 }
  0x82   : > { %s281_s15 = sshll.u32 %s9949_s12, 4  ;;  %p9805_p13 = scmp.ne.s32.totalorder %s12795_s6, %s9804_s20  ;;  %s282_s15 = int_to_ptr.vmem [resolvable:$true] %s281_s15 }
  0x83   : > { %p9811_p3 = scmp.lt.u32.totalorder %s9804_s20, %s12795_s6 }
  0x84   : > { %p9807_p0 = pnand %p9805_p13, %p10048_p8 }
  0x86   : > { %p9808_p1 = pneg %p9807_p0 }
  0x88   : > { %p9813_p2 = pnand %p9811_p3, %p9808_p1 }
  0x8a   : > { %9816 = shalt.err (!%p9813_p2)
}
  0x8b   : > { %s9817_s16 = scalar_lea.vmem %s282_s15, 16  ;;  %s9824_s13 = scalar_lea.vmem %s282_s15, 32 }
  0x8c   : > { %p9818_p5 = scmp.ne.s32.totalorder %s282_s15, %s9817_s16  ;;  %p9825_p4 = scmp.lt.s32.totalorder %s282_s15, %s282_s15 }
  0x8d   : > { %p9826_p10 = scmp.lt.s32.totalorder %s9824_s13, %s9817_s16 }
  0x8e   : > { %p9820_p7 = pnand %p9818_p5, %p10048_p8 }
  0x8f   : > { %p9827_p11 = por %p9826_p10, %p9825_p4 }
  0x90   : > { %p9821_p9 = pneg %p9820_p7 }
  0x92   : > { %p9828_p12 = pnand %p9827_p11, %p9821_p9 }
  0x94   : > { %9831 = shalt.err (!%p9828_p12)
}
  0x95   : > { %9147 = dma.hbm_to_vmem [thread:$0]  (!%p10032_p6), %s12795_s6, 16, %s282_s15, [#allocation13]  }
  0x96   : > { %s7263_s19 = sadd.s32 4294967294, %s9940_s27   ;;  %s10179_s11 = sadd.s32 1, %s9940_s27  }
  0x97   : > { %s30_s12 = ssub.s32 %s9940_s27, %s10179_s11  ;;  %s33_s17 = sadd.s32 1, %s9936_s26 }
  0x98   : > { %p31_p8 = scmp.eq.s32.totalorder %s30_s12, 0  ;;  %p40_p13 = scmp.ne.s32.totalorder %s9936_s26, %s9932_s25 }
  0x99   : > { %p41_p0 = scmp.eq.s32.totalorder %s9940_s27, 0  ;;  %p46_p1 = scmp.ne.s32.totalorder %s9932_s25, %s9928_s24 }
  0x9a   : > { %s10190_s18 = scalar_select %p31_p8, %s9936_s26, %s33_s17  }
  0x9b   : > { %p42_p3 = por %p41_p0, %p40_p13  ;;  %p12846_p2 = scmp.eq.s32.totalorder %s10016_s30, 0 }
  0x9c   : > { %p196_p6 = scmp.eq.s32.totalorder %s10016_s30, 1  ;;  %p202_p7 = scmp.eq.s32.totalorder %s7263_s19, 1 }
  0x9d   : > { %p10194_p5 = por %p12846_p2, %p46_p1  ;;  %p9162_p9 = scmp.lt.s32.totalorder %s9940_s27, 2 }
  0x9e   : > { %s292_s15 = sand.u32 1, %s9936_s26   ;;  %p10201_p4 = por %p196_p6, %p40_p13 }
  0x9f   : > { %p10205_p10 = por %p202_p7, %p46_p1  ;;  %s9098_s29 = smul.u32 216, %s292_s15 }
  0xa0   : > { %s12848_s21 = scalar_select %p10201_p4, 1, 0 }
  0xa1   : > { %s12849_s10 = scalar_select %p10205_p10, 1, 0 }
  0xa2   : > { %s9099_s22 = smul.u32 3456, %s9940_s27  ;;  %p10210_p11 = pnand %p9162_p9, %p42_p3 }
  0xa3   : > { %s296_s19 = scalar_lea.vmem [#allocation3], %s9098_s29  ;;  %s10221_s17 = scalar_lea.sflag [#allocation4], %s292_s15 }
  0xa4   : > { %s10217_s9 = scalar_lea.hbm %s12789_s0, %s9099_s22  ;;  %s303_s12 = sshll.u32 %s296_s19, 4  ;;  %s10219_s12 = int_to_ptr.vmem [resolvable:$true] %s303_s12 }
  0xa5   : > { %s9832_s23 = scalar_lea.hbm %s10217_s9, 3456  ;;  %p9834_p8 = pneg %p10210_p11 }
  0xa6   : > { %p9833_p12 = scmp.ne.s32.totalorder %s10217_s9, %s9832_s23  ;;  %s9837_s14 = scalar_lea.hbm %s12789_s0, 6912 }
  0xa7   : > { %p9838_p1 = scmp.lt.u32.totalorder %s10217_s9, %s12789_s0  ;;  %p9839_p3 = scmp.lt.u32.totalorder %s9837_s14, %s9832_s23 }
  0xa8   : > { %p9835_p13 = pnand %p9834_p8, %p9833_p12  ;;  %p9841_p6 = scmp.lt.u32.totalorder %s9832_s23, %s10217_s9 }
  0xa9   : > { %p9840_p2 = por %p9839_p3, %p9838_p1 }
  0xaa   : > { %p9836_p0 = pneg %p9835_p13 }
  0xab   : > { %p9842_p7 = por %p9841_p6, %p9840_p2 }
  0xad   : > { %p9843_p9 = pnand %p9842_p7, %p9836_p0 }
  0xaf   : > { %9846 = shalt.err (!%p9843_p9)
}
  0xb0   : > { %s9847_s15 = scalar_lea.vmem %s10219_s12, 3456  ;;  %s9950_s29 = smov [#allocation3]  }
  0xb1   : > { %p9848_p12 = scmp.ne.s32.totalorder %s10219_s12, %s9847_s15  ;;  %s9852_s19 = sshll.u32 %s9950_s29, 4  ;;  %s9853_s19 = int_to_ptr.vmem [resolvable:$false] %s9852_s19 }
  0xb2   : > { %s9854_s1 = scalar_lea.vmem %s9853_s19, 6912  ;;  %p9855_p4 = scmp.lt.s32.totalorder %s10219_s12, %s9853_s19 }
  0xb3   : > { %p9850_p13 = pnand %p9848_p12, %p9834_p8  ;;  %p9856_p1 = scmp.lt.s32.totalorder %s9854_s1, %s9847_s15 }
  0xb5   : > { %p9851_p10 = pneg %p9850_p13  ;;  %p9857_p3 = por %p9856_p1, %p9855_p4 }
  0xb7   : > { %p9858_p2 = pnand %p9857_p3, %p9851_p10 }
  0xb9   : > { %9861 = shalt.err (!%p9858_p2)
}
  0xba   : > { %s12851_s23 = smov 4   ;;  %s12852_s28 = smov 64  }
  0xbb   : > { %9151 = dma.hbm_to_vmem [thread:$0]  (!%p10210_p11), %s10217_s9, 3456, %s10219_s12, %s10221_s17, %s12852_s28, %s12852_s28, %s12851_s23  }
  0xbc   : > { %p12853_p8 = scmp.ne.s32.totalorder %s12842_s8, 0 }
  0xbe   : > { %315 = sbr.rel (%p12853_p8) target bundleno = 1324 (0x52c), region = 48 }
  0xc5   : > { %s10255_s22 = sand.u32 1, %s9932_s25  }
  0xc6   : > { %s9100_s13 = smul.u32 216, %s10255_s22  ;;  %s318_s14 = scalar_lea.sflag [#allocation4], %s10255_s22 }
  0xc8   : > { %s10259_s15 = scalar_lea.vmem [#allocation3], %s9100_s13 }
  0xc9   : > { %9907 = dma.done.wait (%p10194_p5), %s318_s14, 3456  }
  0xca   : > { %9909 = vsyncadd (%p10194_p5), %s318_s14, 4294963840  ;;  %p12854_p4 = scmp.eq.s32.totalorder %s10016_s30, 0 }
  0xcc   : > { %9911 = dma.done.wait (%p12854_p4), [#allocation7], 9232   ;;  %p12855_p10 = pmov %p12854_p4 }
  0xcd   : > { %p12856_p11 = pmov %p12854_p4 }
  0xce   : > { %9913 = vsyncadd (%p12855_p10), [#allocation7], 4294958064 }
  0xcf   : > { %9915 = dma.done.wait (%p12856_p11), [#allocation10], 9232   ;;  %p12857_p0 = pmov %p12854_p4 }
  0xd1   : > { %9917 = vsyncadd (%p12857_p0), [#allocation10], 4294958064  ;;  %p12858_p6 = pmov %p12857_p0 }
  0xd2   : > { %p12859_p7 = pmov %p12857_p0 }
  0xd3   : > { %9919 = dma.done.wait (%p12858_p6), [#allocation13], 32  }
  0xd4   : > { %9921 = vsyncadd (%p12859_p7), [#allocation13], 4294967264  ;;  %v9213_v0 = vld [vmem:[#allocation6 + $0x40] sm:$0xff]   ;;  %v9217_v4 = vld [vmem:[#allocation6 + $0x48] sm:$0xff]   ;;  %vm715_vm0 = vsmask.f32 7424 }
  0xd5   : > { %v9214_v1 = vld [vmem:[#allocation6 + $0xc0] sm:$0xff]   ;;  %8058 = vmatprep.subr.bf16.mxu0 %v9213_v0  ;;  %v9218_v5 = vld [vmem:[#allocation6 + $0xc8] sm:$0xff]   ;;  %v9221_v8 = vld [vmem:[#allocation6 + $0x50] sm:$0xff]   ;;  %vm972_vm1 = vcmask 1046528   ;;  %vm3616_vm2 = vcmask 1040384   ;;  %s7280_s8 = sshll.u32 %s10255_s22, 7 }
  0xd6   : > { %v9215_v2 = vld [vmem:[#allocation6] sm:$0xff]   ;;  %8170 = vmatprep.subr.bf16.mxu1 %v9214_v1  ;;  %v9219_v6 = vld [vmem:[#allocation6 + $0x8] sm:$0xff]   ;;  %v9222_v9 = vld [vmem:[#allocation6 + $0xd0] sm:$0xff]   ;;  %vm3617_vm3 = vsmask.f32 256  ;;  %s12642_s20 = scalar_lea.vmem [#allocation15], %s7280_s8 }
  0xd7   : > { %v9216_v3 = vld [vmem:[#allocation6 + $0x80] sm:$0xff]   ;;  %8059 = vmatpush3.bf16.msra.mxu0 %v9215_v2  ;;  %v9220_v7 = vld [vmem:[#allocation6 + $0x88] sm:$0xff]   ;;  %v9223_v10 = vld [vmem:[#allocation6 + $0x10] sm:$0xff]   ;;  %s7962_s16 = sshll.u32 %s10016_s30, 11  ;;  %s7133_s9 = sshll.u32 %s12642_s20, 4  ;;  %s12743_s9 = int_to_ptr.vmem [resolvable:$true] %s7133_s9 }
  0xd8   : > { %8171 = vmatpush3.bf16.msra.mxu1 %v9216_v3  ;;  %8060 = vmatprep.subr.bf16.mxu0 %v9217_v4  ;;  %v9224_v11 = vld [vmem:[#allocation6 + $0x90] sm:$0xff]   ;;  %v9225_v12 = vld [vmem:[#allocation6 + $0x58] sm:$0xff]   ;;  %v9229_v16 = vld [vmem:[#allocation6 + $0x60] sm:$0xff]   ;;  %s12741_s29 = scalar_lea.hbm %s12796_s7, %s7962_s16  ;;  %s7120_s30 = scalar_lea.sflag [#allocation5], %s10255_s22 }
  0xd9   : > { %8172 = vmatprep.subr.bf16.mxu1 %v9218_v5  ;;  %v9226_v13 = vld [vmem:[#allocation6 + $0xd8] sm:$0xff]   ;;  %v9230_v17 = vld [vmem:[#allocation6 + $0xe0] sm:$0xff]   ;;  %v9233_v20 = vld [vmem:[#allocation6 + $0x68] sm:$0xff]   ;;  %s9862_s19 = scalar_lea.vmem %s12743_s9, 2048  ;;  %p13028_p9 = scmp.ne.s32.totalorder %s12848_s21, 0 }
  0xda   : > { %v9227_v14 = vld [vmem:[#allocation6 + $0x18] sm:$0xff]   ;;  %v9231_v18 = vld [vmem:[#allocation6 + $0x20] sm:$0xff]   ;;  %v9234_v21 = vld [vmem:[#allocation6 + $0xe8] sm:$0xff]   ;;  %p9863_p5 = scmp.ne.s32.totalorder %s12743_s9, %s9862_s19  ;;  %s9952_s1 = smov [#allocation15]  }
  0xdb   : > { %8061 = vmatpush3.bf16.msra.mxu0 %v9219_v6  ;;  %v9228_v15 = vld [vmem:[#allocation6 + $0x98] sm:$0xff]   ;;  %v9232_v19 = vld [vmem:[#allocation6 + $0xa0] sm:$0xff]   ;;  %v9235_v22 = vld [vmem:[#allocation6 + $0x28] sm:$0xff]   ;;  %s9866_s23 = sshll.u32 %s9952_s1, 4  ;;  %s9867_s23 = int_to_ptr.vmem [resolvable:$false] %s9866_s23 }
  0xdc   : > { %8173 = vmatpush3.bf16.msra.mxu1 %v9220_v7  ;;  %8062 = vmatprep.subr.bf16.mxu0 %v9221_v8  ;;  %v9236_v23 = vld [vmem:[#allocation6 + $0xa8] sm:$0xff]   ;;  %v9237_v24 = vld [vmem:[#allocation6 + $0x70] sm:$0xff]   ;;  %v9241_v28 = vld [vmem:[#allocation6 + $0x78] sm:$0xff]   ;;  %p9864_p12 = pnand %p9863_p5, %p13028_p9  ;;  %s9868_s28 = scalar_lea.vmem %s9867_s23, 4096 }
  0xdd   : > { %8174 = vmatprep.subr.bf16.mxu1 %v9222_v9  ;;  %v9238_v25 = vld [vmem:[#allocation6 + $0xf0] sm:$0xff]   ;;  %v9242_v29 = vld [vmem:[#allocation6 + $0xf8] sm:$0xff]   ;;  %v9250_v37 = vld [vmem:[#allocation6 + $0x140] sm:$0xff]   ;;  %p9869_p1 = scmp.lt.s32.totalorder %s12743_s9, %s9867_s23  ;;  %p9870_p3 = scmp.lt.s32.totalorder %s9868_s28, %s9862_s19 }
  0xde   : > { %v9239_v26 = vld [vmem:[#allocation6 + $0x30] sm:$0xff]   ;;  %v9243_v30 = vld [vmem:[#allocation6 + $0x38] sm:$0xff]   ;;  %v9251_v55 = vld [vmem:[#allocation6 + $0x100] sm:$0xff]   ;;  %p9865_p13 = pneg %p9864_p12 }
  0xdf   : > { %8063 = vmatpush3.bf16.msra.mxu0 %v9223_v10  ;;  %v9240_v27 = vld [vmem:[#allocation6 + $0xb0] sm:$0xff]   ;;  %v9244_v31 = vld [vmem:[#allocation6 + $0xb8] sm:$0xff]   ;;  %v7283_v56 = vld [vmem:[%s10259_s15 + $0x18] sm:$0xf]  ;;  %p9871_p2 = por %p9870_p3, %p9869_p1 }
  0xe0   : > { %8175 = vmatpush3.bf16.msra.mxu1 %v9224_v11  ;;  %8064 = vmatprep.subr.bf16.mxu0 %v9225_v12  ;;  %v377_v32 = vld [vmem:[%s10259_s15] sm:$0xf]  ;;  %v378_v33 = vld [vmem:[%s10259_s15 + $0x4] sm:$0xf]  ;;  %v7281_v36 = vld [vmem:[%s10259_s15 + $0xc] sm:$0xf] }
  0xe1   : > { %8176 = vmatprep.subr.bf16.mxu1 %v9226_v13  ;;  %v7409_v34 = vcombine.low %v377_v32, %v378_v33  ;;  %v9246_v35 = vld [vmem:[%s10259_s15 + $0x8] ss:$0 sps:$4 sm:$0x11]   ;;  %v10282_v38 = vld [vmem:[%s10259_s15 + $0x10] sm:$0xf]  ;;  %v9262_v63 = vld [vmem:[#allocation6 + $0x148] sm:$0xff]   ;;  %p9872_p8 = pnand %p9871_p2, %p9865_p13 }
  0xe2   : > { %v425_v39 = vld [vmem:[%s10259_s15] sm:$0xe]  ;;  %v724_v42 = vshll.u32 %v9246_v35, 16  ;;  %v10286_v43 = vcombine.low %v7281_v36, %v10282_v38  ;;  %v974_v45 = vrot.slane %v9246_v35, 1  ;;  %v379_v49 = vld [vmem:[%s10259_s15 + $0xc] sm:$0xf]  ;;  %vm11640_vm4 = vmand %vm3616_vm2, %vm3617_vm3 }
  0xe3   : > { %8065 = vmatpush3.bf16.msra.mxu0 %v9227_v14  ;;  %v717_v40 = vshrl.u32 %v7409_v34, 16  ;;  %v719_v41 = vshll.u32 %v7409_v34, 16  ;;  %v7441_v44 = vcombine.low %v425_v39, %v378_v33  ;;  %v380_v50 = vld [vmem:[%s10259_s15 + $0x10] sm:$0xf]  ;;  %v10295_v57 = vld [vmem:[%s10259_s15 + $0x1c] sm:$0xf] }
  0xe4   : > { %8177 = vmatpush3.bf16.msra.mxu1 %v9228_v15  ;;  %8066 = vmatprep.subr.bf16.mxu0 %v9229_v16  ;;  %v726_v47 = vrot.slane %v724_v42, 1  ;;  %v7410_v52 = vcombine.low %v379_v49, %v380_v50  ;;  %v9253_v53 = vld [vmem:[%s10259_s15 + $0x14] ss:$0 sps:$4 sm:$0x11]   ;;  %v426_v62 = vld [vmem:[%s10259_s15 + $0xc] sm:$0xe]  ;;  %v10300_v0 = vcombine.low %v7283_v56, %v10295_v57 }
  0xe5   : > { %8178 = vmatprep.subr.bf16.mxu1 %v9230_v17  ;;  %v721_v46 = vrot.slane %v719_v41, 1  ;;  %2734 = vmatprep.mubr.bf16.mxu1 %v10286_v43  ;;  %v973_v48 = vrot.slane %v7441_v44, 1  ;;  %v736_v61 = vshll.u32 %v9253_v53, 16  ;;  %v7442_v1 = vcombine.low %v426_v62, %v380_v50  ;;  %v381_v3 = vld [vmem:[%s10259_s15 + $0x18] sm:$0xf]  ;;  %v9274_v16 = vld [vmem:[#allocation6 + $0x150] sm:$0xff]  }
  0xe6   : > { %v729_v59 = vshrl.u32 %v7410_v52, 16  ;;  %v731_v60 = vshll.u32 %v7410_v52, 16  ;;  %v977_v2 = vrot.slane %v9253_v53, 1  ;;  %v382_v4 = vld [vmem:[%s10259_s15 + $0x1c] sm:$0xf]  ;;  %v9287_v44 = vld [vmem:[#allocation6 + $0x118] sm:$0xff]  }
  0xe7   : > { %8067 = vmatpush3.bf16.msra.mxu0 %v9231_v18  ;;  %v722_v51 = vor.u32 %v721_v46, %v717_v40  ;;  %v975_v54 = vsel %vm972_vm1, %v973_v48, %v974_v45  ;;  %v738_v6 = vrot.slane %v736_v61, 1  ;;  %v10304_v7 = vcombine.low %v381_v3, %v382_v4  ;;  %v7285_v8 = vld [vmem:[%s10259_s15 + $0x24] sm:$0xf]  ;;  %v9258_v10 = vld [vmem:[%s10259_s15 + $0x20] ss:$0 sps:$4 sm:$0x11]  }
  0xe8   : > { %8179 = vmatpush3.bf16.msra.mxu1 %v9232_v19  ;;  %8068 = vmatprep.subr.bf16.mxu0 %v9233_v20  ;;  %v733_v5 = vrot.slane %v731_v60, 1  ;;  %v976_v9 = vrot.slane %v7442_v1, 1  ;;  %v9263_v11 = vld [vmem:[#allocation6 + $0x108] sm:$0xff]   ;;  %v10312_v15 = vld [vmem:[%s10259_s15 + $0x28] sm:$0xf]  ;;  %v748_v18 = vshll.u32 %v9258_v10, 16 }
  0xe9   : > { %8180 = vmatprep.subr.bf16.mxu1 %v9234_v21  ;;  %v727_v58 = vsel %vm715_vm0, %v722_v51, %v726_v47  ;;  %v741_v13 = vshrl.u32 %v10304_v7, 16  ;;  %v743_v14 = vshll.u32 %v10304_v7, 16  ;;  %v10316_v19 = vcombine.low %v7285_v8, %v10312_v15  ;;  %v427_v20 = vld [vmem:[%s10259_s15 + $0x18] sm:$0xe]  ;;  %v10329_v36 = vld [vmem:[%s10259_s15 + $0x34] sm:$0xf] }
  0xea   : > { %2573 = vmatprep.mubr.bf16.mxu0 %v727_v58  ;;  %v734_v12 = vor.u32 %v733_v5, %v729_v59  ;;  %v978_v17 = vsel %vm972_vm1, %v976_v9, %v977_v2  ;;  %v9265_v33 = vld [vmem:[%s10259_s15 + $0x2c] ss:$0 sps:$4 sm:$0x11]   ;;  %v385_v42 = vld [vmem:[%s10259_s15 + $0x30] sm:$0xf]  ;;  %v9310_v60 = vld [vmem:[#allocation6 + $0x168] sm:$0xff]  }
  0xeb   : > { %8069 = vmatpush3.bf16.msra.mxu0 %v9235_v22  ;;  %v745_v22 = vrot.slane %v743_v14, 1  ;;  %v760_v41 = vshll.u32 %v9265_v33, 16  ;;  %v386_v47 = vld [vmem:[%s10259_s15 + $0x34] sm:$0xf]  ;;  %v983_v61 = vrot.slane %v9265_v33, 1 }
  0xec   : > { %8181 = vmatpush3.bf16.msra.mxu1 %v9236_v23  ;;  %8070 = vmatprep.subr.bf16.mxu0 %v9237_v24  ;;  %v739_v21 = vsel %vm715_vm0, %v734_v12, %v738_v6  ;;  %v7443_v23 = vcombine.low %v427_v20, %v382_v4  ;;  %v9275_v24 = vld [vmem:[#allocation6 + $0x110] sm:$0xff]   ;;  %v9298_v48 = vld [vmem:[#allocation6 + $0x160] sm:$0xff]   ;;  %v9311_v6 = vld [vmem:[#allocation6 + $0x128] sm:$0xff]  }
  0xed   : > { %8182 = vmatprep.subr.bf16.mxu1 %v9238_v25  ;;  %v750_v25 = vrot.slane %v748_v18, 1  ;;  %v762_v50 = vrot.slane %v760_v41, 1  ;;  %v10343_v53 = vld [vmem:[%s10259_s15 + $0x38] ss:$0 sps:$4 sm:$0x11]  }
  0xee   : > { %v772_v58 = vshll.u32 %v10343_v53, 16  ;;  %v9299_v59 = vld [vmem:[#allocation6 + $0x120] sm:$0xff]   ;;  %v10358_v12 = vld [vmem:[%s10259_s15 + $0x40] sm:$0xf] }
  0xef   : > { %8071 = vmatpush3.bf16.msra.mxu0 %v9239_v26  ;;  %v383_v26 = vld [vmem:[%s10259_s15 + $0x24] sm:$0xf]  ;;  %v7289_v62 = vld [vmem:[%s10259_s15 + $0x3c] sm:$0xf]  ;;  %v429_v1 = vld [vmem:[%s10259_s15 + $0x30] sm:$0xe] }
  0xf0   : > { %8183 = vmatpush3.bf16.msra.mxu1 %v9240_v27  ;;  %8072 = vmatprep.subr.bf16.mxu0 %v9241_v28  ;;  %v9286_v27 = vld [vmem:[#allocation6 + $0x158] sm:$0xff]   ;;  %v746_v28 = vor.u32 %v745_v22, %v741_v13  ;;  %v9324_v2 = vld [vmem:[#allocation6 + $0x1c0] sm:$0xff]   ;;  %v9326_v13 = vld [vmem:[#allocation6 + $0x1c8] sm:$0xff]   ;;  %v7445_v20 = vcombine.low %v429_v1, %v386_v47 }
  0xf1   : > { %8184 = vmatprep.subr.bf16.mxu1 %v9242_v29  ;;  %v979_v29 = vrot.slane %v7443_v23, 1  ;;  %v387_v8 = vld [vmem:[%s10259_s15 + $0x3c] sm:$0xf]  ;;  %v389_v23 = vld [vmem:[%s10259_s15 + $0x48] sm:$0xf] }
  0xf2   : > { %v751_v35 = vsel %vm715_vm0, %v746_v28, %v750_v25  ;;  %v9325_v9 = vld [vmem:[#allocation6 + $0x180] sm:$0xff]   ;;  %v10361_v14 = vcombine.low %v387_v8, %v10358_v12  ;;  %v9323_v28 = vld [vmem:[#allocation6 + $0x130] sm:$0xff]   ;;  %v9346_v8 = vld [vmem:[#allocation6 + $0x1e8] sm:$0xff]  }
  0xf3   : > { %8073 = vmatpush3.bf16.msra.mxu0 %v9243_v30  ;;  %v980_v30 = vrot.slane %v9258_v10, 1  ;;  %v10390_v41 = vld [vmem:[%s10259_s15 + $0x50] ss:$0 sps:$4 sm:$0x11]  }
  0xf4   : > { %8185 = vmatpush3.bf16.msra.mxu1 %v9244_v31  ;;  %8282 = vmatprep.subr.bf16.mxu0 %v9250_v37  ;;  %v384_v31 = vld [vmem:[%s10259_s15 + $0x28] sm:$0xf]  ;;  %v428_v37 = vld [vmem:[%s10259_s15 + $0x24] sm:$0xe]  ;;  %v779_v22 = vshll.u32 %v10361_v14, 16 }
  0xf5   : > { %v10323_v32 = vcombine.low %v383_v26, %v384_v31  ;;  %v981_v45 = vsel %vm972_vm1, %v979_v29, %v980_v30  ;;  %v7444_v51 = vcombine.low %v428_v37, %v384_v31  ;;  %8394 = vmatprep.subr.bf16.mxu1 %v9324_v2  ;;  %v986_v26 = vrot.slane %v10343_v53, 1  ;;  %v10385_v37 = vld [vmem:[%s10259_s15 + $0x4c] sm:$0xf]  ;;  %v391_v53 = vld [vmem:[%s10259_s15 + $0x54] sm:$0xf] }
  0xf6   : > { %2574 = vmatmul.mubr.bf16.vlgmr.msra.gmra.mrb[0].mxu0 %v7409_v34  ;;  %v7287_v34 = vld [vmem:[%s10259_s15 + $0x30] sm:$0xf]  ;;  %v777_v29 = vshrl.u32 %v10361_v14, 16  ;;  %v781_v30 = vrot.slane %v779_v22, 1 }
  0xf7   : > { %2735 = vmatmul.mubr.bf16.vlgmr.msra.gmra.mrb[0].mxu1 %v975_v54  ;;  %8283 = vmatpush3.bf16.msra.mxu0 %v9251_v55  ;;  %v753_v39 = vshrl.u32 %v10323_v32, 16  ;;  %v755_v40 = vshll.u32 %v10323_v32, 16  ;;  %v10337_v46 = vcombine.low %v7287_v34, %v10329_v36  ;;  %v982_v4 = vrot.slane %v7444_v51, 1 }
  0xf8   : > { %2742 = vmatprep.mubr.bf16.mxu1 %v10300_v0  ;;  %8284 = vmatprep.subr.bf16.mxu0 %v9262_v63  ;;  %v10350_v63 = vld [vmem:[%s10259_s15 + $0x40] sm:$0xf]  ;;  %v985_v34 = vrot.slane %v7445_v20, 1 }
  0xf9   : > { %2581 = vmatprep.mubr.bf16.mxu0 %v739_v21  ;;  %v757_v49 = vrot.slane %v755_v40, 1  ;;  %8395 = vmatpush3.bf16.msra.mxu1 %v9325_v9  ;;  %v10368_v18 = vcombine.low %v7289_v62, %v10350_v63  ;;  %v9331_v21 = vld [vmem:[#allocation6 + $0x188] sm:$0xff]  }
  0xfa   : > { %8396 = vmatprep.subr.bf16.mxu1 %v9326_v13  ;;  %v430_v40 = vld [vmem:[%s10259_s15 + $0x3c] sm:$0xe] }
  0xfb   : > { %8285 = vmatpush3.bf16.msra.mxu0 %v9263_v11  ;;  %v758_v54 = vor.u32 %v757_v49, %v753_v39  ;;  %v774_v11 = vrot.slane %v772_v58, 1  ;;  %v9334_v39 = vld [vmem:[#allocation6 + $0x190] sm:$0xff]   ;;  %v9340_v49 = vld [vmem:[#allocation6 + $0x198] sm:$0xff]   ;;  %v9351_v20 = vld [vmem:[#allocation6 + $0x1a8] sm:$0xff]  }
  0xfc   : > { %8286 = vmatprep.subr.bf16.mxu0 %v9274_v16  ;;  %v10364_v16 = vld [vmem:[%s10259_s15 + $0x44] ss:$0 sps:$4 sm:$0x11]  }
  0xfd   : > { %v763_v3 = vsel %vm715_vm0, %v758_v54, %v762_v50  ;;  %v784_v31 = vshll.u32 %v10364_v16, 16  ;;  %8397 = vmatpush3.bf16.msra.mxu1 %v9331_v21  ;;  %v987_v50 = vsel %vm972_vm1, %v985_v34, %v986_v26  ;;  %v9343_v54 = vld [vmem:[#allocation6 + $0x138] sm:$0xff]   ;;  %v989_v62 = vrot.slane %v10364_v16, 1  ;;  %v9353_v21 = vld [vmem:[#allocation6 + $0x1f0] sm:$0xff]  }
  0xfe   : > { %2582 = vmatmul.mubr.bf16.gmra.mrb[4].mxu0 %v7410_v52  ;;  %v10340_v52 = vcombine.low %v385_v42, %v386_v47  ;;  %v9335_v42 = vld [vmem:[#allocation6 + $0x1d8] sm:$0xff]   ;;  %v782_v47 = vor.u32 %v781_v30, %v777_v29  ;;  %v9354_v34 = vld [vmem:[#allocation6 + $0x1b0] sm:$0xff]  }
  0xff   : > { %2743 = vmatmul.mubr.bf16.gmra.mrb[4].mxu1 %v978_v17  ;;  %2589 = vmatprep.mubr.bf16.mxu0 %v751_v35  ;;  %v9322_v17 = vld [vmem:[#allocation6 + $0x170] sm:$0xff]  }
 0x100   : > { %2750 = vmatprep.mubr.bf16.mxu1 %v10316_v19  ;;  %8287 = vmatpush3.bf16.msra.mxu0 %v9275_v24  ;;  %v765_v55 = vshrl.u32 %v10340_v52, 16  ;;  %v767_v56 = vshll.u32 %v10340_v52, 16  ;;  %v9333_v24 = vld [vmem:[#allocation6 + $0x1d0] sm:$0xff]  }
 0x101   : > { %8288 = vmatprep.subr.bf16.mxu0 %v9286_v27  ;;  %v10375_v27 = vld [vmem:[%s10259_s15 + $0x4c] sm:$0xf]  ;;  %v7291_v35 = vld [vmem:[%s10259_s15 + $0x48] sm:$0xf]  ;;  %8398 = vmatprep.subr.bf16.mxu1 %v9333_v24 }
 0x102   : > { %v769_v5 = vrot.slane %v767_v56, 1  ;;  %v10380_v33 = vcombine.low %v389_v23, %v10375_v27  ;;  %v10395_v51 = vcombine.low %v7291_v35, %v10385_v37  ;;  %8399 = vmatpush3.bf16.msra.mxu1 %v9334_v39  ;;  %v9344_v56 = vld [vmem:[#allocation6 + $0x1e0] sm:$0xff]   ;;  %v992_v23 = vrot.slane %v10390_v41, 1  ;;  %v10444_v35 = vld [vmem:[%s10259_s15 + $0x68] ss:$0 sps:$4 sm:$0x11]  }
 0x103   : > { %8400 = vmatprep.subr.bf16.mxu1 %v9335_v42  ;;  %v9355_v39 = vld [vmem:[#allocation6 + $0x1f8] sm:$0xff]  }
 0x104   : > { %8289 = vmatpush3.bf16.msra.mxu0 %v9287_v44  ;;  %v770_v10 = vor.u32 %v769_v5, %v765_v55  ;;  %v791_v44 = vshll.u32 %v10380_v33, 16  ;;  %v10400_v55 = vld [vmem:[%s10259_s15 + $0x58] sm:$0xf]  ;;  %v789_v58 = vshrl.u32 %v10380_v33, 16 }
 0x105   : > { %8290 = vmatprep.subr.bf16.mxu0 %v9298_v48  ;;  %v786_v48 = vrot.slane %v784_v31, 1  ;;  %v10407_v1 = vcombine.low %v391_v53, %v10400_v55  ;;  %v9345_v5 = vld [vmem:[#allocation6 + $0x1a0] sm:$0xff]  }
 0x106   : > { %2590 = vmatmul.mubr.bf16.gmra.mrb[8].mxu0 %v10304_v7  ;;  %v984_v7 = vsel %vm972_vm1, %v982_v4, %v983_v61  ;;  %v775_v25 = vsel %vm715_vm0, %v770_v10, %v774_v11  ;;  %v10412_v4 = vld [vmem:[%s10259_s15 + $0x58] sm:$0xf]  ;;  %8401 = vmatpush3.bf16.msra.mxu1 %v9340_v49  ;;  %v10417_v11 = vld [vmem:[%s10259_s15 + $0x5c] ss:$0 sps:$4 sm:$0x11]  }
 0x107   : > { %2751 = vmatmul.mubr.bf16.gmra.mrb[8].mxu1 %v981_v45  ;;  %2597 = vmatprep.mubr.bf16.mxu0 %v763_v3  ;;  %v9342_v45 = vld [vmem:[#allocation6 + $0x178] sm:$0xff]   ;;  %v787_v61 = vsel %vm715_vm0, %v782_v47, %v786_v48  ;;  %v801_v24 = vshrl.u32 %v10407_v1, 16  ;;  %v808_v26 = vshll.u32 %v10417_v11, 16  ;;  %v995_v53 = vrot.slane %v10417_v11, 1 }
 0x108   : > { %2758 = vmatprep.mubr.bf16.mxu1 %v10337_v46  ;;  %8291 = vmatpush3.bf16.msra.mxu0 %v9299_v59  ;;  %v793_v59 = vrot.slane %v791_v44, 1  ;;  %v7293_v3 = vld [vmem:[%s10259_s15 + $0x54] sm:$0xf]  ;;  %v395_v47 = vld [vmem:[%s10259_s15 + $0x6c] sm:$0xf] }
 0x109   : > { %8292 = vmatprep.subr.bf16.mxu0 %v9310_v60  ;;  %v796_v60 = vshll.u32 %v10390_v41, 16  ;;  %8402 = vmatprep.subr.bf16.mxu1 %v9344_v56  ;;  %v10422_v16 = vcombine.low %v7293_v3, %v10412_v4  ;;  %v432_v31 = vld [vmem:[%s10259_s15 + $0x54] sm:$0xe]  ;;  %v810_v42 = vrot.slane %v808_v26, 1  ;;  %v10452_v48 = vld [vmem:[%s10259_s15 + $0x70] sm:$0xf] }
 0x10a   : > { %v794_v9 = vor.u32 %v793_v59, %v789_v58  ;;  %8403 = vmatpush3.bf16.msra.mxu1 %v9345_v5  ;;  %v7448_v44 = vcombine.low %v432_v31, %v10400_v55  ;;  %v10474_v3 = vld [vmem:[%s10259_s15 + $0x74] ss:$0 sps:$4 sm:$0x11]   ;;  %v7299_v26 = vld [vmem:[%s10259_s15 + $0x78] sm:$0xf]  ;;  %v1196_v31 = vshll.u32 %v10300_v0, 16 }
 0x10b   : > { %v798_v10 = vrot.slane %v796_v60, 1  ;;  %12860 = vst [vmem:[#allocation21_spill] sm:$0xff] %v10422_v16  ;;  %8404 = vmatprep.subr.bf16.mxu1 %v9346_v8  ;;  %v7297_v60 = vld [vmem:[%s10259_s15 + $0x6c] sm:$0xf]  ;;  %v397_v8 = vld [vmem:[%s10259_s15 + $0x78] sm:$0xf] }
 0x10c   : > { %8293 = vmatpush3.bf16.msra.mxu0 %v9311_v6  ;;  %v431_v6 = vld [vmem:[%s10259_s15 + $0x48] sm:$0xe]  ;;  %v994_v56 = vrot.slane %v7448_v44, 1 }
 0x10d   : > { %8294 = vmatprep.subr.bf16.mxu0 %v9322_v17  ;;  %v7447_v17 = vcombine.low %v431_v6, %v10375_v27  ;;  %v799_v22 = vsel %vm715_vm0, %v794_v9, %v798_v10  ;;  %v7295_v27 = vld [vmem:[%s10259_s15 + $0x60] sm:$0xf]  ;;  %v398_v9 = vld [vmem:[%s10259_s15 + $0x7c] sm:$0xf]  ;;  %v1184_v10 = vshll.u32 %v10286_v43, 16 }
 0x10e   : > { %2598 = vmatmul.mubr.bf16.gmra.mrb[12].mxu0 %v10323_v32  ;;  %v7446_v32 = vcombine.low %v430_v40, %v10358_v12  ;;  %v803_v12 = vshll.u32 %v10407_v1, 16  ;;  %8405 = vmatpush3.bf16.msra.mxu1 %v9351_v20  ;;  %v10446_v40 = vld [vmem:[#allocation6 + $0x200] sm:$0xff]   ;;  %v996_v11 = vsel %vm972_vm1, %v994_v56, %v995_v53 }
 0x10f   : > { %2759 = vmatmul.mubr.bf16.gmra.mrb[12].mxu1 %v984_v7  ;;  %2605 = vmatprep.mubr.bf16.mxu0 %v775_v25  ;;  %v10427_v7 = vld [vmem:[%s10259_s15 + $0x64] sm:$0xf]  ;;  %v991_v30 = vrot.slane %v7447_v17, 1  ;;  %v832_v17 = vshll.u32 %v10474_v3, 16 }
 0x110   : > { %2766 = vmatprep.mubr.bf16.mxu1 %v10368_v18  ;;  %8295 = vmatpush3.bf16.msra.mxu0 %v9323_v28  ;;  %v988_v2 = vrot.slane %v7446_v32, 1  ;;  %v805_v25 = vrot.slane %v803_v12, 1  ;;  %v10435_v28 = vld [vmem:[%s10259_s15 + $0x64] sm:$0xf]  ;;  %v820_v32 = vshll.u32 %v10444_v35, 16 }
 0x111   : > { %8296 = vmatprep.subr.bf16.mxu0 %v9342_v45  ;;  %8406 = vmatprep.subr.bf16.mxu1 %v9353_v21  ;;  %v10457_v49 = vcombine.low %v7295_v27, %v10435_v28  ;;  %v10501_v27 = vld [vmem:[%s10259_s15 + $0x7c] sm:$0xf]  ;;  %v834_v44 = vrot.slane %v832_v17, 1 }
 0x112   : > { %v990_v13 = vsel %vm972_vm1, %v988_v2, %v989_v62  ;;  %v806_v41 = vor.u32 %v805_v25, %v801_v24  ;;  %8407 = vmatpush3.bf16.msra.mxu1 %v9354_v34  ;;  %v433_v62 = vld [vmem:[%s10259_s15 + $0x60] sm:$0xe]  ;;  %v822_v2 = vrot.slane %v820_v32, 1  ;;  %v10494_v24 = vrot.slane %v1184_v10, 1  ;;  %v435_v32 = vld [vmem:[%s10259_s15 + $0x78] sm:$0xe] }
 0x113   : > { %12861 = vst [vmem:[#allocation22_spill] sm:$0xff] %v10457_v49  ;;  %8408 = vmatprep.subr.bf16.mxu1 %v9355_v39  ;;  %v998_v25 = vrot.slane %v10444_v35, 1  ;;  %v1208_v34 = vshll.u32 %v10316_v19, 16  ;;  %v1220_v39 = vshll.u32 %v10337_v46, 16  ;;  %v10530_v10 = vld [vmem:[%s10259_s15 + $0x88] sm:$0xf] }
 0x114   : > { %8297 = vmatpush3.bf16.msra.mxu0 %v9343_v54  ;;  %v10462_v54 = vcombine.low %v395_v47, %v10452_v48  ;;  %v811_v55 = vsel %vm715_vm0, %v806_v41, %v810_v42  ;;  %v10512_v47 = vcombine.low %v7299_v26, %v10501_v27 }
 0x115   : > { %9002 = vmatprep.subr.bf16.mxu0 %v10446_v40 }
 0x116   : > { %2606 = vmatmul.mubr.bf16.gmra.mrb[16].mxu0 %v10340_v52  ;;  %v393_v52 = vld [vmem:[%s10259_s15 + $0x60] sm:$0xf]  ;;  %v827_v5 = vshll.u32 %v10462_v54, 16  ;;  %12863 = vst [vmem:[#allocation24_spill] sm:$0xff] %v10512_v47 }
 0x117   : > { %2767 = vmatmul.mubr.bf16.gmra.mrb[16].mxu1 %v987_v50  ;;  %2613 = vmatprep.mubr.bf16.mxu0 %v787_v61  ;;  %v10438_v29 = vcombine.low %v393_v52, %v10427_v7  ;;  %v9357_v50 = vld [vmem:[#allocation6 + $0x1b8] sm:$0xff]   ;;  %v10487_v52 = vcombine.low %v397_v8, %v398_v9  ;;  %v7301_v8 = vld [vmem:[%s10259_s15 + $0x84] sm:$0xf] }
 0x118   : > { %2774 = vmatprep.mubr.bf16.mxu1 %v10395_v51  ;;  %v10469_v61 = vld [vmem:[%s10259_s15 + $0x70] sm:$0xf]  ;;  %8409 = vmatpush3.bf16.msra.mxu1 %v9357_v50  ;;  %v829_v21 = vrot.slane %v827_v5, 1  ;;  %v400_v50 = vld [vmem:[%s10259_s15 + $0x88] sm:$0xf] }
 0x119   : > { %v815_v45 = vshll.u32 %v10438_v29, 16  ;;  %v813_v58 = vshrl.u32 %v10438_v29, 16  ;;  %v10482_v12 = vcombine.low %v7297_v60, %v10469_v61  ;;  %v839_v41 = vshll.u32 %v10487_v52, 16 }
 0x11a   : > { %v837_v53 = vshrl.u32 %v10487_v52, 16  ;;  %v1244_v60 = vshll.u32 %v10395_v51, 16 }
 0x11b   : > { %v817_v59 = vrot.slane %v815_v45, 1  ;;  %12862 = vst [vmem:[#allocation23_spill] sm:$0xff] %v10482_v12 }
 0x11d   : > { %v818_v6 = vor.u32 %v817_v59, %v813_v58  ;;  %v1232_v59 = vshll.u32 %v10368_v18, 16 }
 0x11e   : > { %2614 = vmatmul.mubr.bf16.gmra.mrb[20].mxu0 %v10361_v14  ;;  %v993_v14 = vsel %vm972_vm1, %v991_v30, %v992_v23  ;;  %v434_v30 = vld [vmem:[%s10259_s15 + $0x6c] sm:$0xe]  ;;  %v7347_v23 = vld [vmem:[%s10259_s15 + $0x24] sm:$0xf] }
 0x11f   : > { %2775 = vmatmul.mubr.bf16.gmra.mrb[20].mxu1 %v990_v13  ;;  %2621 = vmatprep.mubr.bf16.mxu0 %v799_v22  ;;  %v825_v13 = vshrl.u32 %v10462_v54, 16  ;;  %v823_v20 = vsel %vm715_vm0, %v818_v6, %v822_v2  ;;  %v10491_v22 = vld [vmem:[%s10259_s15 + $0x80] ss:$0 sps:$4 sm:$0x11]   ;;  %v7329_v2 = vld [vmem:[%s10259_s15 + $0xc] sm:$0xe] }
 0x120   : > { %2782 = vmatprep.mubr.bf16.mxu1 %v10422_v16  ;;  %v844_v35 = vshll.u32 %v10491_v22, 16  ;;  %v1004_v26 = vrot.slane %v10491_v22, 1  ;;  %v10555_v22 = vld [vmem:[%s10259_s15 + $0x94] sm:$0xf] }
 0x121   : > { %v830_v42 = vor.u32 %v829_v21, %v825_v13  ;;  %v10534_v13 = vld [vmem:[%s10259_s15 + $0x94] sm:$0xf] }
 0x122   : > { %v846_v6 = vrot.slane %v844_v35, 1 }
 0x123   : > { %v835_v56 = vsel %vm715_vm0, %v830_v42, %v834_v44  ;;  %v7489_v42 = vcombine.low %v7329_v2, %v10282_v38 }
 0x126   : > { %2622 = vmatmul.mubr.bf16.gmra.mrb[24].mxu0 %v10380_v33  ;;  %v7449_v33 = vcombine.low %v433_v62, %v10427_v7  ;;  %v1001_v62 = vrot.slane %v10474_v3, 1 }
 0x127   : > { %2783 = vmatmul.mubr.bf16.gmra.mrb[24].mxu1 %v993_v14  ;;  %2629 = vmatprep.mubr.bf16.mxu0 %v811_v55  ;;  %v7450_v14 = vcombine.low %v434_v30, %v10452_v48  ;;  %v841_v55 = vrot.slane %v839_v41, 1  ;;  %v436_v30 = vld [vmem:[%s10259_s15 + $0x84] sm:$0xe] }
 0x128   : > { %2790 = vmatprep.mubr.bf16.mxu1 %v10457_v49  ;;  %v997_v7 = vrot.slane %v7449_v33, 1  ;;  %v401_v33 = vld [vmem:[%s10259_s15 + $0x90] sm:$0xf] }
 0x129   : > { %v1000_v48 = vrot.slane %v7450_v14, 1  ;;  %v842_v17 = vor.u32 %v841_v55, %v837_v53  ;;  %v10547_v41 = vcombine.low %v401_v33, %v10534_v13  ;;  %v7303_v14 = vld [vmem:[%s10259_s15 + $0x90] sm:$0xf]  ;;  %v10559_v53 = vld [vmem:[%s10259_s15 + $0x98] ss:$0 sps:$4 sm:$0x11]  }
 0x12a   : > { %v999_v45 = vsel %vm972_vm1, %v997_v7, %v998_v25  ;;  %v10542_v25 = vcombine.low %v7301_v8, %v10530_v10  ;;  %v403_v55 = vld [vmem:[%s10259_s15 + $0x9c] sm:$0xf]  ;;  %v10567_v8 = vrot.slane %v7489_v42, 1  ;;  %v10584_v42 = vld [vmem:[%s10259_s15 + $0xa0] sm:$0xf] }
 0x12b   : > { %v1002_v7 = vsel %vm972_vm1, %v1000_v48, %v1001_v62  ;;  %v847_v44 = vsel %vm715_vm0, %v842_v17, %v846_v6  ;;  %v863_v38 = vshll.u32 %v10547_v41, 16  ;;  %v7330_v48 = vld [vmem:[%s10259_s15 + $0x18] sm:$0xe]  ;;  %v861_v33 = vshrl.u32 %v10547_v41, 16  ;;  %v437_v17 = vld [vmem:[%s10259_s15 + $0x90] sm:$0xe] }
 0x12c   : > { %12864 = vst [vmem:[#allocation25_spill] sm:$0xff] %v10542_v25 }
 0x12e   : > { %2630 = vmatmul.mubr.bf16.gmra.mrb[28].mxu0 %v10407_v1  ;;  %v399_v1 = vld [vmem:[%s10259_s15 + $0x84] sm:$0xf] }
 0x12f   : > { %2791 = vmatmul.mubr.bf16.gmra.mrb[28].mxu1 %v996_v11  ;;  %2637 = vmatprep.mubr.bf16.mxu0 %v823_v20  ;;  %v10519_v58 = vcombine.low %v399_v1, %v400_v50  ;;  %v7451_v11 = vcombine.low %v435_v32, %v398_v9  ;;  %v9313_v20 = vld [vmem:[%s10259_s15 + $0x8c] ss:$0 sps:$4 sm:$0x11]   ;;  %v7452_v32 = vcombine.low %v436_v30, %v400_v50  ;;  %v865_v30 = vrot.slane %v863_v38, 1 }
 0x130   : > { %2798 = vmatprep.mubr.bf16.mxu1 %v10482_v12  ;;  %v1007_v6 = vrot.slane %v9313_v20, 1 }
 0x131   : > { %v851_v21 = vshll.u32 %v10519_v58, 16  ;;  %v1003_v9 = vrot.slane %v7451_v11, 1  ;;  %v849_v35 = vshrl.u32 %v10519_v58, 16  ;;  %v1006_v11 = vrot.slane %v7452_v32, 1 }
 0x133   : > { %v853_v1 = vrot.slane %v851_v21, 1  ;;  %v1005_v50 = vsel %vm972_vm1, %v1003_v9, %v1004_v26  ;;  %v7305_v26 = vld [vmem:[%s10259_s15 + $0x9c] sm:$0xf] }
 0x135   : > { %v854_v62 = vor.u32 %v853_v1, %v849_v35  ;;  %v10589_v35 = vld [vmem:[%s10259_s15 + $0xa4] ss:$0 sps:$4 sm:$0x11]   ;;  %v7331_v1 = vld [vmem:[%s10259_s15 + $0x24] sm:$0xe] }
 0x136   : > { %2638 = vmatmul.mubr.bf16.gmra.mrb[32].mxu0 %v10438_v29 }
 0x137   : > { %2799 = vmatmul.mubr.bf16.gmra.mrb[32].mxu1 %v999_v45  ;;  %2645 = vmatprep.mubr.bf16.mxu0 %v835_v56  ;;  %v856_v45 = vshll.u32 %v9313_v20, 16  ;;  %v10564_v56 = vld [vmem:[%s10259_s15 + $0xa0] sm:$0xf]  ;;  %v868_v20 = vshll.u32 %v10559_v53, 16 }
 0x138   : > { %2806 = vmatprep.mubr.bf16.mxu1 %v10512_v47  ;;  %v10576_v21 = vcombine.low %v403_v55, %v10564_v56  ;;  %v866_v55 = vor.u32 %v865_v30, %v861_v33 }
 0x139   : > { %v858_v2 = vrot.slane %v856_v45, 1 }
 0x13a   : > { %v873_v30 = vshrl.u32 %v10576_v21, 16 }
 0x13b   : > { %v859_v9 = vsel %vm715_vm0, %v854_v62, %v858_v2  ;;  %v7332_v62 = vld [vmem:[%s10259_s15 + $0x30] sm:$0xe]  ;;  %v1008_v2 = vsel %vm972_vm1, %v1006_v11, %v1007_v6  ;;  %v438_v6 = vld [vmem:[%s10259_s15 + $0x9c] sm:$0xe] }
 0x13e   : > { %2646 = vmatmul.mubr.bf16.gmra.mrb[36].mxu0 %v10462_v54  ;;  %v10571_v54 = vcombine.low %v7303_v14, %v10555_v22  ;;  %v7333_v14 = vld [vmem:[%s10259_s15 + $0x3c] sm:$0xe] }
 0x13f   : > { %2807 = vmatmul.mubr.bf16.gmra.mrb[36].mxu1 %v1002_v7  ;;  %2653 = vmatprep.mubr.bf16.mxu0 %v847_v44  ;;  %v7490_v7 = vcombine.low %v7330_v48, %v10295_v57  ;;  %v7453_v44 = vcombine.low %v437_v17, %v10534_v13  ;;  %v875_v57 = vshll.u32 %v10576_v21, 16  ;;  %v1010_v13 = vrot.slane %v10559_v53, 1  ;;  %v405_v17 = vld [vmem:[%s10259_s15 + $0xa8] sm:$0xf] }
 0x140   : > { %2814 = vmatprep.mubr.bf16.mxu1 %v10542_v25  ;;  %12865 = vst [vmem:[#allocation26_spill] sm:$0xff] %v10571_v54  ;;  %v10601_v48 = vrot.slane %v1196_v31, 1  ;;  %v7491_v31 = vcombine.low %v7331_v1, %v10312_v15 }
 0x141   : > { %v10595_v32 = vrot.slane %v7490_v7, 1  ;;  %v10610_v7 = vld [vmem:[%s10259_s15 + $0xac] sm:$0xf]  ;;  %v1009_v33 = vrot.slane %v7453_v44, 1  ;;  %v877_v53 = vrot.slane %v875_v57, 1  ;;  %v7492_v57 = vcombine.low %v7332_v62, %v10329_v36 }
 0x142   : > { %v10618_v11 = vcombine.low %v405_v17, %v10610_v7  ;;  %v10623_v44 = vld [vmem:[%s10259_s15 + $0xac] sm:$0xf]  ;;  %v10633_v17 = vrot.slane %v7491_v31, 1  ;;  %v407_v62 = vld [vmem:[%s10259_s15 + $0xb4] sm:$0xf] }
 0x143   : > { %v878_v15 = vor.u32 %v877_v53, %v873_v30  ;;  %v1011_v45 = vsel %vm972_vm1, %v1009_v33, %v1010_v13  ;;  %v10650_v31 = vrot.slane %v7492_v57, 1  ;;  %v7493_v33 = vcombine.low %v7333_v14, %v10350_v63  ;;  %v7334_v30 = vld [vmem:[%s10259_s15 + $0x48] sm:$0xe]  ;;  %v7309_v63 = vld [vmem:[%s10259_s15 + $0xb4] sm:$0xf] }
 0x144   : > { %v885_v57 = vshrl.u32 %v10618_v11, 16 }
 0x145   : > { %v10680_v3 = vrot.slane %v7493_v33, 1  ;;  %v10693_v33 = vrot.slane %v1232_v59, 1  ;;  %v9360_v59 = vld [vmem:[%s10259_s15 + $0x20] ss:$0 sps:$4 sm:$0x11]  }
 0x146   : > { %2654 = vmatmul.mubr.bf16.gmra.mrb[40].mxu0 %v10487_v52  ;;  %v870_v52 = vrot.slane %v868_v20, 1  ;;  %v880_v20 = vshll.u32 %v10589_v35, 16 }
 0x147   : > { %2815 = vmatmul.mubr.bf16.gmra.mrb[40].mxu1 %v1005_v50  ;;  %2661 = vmatprep.mubr.bf16.mxu0 %v859_v9  ;;  %v10606_v50 = vcombine.low %v7305_v26, %v10584_v42  ;;  %v7307_v26 = vld [vmem:[%s10259_s15 + $0xa8] sm:$0xf] }
 0x148   : > { %2822 = vmatprep.mubr.bf16.mxu1 %v10571_v54  ;;  %v871_v9 = vsel %vm715_vm0, %v866_v55, %v870_v52  ;;  %v882_v1 = vrot.slane %v880_v20, 1  ;;  %v7454_v55 = vcombine.low %v438_v6, %v10564_v56  ;;  %v10630_v52 = vld [vmem:[%s10259_s15 + $0xb0] ss:$0 sps:$4 sm:$0x11]   ;;  %v10637_v36 = vcombine.low %v7307_v26, %v10623_v44 }
 0x149   : > { %12866 = vst [vmem:[#allocation27_spill] sm:$0xff] %v10606_v50  ;;  %v10646_v56 = vrot.slane %v1208_v34, 1  ;;  %v1013_v26 = vrot.slane %v10589_v35, 1  ;;  %v439_v34 = vld [vmem:[%s10259_s15 + $0xa8] sm:$0xe]  ;;  %v892_v53 = vshll.u32 %v10630_v52, 16 }
 0x14a   : > { %12867 = vst [vmem:[#allocation28_spill] sm:$0xff] %v10637_v36  ;;  %v1012_v6 = vrot.slane %v7454_v55, 1  ;;  %v7310_v35 = vld [vmem:[%s10259_s15 + $0xb8] sm:$0xf]  ;;  %v7455_v14 = vcombine.low %v439_v34, %v10610_v7  ;;  %v7312_v7 = vld [vmem:[%s10259_s15 + $0xc4] sm:$0xf] }
 0x14b   : > { %v7345_v55 = vld [vmem:[%s10259_s15 + $0x18] sm:$0xf]  ;;  %v894_v38 = vrot.slane %v892_v53, 1 }
 0x14c   : > { %v1014_v34 = vsel %vm972_vm1, %v1012_v6, %v1013_v26  ;;  %v10698_v26 = vld [vmem:[%s10259_s15 + $0x14] ss:$0 sps:$4 sm:$0x11]  }
 0x14e   : > { %2662 = vmatmul.mubr.bf16.gmra.mrb[44].mxu0 %v10519_v58  ;;  %v10641_v58 = vld [vmem:[%s10259_s15 + $0xb8] sm:$0xf] }
 0x14f   : > { %2823 = vmatmul.mubr.bf16.gmra.mrb[44].mxu1 %v1008_v2  ;;  %2669 = vmatprep.mubr.bf16.mxu0 %v871_v9  ;;  %v887_v2 = vshll.u32 %v10618_v11, 16  ;;  %v883_v9 = vsel %vm715_vm0, %v878_v15, %v882_v1  ;;  %v10661_v13 = vcombine.low %v407_v62, %v10641_v58  ;;  %v10669_v15 = vld [vmem:[%s10259_s15 + $0xbc] ss:$0 sps:$4 sm:$0x11]   ;;  %v7494_v1 = vcombine.low %v7334_v30, %v10385_v37  ;;  %v7335_v62 = vld [vmem:[%s10259_s15 + $0x54] sm:$0xe] }
 0x150   : > { %2830 = vmatprep.mubr.bf16.mxu1 %v10606_v50  ;;  %v440_v37 = vld [vmem:[%s10259_s15 + $0xb4] sm:$0xe]  ;;  %v904_v6 = vshll.u32 %v10669_v15, 16  ;;  %v1019_v30 = vrot.slane %v10669_v15, 1 }
 0x151   : > { %v889_v20 = vrot.slane %v887_v2, 1  ;;  %v7346_v2 = vld [vmem:[%s10259_s15 + $0x1c] sm:$0xf] }
 0x152   : > { %v10689_v53 = vcombine.low %v7345_v55, %v7346_v2  ;;  %v7456_v55 = vcombine.low %v440_v37, %v10641_v58  ;;  %v7495_v2 = vcombine.low %v7335_v62, %v10412_v4  ;;  %v10717_v58 = vrot.slane %v1244_v60, 1  ;;  %v10722_v62 = vld [vmem:[%s10259_s15 + $0x20] ss:$0 sps:$4 sm:$0x11]  }
 0x153   : > { %v890_v29 = vor.u32 %v889_v20, %v885_v57  ;;  %v1016_v20 = vrot.slane %v10630_v52, 1  ;;  %v897_v57 = vshrl.u32 %v10661_v13, 16  ;;  %v1189_v4 = vshll.u32 %v10698_v26, 16  ;;  %v9363_v60 = vld [vmem:[%s10259_s15 + $0x2c] ss:$0 sps:$4 sm:$0x11]  }
 0x154   : > { %v1018_v37 = vrot.slane %v7456_v55, 1  ;;  %v1646_v50 = vshrl.u32 %v10689_v53, 16  ;;  %v10779_v55 = vld [vmem:[%s10259_s15 + $0x4c] sm:$0xf] }
 0x155   : > { %v895_v52 = vsel %vm715_vm0, %v890_v29, %v894_v38  ;;  %v1648_v29 = vshll.u32 %v10689_v53, 16  ;;  %v7348_v38 = vld [vmem:[%s10259_s15 + $0x28] sm:$0xf]  ;;  %12878 = vst [vmem:[#allocation38_spill] sm:$0xff] %v10779_v55 }
 0x156   : > { %2670 = vmatmul.mubr.bf16.gmra.mrb[48].mxu0 %v10547_v41  ;;  %v899_v41 = vshll.u32 %v10661_v13, 16 }
 0x157   : > { %2831 = vmatmul.mubr.bf16.gmra.mrb[48].mxu1 %v1011_v45  ;;  %v10673_v45 = vrot.slane %v1220_v39, 1  ;;  %2677 = vmatprep.mubr.bf16.mxu0 %v883_v9  ;;  %v10684_v39 = vcombine.low %v7309_v63, %v7310_v35  ;;  %v1015_v9 = vrot.slane %v7455_v14, 1  ;;  %v10700_v63 = vrot.slane %v7494_v1, 1  ;;  %v7311_v14 = vld [vmem:[%s10259_s15 + $0xc0] sm:$0xf] }
 0x158   : > { %2838 = vmatprep.mubr.bf16.mxu1 %v10637_v36  ;;  %v901_v35 = vrot.slane %v899_v41, 1  ;;  %v7336_v41 = vld [vmem:[%s10259_s15 + $0x60] sm:$0xe]  ;;  %v1653_v1 = vshll.u32 %v9360_v59, 16  ;;  %v10725_v5 = vcombine.low %v7311_v14, %v7312_v7  ;;  %v10730_v36 = vrot.slane %v7495_v2, 1 }
 0x159   : > { %12868 = vst [vmem:[#allocation29_spill] sm:$0xff] %v10684_v39  ;;  %12869 = vst [vmem:[#allocation30_spill] sm:$0xff] %v10700_v63  ;;  %v1650_v63 = vrot.slane %v1648_v29, 1  ;;  %v1201_v7 = vshll.u32 %v10722_v62, 16  ;;  %v7349_v59 = vld [vmem:[%s10259_s15 + $0x30] sm:$0xf] }
 0x15a   : > { %v902_v15 = vor.u32 %v901_v35, %v897_v57  ;;  %12870 = vst [vmem:[#allocation31_spill] sm:$0xff] %v10725_v5  ;;  %12871 = vst [vmem:[#allocation32_spill] sm:$0xff] %v10730_v36  ;;  %v7496_v35 = vcombine.low %v7336_v41, %v10435_v28  ;;  %v1655_v14 = vrot.slane %v1653_v1, 1  ;;  %v10750_v2 = vld [vmem:[%s10259_s15 + $0x34] sm:$0xf] }
 0x15b   : > { %12874 = vst [vmem:[#allocation34_spill] sm:$0xff] %v10750_v2  ;;  %v1651_v28 = vor.u32 %v1650_v63, %v1646_v50  ;;  %v10756_v41 = vld [vmem:[%s10259_s15 + $0x38] ss:$0 sps:$4 sm:$0x11]   ;;  %v7337_v63 = vld [vmem:[%s10259_s15 + $0x6c] sm:$0xe] }
 0x15c   : > { %12875 = vst [vmem:[#allocation35_spill] sm:$0xff] %v10756_v41  ;;  %v10759_v1 = vld [vmem:[%s10259_s15 + $0x38] ss:$0 sps:$4 sm:$0x11]   ;;  %v7353_v57 = vld [vmem:[%s10259_s15 + $0x48] sm:$0xf] }
 0x15d   : > { %v10786_v36 = vld [vmem:[%s10259_s15 + $0x44] ss:$0 sps:$4 sm:$0x11]  }
 0x15e   : > { %2678 = vmatmul.mubr.bf16.gmra.mrb[52].mxu0 %v10576_v21  ;;  %v1017_v21 = vsel %vm972_vm1, %v1015_v9, %v1016_v20  ;;  %v12872_v9 = vshll.u32 %v10422_v16, 16  ;;  %12879 = vst [vmem:[#allocation39_spill] sm:$0xff] %v10786_v36 }
 0x15f   : > { %2839 = vmatmul.mubr.bf16.gmra.mrb[52].mxu1 %v1014_v34  ;;  %2685 = vmatprep.mubr.bf16.mxu0 %v895_v52  ;;  %v906_v34 = vrot.slane %v904_v6, 1  ;;  %v1438_v52 = vrot.slane %v10698_v26, 1  ;;  %v10735_v6 = vrot.slane %v1189_v4, 1  ;;  %v10761_v4 = vrot.slane %v1201_v7, 1 }
 0x160   : > { %2846 = vmatprep.mubr.bf16.mxu1 %v10684_v39  ;;  %v10727_v39 = vcombine.low %v7347_v23, %v7348_v38  ;;  %v10739_v23 = vld [vmem:[%s10259_s15 + $0x2c] ss:$0 sps:$4 sm:$0x11]   ;;  %v10743_v20 = vrot.slane %v12872_v9, 1  ;;  %v1665_v38 = vshll.u32 %v9363_v60, 16  ;;  %v1020_v9 = vsel %vm972_vm1, %v1018_v37, %v1019_v30 }
 0x161   : > { %v907_v26 = vsel %vm715_vm0, %v902_v15, %v906_v34  ;;  %v10765_v34 = vcombine.low %v7349_v59, %v10750_v2  ;;  %v10769_v60 = vld [vmem:[%s10259_s15 + $0x40] sm:$0xf]  ;;  %v1213_v50 = vshll.u32 %v10739_v23, 16  ;;  %v1656_v59 = vsel %vm715_vm0, %v1651_v28, %v1655_v14  ;;  %v10792_v37 = vld [vmem:[%s10259_s15 + $0x44] ss:$0 sps:$4 sm:$0x11]  }
 0x162   : > { %12873 = vst [vmem:[#allocation33_spill] sm:$0xff] %v10743_v20  ;;  %v1660_v29 = vshll.u32 %v10727_v39, 16  ;;  %v1658_v15 = vshrl.u32 %v10727_v39, 16  ;;  %12876 = vst [vmem:[#allocation36_spill] sm:$0xff] %v10769_v60  ;;  %v1677_v14 = vshll.u32 %v10756_v41, 16  ;;  %v10799_v28 = vcombine.low %v7353_v57, %v10779_v55 }
 0x163   : > { %v1672_v30 = vshll.u32 %v10765_v34, 16  ;;  %v1670_v7 = vshrl.u32 %v10765_v34, 16  ;;  %v1689_v57 = vshll.u32 %v10786_v36, 16  ;;  %v7355_v55 = vld [vmem:[%s10259_s15 + $0x54] sm:$0xf] }
 0x164   : > { %v10817_v41 = vld [vmem:[%s10259_s15 + $0x58] sm:$0xf] }
 0x165   : > { %v10837_v16 = vrot.slane %v1689_v57, 1 }
 0x166   : > { %2686 = vmatmul.mubr.bf16.gmra.mrb[56].mxu0 %v10618_v11  ;;  %v10772_v11 = vrot.slane %v7496_v35, 1  ;;  %v1439_v35 = vsel %vm972_vm1, %v10567_v8, %v1438_v52  ;;  %v12881_v8 = vshrl.u32 %v10286_v43, 16  ;;  %v1674_v43 = vrot.slane %v1672_v30, 1 }
 0x167   : > { %2847 = vmatmul.mubr.bf16.gmra.mrb[56].mxu1 %v1017_v21  ;;  %2693 = vmatprep.mubr.bf16.mxu0 %v907_v26  ;;  %v7351_v21 = vld [vmem:[%s10259_s15 + $0x3c] sm:$0xf]  ;;  %v1662_v26 = vrot.slane %v1660_v29, 1  ;;  %v10794_v29 = vrot.slane %v1213_v50, 1  ;;  %v7497_v50 = vcombine.low %v7337_v63, %v10469_v61  ;;  %v1679_v63 = vrot.slane %v1677_v14, 1 }
 0x168   : > { %2854 = vmatprep.mubr.bf16.mxu1 %v10725_v5  ;;  %12877 = vst [vmem:[#allocation37_spill] sm:$0xff] %v10772_v11  ;;  %v1667_v5 = vrot.slane %v1665_v38, 1  ;;  %v10783_v2 = vcombine.low %v7351_v21, %v10769_v60  ;;  %v1225_v38 = vshll.u32 %v10759_v1, 16  ;;  %v10802_v21 = vld [vmem:[%s10259_s15 + $0x50] ss:$0 sps:$4 sm:$0x11]   ;;  %v1187_v52 = vor.u32 %v10494_v24, %v12881_v8 }
 0x169   : > { %12880 = vst [vmem:[#allocation40_spill] sm:$0xff] %v10802_v21  ;;  %v1663_v11 = vor.u32 %v1662_v26, %v1658_v15  ;;  %v1696_v15 = vshll.u32 %v10799_v28, 16  ;;  %v12882_v26 = vshll.u32 %v10457_v49, 16  ;;  %v10833_v24 = vcombine.low %v7355_v55, %v10817_v41  ;;  %v7338_v61 = vld [vmem:[%s10259_s15 + $0x78] sm:$0xe] }
 0x16a   : > { %v1684_v60 = vshll.u32 %v10783_v2, 16  ;;  %v1682_v36 = vshrl.u32 %v10783_v2, 16  ;;  %v1192_v49 = vsel %vm715_vm0, %v1187_v52, %v10735_v6  ;;  %v10847_v55 = vrot.slane %v7497_v50, 1  ;;  %v10859_v6 = vld [vmem:[%s10259_s15 + $0x5c] ss:$0 sps:$4 sm:$0x11]  }
 0x16b   : > { %v10827_v8 = vrot.slane %v12882_v26, 1  ;;  %v1668_v14 = vsel %vm715_vm0, %v1663_v11, %v1667_v5  ;;  %v12886_v5 = vrot.slane %v10722_v62, 1  ;;  %v10855_v57 = vrot.slane %v1696_v15, 1  ;;  %v7357_v15 = vld [vmem:[%s10259_s15 + $0x60] sm:$0xf] }
 0x16c   : > { %v1686_v20 = vrot.slane %v1684_v60, 1  ;;  %12885 = vst [vmem:[#allocation43_spill] sm:$0xff] %v10847_v55  ;;  %v1261_v26 = vshll.u32 %v10859_v6, 16  ;;  %v10884_v11 = vld [vmem:[%s10259_s15 + $0x68] ss:$0 sps:$4 sm:$0x11]  }
 0x16d   : > { %12883 = vst [vmem:[#allocation41_spill] sm:$0xff] %v10827_v8  ;;  %v10841_v8 = vld [vmem:[%s10259_s15 + $0x5c] ss:$0 sps:$4 sm:$0x11]   ;;  %v1442_v60 = vsel %vm972_vm1, %v10595_v32, %v12886_v5  ;;  %v1675_v32 = vor.u32 %v1674_v43, %v1670_v7  ;;  %v10869_v5 = vld [vmem:[%s10259_s15 + $0x64] sm:$0xf] }
 0x16e   : > { %2694 = vmatmul.mubr.bf16.gmra.mrb[60].mxu0 %v10661_v13  ;;  %v10822_v13 = vrot.slane %v1225_v38, 1  ;;  %v9365_v38 = vld [vmem:[#allocation6 + $0x208] sm:$0xff]   ;;  %12884 = vst [vmem:[#allocation42_spill] sm:$0xff] %v10841_v8  ;;  %12887 = vst [vmem:[#allocation44_spill] sm:$0xff] %v10869_v5  ;;  %v7359_v7 = vld [vmem:[%s10259_s15 + $0x6c] sm:$0xf] }
 0x16f   : > { %2855 = vmatmul.mubr.bf16.gmra.mrb[60].mxu1 %v1020_v9  ;;  %v10809_v9 = vld [vmem:[%s10259_s15 + $0x50] ss:$0 sps:$4 sm:$0x11]   ;;  %2895 = vmatprep.mubr.bf16.mxu0 %v1439_v35  ;;  %v1701_v35 = vshll.u32 %v10802_v21, 16  ;;  %v12889_v55 = vshll.u32 %v10482_v12, 16  ;;  %v12895_v12 = vrot.slane %v10759_v1, 1 }
 0x170   : > { %3056 = vmatprep.mubr.bf16.mxu1 %v1656_v59  ;;  %v1237_v59 = vshll.u32 %v10792_v37, 16  ;;  %v1249_v30 = vshll.u32 %v10809_v9, 16  ;;  %v10880_v43 = vld [vmem:[%s10259_s15 + $0x70] sm:$0xf] }
 0x171   : > { %v10861_v52 = vrot.slane %v1701_v35, 1  ;;  %v7498_v35 = vcombine.low %v7338_v61, %v10501_v27  ;;  %v10890_v27 = vld [vmem:[%s10259_s15 + $0x68] ss:$0 sps:$4 sm:$0x11]   ;;  %v1680_v61 = vsel %vm715_vm0, %v1675_v32, %v1679_v63  ;;  %v10902_v62 = vcombine.low %v7359_v7, %v10880_v43 }
 0x172   : > { %v10845_v21 = vrot.slane %v1237_v59, 1  ;;  %v10863_v50 = vrot.slane %v1249_v30, 1  ;;  %v9372_v59 = vld [vmem:[#allocation6 + $0x210] sm:$0xff]   ;;  %v12888_v30 = vshrl.u32 %v10300_v0, 16  ;;  %v12892_v7 = vrot.slane %v10739_v23, 1 }
 0x173   : > { %v10893_v0 = vld [vmem:[%s10259_s15 + $0x74] ss:$0 sps:$4 sm:$0x11]   ;;  %v1725_v23 = vshll.u32 %v10884_v11, 16  ;;  %v1273_v63 = vshll.u32 %v10890_v27, 16 }
 0x174   : > { %v10914_v32 = vld [vmem:[%s10259_s15 + $0x74] ss:$0 sps:$4 sm:$0x11]   ;;  %v10998_v1 = vld [vmem:[%s10259_s15 + $0x8c] ss:$0 sps:$4 sm:$0x11]  }
 0x176   : > { %2896 = vmatmul.mubr.bf16.vlgmr.msra.gmra.mrb[64].mxu0 %v1192_v49  ;;  %v1713_v49 = vshll.u32 %v10841_v8, 16 }
 0x177   : > { %3057 = vmatmul.mubr.bf16.vlgmr.msra.gmra.mrb[64].mxu1 %v10689_v53  ;;  %v1708_v53 = vshll.u32 %v10833_v24, 16  ;;  %9003 = vmatpush3.bf16.msra.mxu0 %v10446_v40  ;;  %v10887_v40 = vcombine.low %v7357_v15, %v10869_v5  ;;  %v10906_v15 = vrot.slane %v12889_v55, 1  ;;  %v1445_v55 = vsel %vm972_vm1, %v10633_v17, %v12892_v7  ;;  %v7363_v7 = vld [vmem:[%s10259_s15 + $0x84] sm:$0xf] }
 0x178   : > { %3064 = vmatprep.mubr.bf16.mxu1 %v1668_v14  ;;  %2903 = vmatprep.mubr.bf16.mxu0 %v1442_v60  ;;  %v1199_v14 = vor.u32 %v10601_v48, %v12888_v30  ;;  %v10896_v48 = vld [vmem:[%s10259_s15 + $0x84] sm:$0xe]  ;;  %v9379_v30 = vld [vmem:[#allocation6 + $0x218] sm:$0xff]   ;;  %v10910_v8 = vrot.slane %v1713_v49, 1  ;;  %v10928_v49 = vld [vmem:[%s10259_s15 + $0x7c] sm:$0xf] }
 0x179   : > { %9004 = vmatprep.subr.bf16.mxu0 %v9365_v38  ;;  %v10899_v60 = vrot.slane %v1708_v53, 1  ;;  %12890 = vst [vmem:[#allocation45_spill] sm:$0xff] %v10906_v15  ;;  %v10916_v53 = vrot.slane %v7498_v35, 1  ;;  %v12893_v15 = vshrl.u32 %v10316_v19, 16  ;;  %12894 = vst [vmem:[#allocation47_spill] sm:$0xff] %v10928_v49  ;;  %v10930_v35 = vrot.slane %v1261_v26, 1 }
 0x17a   : > { %v1204_v5 = vsel %vm715_vm0, %v1199_v14, %v10761_v4  ;;  %v7361_v14 = vld [vmem:[%s10259_s15 + $0x78] sm:$0xf]  ;;  %v1732_v19 = vshll.u32 %v10902_v62, 16  ;;  %v1737_v17 = vshll.u32 %v10893_v0, 16  ;;  %v7499_v26 = vcombine.low %v10896_v48, %v10530_v10 }
 0x17b   : > { %9005 = vmatpush3.bf16.msra.mxu0 %v9365_v38  ;;  %12891 = vst [vmem:[#allocation46_spill] sm:$0xff] %v10916_v53  ;;  %v1211_v4 = vor.u32 %v10646_v56, %v12893_v15  ;;  %v1687_v38 = vor.u32 %v1686_v20, %v1682_v36  ;;  %v9386_v36 = vld [vmem:[#allocation6 + $0x220] sm:$0xff]   ;;  %v10938_v56 = vld [vmem:[%s10259_s15 + $0x80] ss:$0 sps:$4 sm:$0x11]   ;;  %v10946_v15 = vcombine.low %v7361_v14, %v10928_v49  ;;  %v10967_v49 = vrot.slane %v1725_v23, 1 }
 0x17c   : > { %9006 = vmatprep.subr.bf16.mxu0 %v9372_v59  ;;  %v1448_v20 = vsel %vm972_vm1, %v10650_v31, %v12895_v12  ;;  %v10959_v48 = vld [vmem:[%s10259_s15 + $0x80] ss:$0 sps:$4 sm:$0x11]   ;;  %v7340_v14 = vld [vmem:[%s10259_s15 + $0x90] sm:$0xe]  ;;  %v10972_v12 = vrot.slane %v1732_v19, 1 }
 0x17d   : > { %v1216_v53 = vsel %vm715_vm0, %v1211_v4, %v10794_v29  ;;  %v1692_v10 = vsel %vm715_vm0, %v1687_v38, %v10837_v16  ;;  %12896 = vst [vmem:[#allocation48_spill] sm:$0xff] %v10959_v48  ;;  %v10969_v29 = vrot.slane %v1273_v63, 1  ;;  %v10974_v31 = vrot.slane %v1737_v17, 1  ;;  %v9393_v16 = vld [vmem:[#allocation6 + $0x228] sm:$0xff]  }
 0x17e   : > { %2904 = vmatmul.mubr.bf16.gmra.mrb[68].mxu0 %v1204_v5  ;;  %v1285_v5 = vshll.u32 %v10914_v32, 16  ;;  %v12897_v4 = vshll.u32 %v10512_v47, 16  ;;  %v1744_v63 = vshll.u32 %v10946_v15, 16  ;;  %v1749_v23 = vshll.u32 %v10938_v56, 16  ;;  %v9400_v47 = vld [vmem:[#allocation6 + $0x230] sm:$0xff]  }
 0x17f   : > { %3065 = vmatmul.mubr.bf16.gmra.mrb[68].mxu1 %v10727_v39  ;;  %v1720_v39 = vshll.u32 %v10887_v40, 16  ;;  %2911 = vmatprep.mubr.bf16.mxu0 %v1445_v55  ;;  %v10962_v55 = vld [vmem:[%s10259_s15 + $0x88] sm:$0xf]  ;;  %v12902_v17 = vshrl.u32 %v10799_v28, 16 }
 0x180   : > { %3072 = vmatprep.mubr.bf16.mxu1 %v1680_v61  ;;  %9007 = vmatpush3.bf16.msra.mxu0 %v9372_v59  ;;  %v10979_v38 = vrot.slane %v12897_v4, 1  ;;  %v10986_v19 = vcombine.low %v7363_v7, %v10962_v55  ;;  %v10995_v59 = vld [vmem:[%s10259_s15 + $0x8c] ss:$0 sps:$4 sm:$0x11]   ;;  %v7500_v7 = vcombine.low %v7340_v14, %v10555_v22  ;;  %v11016_v22 = vrot.slane %v1749_v23, 1 }
 0x181   : > { %9008 = vmatprep.subr.bf16.mxu0 %v9379_v30  ;;  %v10965_v61 = vrot.slane %v1720_v39, 1  ;;  %v10981_v39 = vrot.slane %v1285_v5, 1  ;;  %v10992_v5 = vrot.slane %v7499_v26, 1  ;;  %v1699_v26 = vor.u32 %v10855_v57, %v12902_v17  ;;  %v11035_v23 = vld [vmem:[%s10259_s15 + $0x98] ss:$0 sps:$4 sm:$0x11]  }
 0x182   : > { %12898 = vst [vmem:[#allocation49_spill] sm:$0xff] %v10979_v38  ;;  %v11002_v38 = vld [vmem:[%s10259_s15 + $0x9c] sm:$0xe]  ;;  %v12904_v14 = vshll.u32 %v10542_v25, 16  ;;  %12906 = vst [vmem:[#allocation54_spill] sm:$0xff] %v11035_v23 }
 0x183   : > { %12899 = vst [vmem:[#allocation50_spill] sm:$0xff] %v10981_v39  ;;  %12900 = vst [vmem:[#allocation51_spill] sm:$0xff] %v10992_v5  ;;  %v7365_v5 = vld [vmem:[%s10259_s15 + $0x90] sm:$0xf]  ;;  %v11044_v57 = vld [vmem:[%s10259_s15 + $0xa0] sm:$0xf]  ;;  %v7501_v25 = vcombine.low %v11002_v38, %v10584_v42 }
 0x184   : > { %9009 = vmatpush3.bf16.msra.mxu0 %v9379_v30  ;;  %v1297_v30 = vshll.u32 %v10959_v48, 16  ;;  %v11014_v48 = vrot.slane %v1744_v63, 1  ;;  %v11025_v17 = vrot.slane %v12904_v14, 1  ;;  %v1761_v63 = vshll.u32 %v10995_v59, 16  ;;  %v7367_v14 = vld [vmem:[%s10259_s15 + $0x9c] sm:$0xf] }
 0x185   : > { %9010 = vmatprep.subr.bf16.mxu0 %v9386_v36  ;;  %v12910_v38 = vshrl.u32 %v10395_v51, 16 }
 0x186   : > { %2912 = vmatmul.mubr.bf16.gmra.mrb[72].mxu0 %v1216_v53  ;;  %v11020_v53 = vrot.slane %v1297_v30, 1  ;;  %12905 = vst [vmem:[#allocation53_spill] sm:$0xff] %v11025_v17  ;;  %v1704_v30 = vsel %vm715_vm0, %v1699_v26, %v10861_v52  ;;  %v9407_v17 = vld [vmem:[#allocation6 + $0x238] sm:$0xff]   ;;  %v11056_v52 = vld [vmem:[%s10259_s15 + $0xa4] ss:$0 sps:$4 sm:$0x11]  }
 0x187   : > { %3073 = vmatmul.mubr.bf16.gmra.mrb[72].mxu1 %v10765_v34  ;;  %v12901_v34 = vshrl.u32 %v10337_v46, 16  ;;  %2919 = vmatprep.mubr.bf16.mxu0 %v1448_v20  ;;  %v1756_v46 = vshll.u32 %v10986_v19, 16  ;;  %v11028_v20 = vld [vmem:[%s10259_s15 + $0x98] ss:$0 sps:$4 sm:$0x11]  }
 0x188   : > { %3080 = vmatprep.mubr.bf16.mxu1 %v1692_v10  ;;  %v11012_v10 = vld [vmem:[%s10259_s15 + $0x94] sm:$0xf]  ;;  %9011 = vmatpush3.bf16.msra.mxu0 %v9386_v36  ;;  %12903 = vst [vmem:[#allocation52_spill] sm:$0xff] %v11020_v53 }
 0x189   : > { %v1223_v4 = vor.u32 %v10673_v45, %v12901_v34  ;;  %9012 = vmatprep.subr.bf16.mxu0 %v9393_v16  ;;  %v11032_v36 = vcombine.low %v7365_v5, %v11012_v10  ;;  %v1309_v34 = vshll.u32 %v10998_v1, 16  ;;  %v11040_v45 = vrot.slane %v7500_v7, 1  ;;  %v11049_v5 = vld [vmem:[%s10259_s15 + $0xa8] sm:$0xe] }
 0x18a   : > { %v11053_v39 = vrot.slane %v1756_v46, 1  ;;  %v12908_v7 = vrot.slane %v10792_v37, 1 }
 0x18b   : > { %12907 = vst [vmem:[#allocation55_spill] sm:$0xff] %v11040_v45  ;;  %v1228_v53 = vsel %vm715_vm0, %v1223_v4, %v10822_v13  ;;  %v12909_v45 = vshrl.u32 %v10368_v18, 16  ;;  %v1247_v13 = vor.u32 %v10717_v58, %v12910_v38  ;;  %v11071_v4 = vld [vmem:[%s10259_s15 + $0xac] sm:$0xf]  ;;  %v1768_v37 = vshll.u32 %v11032_v36, 16 }
 0x18c   : > { %9013 = vmatpush3.bf16.msra.mxu0 %v9393_v16  ;;  %v1451_v26 = vsel %vm972_vm1, %v10680_v3, %v12908_v7  ;;  %v7369_v16 = vld [vmem:[%s10259_s15 + $0xa8] sm:$0xf]  ;;  %v1773_v3 = vshll.u32 %v11028_v20, 16  ;;  %v11077_v18 = vcombine.low %v7367_v14, %v11044_v57  ;;  %v11082_v58 = vrot.slane %v1761_v63, 1 }
 0x18d   : > { %v1235_v42 = vor.u32 %v10693_v33, %v12909_v45  ;;  %9014 = vmatprep.subr.bf16.mxu0 %v9400_v47  ;;  %v12911_v33 = vshrl.u32 %v10833_v24, 16  ;;  %v11084_v46 = vrot.slane %v1309_v34, 1  ;;  %v12914_v14 = vshll.u32 %v10571_v54, 16  ;;  %v12917_v34 = vld [vmem:[#allocation21_spill] sm:$0xff] }
 0x18e   : > { %2920 = vmatmul.mubr.bf16.gmra.mrb[76].mxu0 %v1228_v53  ;;  %v1321_v53 = vshll.u32 %v11035_v23, 16  ;;  %v11108_v7 = vld [vmem:[%s10259_s15 + $0xb0] ss:$0 sps:$4 sm:$0x11]   ;;  %v7395_v23 = vld [vmem:[%s10259_s15 + $0x30] sm:$0xe] }
 0x18f   : > { %3081 = vmatmul.mubr.bf16.gmra.mrb[76].mxu1 %v10783_v2  ;;  %v1711_v51 = vor.u32 %v10899_v60, %v12911_v33  ;;  %12912 = vst [vmem:[#allocation56_spill] sm:$0xff] %v11084_v46  ;;  %2927 = vmatprep.mubr.bf16.mxu0 %v1451_v26  ;;  %v11093_v38 = vrot.slane %v12914_v14, 1  ;;  %v11097_v2 = vcombine.low %v7369_v16, %v11071_v4  ;;  %v12918_v26 = vshrl.u32 %v12917_v34, 16  ;;  %v12919_v33 = vld [vmem:[#allocation33_spill] sm:$0xff] }
 0x190   : > { %3088 = vmatprep.mubr.bf16.mxu1 %v1704_v30  ;;  %v11088_v30 = vld [vmem:[%s10259_s15 + $0xa4] ss:$0 sps:$4 sm:$0x11]   ;;  %9015 = vmatpush3.bf16.msra.mxu0 %v9400_v47  ;;  %v7502_v60 = vcombine.low %v11049_v5, %v10623_v44  ;;  %v1240_v63 = vsel %vm715_vm0, %v1235_v42, %v10845_v21  ;;  %v1785_v14 = vshll.u32 %v11056_v52, 16  ;;  %v11110_v16 = vrot.slane %v1768_v37, 1 }
 0x191   : > { %12913 = vst [vmem:[#allocation57_spill] sm:$0xff] %v11088_v30  ;;  %12915 = vst [vmem:[#allocation58_spill] sm:$0xff] %v11093_v38  ;;  %v1259_v45 = vor.u32 %v12919_v33, %v12918_v26  ;;  %9016 = vmatprep.subr.bf16.mxu0 %v9407_v17  ;;  %v11112_v47 = vrot.slane %v1773_v3, 1  ;;  %v1780_v5 = vshll.u32 %v11077_v18, 16  ;;  %v12920_v21 = vrot.slane %v10809_v9, 1  ;;  %v12921_v42 = vld [vmem:[#allocation30_spill] sm:$0xff] }
 0x192   : > { %12916 = vst [vmem:[#allocation59_spill] sm:$0xff] %v11097_v2  ;;  %v11122_v26 = vsel %vm715_vm0, %v1247_v13, %v10863_v50  ;;  %v1716_v33 = vsel %vm715_vm0, %v1711_v51, %v10910_v8  ;;  %v1333_v37 = vshll.u32 %v11088_v30, 16  ;;  %v11128_v3 = vld [vmem:[%s10259_s15 + $0xb0] ss:$0 sps:$4 sm:$0x11]   ;;  %v12923_v44 = vrot.slane %v10859_v6, 1 }
 0x193   : > { %v1454_v34 = vsel %vm972_vm1, %v12921_v42, %v12920_v21  ;;  %12922 = vst [vmem:[#allocation21_spill] sm:$0xff] %v11128_v3  ;;  %v12924_v38 = vld [vmem:[#allocation32_spill] sm:$0xff]  ;;  %v12925_v9 = vshrl.u32 %v10887_v40, 16  ;;  %v11139_v50 = vrot.slane %v1321_v53, 1  ;;  %v1792_v13 = vshll.u32 %v11097_v2, 16 }
 0x194   : > { %v11134_v54 = vsel %vm972_vm1, %v12924_v38, %v12923_v44  ;;  %v7371_v8 = vld [vmem:[%s10259_s15 + $0xb4] sm:$0xf]  ;;  %v11144_v51 = vld [vmem:[%s10259_s15 + $0xb8] sm:$0xf]  ;;  %9017 = vmatpush3.bf16.msra.mxu0 %v9407_v17  ;;  %v11148_v38 = vrot.slane %v1785_v14, 1  ;;  %v11150_v44 = vrot.slane %v7501_v25, 1  ;;  %v11191_v6 = vsel %vm715_vm0, %v1259_v45, %v10930_v35 }
 0x195   : > { %v1723_v21 = vor.u32 %v10965_v61, %v12925_v9  ;;  %12926 = vst [vmem:[#allocation33_spill] sm:$0xff] %v11139_v50  ;;  %v1797_v61 = vshll.u32 %v11108_v7, 16  ;;  %v11153_v53 = vrot.slane %v1780_v5, 1  ;;  %v12929_v9 = vld [vmem:[#allocation27_spill] sm:$0xff]  ;;  %v11162_v14 = vrot.slane %v1333_v37, 1 }
 0x196   : > { %12927 = vst [vmem:[#allocation30_spill] sm:$0xff] %v11148_v38  ;;  %12928 = vst [vmem:[#allocation32_spill] sm:$0xff] %v11150_v44  ;;  %v12930_v17 = vshll.u32 %v12929_v9, 16  ;;  %2928 = vmatmul.mubr.bf16.gmra.mrb[80].mxu0 %v1240_v63  ;;  %v11168_v5 = vcombine.low %v7371_v8, %v11144_v51  ;;  %v7396_v42 = vld [vmem:[%s10259_s15 + $0x3c] sm:$0xe]  ;;  %v11171_v50 = vrot.slane %v1792_v13, 1 }
 0x197   : > { %3089 = vmatmul.mubr.bf16.gmra.mrb[80].mxu1 %v10799_v28  ;;  %12932 = vst [vmem:[#allocation61_spill] sm:$0xff] %v11162_v14  ;;  %2935 = vmatprep.mubr.bf16.mxu0 %v1454_v34  ;;  %v12935_v63 = vld [vmem:[#allocation28_spill] sm:$0xff]  ;;  %v7397_v25 = vld [vmem:[%s10259_s15 + $0x48] sm:$0xe]  ;;  %v1728_v34 = vsel %vm715_vm0, %v1723_v21, %v10967_v49  ;;  %v7402_v2 = vld [vmem:[%s10259_s15 + $0x84] sm:$0xe] }
 0x198   : > { %3096 = vmatprep.mubr.bf16.mxu1 %v1716_v33  ;;  %v11159_v28 = vrot.slane %v12930_v17, 1  ;;  %v11165_v33 = vrot.slane %v7502_v60, 1  ;;  %12934 = vst [vmem:[#allocation63_spill] sm:$0xff] %v11171_v50  ;;  %v12936_v37 = vshll.u32 %v12935_v63, 16  ;;  %v12938_v60 = vshrl.u32 %v10902_v62, 16  ;;  %v12940_v13 = vld [vmem:[#allocation34_spill] sm:$0xff] }
 0x199   : > { %v7398_v9 = vld [vmem:[%s10259_s15 + $0x54] sm:$0xe]  ;;  %v7399_v17 = vld [vmem:[%s10259_s15 + $0x60] sm:$0xe] }
 0x19a   : > { %12931 = vst [vmem:[#allocation60_spill] sm:$0xff] %v11159_v28  ;;  %12933 = vst [vmem:[#allocation62_spill] sm:$0xff] %v11165_v33  ;;  %v11177_v14 = vrot.slane %v12936_v37, 1  ;;  %v1735_v8 = vor.u32 %v10972_v12, %v12938_v60  ;;  %v11183_v33 = vrot.slane %v1797_v61, 1  ;;  %v7539_v28 = vcombine.low %v7395_v23, %v12940_v13  ;;  %v12941_v37 = vld [vmem:[#allocation35_spill] sm:$0xff]  ;;  %v12942_v63 = vld [vmem:[#allocation36_spill] sm:$0xff] }
 0x19b   : > { %v7540_v3 = vcombine.low %v7396_v42, %v12942_v63  ;;  %v12943_v44 = vld [vmem:[#allocation39_spill] sm:$0xff]  ;;  %v7401_v61 = vld [vmem:[%s10259_s15 + $0x78] sm:$0xe]  ;;  %v12944_v13 = vld [vmem:[#allocation38_spill] sm:$0xff]  ;;  %v7542_v45 = vcombine.low %v7398_v9, %v10817_v41 }
 0x19c   : > { %12937 = vst [vmem:[#allocation64_spill] sm:$0xff] %v11177_v14  ;;  %12939 = vst [vmem:[#allocation65_spill] sm:$0xff] %v11183_v33  ;;  %v1908_v14 = vrot.slane %v12941_v37, 1  ;;  %v1911_v12 = vrot.slane %v12943_v44, 1  ;;  %v7400_v60 = vld [vmem:[%s10259_s15 + $0x6c] sm:$0xe]  ;;  %v7541_v30 = vcombine.low %v7397_v25, %v12944_v13  ;;  %v1740_v38 = vsel %vm715_vm0, %v1735_v8, %v10974_v31 }
 0x19d   : > { %v1907_v23 = vrot.slane %v7539_v28, 1  ;;  %v12945_v33 = vld [vmem:[#allocation40_spill] sm:$0xff]  ;;  %v1910_v35 = vrot.slane %v7540_v3, 1  ;;  %v12946_v37 = vld [vmem:[#allocation42_spill] sm:$0xff]  ;;  %v1920_v28 = vrot.slane %v10884_v11, 1  ;;  %v1916_v9 = vrot.slane %v7542_v45, 1 }
 0x19e   : > { %v1914_v50 = vrot.slane %v12945_v33, 1  ;;  %v1917_v46 = vrot.slane %v12946_v37, 1  ;;  %v12947_v42 = vld [vmem:[#allocation44_spill] sm:$0xff]  ;;  %v1913_v21 = vrot.slane %v7541_v30, 1  ;;  %2936 = vmatmul.mubr.bf16.gmra.mrb[84].mxu0 %v11122_v26  ;;  %v1923_v30 = vrot.slane %v10893_v0, 1  ;;  %v12950_v37 = vld [vmem:[#allocation37_spill] sm:$0xff] }
 0x19f   : > { %v7543_v63 = vcombine.low %v7399_v17, %v12947_v42  ;;  %v7403_v44 = vld [vmem:[%s10259_s15 + $0x90] sm:$0xe]  ;;  %3097 = vmatmul.mubr.bf16.gmra.mrb[84].mxu1 %v10833_v24  ;;  %v11211_v49 = vsel %vm972_vm1, %v1907_v23, %v1908_v14  ;;  %v7404_v3 = vld [vmem:[%s10259_s15 + $0x9c] sm:$0xe]  ;;  %v11216_v41 = vsel %vm972_vm1, %v1910_v35, %v1911_v12  ;;  %v7544_v24 = vcombine.low %v7400_v60, %v10880_v43 }
 0x1a0   : > { %3104 = vmatprep.mubr.bf16.mxu1 %v1728_v34  ;;  %v11221_v31 = vsel %vm972_vm1, %v1913_v21, %v1914_v50  ;;  %v12948_v14 = vld [vmem:[#allocation47_spill] sm:$0xff]  ;;  %v1926_v33 = vrot.slane %v10938_v56, 1  ;;  %2943 = vmatprep.mubr.bf16.mxu0 %v11134_v54  ;;  %v11228_v17 = vld [vmem:[%s10259_s15 + $0xbc] ss:$0 sps:$4 sm:$0x11]   ;;  %v11231_v8 = vsel %vm972_vm1, %v1916_v9, %v1917_v46  ;;  %v7546_v50 = vcombine.low %v7402_v2, %v10962_v55 }
 0x1a1   : > { %v1919_v25 = vrot.slane %v7543_v63, 1  ;;  %v7545_v11 = vcombine.low %v7401_v61, %v12948_v14  ;;  %v1922_v26 = vrot.slane %v7544_v24, 1  ;;  %v7405_v34 = vld [vmem:[%s10259_s15 + $0xa8] sm:$0xe]  ;;  %v1929_v0 = vrot.slane %v10995_v59, 1 }
 0x1a2   : > { %v7547_v60 = vcombine.low %v7403_v44, %v11012_v10  ;;  %v1932_v56 = vrot.slane %v11028_v20, 1  ;;  %v7406_v54 = vld [vmem:[%s10259_s15 + $0xb4] sm:$0xe]  ;;  %v1928_v46 = vrot.slane %v7546_v50, 1  ;;  %v7548_v23 = vcombine.low %v7404_v3, %v11044_v57  ;;  %v11268_v44 = vld [vmem:[%s10259_s15 + $0xc4] sm:$0xf] }
 0x1a3   : > { %v11234_v43 = vsel %vm972_vm1, %v1919_v25, %v1920_v28  ;;  %v1925_v12 = vrot.slane %v7545_v11, 1  ;;  %v11243_v61 = vsel %vm972_vm1, %v1922_v26, %v1923_v30  ;;  %v1935_v13 = vrot.slane %v11056_v52, 1  ;;  %v11278_v3 = vld [vmem:[%s10259_s15 + $0xc8] ss:$0 sps:$4 sm:$0x11]   ;;  %v12954_v30 = vld [vmem:[#allocation41_spill] sm:$0xff] }
 0x1a4   : > { %v1931_v2 = vrot.slane %v7547_v60, 1  ;;  %v7549_v59 = vcombine.low %v7405_v34, %v11071_v4  ;;  %v1938_v10 = vrot.slane %v11108_v7, 1  ;;  %v11253_v20 = vsel %vm972_vm1, %v1928_v46, %v1929_v0  ;;  %v11281_v9 = vld [vmem:[%s10259_s15 + $0xd0] sm:$0xf]  ;;  %v12952_v25 = vld [vmem:[#allocation22_spill] sm:$0xff] }
 0x1a5   : > { %v11248_v55 = vsel %vm972_vm1, %v1925_v12, %v1926_v33  ;;  %v1934_v35 = vrot.slane %v7548_v23, 1  ;;  %v7550_v45 = vcombine.low %v7406_v54, %v11144_v51  ;;  %v1941_v57 = vrot.slane %v11228_v17, 1  ;;  %v11290_v11 = vld [vmem:[%s10259_s15 + $0xd4] ss:$0 sps:$4 sm:$0x11]  }
 0x1a6   : > { %v12949_v52 = vrot.slane %v10890_v27, 1  ;;  %v1804_v4 = vshll.u32 %v11168_v5, 16  ;;  %v11264_v7 = vsel %vm972_vm1, %v1931_v2, %v1932_v56  ;;  %v1937_v63 = vrot.slane %v7549_v59, 1  ;;  %2944 = vmatmul.mubr.bf16.gmra.mrb[88].mxu0 %v11191_v6  ;;  %v7407_v33 = vld [vmem:[%s10259_s15 + $0xc0] sm:$0xe]  ;;  %v12956_v46 = vld [vmem:[#allocation43_spill] sm:$0xff] }
 0x1a7   : > { %3105 = vmatmul.mubr.bf16.gmra.mrb[88].mxu1 %v10887_v40  ;;  %v1809_v51 = vshll.u32 %v11228_v17, 16  ;;  %v11271_v40 = vsel %vm972_vm1, %v1934_v35, %v1935_v13  ;;  %v1940_v27 = vrot.slane %v7550_v45, 1  ;;  %v12951_v21 = vshrl.u32 %v10946_v15, 16  ;;  %v7408_v17 = vld [vmem:[%s10259_s15 + $0xcc] sm:$0xe] }
 0x1a8   : > { %v1460_v42 = vsel %vm972_vm1, %v12950_v37, %v12949_v52  ;;  %3112 = vmatprep.mubr.bf16.mxu1 %v1740_v38  ;;  %v11284_v38 = vsel %vm972_vm1, %v1937_v63, %v1938_v10  ;;  %v12953_v24 = vshrl.u32 %v12952_v25, 16  ;;  %v7552_v26 = vcombine.low %v7408_v17, %v11281_v9  ;;  %v12958_v59 = vld [vmem:[#allocation23_spill] sm:$0xff]  ;;  %v12960_v10 = vld [vmem:[#allocation45_spill] sm:$0xff]  ;;  %v12961_v45 = vld [vmem:[#allocation50_spill] sm:$0xff] }
 0x1a9   : > { %v1747_v28 = vor.u32 %v11014_v48, %v12951_v21  ;;  %2951 = vmatprep.mubr.bf16.mxu0 %v1460_v42  ;;  %v11293_v6 = vsel %vm972_vm1, %v1940_v27, %v1941_v57  ;;  %v7551_v48 = vcombine.low %v7407_v33, %v11268_v44  ;;  %v1944_v12 = vrot.slane %v11278_v3, 1  ;;  %v12962_v52 = vld [vmem:[#allocation48_spill] sm:$0xff]  ;;  %v12964_v42 = vld [vmem:[#allocation46_spill] sm:$0xff]  ;;  %v12971_v33 = vld [vmem:[#allocation51_spill] sm:$0xff] }
 0x1aa   : > { %v1271_v14 = vor.u32 %v12954_v30, %v12953_v24  ;;  %v1946_v60 = vrot.slane %v7552_v26, 1  ;;  %v1947_v56 = vrot.slane %v11290_v11, 1  ;;  %v12955_v54 = vrot.slane %v10914_v32, 1  ;;  %v12966_v21 = vld [vmem:[#allocation24_spill] sm:$0xff]  ;;  %v12973_v26 = vld [vmem:[#allocation25_spill] sm:$0xff] }
 0x1ab   : > { %v1752_v50 = vsel %vm715_vm0, %v1747_v28, %v11016_v22  ;;  %v1943_v34 = vrot.slane %v7551_v48, 1  ;;  %v12963_v37 = vrot.slane %v12962_v52, 1  ;;  %v12968_v28 = vld [vmem:[#allocation49_spill] sm:$0xff]  ;;  %v12969_v24 = vld [vmem:[#allocation52_spill] sm:$0xff]  ;;  %v1811_v52 = vrot.slane %v1809_v51, 1 }
 0x1ac   : > { %v1276_v0 = vsel %vm715_vm0, %v1271_v14, %v10969_v29  ;;  %v1463_v23 = vsel %vm972_vm1, %v12956_v46, %v12955_v54  ;;  %v11314_v22 = vsel %vm972_vm1, %v1946_v60, %v1947_v56  ;;  %v12957_v29 = vshrl.u32 %v10986_v19, 16  ;;  %v7373_v60 = vld [vmem:[%s10259_s15 + $0xc0] sm:$0xf]  ;;  %v12980_v46 = vld [vmem:[#allocation55_spill] sm:$0xff] }
 0x1ad   : > { %v11311_v13 = vsel %vm972_vm1, %v1943_v34, %v1944_v12  ;;  %v1466_v63 = vsel %vm972_vm1, %v12964_v42, %v12963_v37  ;;  %v12970_v14 = vrot.slane %v10998_v1, 1  ;;  %v12976_v12 = vld [vmem:[#allocation30_spill] sm:$0xff]  ;;  %v11371_v37 = vcombine.low %v7373_v60, %v11268_v44  ;;  %v12995_v60 = vld [vmem:[#allocation60_spill] sm:$0xff] }
 0x1ae   : > { %2952 = vmatmul.mubr.bf16.gmra.mrb[92].mxu0 %v1276_v0  ;;  %v1759_v2 = vor.u32 %v11053_v39, %v12957_v29  ;;  %v12965_v39 = vshrl.u32 %v11032_v36, 16  ;;  %v12978_v56 = vld [vmem:[#allocation54_spill] sm:$0xff] }
 0x1af   : > { %3113 = vmatmul.mubr.bf16.gmra.mrb[92].mxu1 %v10902_v62  ;;  %2959 = vmatprep.mubr.bf16.mxu0 %v1463_v23  ;;  %v12959_v62 = vshrl.u32 %v12958_v59, 16  ;;  %v1469_v48 = vsel %vm972_vm1, %v12971_v33, %v12970_v14  ;;  %v12979_v54 = vrot.slane %v12978_v56, 1  ;;  %v1814_v51 = vshrl.u32 %v11371_v37, 16  ;;  %v12989_v14 = vld [vmem:[#allocation57_spill] sm:$0xff] }
 0x1b0   : > { %3120 = vmatprep.mubr.bf16.mxu1 %v1752_v50  ;;  %v1764_v35 = vsel %vm715_vm0, %v1759_v2, %v11082_v58  ;;  %v1771_v27 = vor.u32 %v11110_v16, %v12965_v39  ;;  %v12967_v58 = vshrl.u32 %v12966_v21, 16  ;;  %v12972_v16 = vshrl.u32 %v11077_v18, 16  ;;  %v12983_v2 = vld [vmem:[#allocation63_spill] sm:$0xff] }
 0x1b1   : > { %v1283_v32 = vor.u32 %v12960_v10, %v12959_v62  ;;  %v12974_v50 = vshrl.u32 %v12973_v26, 16  ;;  %v1472_v23 = vsel %vm972_vm1, %v12980_v46, %v12979_v54  ;;  %v12984_v10 = vld [vmem:[#allocation26_spill] sm:$0xff]  ;;  %v12990_v33 = vrot.slane %v12989_v14, 1 }
 0x1b2   : > { %v1295_v25 = vor.u32 %v12968_v28, %v12967_v58  ;;  %v1783_v17 = vor.u32 %v11153_v53, %v12972_v16  ;;  %v12981_v53 = vld [vmem:[#allocation59_spill] sm:$0xff]  ;;  %v12987_v58 = vld [vmem:[#allocation65_spill] sm:$0xff]  ;;  %v1821_v54 = vshll.u32 %v11278_v3, 16 }
 0x1b3   : > { %v1288_v57 = vsel %vm715_vm0, %v1283_v32, %v12961_v45  ;;  %v12982_v29 = vshrl.u32 %v12981_v53, 16  ;;  %v12985_v32 = vshrl.u32 %v12984_v10, 16  ;;  %v12996_v3 = vld [vmem:[#allocation61_spill] sm:$0xff] }
 0x1b4   : > { %v1300_v30 = vsel %vm715_vm0, %v1295_v25, %v12969_v24  ;;  %v1788_v0 = vsel %vm715_vm0, %v1783_v17, %v12976_v12  ;;  %v1816_v17 = vshll.u32 %v11371_v37, 16 }
 0x1b5   : > { %v1795_v59 = vor.u32 %v12983_v2, %v12982_v29 }
 0x1b6   : > { %2960 = vmatmul.mubr.bf16.gmra.mrb[96].mxu0 %v1288_v57  ;;  %v1818_v29 = vrot.slane %v1816_v17, 1 }
 0x1b7   : > { %3121 = vmatmul.mubr.bf16.gmra.mrb[96].mxu1 %v10946_v15  ;;  %2967 = vmatprep.mubr.bf16.mxu0 %v1466_v63  ;;  %v1776_v15 = vsel %vm715_vm0, %v1771_v27, %v11112_v47  ;;  %v12975_v47 = vld [vmem:[#allocation53_spill] sm:$0xff]  ;;  %v1800_v28 = vsel %vm715_vm0, %v1795_v59, %v12987_v58 }
 0x1b8   : > { %3128 = vmatprep.mubr.bf16.mxu1 %v1764_v35  ;;  %v1307_v34 = vor.u32 %v12975_v47, %v12974_v50  ;;  %v12986_v35 = vld [vmem:[#allocation58_spill] sm:$0xff]  ;;  %v1819_v14 = vor.u32 %v1818_v29, %v1814_v51 }
 0x1b9   : > { %v1319_v45 = vor.u32 %v12986_v35, %v12985_v32  ;;  %v7375_v50 = vld [vmem:[%s10259_s15 + $0xcc] sm:$0xf] }
 0x1be   : > { %2968 = vmatmul.mubr.bf16.gmra.mrb[100].mxu0 %v1300_v30  ;;  %v12988_v30 = vld [vmem:[#allocation33_spill] sm:$0xff] }
 0x1bf   : > { %3129 = vmatmul.mubr.bf16.gmra.mrb[100].mxu1 %v10986_v19  ;;  %2975 = vmatprep.mubr.bf16.mxu0 %v1469_v48  ;;  %v12977_v19 = vld [vmem:[#allocation56_spill] sm:$0xff] }
 0x1c0   : > { %3136 = vmatprep.mubr.bf16.mxu1 %v1776_v15  ;;  %v1312_v1 = vsel %vm715_vm0, %v1307_v34, %v12977_v19  ;;  %v12991_v48 = vld [vmem:[#allocation32_spill] sm:$0xff]  ;;  %v12992_v34 = vshrl.u32 %v11168_v5, 16 }
 0x1c1   : > { %v1475_v16 = vsel %vm972_vm1, %v12991_v48, %v12990_v33  ;;  %v1823_v33 = vrot.slane %v1821_v54, 1 }
 0x1c6   : > { %2976 = vmatmul.mubr.bf16.gmra.mrb[104].mxu0 %v1312_v1 }
 0x1c7   : > { %3137 = vmatmul.mubr.bf16.gmra.mrb[104].mxu1 %v11032_v36  ;;  %2983 = vmatprep.mubr.bf16.mxu0 %v1472_v23  ;;  %v1806_v36 = vrot.slane %v1804_v4, 1  ;;  %v1324_v4 = vsel %vm715_vm0, %v1319_v45, %v12988_v30  ;;  %v11398_v45 = vcombine.low %v7375_v50, %v11281_v9 }
 0x1c8   : > { %3144 = vmatprep.mubr.bf16.mxu1 %v1788_v0  ;;  %v7343_v0 = vld [vmem:[%s10259_s15 + $0xb4] sm:$0xe] }
 0x1c9   : > { %v8074_v42 = vpop.f32.mrb[0].mxu0  ;;  %v1807_v12 = vor.u32 %v1806_v36, %v12992_v34  ;;  %v1828_v48 = vshll.u32 %v11398_v45, 16 }
 0x1ca   : > { %v8186_v62 = vpop.f32.mrb[0].mxu1  ;;  %v8075_v27 = vpop.f32.mrb[1].mxu0 }
 0x1cb   : > { %v8187_v57 = vpop.f32.mrb[1].mxu1  ;;  %v8076_v25 = vadd.f32 %v8075_v27, %v8074_v42  ;;  %v8077_v15 = vpop.f32.mrb[2].mxu0  ;;  %v1812_v35 = vsel %vm715_vm0, %v1807_v12, %v1811_v52  ;;  %v9406_v52 = vld [vmem:[%s10259_s15 + $0xbc] ss:$0 sps:$4 sm:$0x11]  }
 0x1cc   : > { %v8188_v63 = vadd.f32 %v8187_v57, %v8186_v62  ;;  %v8189_v39 = vpop.f32.mrb[2].mxu1  ;;  %v8078_v44 = vpop.f32.mrb[3].mxu0  ;;  %v1357_v29 = vshll.u32 %v9406_v52, 16 }
 0x1cd   : > { %v8190_v21 = vpop.f32.mrb[3].mxu1  ;;  %v8079_v26 = vadd.f32 %v8078_v44, %v8077_v15  ;;  %v12999_v15 = vld [vmem:[#allocation62_spill] sm:$0xff] }
 0x1ce   : > { %v8191_v24 = vadd.f32 %v8190_v21, %v8189_v39  ;;  %v11385_v47 = vadd.f32 %v8188_v63, %v8076_v25  ;;  %2984 = vmatmul.mubr.bf16.gmra.mrb[108].mxu0 %v1324_v4  ;;  %v12997_v39 = vld [vmem:[#allocation21_spill] sm:$0xff] }
 0x1cf   : > { %3145 = vmatmul.mubr.bf16.gmra.mrb[108].mxu1 %v11077_v18  ;;  %2991 = vmatprep.mubr.bf16.mxu0 %v1475_v16  ;;  %v12993_v18 = vld [vmem:[#allocation27_spill] sm:$0xff]  ;;  %v1345_v27 = vshll.u32 %v12997_v39, 16  ;;  %v9645_v21 = vld [vmem:[%s10259_s15 + $0xb8] sm:$0xf]  ;;  %v12998_v25 = vrot.slane %v12997_v39, 1 }
 0x1d0   : > { %3152 = vmatprep.mubr.bf16.mxu1 %v1800_v28  ;;  %v12994_v1 = vshrl.u32 %v12993_v18, 16  ;;  %v11394_v46 = vadd.f32 %v8191_v24, %v8079_v26  ;;  %v7503_v58 = vcombine.low %v7343_v0, %v9645_v21  ;;  %v13000_v24 = vld [vmem:[#allocation29_spill] sm:$0xff]  ;;  %v13003_v26 = vld [vmem:[#allocation64_spill] sm:$0xff] }
 0x1d1   : > { %v8080_v2 = vpop.f32.mrb[4].mxu0  ;;  %v1478_v9 = vsel %vm972_vm1, %v12999_v15, %v12998_v25  ;;  %v1352_v30 = vshll.u32 %v13000_v24, 16  ;;  %v1347_v34 = vrot.slane %v1345_v27, 1  ;;  %v7344_v0 = vld [vmem:[%s10259_s15 + $0xc0] sm:$0xe]  ;;  %v1350_v54 = vshrl.u32 %v13000_v24, 16 }
 0x1d2   : > { %v8192_v19 = vpop.f32.mrb[4].mxu1  ;;  %v1331_v56 = vor.u32 %v12995_v60, %v12994_v1  ;;  %v8081_v10 = vpop.f32.mrb[5].mxu0  ;;  %v1479_v18 = vrot.slane %v7503_v58, 1  ;;  %v1480_v1 = vrot.slane %v9406_v52, 1  ;;  %v1359_v15 = vrot.slane %v1357_v29, 1  ;;  %v13004_v24 = vld [vmem:[#allocation31_spill] sm:$0xff] }
 0x1d3   : > { %v8193_v23 = vpop.f32.mrb[5].mxu1  ;;  %v8082_v36 = vadd.f32 %v8081_v10, %v8080_v2  ;;  %v8083_v57 = vpop.f32.mrb[6].mxu0  ;;  %v1826_v10 = vshrl.u32 %v11398_v45, 16  ;;  %v9410_v58 = vld [vmem:[%s10259_s15 + $0xc8] ss:$0 sps:$4 sm:$0x11]  }
 0x1d4   : > { %v8194_v59 = vadd.f32 %v8193_v23, %v8192_v19  ;;  %v8195_v62 = vpop.f32.mrb[6].mxu1  ;;  %v1336_v63 = vsel %vm715_vm0, %v1331_v56, %v12996_v3  ;;  %v8084_v28 = vpop.f32.mrb[7].mxu0  ;;  %v1354_v23 = vrot.slane %v1352_v30, 1  ;;  %v1481_v21 = vsel %vm972_vm1, %v1479_v18, %v1480_v1 }
 0x1d5   : > { %v8196_v32 = vpop.f32.mrb[7].mxu1  ;;  %v8085_v4 = vadd.f32 %v8084_v28, %v8083_v57  ;;  %v1364_v30 = vshll.u32 %v13004_v24, 16 }
 0x1d6   : > { %v8197_v42 = vadd.f32 %v8196_v32, %v8195_v62  ;;  %v11411_v44 = vadd.f32 %v8194_v59, %v8082_v36  ;;  %2992 = vmatmul.mubr.bf16.gmra.mrb[112].mxu0 %v1336_v63  ;;  %v1824_v62 = vsel %vm715_vm0, %v1819_v14, %v1823_v33  ;;  %v1830_v32 = vrot.slane %v1828_v48, 1  ;;  %v9646_v63 = vld [vmem:[%s10259_s15 + $0xc4] sm:$0xf] }
 0x1d7   : > { %3153 = vmatmul.mubr.bf16.gmra.mrb[112].mxu1 %v12981_v53  ;;  %2999 = vmatprep.mubr.bf16.mxu0 %v1478_v9  ;;  %v13001_v53 = vld [vmem:[#allocation28_spill] sm:$0xff]  ;;  %v7504_v39 = vcombine.low %v7344_v0, %v9646_v63  ;;  %v1483_v48 = vrot.slane %v9410_v58, 1 }
 0x1d8   : > { %3160 = vmatprep.mubr.bf16.mxu1 %v1812_v35  ;;  %v13002_v17 = vshrl.u32 %v13001_v53, 16  ;;  %v11417_v12 = vadd.f32 %v8197_v42, %v8085_v4  ;;  %v1833_v35 = vshll.u32 %v11290_v11, 16  ;;  %v1355_v11 = vor.u32 %v1354_v23, %v1350_v54 }
 0x1d9   : > { %v8086_v60 = vpop.f32.mrb[8].mxu0  ;;  %v1831_v9 = vor.u32 %v1830_v32, %v1826_v10  ;;  %v1482_v33 = vrot.slane %v7504_v39, 1  ;;  %v1369_v54 = vshll.u32 %v9410_v58, 16  ;;  %v7394_v39 = vld [vmem:[%s10259_s15 + $0x24] sm:$0xe] }
 0x1da   : > { %v8198_v16 = vpop.f32.mrb[8].mxu1  ;;  %v1343_v50 = vor.u32 %v13003_v26, %v13002_v17  ;;  %v8087_v2 = vpop.f32.mrb[9].mxu0  ;;  %v1835_v52 = vrot.slane %v1833_v35, 1  ;;  %v7393_v26 = vld [vmem:[%s10259_s15 + $0x18] sm:$0xe]  ;;  %v1360_v0 = vsel %vm715_vm0, %v1355_v11, %v1359_v15 }
 0x1db   : > { %v8199_v19 = vpop.f32.mrb[9].mxu1  ;;  %v8088_v36 = vadd.f32 %v8087_v2, %v8086_v60  ;;  %v8089_v57 = vpop.f32.mrb[10].mxu0  ;;  %v1484_v29 = vsel %vm972_vm1, %v1482_v33, %v1483_v48  ;;  %v9647_v2 = vld [vmem:[%s10259_s15 + $0x1c] sm:$0xf] }
 0x1dc   : > { %v8200_v56 = vadd.f32 %v8199_v19, %v8198_v16  ;;  %v8201_v51 = vpop.f32.mrb[10].mxu1  ;;  %v1348_v3 = vsel %vm715_vm0, %v1343_v50, %v1347_v34  ;;  %v8090_v27 = vpop.f32.mrb[11].mxu0  ;;  %v1362_v19 = vshrl.u32 %v13004_v24, 16  ;;  %v1836_v18 = vsel %vm715_vm0, %v1831_v9, %v1835_v52 }
 0x1dd   : > { %v8202_v59 = vpop.f32.mrb[11].mxu1  ;;  %v8091_v28 = vadd.f32 %v8090_v27, %v8089_v57 }
 0x1de   : > { %v8203_v42 = vadd.f32 %v8202_v59, %v8201_v51  ;;  %v11429_v25 = vadd.f32 %v8200_v56, %v8088_v36  ;;  %3000 = vmatmul.mubr.bf16.gmra.mrb[116].mxu0 %v1348_v3  ;;  %v1366_v51 = vrot.slane %v1364_v30, 1  ;;  %v7537_v59 = vcombine.low %v7393_v26, %v9647_v2  ;;  %v9649_v30 = vld [vmem:[%s10259_s15 + $0x28] sm:$0xf] }
 0x1df   : > { %3161 = vmatmul.mubr.bf16.gmra.mrb[116].mxu1 %v11168_v5  ;;  %3007 = vmatprep.mubr.bf16.mxu0 %v1481_v21  ;;  %v1371_v36 = vrot.slane %v1369_v54, 1 }
 0x1e0   : > { %3168 = vmatprep.mubr.bf16.mxu1 %v1824_v62  ;;  %v11432_v14 = vadd.f32 %v8203_v42, %v8091_v28  ;;  %v1367_v35 = vor.u32 %v1366_v51, %v1362_v19  ;;  %v1901_v3 = vrot.slane %v7537_v59, 1 }
 0x1e1   : > { %v8092_v16 = vpop.f32.mrb[12].mxu0 }
 0x1e2   : > { %v8204_v4 = vpop.f32.mrb[12].mxu1  ;;  %v8093_v50 = vpop.f32.mrb[13].mxu0  ;;  %v1372_v24 = vsel %vm715_vm0, %v1367_v35, %v1371_v36 }
 0x1e3   : > { %v8205_v5 = vpop.f32.mrb[13].mxu1  ;;  %v8094_v1 = vadd.f32 %v8093_v50, %v8092_v16  ;;  %v8095_v60 = vpop.f32.mrb[14].mxu0 }
 0x1e4   : > { %v8206_v53 = vadd.f32 %v8205_v5, %v8204_v4  ;;  %v8207_v17 = vpop.f32.mrb[14].mxu1  ;;  %v8096_v23 = vpop.f32.mrb[15].mxu0  ;;  %v7538_v4 = vcombine.low %v7394_v39, %v9649_v30 }
 0x1e5   : > { %v8208_v34 = vpop.f32.mrb[15].mxu1  ;;  %v8097_v62 = vadd.f32 %v8096_v23, %v8095_v60 }
 0x1e6   : > { %v8209_v56 = vadd.f32 %v8208_v34, %v8207_v17  ;;  %v11441_v10 = vadd.f32 %v8206_v53, %v8094_v1  ;;  %3008 = vmatmul.mubr.bf16.gmra.mrb[120].mxu0 %v1360_v0  ;;  %v9429_v53 = vld [vmem:[#allocation11 + $0x40] sm:$0xff]   ;;  %v1904_v50 = vrot.slane %v7538_v4, 1  ;;  %v9650_v34 = vld [vmem:[%s10259_s15 + $0x2c] ss:$0 sps:$4 sm:$0x11]  }
 0x1e7   : > { %3169 = vmatmul.mubr.bf16.gmra.mrb[120].mxu1 %v11371_v37  ;;  %3015 = vmatprep.mubr.bf16.mxu0 %v1484_v29  ;;  %v9648_v37 = vld [vmem:[%s10259_s15 + $0x20] ss:$0 sps:$4 sm:$0x11]   ;;  %v1905_v0 = vrot.slane %v9650_v34, 1 }
 0x1e8   : > { %3176 = vmatprep.mubr.bf16.mxu1 %v1836_v18  ;;  %v11443_v57 = vadd.f32 %v8209_v56, %v8097_v62  ;;  %v1902_v63 = vrot.slane %v9648_v37, 1  ;;  %v9430_v17 = vld [vmem:[#allocation11] sm:$0xff]   ;;  %8530 = vmatprep.subr.bf16.mxu1 %v9429_v53 }
 0x1e9   : > { %v8098_v27 = vpop.f32.mrb[16].mxu0  ;;  %8531 = vmatpush3.bf16.msra.mxu1 %v9430_v17  ;;  %v1906_v2 = vsel %vm972_vm1, %v1904_v50, %v1905_v0 }
 0x1ea   : > { %v8210_v32 = vpop.f32.mrb[16].mxu1  ;;  %v8099_v28 = vpop.f32.mrb[17].mxu0  ;;  %v1903_v33 = vsel %vm972_vm1, %v1901_v3, %v1902_v63 }
 0x1eb   : > { %v8211_v42 = vpop.f32.mrb[17].mxu1  ;;  %v8100_v15 = vadd.f32 %v8099_v28, %v8098_v27  ;;  %v8101_v9 = vpop.f32.mrb[18].mxu0 }
 0x1ec   : > { %v8212_v21 = vadd.f32 %v8211_v42, %v8210_v32  ;;  %v8213_v58 = vpop.f32.mrb[18].mxu1  ;;  %v8102_v5 = vpop.f32.mrb[19].mxu0 }
 0x1ed   : > { %v8214_v11 = vpop.f32.mrb[19].mxu1  ;;  %v8103_v48 = vadd.f32 %v8102_v5, %v8101_v9 }
 0x1ee   : > { %v8215_v52 = vadd.f32 %v8214_v11, %v8213_v58  ;;  %v11451_v16 = vadd.f32 %v8212_v21, %v8100_v15  ;;  %3016 = vmatmul.mubr.bf16.gmra.mrb[124].mxu0 %v1372_v24  ;;  %v9432_v24 = vld [vmem:[#allocation11 + $0x8] sm:$0xff]  }
 0x1ef   : > { %3177 = vmatmul.mubr.bf16.gmra.mrb[124].mxu1 %v11398_v45  ;;  %9018 = vmatprep.mubr.bf16.mxu0 %v1903_v33 }
 0x1f0   : > { %v11454_v19 = vadd.f32 %v8215_v52, %v8103_v48  ;;  %v9431_v52 = vld [vmem:[#allocation11 + $0x48] sm:$0xff]  }
 0x1f1   : > { %v8104_v1 = vpop.f32.mrb[20].mxu0  ;;  %8532 = vmatprep.subr.bf16.mxu1 %v9431_v52 }
 0x1f2   : > { %v8216_v26 = vpop.f32.mrb[20].mxu1  ;;  %v8105_v56 = vpop.f32.mrb[21].mxu0  ;;  %8533 = vmatpush3.bf16.msra.mxu1 %v9432_v24 }
 0x1f3   : > { %v8217_v18 = vpop.f32.mrb[21].mxu1  ;;  %v8106_v54 = vadd.f32 %v8105_v56, %v8104_v1  ;;  %v8107_v23 = vpop.f32.mrb[22].mxu0 }
 0x1f4   : > { %v8218_v45 = vadd.f32 %v8217_v18, %v8216_v26  ;;  %v8219_v60 = vpop.f32.mrb[22].mxu1  ;;  %v8108_v59 = vpop.f32.mrb[23].mxu0 }
 0x1f5   : > { %v8220_v51 = vpop.f32.mrb[23].mxu1  ;;  %v8109_v62 = vadd.f32 %v8108_v59, %v8107_v23 }
 0x1f6   : > { %v8221_v29 = vadd.f32 %v8220_v51, %v8219_v60  ;;  %v11457_v32 = vadd.f32 %v8218_v45, %v8106_v54  ;;  %9019 = vmatmul.mubr.bf16.vlgmr.msra.gmra.mrb[128].mxu0 %v1906_v2 }
 0x1f7   : > { %9022 = vmatprep.mubr.bf16.mxu0 %v11211_v49 }
 0x1f8   : > { %v11460_v36 = vadd.f32 %v8221_v29, %v8109_v62 }
 0x1f9   : > { %v8110_v3 = vpop.f32.mrb[24].mxu0 }
 0x1fa   : > { %v8222_v35 = vpop.f32.mrb[24].mxu1  ;;  %v8111_v39 = vpop.f32.mrb[25].mxu0 }
 0x1fb   : > { %v8223_v42 = vpop.f32.mrb[25].mxu1  ;;  %v8112_v21 = vadd.f32 %v8111_v39, %v8110_v3  ;;  %v8113_v58 = vpop.f32.mrb[26].mxu0  ;;  %v9433_v3 = vld [vmem:[#allocation11 + $0x50] sm:$0xff]  }
 0x1fc   : > { %v8224_v37 = vadd.f32 %v8223_v42, %v8222_v35  ;;  %v8225_v63 = vpop.f32.mrb[26].mxu1  ;;  %v8114_v11 = vpop.f32.mrb[27].mxu0  ;;  %8534 = vmatprep.subr.bf16.mxu1 %v9433_v3 }
 0x1fd   : > { %v8226_v27 = vpop.f32.mrb[27].mxu1  ;;  %v8115_v15 = vadd.f32 %v8114_v11, %v8113_v58 }
 0x1fe   : > { %v8227_v28 = vadd.f32 %v8226_v27, %v8225_v63  ;;  %v11462_v9 = vadd.f32 %v8224_v37, %v8112_v21  ;;  %9023 = vmatmul.mubr.bf16.gmra.mrb[132].mxu0 %v11216_v41 }
 0x1ff   : > { %9026 = vmatprep.mubr.bf16.mxu0 %v11221_v31 }
 0x200   : > { %v11466_v30 = vadd.f32 %v8227_v28, %v8115_v15 }
 0x201   : > { %v8116_v5 = vpop.f32.mrb[28].mxu0 }
 0x202   : > { %v8228_v49 = vpop.f32.mrb[28].mxu1  ;;  %v8117_v53 = vpop.f32.mrb[29].mxu0 }
 0x203   : > { %v8229_v4 = vpop.f32.mrb[29].mxu1  ;;  %v8118_v26 = vadd.f32 %v8117_v53, %v8116_v5  ;;  %v8119_v50 = vpop.f32.mrb[30].mxu0 }
 0x204   : > { %v8230_v33 = vadd.f32 %v8229_v4, %v8228_v49  ;;  %v8231_v48 = vpop.f32.mrb[30].mxu1  ;;  %v8120_v0 = vpop.f32.mrb[31].mxu0 }
 0x205   : > { %v8232_v17 = vpop.f32.mrb[31].mxu1  ;;  %v8121_v18 = vadd.f32 %v8120_v0, %v8119_v50 }
 0x206   : > { %v8233_v34 = vadd.f32 %v8232_v17, %v8231_v48  ;;  %v11468_v1 = vadd.f32 %v8230_v33, %v8118_v26  ;;  %9027 = vmatmul.mubr.bf16.gmra.mrb[136].mxu0 %v11231_v8  ;;  %v9434_v8 = vld [vmem:[#allocation11 + $0x10] sm:$0xff]  }
 0x207   : > { %9030 = vmatprep.mubr.bf16.mxu0 %v11234_v43  ;;  %8535 = vmatpush3.bf16.msra.mxu1 %v9434_v8 }
 0x208   : > { %v11472_v31 = vadd.f32 %v8233_v34, %v8121_v18 }
 0x209   : > { %v8122_v60 = vpop.f32.mrb[32].mxu0 }
 0x20a   : > { %v8234_v41 = vpop.f32.mrb[32].mxu1  ;;  %v8123_v54 = vpop.f32.mrb[33].mxu0 }
 0x20b   : > { %v8235_v45 = vpop.f32.mrb[33].mxu1  ;;  %v8124_v29 = vadd.f32 %v8123_v54, %v8122_v60  ;;  %v8125_v2 = vpop.f32.mrb[34].mxu0  ;;  %v9435_v60 = vld [vmem:[#allocation11 + $0x58] sm:$0xff]  }
 0x20c   : > { %v8236_v56 = vadd.f32 %v8235_v45, %v8234_v41  ;;  %v8237_v51 = vpop.f32.mrb[34].mxu1  ;;  %v8126_v62 = vpop.f32.mrb[35].mxu0  ;;  %8536 = vmatprep.subr.bf16.mxu1 %v9435_v60 }
 0x20d   : > { %v8238_v23 = vpop.f32.mrb[35].mxu1  ;;  %v8127_v42 = vadd.f32 %v8126_v62, %v8125_v2 }
 0x20e   : > { %v8239_v59 = vadd.f32 %v8238_v23, %v8237_v51  ;;  %v11474_v35 = vadd.f32 %v8236_v56, %v8124_v29  ;;  %9031 = vmatmul.mubr.bf16.gmra.mrb[140].mxu0 %v11243_v61 }
 0x20f   : > { %9034 = vmatprep.mubr.bf16.mxu0 %v11248_v55 }
 0x210   : > { %v11477_v43 = vadd.f32 %v8239_v59, %v8127_v42 }
 0x211   : > { %v8128_v39 = vpop.f32.mrb[36].mxu0 }
 0x212   : > { %v8240_v37 = vpop.f32.mrb[36].mxu1  ;;  %v8129_v58 = vpop.f32.mrb[37].mxu0 }
 0x213   : > { %v8241_v63 = vpop.f32.mrb[37].mxu1  ;;  %v8130_v11 = vadd.f32 %v8129_v58, %v8128_v39  ;;  %v8131_v15 = vpop.f32.mrb[38].mxu0 }
 0x214   : > { %v8242_v27 = vadd.f32 %v8241_v63, %v8240_v37  ;;  %v8243_v21 = vpop.f32.mrb[38].mxu1  ;;  %v8132_v24 = vpop.f32.mrb[39].mxu0 }
 0x215   : > { %v8244_v28 = vpop.f32.mrb[39].mxu1  ;;  %v8133_v61 = vadd.f32 %v8132_v24, %v8131_v15 }
 0x216   : > { %v8245_v52 = vadd.f32 %v8244_v28, %v8243_v21  ;;  %v11480_v49 = vadd.f32 %v8242_v27, %v8130_v11  ;;  %9035 = vmatmul.mubr.bf16.gmra.mrb[144].mxu0 %v11253_v20  ;;  %v9436_v20 = vld [vmem:[#allocation11 + $0x18] sm:$0xff]  }
 0x217   : > { %9038 = vmatprep.mubr.bf16.mxu0 %v11264_v7  ;;  %8537 = vmatpush3.bf16.msra.mxu1 %v9436_v20 }
 0x218   : > { %v11483_v4 = vadd.f32 %v8245_v52, %v8133_v61 }
 0x219   : > { %v8134_v33 = vpop.f32.mrb[40].mxu0 }
 0x21a   : > { %v8246_v55 = vpop.f32.mrb[40].mxu1  ;;  %v8135_v17 = vpop.f32.mrb[41].mxu0 }
 0x21b   : > { %v8247_v5 = vpop.f32.mrb[41].mxu1  ;;  %v8136_v50 = vadd.f32 %v8135_v17, %v8134_v33  ;;  %v8137_v34 = vpop.f32.mrb[42].mxu0  ;;  %v9437_v33 = vld [vmem:[#allocation11 + $0x60] sm:$0xff]  }
 0x21c   : > { %v8248_v48 = vadd.f32 %v8247_v5, %v8246_v55  ;;  %v8249_v53 = vpop.f32.mrb[42].mxu1  ;;  %v8138_v18 = vpop.f32.mrb[43].mxu0  ;;  %8538 = vmatprep.subr.bf16.mxu1 %v9437_v33 }
 0x21d   : > { %v8250_v26 = vpop.f32.mrb[43].mxu1  ;;  %v8139_v45 = vadd.f32 %v8138_v18, %v8137_v34 }
 0x21e   : > { %v8251_v0 = vadd.f32 %v8250_v26, %v8249_v53  ;;  %v11486_v41 = vadd.f32 %v8248_v48, %v8136_v50  ;;  %9039 = vmatmul.mubr.bf16.gmra.mrb[148].mxu0 %v11271_v40 }
 0x21f   : > { %9042 = vmatprep.mubr.bf16.mxu0 %v11284_v38 }
 0x220   : > { %v11489_v56 = vadd.f32 %v8251_v0, %v8139_v45 }
 0x221   : > { %v8140_v54 = vpop.f32.mrb[44].mxu0 }
 0x222   : > { %v8252_v7 = vpop.f32.mrb[44].mxu1  ;;  %v8141_v2 = vpop.f32.mrb[45].mxu0 }
 0x223   : > { %v8253_v51 = vpop.f32.mrb[45].mxu1  ;;  %v8142_v62 = vadd.f32 %v8141_v2, %v8140_v54  ;;  %v8143_v42 = vpop.f32.mrb[46].mxu0 }
 0x224   : > { %v8254_v23 = vadd.f32 %v8253_v51, %v8252_v7  ;;  %v8255_v29 = vpop.f32.mrb[46].mxu1  ;;  %v8144_v8 = vpop.f32.mrb[47].mxu0 }
 0x225   : > { %v8256_v59 = vpop.f32.mrb[47].mxu1  ;;  %v8145_v40 = vadd.f32 %v8144_v8, %v8143_v42 }
 0x226   : > { %v8257_v3 = vadd.f32 %v8256_v59, %v8255_v29  ;;  %v11492_v37 = vadd.f32 %v8254_v23, %v8142_v62  ;;  %9043 = vmatmul.mubr.bf16.gmra.mrb[152].mxu0 %v11293_v6  ;;  %v9438_v6 = vld [vmem:[#allocation11 + $0x20] sm:$0xff]  }
 0x227   : > { %9046 = vmatprep.mubr.bf16.mxu0 %v11311_v13  ;;  %8539 = vmatpush3.bf16.msra.mxu1 %v9438_v6 }
 0x228   : > { %v11495_v63 = vadd.f32 %v8257_v3, %v8145_v40 }
 0x229   : > { %v8146_v27 = vpop.f32.mrb[48].mxu0 }
 0x22a   : > { %v8258_v38 = vpop.f32.mrb[48].mxu1  ;;  %v8147_v28 = vpop.f32.mrb[49].mxu0 }
 0x22b   : > { %v8259_v39 = vpop.f32.mrb[49].mxu1  ;;  %v8148_v15 = vadd.f32 %v8147_v28, %v8146_v27  ;;  %v8149_v52 = vpop.f32.mrb[50].mxu0 }
 0x22c   : > { %v8260_v21 = vadd.f32 %v8259_v39, %v8258_v38  ;;  %v8261_v58 = vpop.f32.mrb[50].mxu1  ;;  %v8150_v61 = vpop.f32.mrb[51].mxu0 }
 0x22d   : > { %v8262_v11 = vpop.f32.mrb[51].mxu1  ;;  %v8151_v5 = vadd.f32 %v8150_v61, %v8149_v52 }
 0x22e   : > { %v8263_v24 = vadd.f32 %v8262_v11, %v8261_v58  ;;  %v11498_v55 = vadd.f32 %v8260_v21, %v8148_v15  ;;  %9047 = vmatmul.mubr.bf16.gmra.mrb[156].mxu0 %v11314_v22  ;;  %v9439_v21 = vld [vmem:[#allocation11 + $0x68] sm:$0xff]  }
 0x22f   : > { %v9440_v58 = vld [vmem:[#allocation11 + $0x28] sm:$0xff]   ;;  %8540 = vmatprep.subr.bf16.mxu1 %v9439_v21 }
 0x230   : > { %v11501_v48 = vadd.f32 %v8263_v24, %v8151_v5  ;;  %8541 = vmatpush3.bf16.msra.mxu1 %v9440_v58 }
 0x231   : > { %v8152_v17 = vpop.f32.mrb[52].mxu0 }
 0x232   : > { %v8264_v13 = vpop.f32.mrb[52].mxu1  ;;  %v8153_v34 = vpop.f32.mrb[53].mxu0 }
 0x233   : > { %v8265_v53 = vpop.f32.mrb[53].mxu1  ;;  %v8154_v18 = vadd.f32 %v8153_v34, %v8152_v17  ;;  %v8155_v45 = vpop.f32.mrb[54].mxu0 }
 0x234   : > { %v8266_v26 = vadd.f32 %v8265_v53, %v8264_v13  ;;  %v8267_v50 = vpop.f32.mrb[54].mxu1  ;;  %v8156_v20 = vpop.f32.mrb[55].mxu0 }
 0x235   : > { %v8268_v0 = vpop.f32.mrb[55].mxu1  ;;  %v8157_v51 = vadd.f32 %v8156_v20, %v8155_v45 }
 0x236   : > { %v8269_v60 = vadd.f32 %v8268_v0, %v8267_v50  ;;  %v11503_v7 = vadd.f32 %v8266_v26, %v8154_v18 }
 0x238   : > { %v11505_v54 = vadd.f32 %v8269_v60, %v8157_v51  ;;  %v9443_v51 = vld [vmem:[#allocation11 + $0xc0] sm:$0xff]  }
 0x239   : > { %v8158_v29 = vpop.f32.mrb[56].mxu0  ;;  %8642 = vmatprep.subr.bf16.mxu0 %v9443_v51 }
 0x23a   : > { %v8270_v22 = vpop.f32.mrb[56].mxu1  ;;  %v8159_v62 = vpop.f32.mrb[57].mxu0 }
 0x23b   : > { %v8271_v23 = vpop.f32.mrb[57].mxu1  ;;  %v8160_v3 = vadd.f32 %v8159_v62, %v8158_v29  ;;  %v8161_v8 = vpop.f32.mrb[58].mxu0  ;;  %v9444_v29 = vld [vmem:[#allocation11 + $0x80] sm:$0xff]  }
 0x23c   : > { %v8272_v2 = vadd.f32 %v8271_v23, %v8270_v22  ;;  %v8273_v59 = vpop.f32.mrb[58].mxu1  ;;  %v8162_v38 = vpop.f32.mrb[59].mxu0  ;;  %8643 = vmatpush3.bf16.msra.mxu0 %v9444_v29 }
 0x23d   : > { %v8274_v42 = vpop.f32.mrb[59].mxu1  ;;  %v8163_v27 = vadd.f32 %v8162_v38, %v8161_v8  ;;  %v9446_v38 = vld [vmem:[#allocation11 + $0x88] sm:$0xff]  }
 0x23e   : > { %v8275_v40 = vadd.f32 %v8274_v42, %v8273_v59  ;;  %v11507_v39 = vadd.f32 %v8272_v2, %v8160_v3 }
 0x240   : > { %v11509_v28 = vadd.f32 %v8275_v40, %v8163_v27  ;;  %v9445_v40 = vld [vmem:[#allocation11 + $0xc8] sm:$0xff]  }
 0x241   : > { %v8164_v52 = vpop.f32.mrb[60].mxu0  ;;  %8644 = vmatprep.subr.bf16.mxu0 %v9445_v40 }
 0x242   : > { %v8276_v11 = vpop.f32.mrb[60].mxu1  ;;  %v8165_v5 = vpop.f32.mrb[61].mxu0  ;;  %8645 = vmatpush3.bf16.msra.mxu0 %v9446_v38 }
 0x243   : > { %v8277_v15 = vpop.f32.mrb[61].mxu1  ;;  %v8166_v6 = vadd.f32 %v8165_v5, %v8164_v52  ;;  %v8167_v13 = vpop.f32.mrb[62].mxu0 }
 0x244   : > { %v8278_v24 = vadd.f32 %v8277_v15, %v8276_v11  ;;  %v8279_v61 = vpop.f32.mrb[62].mxu1  ;;  %v8168_v17 = vpop.f32.mrb[63].mxu0 }
 0x245   : > { %v8280_v33 = vpop.f32.mrb[63].mxu1  ;;  %v8169_v50 = vadd.f32 %v8168_v17, %v8167_v13  ;;  %v9448_v13 = vld [vmem:[#allocation11 + $0x90] sm:$0xff]  }
 0x246   : > { %v8281_v53 = vadd.f32 %v8280_v33, %v8279_v61  ;;  %v11511_v26 = vadd.f32 %v8278_v24, %v8166_v6  ;;  %v9441_v61 = vld [vmem:[#allocation11 + $0x70] sm:$0xff]  }
 0x247   : > { %v9447_v33 = vld [vmem:[#allocation11 + $0xd0] sm:$0xff]   ;;  %8542 = vmatprep.subr.bf16.mxu1 %v9441_v61 }
 0x248   : > { %v11513_v34 = vadd.f32 %v8281_v53, %v8169_v50  ;;  %8646 = vmatprep.subr.bf16.mxu0 %v9447_v33 }
 0x249   : > { %v8298_v45 = vpop.f32.mrb[64].mxu0  ;;  %8647 = vmatpush3.bf16.msra.mxu0 %v9448_v13 }
 0x24a   : > { %v8410_v0 = vpop.f32.mrb[64].mxu1  ;;  %v8299_v22 = vpop.f32.mrb[65].mxu0 }
 0x24b   : > { %v8411_v18 = vpop.f32.mrb[65].mxu1  ;;  %v8300_v2 = vadd.f32 %v8299_v22, %v8298_v45  ;;  %v8301_v59 = vpop.f32.mrb[66].mxu0  ;;  %v9449_v45 = vld [vmem:[#allocation11 + $0xd8] sm:$0xff]  }
 0x24c   : > { %v8412_v60 = vadd.f32 %v8411_v18, %v8410_v0  ;;  %v8413_v20 = vpop.f32.mrb[66].mxu1  ;;  %v8302_v42 = vpop.f32.mrb[67].mxu0  ;;  %8648 = vmatprep.subr.bf16.mxu0 %v9449_v45 }
 0x24d   : > { %v8414_v23 = vpop.f32.mrb[67].mxu1  ;;  %v2898_v3 = vadd.f32 %v8300_v2, %v11385_v47  ;;  %v8303_v8 = vadd.f32 %v8302_v42, %v8301_v59 }
 0x24e   : > { %v8415_v62 = vadd.f32 %v8414_v23, %v8413_v20 }
 0x24f   : > { %v2901_v27 = vadd.f32 %v8303_v8, %v11394_v46  ;;  %v11517_v58 = vadd.f32 %v8412_v60, %v2898_v3  ;;  %v9450_v60 = vld [vmem:[#allocation11 + $0x98] sm:$0xff]   ;;  %v9951_v8 = vmov 0  }
 0x250   : > { %8649 = vmatpush3.bf16.msra.mxu0 %v9450_v60  ;;  %3876 = vst [vmem:[#allocation2] sm:$0xf] %v9951_v8  ;;  %3877 = vst [vmem:[#allocation2 + $0x4] sm:$0xf] %v9951_v8 }
 0x251   : > { %v8304_v15 = vpop.f32.mrb[68].mxu0  ;;  %v11519_v5 = vadd.f32 %v8415_v62, %v2901_v27  ;;  %3878 = vst [vmem:[#allocation2 + $0x8] sm:$0x1] %v9951_v8  ;;  %3880 = vst [vmem:[#allocation2 + $0xcc] sm:$0xf] %v9951_v8 }
 0x252   : > { %v8416_v21 = vpop.f32.mrb[68].mxu1  ;;  %v8305_v6 = vpop.f32.mrb[69].mxu0  ;;  %3881 = vst [vmem:[#allocation2 + $0xd0] sm:$0xf] %v9951_v8  ;;  %3882 = vst [vmem:[#allocation2 + $0xd4] sm:$0x1] %v9951_v8 }
 0x253   : > { %v8417_v11 = vpop.f32.mrb[69].mxu1  ;;  %v8306_v53 = vadd.f32 %v8305_v6, %v8304_v15  ;;  %v8307_v17 = vpop.f32.mrb[70].mxu0  ;;  %v9442_v15 = vld [vmem:[#allocation11 + $0x30] sm:$0xff]   ;;  %v9452_v8 = vld [vmem:[#allocation11 + $0x38] sm:$0xff]  }
 0x254   : > { %v8418_v52 = vadd.f32 %v8417_v11, %v8416_v21  ;;  %v8419_v24 = vpop.f32.mrb[70].mxu1  ;;  %v8308_v46 = vpop.f32.mrb[71].mxu0  ;;  %v9453_v11 = vld [vmem:[#allocation11 + $0xe0] sm:$0xff]   ;;  %8543 = vmatpush3.bf16.msra.mxu1 %v9442_v15 }
 0x255   : > { %v8420_v47 = vpop.f32.mrb[71].mxu1  ;;  %v2906_v0 = vadd.f32 %v8306_v53, %v11411_v44  ;;  %v8309_v18 = vadd.f32 %v8308_v46, %v8307_v17  ;;  %8650 = vmatprep.subr.bf16.mxu0 %v9453_v11  ;;  %v9458_v11 = vld [vmem:[#allocation11 + $0xb0] sm:$0xff]  }
 0x256   : > { %v8421_v50 = vadd.f32 %v8420_v47, %v8419_v24 }
 0x257   : > { %v2909_v20 = vadd.f32 %v8309_v18, %v11417_v12  ;;  %v11523_v22 = vadd.f32 %v8418_v52, %v2906_v0  ;;  %v9454_v52 = vld [vmem:[#allocation11 + $0xa0] sm:$0xff]   ;;  %v9456_v18 = vld [vmem:[#allocation11 + $0xa8] sm:$0xff]   ;;  %v3884_v45 = vld [vmem:[#allocation2 + $0x4] sm:$0xf] }
 0x258   : > { %8651 = vmatpush3.bf16.msra.mxu0 %v9454_v52 }
 0x259   : > { %v8310_v29 = vpop.f32.mrb[72].mxu0  ;;  %v11525_v62 = vadd.f32 %v8421_v50, %v2909_v20  ;;  %v9455_v50 = vld [vmem:[#allocation11 + $0xe8] sm:$0xff]  }
 0x25a   : > { %v8422_v51 = vpop.f32.mrb[72].mxu1  ;;  %v8311_v42 = vpop.f32.mrb[73].mxu0  ;;  %8652 = vmatprep.subr.bf16.mxu0 %v9455_v50 }
 0x25b   : > { %v8423_v23 = vpop.f32.mrb[73].mxu1  ;;  %v8312_v44 = vadd.f32 %v8311_v42, %v8310_v29  ;;  %v8313_v12 = vpop.f32.mrb[74].mxu0  ;;  %v9460_v29 = vld [vmem:[#allocation2 + $0x8] ss:$0 sps:$4 sm:$0x11]  }
 0x25c   : > { %v8424_v2 = vadd.f32 %v8423_v23, %v8422_v51  ;;  %v8425_v59 = vpop.f32.mrb[74].mxu1  ;;  %v8314_v38 = vpop.f32.mrb[75].mxu0  ;;  %8653 = vmatpush3.bf16.msra.mxu0 %v9456_v18  ;;  %v9451_v42 = vld [vmem:[#allocation11 + $0x78] sm:$0xff]  }
 0x25d   : > { %v8426_v3 = vpop.f32.mrb[75].mxu1  ;;  %v2914_v27 = vadd.f32 %v8312_v44, %v11429_v25  ;;  %v8315_v21 = vadd.f32 %v8314_v38, %v8313_v12  ;;  %v3883_v25 = vld [vmem:[#allocation2] sm:$0xf]  ;;  %8544 = vmatprep.subr.bf16.mxu1 %v9451_v42 }
 0x25e   : > { %v8427_v40 = vadd.f32 %v8426_v3, %v8425_v59  ;;  %v7675_v51 = vcombine.low %v3883_v25, %v3884_v45  ;;  %v9457_v44 = vld [vmem:[#allocation11 + $0xf0] sm:$0xff]   ;;  %8545 = vmatpush3.bf16.msra.mxu1 %v9452_v8 }
 0x25f   : > { %v2917_v24 = vadd.f32 %v8315_v21, %v11432_v14  ;;  %v11529_v33 = vadd.f32 %v8424_v2, %v2914_v27  ;;  %8654 = vmatprep.subr.bf16.mxu0 %v9457_v44 }
 0x260   : > { %v4223_v3 = vshll.u32 %v7675_v51, 16  ;;  %v4221_v12 = vshrl.u32 %v7675_v51, 16  ;;  %8655 = vmatpush3.bf16.msra.mxu0 %v9458_v11 }
 0x261   : > { %v8316_v47 = vpop.f32.mrb[76].mxu0  ;;  %v11531_v17 = vadd.f32 %v8427_v40, %v2917_v24  ;;  %v4228_v40 = vshll.u32 %v9460_v29, 16 }
 0x262   : > { %v8428_v61 = vpop.f32.mrb[76].mxu1  ;;  %v8317_v46 = vpop.f32.mrb[77].mxu0  ;;  %v4225_v15 = vrot.slane %v4223_v3, 1  ;;  %v3931_v3 = vld [vmem:[#allocation2] sm:$0xe] }
 0x263   : > { %v8429_v6 = vpop.f32.mrb[77].mxu1  ;;  %v8318_v60 = vadd.f32 %v8317_v46, %v8316_v47  ;;  %v8319_v14 = vpop.f32.mrb[78].mxu0  ;;  %v4230_v24 = vrot.slane %v4228_v40, 1  ;;  %v7707_v44 = vcombine.low %v3931_v3, %v3884_v45 }
 0x264   : > { %v8430_v13 = vadd.f32 %v8429_v6, %v8428_v61  ;;  %v8431_v53 = vpop.f32.mrb[78].mxu1  ;;  %v8320_v23 = vpop.f32.mrb[79].mxu0 }
 0x265   : > { %v8432_v0 = vpop.f32.mrb[79].mxu1  ;;  %v2922_v2 = vadd.f32 %v8318_v60, %v11441_v10  ;;  %v8321_v59 = vadd.f32 %v8320_v23, %v8319_v14  ;;  %v9462_v60 = vld [vmem:[#allocation11 + $0xb8] sm:$0xff]  }
 0x266   : > { %v8433_v20 = vadd.f32 %v8432_v0, %v8431_v53  ;;  %v4226_v53 = vor.u32 %v4225_v15, %v4221_v12 }
 0x267   : > { %v2925_v38 = vadd.f32 %v8321_v59, %v11443_v57  ;;  %v11535_v21 = vadd.f32 %v8430_v13, %v2922_v2  ;;  %v9461_v57 = vld [vmem:[#allocation11 + $0xf8] sm:$0xff]  }
 0x268   : > { %v4231_v18 = vsel %vm715_vm0, %v4226_v53, %v4230_v24  ;;  %8656 = vmatprep.subr.bf16.mxu0 %v9461_v57 }
 0x269   : > { %v8322_v10 = vpop.f32.mrb[80].mxu0  ;;  %v11537_v47 = vadd.f32 %v8433_v20, %v2925_v38  ;;  %6076 = vmatprep.mubr.bf16.mxu1 %v4231_v18  ;;  %8657 = vmatpush3.bf16.msra.mxu0 %v9462_v60 }
 0x26a   : > { %v8434_v27 = vpop.f32.mrb[80].mxu1  ;;  %v8323_v50 = vpop.f32.mrb[81].mxu0  ;;  %6077 = vmatmul.mubr.bf16.vlgmr.msra.gmra.mrb[128].mxu1 %v7675_v51 }
 0x26b   : > { %v8435_v52 = vpop.f32.mrb[81].mxu1  ;;  %v8324_v46 = vadd.f32 %v8323_v50, %v8322_v10  ;;  %v8325_v13 = vpop.f32.mrb[82].mxu0 }
 0x26c   : > { %v8436_v61 = vadd.f32 %v8435_v52, %v8434_v27  ;;  %v8437_v6 = vpop.f32.mrb[82].mxu1  ;;  %v8326_v14 = vpop.f32.mrb[83].mxu0  ;;  %v4476_v52 = vrot.slane %v7707_v44, 1 }
 0x26d   : > { %v8438_v25 = vpop.f32.mrb[83].mxu1  ;;  %v2930_v23 = vadd.f32 %v8324_v46, %v11451_v16  ;;  %v8327_v2 = vadd.f32 %v8326_v14, %v8325_v13  ;;  %v4477_v16 = vrot.slane %v9460_v29, 1 }
 0x26e   : > { %v8439_v0 = vadd.f32 %v8438_v25, %v8437_v6 }
 0x26f   : > { %v2933_v20 = vadd.f32 %v8327_v2, %v11454_v19  ;;  %v11542_v42 = vadd.f32 %v8436_v61, %v2930_v23  ;;  %v11547_v19 = vsel %vm972_vm1, %v4476_v52, %v4477_v16 }
 0x271   : > { %v8328_v12 = vpop.f32.mrb[84].mxu0  ;;  %v11544_v27 = vadd.f32 %v8439_v0, %v2933_v20  ;;  %v9465_v20 = vld [vmem:[#allocation11 + $0x140] sm:$0xff]  }
 0x272   : > { %v8440_v59 = vpop.f32.mrb[84].mxu1  ;;  %v8329_v11 = vpop.f32.mrb[85].mxu0  ;;  %8754 = vmatprep.subr.bf16.mxu1 %v9465_v20 }
 0x273   : > { %v8441_v8 = vpop.f32.mrb[85].mxu1  ;;  %v8330_v24 = vadd.f32 %v8329_v11, %v8328_v12  ;;  %v8331_v51 = vpop.f32.mrb[86].mxu0 }
 0x274   : > { %v8442_v40 = vadd.f32 %v8441_v8, %v8440_v59  ;;  %v8443_v38 = vpop.f32.mrb[86].mxu1  ;;  %v8332_v6 = vpop.f32.mrb[87].mxu0 }
 0x275   : > { %v8444_v15 = vpop.f32.mrb[87].mxu1  ;;  %v2938_v61 = vadd.f32 %v8330_v24, %v11457_v32  ;;  %v8333_v53 = vadd.f32 %v8332_v6, %v8331_v51 }
 0x276   : > { %v8445_v10 = vadd.f32 %v8444_v15, %v8443_v38 }
 0x277   : > { %v2941_v45 = vadd.f32 %v8333_v53, %v11460_v36  ;;  %v11551_v25 = vadd.f32 %v8442_v40, %v2938_v61 }
 0x279   : > { %v8334_v46 = vpop.f32.mrb[88].mxu0  ;;  %v11553_v29 = vadd.f32 %v8445_v10, %v2941_v45 }
 0x27a   : > { %v8446_v50 = vpop.f32.mrb[88].mxu1  ;;  %v8335_v18 = vpop.f32.mrb[89].mxu0 }
 0x27b   : > { %v8447_v57 = vpop.f32.mrb[89].mxu1  ;;  %v8336_v14 = vadd.f32 %v8335_v18, %v8334_v46  ;;  %v8337_v23 = vpop.f32.mrb[90].mxu0  ;;  %v9467_v18 = vld [vmem:[#allocation11 + $0x100] sm:$0xff]  }
 0x27c   : > { %v8448_v13 = vadd.f32 %v8447_v57, %v8446_v50  ;;  %v8449_v0 = vpop.f32.mrb[90].mxu1  ;;  %v8338_v59 = vpop.f32.mrb[91].mxu0  ;;  %8755 = vmatpush3.bf16.msra.mxu1 %v9467_v18 }
 0x27d   : > { %v8450_v60 = vpop.f32.mrb[91].mxu1  ;;  %v2946_v32 = vadd.f32 %v8336_v14, %v11462_v9  ;;  %v8339_v3 = vadd.f32 %v8338_v59, %v8337_v23 }
 0x27e   : > { %v8451_v2 = vadd.f32 %v8450_v60, %v8449_v0 }
 0x27f   : > { %v2949_v36 = vadd.f32 %v8339_v3, %v11466_v30  ;;  %v11557_v44 = vadd.f32 %v8448_v13, %v2946_v32 }
 0x281   : > { %v8340_v40 = vpop.f32.mrb[92].mxu0  ;;  %v11559_v15 = vadd.f32 %v8451_v2, %v2949_v36 }
 0x282   : > { %v8452_v8 = vpop.f32.mrb[92].mxu1  ;;  %v8341_v52 = vpop.f32.mrb[93].mxu0 }
 0x283   : > { %v8453_v12 = vpop.f32.mrb[93].mxu1  ;;  %v8342_v24 = vadd.f32 %v8341_v52, %v8340_v40  ;;  %v8343_v51 = vpop.f32.mrb[94].mxu0 }
 0x284   : > { %v8454_v38 = vadd.f32 %v8453_v12, %v8452_v8  ;;  %v8455_v11 = vpop.f32.mrb[94].mxu1  ;;  %v8344_v6 = vpop.f32.mrb[95].mxu0 }
 0x285   : > { %v8456_v16 = vpop.f32.mrb[95].mxu1  ;;  %v2954_v9 = vadd.f32 %v8342_v24, %v11468_v1  ;;  %v8345_v61 = vadd.f32 %v8344_v6, %v8343_v51 }
 0x286   : > { %v8457_v10 = vadd.f32 %v8456_v16, %v8455_v11 }
 0x287   : > { %v2957_v30 = vadd.f32 %v8345_v61, %v11472_v31  ;;  %v11563_v45 = vadd.f32 %v8454_v38, %v2954_v9 }
 0x289   : > { %v8346_v57 = vpop.f32.mrb[96].mxu0  ;;  %v11565_v0 = vadd.f32 %v8457_v10, %v2957_v30 }
 0x28a   : > { %v8458_v53 = vpop.f32.mrb[96].mxu1  ;;  %v8347_v60 = vpop.f32.mrb[97].mxu0 }
 0x28b   : > { %v8459_v50 = vpop.f32.mrb[97].mxu1  ;;  %v8348_v23 = vadd.f32 %v8347_v60, %v8346_v57  ;;  %v8349_v2 = vpop.f32.mrb[98].mxu0 }
 0x28c   : > { %v8460_v46 = vadd.f32 %v8459_v50, %v8458_v53  ;;  %v8461_v13 = vpop.f32.mrb[98].mxu1  ;;  %v8350_v1 = vpop.f32.mrb[99].mxu0 }
 0x28d   : > { %v8462_v14 = vpop.f32.mrb[99].mxu1  ;;  %v2962_v59 = vadd.f32 %v8348_v23, %v11474_v35  ;;  %v8351_v31 = vadd.f32 %v8350_v1, %v8349_v2 }
 0x28e   : > { %v8463_v20 = vadd.f32 %v8462_v14, %v8461_v13 }
 0x28f   : > { %v2965_v32 = vadd.f32 %v8351_v31, %v11477_v43  ;;  %v11569_v36 = vadd.f32 %v8460_v46, %v2962_v59 }
 0x291   : > { %v8352_v12 = vpop.f32.mrb[100].mxu0  ;;  %v11571_v11 = vadd.f32 %v8463_v20, %v2965_v32  ;;  %v9477_v20 = vld [vmem:[#allocation11 + $0x148] sm:$0xff]  }
 0x292   : > { %v8464_v3 = vpop.f32.mrb[100].mxu1  ;;  %v8353_v52 = vpop.f32.mrb[101].mxu0  ;;  %8756 = vmatprep.subr.bf16.mxu1 %v9477_v20 }
 0x293   : > { %v8465_v8 = vpop.f32.mrb[101].mxu1  ;;  %v8354_v24 = vadd.f32 %v8353_v52, %v8352_v12  ;;  %v8355_v51 = vpop.f32.mrb[102].mxu0 }
 0x294   : > { %v8466_v40 = vadd.f32 %v8465_v8, %v8464_v3  ;;  %v8467_v38 = vpop.f32.mrb[102].mxu1  ;;  %v8356_v6 = vpop.f32.mrb[103].mxu0  ;;  %v9481_v3 = vld [vmem:[#allocation11 + $0x108] sm:$0xff]  }
 0x295   : > { %v8468_v16 = vpop.f32.mrb[103].mxu1  ;;  %v2970_v35 = vadd.f32 %v8354_v24, %v11480_v49  ;;  %v8357_v9 = vadd.f32 %v8356_v6, %v8355_v51  ;;  %8757 = vmatpush3.bf16.msra.mxu1 %v9481_v3 }
 0x296   : > { %v8469_v10 = vadd.f32 %v8468_v16, %v8467_v38 }
 0x297   : > { %v2973_v43 = vadd.f32 %v8357_v9, %v11483_v4  ;;  %v11575_v30 = vadd.f32 %v8466_v40, %v2970_v35 }
 0x299   : > { %v8358_v50 = vpop.f32.mrb[104].mxu0  ;;  %v11577_v13 = vadd.f32 %v8469_v10, %v2973_v43 }
 0x29a   : > { %v8470_v61 = vpop.f32.mrb[104].mxu1  ;;  %v8359_v18 = vpop.f32.mrb[105].mxu0 }
 0x29b   : > { %v8471_v53 = vpop.f32.mrb[105].mxu1  ;;  %v8360_v14 = vadd.f32 %v8359_v18, %v8358_v50  ;;  %v8361_v23 = vpop.f32.mrb[106].mxu0 }
 0x29c   : > { %v8472_v57 = vadd.f32 %v8471_v53, %v8470_v61  ;;  %v8473_v46 = vpop.f32.mrb[106].mxu1  ;;  %v8362_v1 = vpop.f32.mrb[107].mxu0 }
 0x29d   : > { %v8474_v60 = vpop.f32.mrb[107].mxu1  ;;  %v2978_v49 = vadd.f32 %v8360_v14, %v11486_v41  ;;  %v8363_v59 = vadd.f32 %v8362_v1, %v8361_v23 }
 0x29e   : > { %v8475_v2 = vadd.f32 %v8474_v60, %v8473_v46 }
 0x29f   : > { %v2981_v4 = vadd.f32 %v8363_v59, %v11489_v56  ;;  %v11581_v32 = vadd.f32 %v8472_v57, %v2978_v49 }
 0x2a1   : > { %v8364_v12 = vpop.f32.mrb[108].mxu0  ;;  %v11583_v52 = vadd.f32 %v8475_v2, %v2981_v4 }
 0x2a2   : > { %v8476_v31 = vpop.f32.mrb[108].mxu1  ;;  %v8365_v16 = vpop.f32.mrb[109].mxu0 }
 0x2a3   : > { %v8477_v8 = vpop.f32.mrb[109].mxu1  ;;  %v8366_v51 = vadd.f32 %v8365_v16, %v8364_v12  ;;  %v8367_v10 = vpop.f32.mrb[110].mxu0 }
 0x2a4   : > { %v8478_v40 = vadd.f32 %v8477_v8, %v8476_v31  ;;  %v8479_v38 = vpop.f32.mrb[110].mxu1  ;;  %v8368_v6 = vpop.f32.mrb[111].mxu0 }
 0x2a5   : > { %v8480_v24 = vpop.f32.mrb[111].mxu1  ;;  %v2986_v35 = vadd.f32 %v8366_v51, %v11492_v37  ;;  %v8369_v56 = vadd.f32 %v8368_v6, %v8367_v10  ;;  %v9493_v51 = vld [vmem:[#allocation11 + $0x110] sm:$0xff]  }
 0x2a6   : > { %v8481_v41 = vadd.f32 %v8480_v24, %v8479_v38  ;;  %v9489_v24 = vld [vmem:[#allocation11 + $0x150] sm:$0xff]  }
 0x2a7   : > { %v2989_v9 = vadd.f32 %v8369_v56, %v11495_v63  ;;  %v11587_v61 = vadd.f32 %v8478_v40, %v2986_v35  ;;  %8758 = vmatprep.subr.bf16.mxu1 %v9489_v24  ;;  %v9501_v56 = vld [vmem:[#allocation11 + $0x158] sm:$0xff]  }
 0x2a8   : > { %8759 = vmatpush3.bf16.msra.mxu1 %v9493_v51 }
 0x2a9   : > { %v8370_v50 = vpop.f32.mrb[112].mxu0  ;;  %v11589_v18 = vadd.f32 %v8481_v41, %v2989_v9  ;;  %8760 = vmatprep.subr.bf16.mxu1 %v9501_v56 }
 0x2aa   : > { %v8482_v43 = vpop.f32.mrb[112].mxu1  ;;  %v8371_v60 = vpop.f32.mrb[113].mxu0 }
 0x2ab   : > { %v8483_v53 = vpop.f32.mrb[113].mxu1  ;;  %v8372_v23 = vadd.f32 %v8371_v60, %v8370_v50  ;;  %v8373_v2 = vpop.f32.mrb[114].mxu0 }
 0x2ac   : > { %v8484_v57 = vadd.f32 %v8483_v53, %v8482_v43  ;;  %v8485_v46 = vpop.f32.mrb[114].mxu1  ;;  %v8374_v1 = vpop.f32.mrb[115].mxu0 }
 0x2ad   : > { %v8486_v14 = vpop.f32.mrb[115].mxu1  ;;  %v2994_v37 = vadd.f32 %v8372_v23, %v11498_v55  ;;  %v8375_v49 = vadd.f32 %v8374_v1, %v8373_v2 }
 0x2ae   : > { %v8487_v20 = vadd.f32 %v8486_v14, %v8485_v46 }
 0x2af   : > { %v2997_v63 = vadd.f32 %v8375_v49, %v11501_v48  ;;  %v11593_v4 = vadd.f32 %v8484_v57, %v2994_v37  ;;  %v9505_v37 = vld [vmem:[#allocation11 + $0x118] sm:$0xff]  }
 0x2b0   : > { %8761 = vmatpush3.bf16.msra.mxu1 %v9505_v37 }
 0x2b1   : > { %v8376_v3 = vpop.f32.mrb[116].mxu0  ;;  %v11595_v40 = vadd.f32 %v8487_v20, %v2997_v63 }
 0x2b2   : > { %v8488_v59 = vpop.f32.mrb[116].mxu1  ;;  %v8377_v38 = vpop.f32.mrb[117].mxu0 }
 0x2b3   : > { %v8489_v31 = vpop.f32.mrb[117].mxu1  ;;  %v8378_v10 = vadd.f32 %v8377_v38, %v8376_v3  ;;  %v8379_v41 = vpop.f32.mrb[118].mxu0 }
 0x2b4   : > { %v8490_v8 = vadd.f32 %v8489_v31, %v8488_v59  ;;  %v8491_v12 = vpop.f32.mrb[118].mxu1  ;;  %v8380_v55 = vpop.f32.mrb[119].mxu0 }
 0x2b5   : > { %v8492_v16 = vpop.f32.mrb[119].mxu1  ;;  %v3002_v48 = vadd.f32 %v8378_v10, %v11503_v7  ;;  %v8381_v35 = vadd.f32 %v8380_v55, %v8379_v41 }
 0x2b6   : > { %v8493_v6 = vadd.f32 %v8492_v16, %v8491_v12 }
 0x2b7   : > { %v3005_v9 = vadd.f32 %v8381_v35, %v11505_v54  ;;  %v11599_v53 = vadd.f32 %v8490_v8, %v3002_v48 }
 0x2b9   : > { %v8382_v57 = vpop.f32.mrb[120].mxu0  ;;  %v11601_v14 = vadd.f32 %v8493_v6, %v3005_v9 }
 0x2ba   : > { %v8494_v43 = vpop.f32.mrb[120].mxu1  ;;  %v8383_v23 = vpop.f32.mrb[121].mxu0 }
 0x2bb   : > { %v8495_v50 = vpop.f32.mrb[121].mxu1  ;;  %v8384_v20 = vadd.f32 %v8383_v23, %v8382_v57  ;;  %v8385_v1 = vpop.f32.mrb[122].mxu0  ;;  %v11613_v57 = vld [vmem:[#allocation8] ss:$0 sm:$0xff] }
 0x2bc   : > { %v8496_v46 = vadd.f32 %v8495_v50, %v8494_v43  ;;  %v8497_v60 = vpop.f32.mrb[122].mxu1  ;;  %v8386_v49 = vpop.f32.mrb[123].mxu0 }
 0x2bd   : > { %v8498_v2 = vpop.f32.mrb[123].mxu1  ;;  %v3010_v63 = vadd.f32 %v8384_v20, %v11507_v39  ;;  %v8387_v54 = vadd.f32 %v8386_v49, %v8385_v1  ;;  %v9513_v39 = vld [vmem:[#allocation11 + $0x1c0] sm:$0xff]  }
 0x2be   : > { %v8499_v7 = vadd.f32 %v8498_v2, %v8497_v60  ;;  %8866 = vmatprep.subr.bf16.mxu0 %v9513_v39  ;;  %v11618_v2 = vld [vmem:[#allocation9] ss:$0 sm:$0xff]  ;;  %v9519_v1 = vld [vmem:[#allocation11 + $0x120] sm:$0xff]  }
 0x2bf   : > { %v3013_v59 = vadd.f32 %v8387_v54, %v11509_v28  ;;  %v11605_v3 = vadd.f32 %v8496_v46, %v3010_v63  ;;  %v9515_v28 = vld [vmem:[#allocation11 + $0x160] sm:$0xff]  }
 0x2c0   : > { %8762 = vmatprep.subr.bf16.mxu1 %v9515_v28 }
 0x2c1   : > { %v8388_v12 = vpop.f32.mrb[124].mxu0  ;;  %v11607_v24 = vadd.f32 %v8499_v7, %v3013_v59  ;;  %8763 = vmatpush3.bf16.msra.mxu1 %v9519_v1 }
 0x2c2   : > { %v8500_v31 = vpop.f32.mrb[124].mxu1  ;;  %v8389_v51 = vpop.f32.mrb[125].mxu0 }
 0x2c3   : > { %v8501_v8 = vpop.f32.mrb[125].mxu1  ;;  %v8390_v41 = vadd.f32 %v8389_v51, %v8388_v12  ;;  %v8391_v6 = vpop.f32.mrb[126].mxu0 }
 0x2c4   : > { %v8502_v38 = vadd.f32 %v8501_v8, %v8500_v31  ;;  %v8503_v16 = vpop.f32.mrb[126].mxu1  ;;  %v8392_v48 = vpop.f32.mrb[127].mxu0 }
 0x2c5   : > { %v8504_v10 = vpop.f32.mrb[127].mxu1  ;;  %v3018_v35 = vadd.f32 %v8390_v41, %v11511_v26  ;;  %v8393_v56 = vadd.f32 %v8392_v48, %v8391_v6 }
 0x2c6   : > { %v8505_v55 = vadd.f32 %v8504_v10, %v8503_v16 }
 0x2c7   : > { %v3021_v9 = vadd.f32 %v8393_v56, %v11513_v34  ;;  %v11611_v43 = vadd.f32 %v8502_v38, %v3018_v35 }
 0x2c9   : > { %v9020_v50 = vpop.f32.mrb[128].mxu0  ;;  %v11615_v46 = vadd.f32 %v8505_v55, %v3021_v9 }
 0x2ca   : > { %v3228_v60 = vadd.f32 %v9020_v50, %v11523_v22  ;;  %v3219_v23 = vpop.f32.mrb[129].mxu0 }
 0x2cb   : > { %v3220_v26 = vadd.f32 %v3219_v23, %v11517_v58  ;;  %v9021_v20 = vpop.f32.mrb[130].mxu0  ;;  %v9529_v23 = vld [vmem:[#allocation11 + $0x168] sm:$0xff]  }
 0x2cc   : > { %v3355_v7 = vmul.f32 %v11613_v57, %v3228_v60  ;;  %v3231_v34 = vadd.f32 %v9021_v20, %v11525_v62  ;;  %v3222_v37 = vpop.f32.mrb[131].mxu0  ;;  %8764 = vmatprep.subr.bf16.mxu1 %v9529_v23 }
 0x2cd   : > { %v3353_v49 = vmul.f32 %v11613_v57, %v3220_v26  ;;  %v3223_v63 = vadd.f32 %v3222_v37, %v11519_v5 }
 0x2ce   : > { %v3394_v54 = vadd.f32 %v11618_v2, %v3355_v7  ;;  %v3356_v22 = vmul.f32 %v11613_v57, %v3231_v34 }
 0x2cf   : > { %v3392_v59 = vadd.f32 %v11618_v2, %v3353_v49  ;;  %v3354_v58 = vmul.f32 %v11613_v57, %v3223_v63 }
 0x2d0   : > { %v3395_v31 = vadd.f32 %v11618_v2, %v3356_v22  ;;  %v3426_v62 = vmax.f32 %v3394_v54, 0.0 }
 0x2d1   : > { %v3393_v8 = vadd.f32 %v11618_v2, %v3354_v58  ;;  %v9024_v12 = vpop.f32.mrb[132].mxu0  ;;  %v3424_v5 = vmax.f32 %v3392_v59, 0.0 }
 0x2d2   : > { %v3427_v38 = vmax.f32 %v3395_v31, 0.0  ;;  %v3244_v16 = vadd.f32 %v9024_v12, %v11535_v21  ;;  %v3235_v51 = vpop.f32.mrb[133].mxu0 }
 0x2d3   : > { %v3425_v10 = vmax.f32 %v3393_v8, 0.0  ;;  %v3236_v41 = vadd.f32 %v3235_v51, %v11529_v33  ;;  %v9025_v6 = vpop.f32.mrb[134].mxu0 }
 0x2d4   : > { %v3457_v55 = vpack.c.bf16 %v3427_v38, %v3426_v62  ;;  %v3359_v48 = vmul.f32 %v11613_v57, %v3244_v16  ;;  %v3247_v39 = vadd.f32 %v9025_v6, %v11537_v47  ;;  %v3238_v35 = vpop.f32.mrb[135].mxu0 }
 0x2d5   : > { %v3456_v56 = vpack.c.bf16 %v3425_v10, %v3424_v5  ;;  %v3357_v28 = vmul.f32 %v11613_v57, %v3236_v41  ;;  %v3239_v9 = vadd.f32 %v3238_v35, %v11531_v17  ;;  %v9533_v10 = vld [vmem:[#allocation11 + $0x128] sm:$0xff]  }
 0x2d6   : > { %v3480_v21 = vshrl.u32 %v3457_v55, 16  ;;  %v3398_v50 = vadd.f32 %v11618_v2, %v3359_v48  ;;  %v3360_v60 = vmul.f32 %v11613_v57, %v3247_v39  ;;  %v3483_v7 = vshll.u32 %v3457_v55, 16  ;;  %8765 = vmatpush3.bf16.msra.mxu1 %v9533_v10 }
 0x2d7   : > { %v3473_v26 = vshrl.u32 %v3456_v56, 16  ;;  %v3396_v47 = vadd.f32 %v11618_v2, %v3357_v28  ;;  %v3358_v20 = vmul.f32 %v11613_v57, %v3239_v9  ;;  %v3476_v34 = vshll.u32 %v3456_v56, 16 }
 0x2d8   : > { %v3482_v1 = vrot.slane %v3480_v21, 7  ;;  %v3399_v17 = vadd.f32 %v11618_v2, %v3360_v60  ;;  %v3430_v49 = vmax.f32 %v3398_v50, 0.0 }
 0x2d9   : > { %v3475_v37 = vrot.slane %v3473_v26, 7  ;;  %v3428_v63 = vmax.f32 %v3396_v47, 0.0  ;;  %v3397_v54 = vadd.f32 %v11618_v2, %v3358_v20  ;;  %v9028_v22 = vpop.f32.mrb[136].mxu0 }
 0x2da   : > { %v3485_v59 = vor.u32 %v3483_v7, %v3482_v1  ;;  %v3636_v58 = vsel %vm11640_vm4, %v3482_v1, 0  ;;  %v3431_v31 = vmax.f32 %v3399_v17, 0.0  ;;  %v3260_v8 = vadd.f32 %v9028_v22, %v11551_v25  ;;  %v3251_v12 = vpop.f32.mrb[137].mxu0 }
 0x2db   : > { %v7632_v62 = vcombine.low %v3636_v58, %v3636_v58  ;;  %v3478_v38 = vor.u32 %v3476_v34, %v3475_v37  ;;  %v3635_v16 = vsel %vm11640_vm4, %v3475_v37, 0  ;;  %v3429_v51 = vmax.f32 %v3397_v54, 0.0  ;;  %v9029_v5 = vpop.f32.mrb[138].mxu0 }
 0x2dc   : > { %v3620_v41 = vsel %vm11640_vm4, 0, %v3485_v59  ;;  %v7629_v6 = vcombine.low %v3635_v16, %v3635_v16  ;;  %v3459_v55 = vpack.c.bf16 %v3431_v31, %v3430_v49  ;;  %v3363_v48 = vmul.f32 %v11613_v57, %v3260_v8  ;;  %v3254_v39 = vpop.f32.mrb[139].mxu0 }
 0x2dd   : > { %v7630_v35 = vcombine.low %v3620_v41, %v3620_v41  ;;  %v7631_v56 = vcombine.high %v3620_v41, %v3620_v41  ;;  %3833 = vst [vmem:[#allocation2 + $0x20] sm:$0x1] %v7632_v62  ;;  %v3619_v25 = vsel %vm11640_vm4, 0, %v3478_v38  ;;  %v3458_v28 = vpack.c.bf16 %v3429_v51, %v3428_v63 }
 0x2de   : > { %v7627_v9 = vcombine.low %v3619_v25, %v3619_v25  ;;  %v7628_v21 = vcombine.high %v3619_v25, %v3619_v25  ;;  %3830 = vst [vmem:[#allocation2 + $0x14] sm:$0x1] %v7629_v6  ;;  %v3494_v50 = vshrl.u32 %v3459_v55, 16  ;;  %v3402_v23 = vadd.f32 %v11618_v2, %v3363_v48 }
 0x2df   : > { %3831 = vst [vmem:[#allocation2 + $0x18] sm:$0xf] %v7630_v35  ;;  %3832 = vst [vmem:[#allocation2 + $0x1c] sm:$0xf] %v7631_v56  ;;  %v3487_v60 = vshrl.u32 %v3458_v28, 16  ;;  %v3252_v26 = vadd.f32 %v3251_v12, %v11542_v42  ;;  %v3497_v20 = vshll.u32 %v3459_v55, 16  ;;  %v3263_v1 = vadd.f32 %v9029_v5, %v11553_v29 }
 0x2e0   : > { %3828 = vst [vmem:[#allocation2 + $0xc] sm:$0xf] %v7627_v9  ;;  %3829 = vst [vmem:[#allocation2 + $0x10] sm:$0xf] %v7628_v21  ;;  %v3496_v47 = vrot.slane %v3494_v50, 7  ;;  %v3255_v7 = vadd.f32 %v3254_v39, %v11544_v27  ;;  %v3490_v17 = vshll.u32 %v3458_v28, 16 }
 0x2e1   : > { %v3489_v34 = vrot.slane %v3487_v60, 7  ;;  %v3434_v37 = vmax.f32 %v3402_v23, 0.0  ;;  %v3361_v49 = vmul.f32 %v11613_v57, %v3252_v26  ;;  %v9032_v63 = vpop.f32.mrb[140].mxu0  ;;  %v3364_v42 = vmul.f32 %v11613_v57, %v3263_v1 }
 0x2e2   : > { %v3499_v54 = vor.u32 %v3497_v20, %v3496_v47  ;;  %v3638_v22 = vsel %vm11640_vm4, %v3496_v47, 0  ;;  %v3362_v59 = vmul.f32 %v11613_v57, %v3255_v7  ;;  %v3267_v58 = vpop.f32.mrb[141].mxu0  ;;  %v3276_v25 = vadd.f32 %v9032_v63, %v11563_v45  ;;  %v9514_v20 = vld [vmem:[#allocation11 + $0x180] sm:$0xff]  }
 0x2e3   : > { %v7638_v31 = vcombine.low %v3638_v22, %v3638_v22  ;;  %v3492_v8 = vor.u32 %v3490_v17, %v3489_v34  ;;  %v3637_v27 = vsel %vm11640_vm4, %v3489_v34, 0  ;;  %v3400_v29 = vadd.f32 %v11618_v2, %v3361_v49  ;;  %v9033_v12 = vpop.f32.mrb[142].mxu0  ;;  %v9527_v34 = vld [vmem:[#allocation11 + $0x1c8] sm:$0xff]  }
 0x2e4   : > { %v3622_v62 = vsel %vm11640_vm4, 0, %v3499_v54  ;;  %v7635_v38 = vcombine.low %v3637_v27, %v3637_v27  ;;  %v3403_v16 = vadd.f32 %v11618_v2, %v3364_v42  ;;  %v3401_v51 = vadd.f32 %v11618_v2, %v3362_v59  ;;  %v3270_v5 = vpop.f32.mrb[143].mxu0 }
 0x2e5   : > { %v7636_v10 = vcombine.low %v3622_v62, %v3622_v62  ;;  %v7637_v41 = vcombine.high %v3622_v62, %v3622_v62  ;;  %3839 = vst [vmem:[#allocation2 + $0x38] sm:$0x1] %v7638_v31  ;;  %v3621_v6 = vsel %vm11640_vm4, 0, %v3492_v8  ;;  %v3432_v55 = vmax.f32 %v3400_v29, 0.0 }
 0x2e6   : > { %v7633_v48 = vcombine.low %v3621_v6, %v3621_v6  ;;  %v7634_v39 = vcombine.high %v3621_v6, %v3621_v6  ;;  %3836 = vst [vmem:[#allocation2 + $0x2c] sm:$0x1] %v7635_v38  ;;  %v3435_v35 = vmax.f32 %v3403_v16, 0.0  ;;  %v3433_v56 = vmax.f32 %v3401_v51, 0.0  ;;  %v9528_v38 = vld [vmem:[#allocation11 + $0x188] sm:$0xff]   ;;  %v9541_v16 = vld [vmem:[#allocation11 + $0x1d0] sm:$0xff]  }
 0x2e7   : > { %3837 = vst [vmem:[#allocation2 + $0x30] sm:$0xf] %v7636_v10  ;;  %3838 = vst [vmem:[#allocation2 + $0x34] sm:$0xf] %v7637_v41  ;;  %v3268_v28 = vadd.f32 %v3267_v58, %v11557_v44  ;;  %v3279_v9 = vadd.f32 %v9033_v12, %v11565_v0  ;;  %v3271_v21 = vadd.f32 %v3270_v5, %v11559_v15  ;;  %v3947_v50 = vld [vmem:[#allocation2 + $0xc] sm:$0xf] }
 0x2e8   : > { %v3948_v60 = vld [vmem:[#allocation2 + $0x10] sm:$0xf]  ;;  %3834 = vst [vmem:[#allocation2 + $0x24] sm:$0xf] %v7633_v48  ;;  %3835 = vst [vmem:[#allocation2 + $0x28] sm:$0xf] %v7634_v39  ;;  %v3461_v23 = vpack.c.bf16 %v3435_v35, %v3434_v37  ;;  %v3460_v26 = vpack.c.bf16 %v3433_v56, %v3432_v55  ;;  %v3367_v1 = vmul.f32 %v11613_v57, %v3276_v25 }
 0x2e9   : > { %v11680_v47 = vcombine.low %v3947_v50, %v3948_v60  ;;  %v3365_v7 = vmul.f32 %v11613_v57, %v3268_v28  ;;  %v3368_v45 = vmul.f32 %v11613_v57, %v3279_v9  ;;  %v3366_v44 = vmul.f32 %v11613_v57, %v3271_v21  ;;  %v9036_v0 = vpop.f32.mrb[144].mxu0  ;;  %v9543_v37 = vld [vmem:[#allocation11 + $0x170] sm:$0xff]  }
 0x2ea   : > { %v3508_v15 = vshrl.u32 %v3461_v23, 16  ;;  %v3511_v17 = vshll.u32 %v3461_v23, 16  ;;  %v3501_v49 = vshrl.u32 %v3460_v26, 16  ;;  %v3504_v63 = vshll.u32 %v3460_v26, 16  ;;  %v3283_v54 = vpop.f32.mrb[145].mxu0  ;;  %8766 = vmatprep.subr.bf16.mxu1 %v9543_v37  ;;  %v9547_v51 = vld [vmem:[#allocation11 + $0x130] sm:$0xff]  }
 0x2eb   : > { %6237 = vmatprep.mubr.bf16.mxu0 %v11680_v47  ;;  %v3406_v22 = vadd.f32 %v11618_v2, %v3367_v1  ;;  %v3404_v42 = vadd.f32 %v11618_v2, %v3365_v7  ;;  %v3407_v59 = vadd.f32 %v11618_v2, %v3368_v45  ;;  %v3405_v58 = vadd.f32 %v11618_v2, %v3366_v44  ;;  %v9037_v31 = vpop.f32.mrb[146].mxu0  ;;  %v9542_v21 = vld [vmem:[#allocation11 + $0x190] sm:$0xff]  }
 0x2ec   : > { %6238 = vmatmul.mubr.bf16.vlgmr.msra.gmra.mrb[160].mxu0 %v11547_v19  ;;  %v3510_v8 = vrot.slane %v3508_v15, 7  ;;  %v3503_v27 = vrot.slane %v3501_v49, 7  ;;  %v3292_v29 = vadd.f32 %v9036_v0, %v11575_v30  ;;  %v3284_v12 = vadd.f32 %v3283_v54, %v11569_v36  ;;  %v3286_v62 = vpop.f32.mrb[147].mxu0  ;;  %8767 = vmatpush3.bf16.msra.mxu1 %v9547_v51  ;;  %v3950_v44 = vld [vmem:[#allocation2 + $0x1c] sm:$0xf] }
 0x2ed   : > { %8867 = vmatpush3.bf16.msra.mxu0 %v9514_v20  ;;  %v3438_v5 = vmax.f32 %v3406_v22, 0.0  ;;  %v3436_v10 = vmax.f32 %v3404_v42, 0.0  ;;  %v3439_v41 = vmax.f32 %v3407_v59, 0.0  ;;  %v3437_v6 = vmax.f32 %v3405_v58, 0.0  ;;  %v3949_v20 = vld [vmem:[#allocation2 + $0x18] sm:$0xf] }
 0x2ee   : > { %8868 = vmatprep.subr.bf16.mxu0 %v9527_v34  ;;  %v3513_v55 = vor.u32 %v3511_v17, %v3510_v8  ;;  %v3640_v19 = vsel %vm11640_vm4, %v3510_v8, 0  ;;  %v3506_v48 = vor.u32 %v3504_v63, %v3503_v27  ;;  %v3639_v30 = vsel %vm11640_vm4, %v3503_v27, 0  ;;  %v9555_v58 = vld [vmem:[#allocation11 + $0x1d8] sm:$0xff]   ;;  %v3885_v27 = vld [vmem:[#allocation2 + $0xc] sm:$0xf] }
 0x2ef   : > { %v7644_v36 = vcombine.low %v3640_v19, %v3640_v19  ;;  %v7641_v39 = vcombine.low %v3639_v30, %v3639_v30  ;;  %v3463_v35 = vpack.c.bf16 %v3439_v41, %v3438_v5  ;;  %v3462_v56 = vpack.c.bf16 %v3437_v6, %v3436_v10  ;;  %v3887_v41 = vld [vmem:[#allocation2 + $0x18] sm:$0xf]  ;;  %v11724_v6 = vld [vmem:[#allocation2 + $0x1c] sm:$0xf] }
 0x2f0   : > { %v3624_v25 = vsel %vm11640_vm4, 0, %v3513_v55  ;;  %v3623_v28 = vsel %vm11640_vm4, 0, %v3506_v48  ;;  %v3371_v9 = vmul.f32 %v11613_v57, %v3292_v29  ;;  %v3369_v49 = vmul.f32 %v11613_v57, %v3284_v12  ;;  %v11713_v29 = vld [vmem:[#allocation2 + $0x14] ss:$0 sps:$4 sm:$0x11]   ;;  %v9557_v55 = vld [vmem:[#allocation11 + $0x178] sm:$0xff]  }
 0x2f1   : > { %8869 = vmatpush3.bf16.msra.mxu0 %v9528_v38  ;;  %v7642_v50 = vcombine.low %v3624_v25, %v3624_v25  ;;  %v7643_v60 = vcombine.high %v3624_v25, %v3624_v25  ;;  %3845 = vst [vmem:[#allocation2 + $0x50] sm:$0x1] %v7644_v36  ;;  %v7639_v23 = vcombine.low %v3623_v28, %v3623_v28  ;;  %3842 = vst [vmem:[#allocation2 + $0x44] sm:$0x1] %v7641_v39  ;;  %v9040_v1 = vpop.f32.mrb[148].mxu0  ;;  %v9556_v38 = vld [vmem:[#allocation11 + $0x198] sm:$0xff]  }
 0x2f2   : > { %v7640_v26 = vcombine.high %v3623_v28, %v3623_v28  ;;  %8870 = vmatprep.subr.bf16.mxu0 %v9541_v16  ;;  %v3522_v7 = vshrl.u32 %v3463_v35, 16  ;;  %v3515_v45 = vshrl.u32 %v3462_v56, 16  ;;  %v3299_v0 = vpop.f32.mrb[149].mxu0  ;;  %v3525_v34 = vshll.u32 %v3463_v35, 16  ;;  %8768 = vmatprep.subr.bf16.mxu1 %v9557_v55 }
 0x2f3   : > { %3843 = vst [vmem:[#allocation2 + $0x48] sm:$0xf] %v7642_v50  ;;  %3844 = vst [vmem:[#allocation2 + $0x4c] sm:$0xf] %v7643_v60  ;;  %v3518_v15 = vshll.u32 %v3462_v56, 16  ;;  %v11704_v17 = vadd.f32 %v11618_v2, %v3371_v9  ;;  %v9041_v63 = vpop.f32.mrb[150].mxu0  ;;  %v3295_v22 = vadd.f32 %v9037_v31, %v11577_v13  ;;  %v3287_v42 = vadd.f32 %v3286_v62, %v11571_v11 }
 0x2f4   : > { %3840 = vst [vmem:[#allocation2 + $0x3c] sm:$0xf] %v7639_v23  ;;  %3841 = vst [vmem:[#allocation2 + $0x40] sm:$0xf] %v7640_v26  ;;  %v3524_v54 = vrot.slane %v3522_v7, 7  ;;  %v3517_v37 = vrot.slane %v3515_v45, 7  ;;  %v11711_v8 = vcombine.low %v3949_v20, %v3950_v44  ;;  %v3408_v36 = vadd.f32 %v11618_v2, %v3369_v49 }
 0x2f5   : > { %v11709_v59 = vpop.f32.mrb[151].mxu0  ;;  %8871 = vmatpush3.bf16.msra.mxu0 %v9542_v21  ;;  %v11719_v31 = vld [vmem:[#allocation2 + $0x10] sm:$0xf]  ;;  %v3372_v5 = vmul.f32 %v11613_v57, %v3295_v22  ;;  %v3370_v10 = vmul.f32 %v11613_v57, %v3287_v42  ;;  %v3442_v30 = vmax.f32 %v11704_v17, 0.0  ;;  %v3308_v50 = vadd.f32 %v9040_v1, %v11587_v61  ;;  %v9561_v42 = vld [vmem:[#allocation11 + $0x138] sm:$0xff]  }
 0x2f6   : > { %v3527_v16 = vor.u32 %v3525_v34, %v3524_v54  ;;  %v3642_v12 = vsel %vm11640_vm4, %v3524_v54, 0  ;;  %v3520_v51 = vor.u32 %v3518_v15, %v3517_v37  ;;  %v3641_v13 = vsel %vm11640_vm4, %v3517_v37, 0  ;;  %8872 = vmatprep.subr.bf16.mxu0 %v9555_v58  ;;  %6245 = vmatprep.mubr.bf16.mxu0 %v11711_v8 }
 0x2f7   : > { %v7650_v11 = vcombine.low %v3642_v12, %v3642_v12  ;;  %v7647_v62 = vcombine.low %v3641_v13, %v3641_v13  ;;  %v3411_v9 = vadd.f32 %v11618_v2, %v3372_v5  ;;  %v3409_v21 = vadd.f32 %v11618_v2, %v3370_v10  ;;  %8769 = vmatpush3.bf16.msra.mxu1 %v9561_v42 }
 0x2f8   : > { %v3626_v19 = vsel %vm11640_vm4, 0, %v3527_v16  ;;  %v3625_v48 = vsel %vm11640_vm4, 0, %v3520_v51  ;;  %v7676_v60 = vcombine.low %v3885_v27, %v11719_v31  ;;  %v4240_v26 = vshll.u32 %v11713_v29, 16 }
 0x2f9   : > { %8873 = vmatpush3.bf16.msra.mxu0 %v9556_v38  ;;  %v7648_v39 = vcombine.low %v3626_v19, %v3626_v19  ;;  %v7649_v35 = vcombine.high %v3626_v19, %v3626_v19  ;;  %3851 = vst [vmem:[#allocation2 + $0x68] sm:$0x1] %v7650_v11  ;;  %v7645_v56 = vcombine.low %v3625_v48, %v3625_v48  ;;  %3848 = vst [vmem:[#allocation2 + $0x5c] sm:$0x1] %v7647_v62  ;;  %v11732_v28 = vpop.f32.mrb[152].mxu0 }
 0x2fa   : > { %v7646_v25 = vcombine.high %v3625_v48, %v3625_v48  ;;  %v11738_v23 = vpop.f32.mrb[153].mxu0  ;;  %v3300_v20 = vadd.f32 %v3299_v0, %v11581_v32  ;;  %v3311_v7 = vadd.f32 %v9041_v63, %v11589_v18  ;;  %v11744_v45 = vcombine.low %v3887_v41, %v11724_v6  ;;  %v11753_v63 = vld [vmem:[#allocation2 + $0x20] ss:$0 sps:$4 sm:$0x11]   ;;  %v3932_v62 = vld [vmem:[#allocation2 + $0xc] sm:$0xe] }
 0x2fb   : > { %3849 = vst [vmem:[#allocation2 + $0x60] sm:$0xf] %v7648_v39  ;;  %3850 = vst [vmem:[#allocation2 + $0x64] sm:$0xf] %v7649_v35  ;;  %v11746_v44 = vpop.f32.mrb[154].mxu0  ;;  %v3440_v61 = vmax.f32 %v3408_v36, 0.0  ;;  %v3375_v15 = vmul.f32 %v11613_v57, %v3308_v50 }
 0x2fc   : > { %3846 = vst [vmem:[#allocation2 + $0x54] sm:$0xf] %v7645_v56  ;;  %3847 = vst [vmem:[#allocation2 + $0x58] sm:$0xf] %v7646_v25  ;;  %v3443_v1 = vmax.f32 %v3411_v9, 0.0  ;;  %v3441_v34 = vmax.f32 %v3409_v21, 0.0  ;;  %v3376_v37 = vmul.f32 %v11613_v57, %v3311_v7  ;;  %v11756_v27 = vmul.f32 %v11613_v57, %v3300_v20 }
 0x2fd   : > { %v11749_v17 = vpop.f32.mrb[155].mxu0  ;;  %v4233_v49 = vshrl.u32 %v7676_v60, 16  ;;  %v4235_v54 = vshll.u32 %v7676_v60, 16  ;;  %v3414_v18 = vadd.f32 %v11618_v2, %v3375_v15  ;;  %v4242_v0 = vrot.slane %v4240_v26, 1  ;;  %v9562_v56 = vld [vmem:[#allocation11 + $0x1e0] sm:$0xff]  }
 0x2fe   : > { %v3465_v22 = vpack.c.bf16 %v3443_v1, %v3442_v30  ;;  %v3464_v32 = vpack.c.bf16 %v3441_v34, %v3440_v61  ;;  %v3415_v38 = vadd.f32 %v11618_v2, %v3376_v37  ;;  %v4247_v16 = vshll.u32 %v11744_v45, 16  ;;  %v9565_v20 = vld [vmem:[#allocation11 + $0x1a0] sm:$0xff]   ;;  %8874 = vmatprep.subr.bf16.mxu0 %v9562_v56 }
 0x2ff   : > { %v4237_v58 = vrot.slane %v4235_v54, 1  ;;  %v4245_v11 = vshrl.u32 %v11744_v45, 16  ;;  %v3446_v10 = vmax.f32 %v3414_v18, 0.0  ;;  %v4252_v39 = vshll.u32 %v11753_v63, 16  ;;  %8875 = vmatpush3.bf16.msra.mxu0 %v9565_v20 }
 0x300   : > { %v3536_v12 = vshrl.u32 %v3465_v22, 16  ;;  %v3539_v51 = vshll.u32 %v3465_v22, 16  ;;  %v3529_v13 = vshrl.u32 %v3464_v32, 16  ;;  %v3532_v5 = vshll.u32 %v3464_v32, 16  ;;  %v3951_v22 = vld [vmem:[#allocation2 + $0x24] sm:$0xf] }
 0x301   : > { %v4238_v41 = vor.u32 %v4237_v58, %v4233_v49  ;;  %v3447_v55 = vmax.f32 %v3415_v38, 0.0  ;;  %v11761_v19 = vpop.f32.mrb[156].mxu0  ;;  %v4249_v36 = vrot.slane %v4247_v16, 1  ;;  %v7708_v21 = vcombine.low %v3932_v62, %v11719_v31  ;;  %v9566_v49 = vld [vmem:[#allocation11 + $0x1e8] sm:$0xff]   ;;  %v3952_v58 = vld [vmem:[#allocation2 + $0x28] sm:$0xf] }
 0x302   : > { %v3538_v48 = vrot.slane %v3536_v12, 7  ;;  %v3531_v30 = vrot.slane %v3529_v13, 7  ;;  %v11764_v35 = vpop.f32.mrb[157].mxu0  ;;  %v4480_v50 = vrot.slane %v11713_v29, 1  ;;  %v4254_v42 = vrot.slane %v4252_v39, 1  ;;  %8876 = vmatprep.subr.bf16.mxu0 %v9566_v49  ;;  %v9567_v38 = vld [vmem:[#allocation11 + $0x1a8] sm:$0xff]  }
 0x303   : > { %v4243_v25 = vsel %vm715_vm0, %v4238_v41, %v4242_v0  ;;  %v3467_v9 = vpack.c.bf16 %v3447_v55, %v3446_v10  ;;  %v11769_v26 = vpop.f32.mrb[158].mxu0  ;;  %v4250_v0 = vor.u32 %v4249_v36, %v4245_v11  ;;  %v9570_v13 = vld [vmem:[#allocation11 + $0x1f0] sm:$0xff]   ;;  %v4479_v10 = vrot.slane %v7708_v21, 1  ;;  %v3889_v36 = vld [vmem:[#allocation2 + $0x24] sm:$0xf]  ;;  %8877 = vmatpush3.bf16.msra.mxu0 %v9567_v38 }
 0x304   : > { %v3541_v7 = vor.u32 %v3539_v51, %v3538_v48  ;;  %v3644_v61 = vsel %vm11640_vm4, %v3538_v48, 0  ;;  %v3534_v1 = vor.u32 %v3532_v5, %v3531_v30  ;;  %v3643_v34 = vsel %vm11640_vm4, %v3531_v30, 0  ;;  %6084 = vmatprep.mubr.bf16.mxu1 %v4243_v25  ;;  %v11775_v15 = vpop.f32.mrb[159].mxu0  ;;  %v11792_v39 = vld [vmem:[#allocation2 + $0x28] sm:$0xf]  ;;  %v9571_v25 = vld [vmem:[#allocation11 + $0x1b0] sm:$0xff]   ;;  %8878 = vmatprep.subr.bf16.mxu0 %v9570_v13 }
 0x305   : > { %v7656_v54 = vcombine.low %v3644_v61, %v3644_v61  ;;  %v7653_v31 = vcombine.low %v3643_v34, %v3643_v34  ;;  %6085 = vmatmul.mubr.bf16.gmra.mrb[132].mxu1 %v7676_v60  ;;  %v3550_v29 = vshrl.u32 %v3467_v9, 16  ;;  %v3553_v37 = vshll.u32 %v3467_v9, 16 }
 0x306   : > { %v3628_v32 = vsel %vm11640_vm4, 0, %v3541_v7  ;;  %v3627_v18 = vsel %vm11640_vm4, 0, %v3534_v1  ;;  %v4255_v5 = vsel %vm715_vm0, %v4250_v0, %v4254_v42  ;;  %v3303_v41 = vadd.f32 %v11709_v59, %v11583_v52  ;;  %v3933_v7 = vld [vmem:[#allocation2 + $0x18] sm:$0xe]  ;;  %v3953_v42 = vld [vmem:[#allocation2 + $0x30] sm:$0xf] }
 0x307   : > { %v7654_v16 = vcombine.low %v3628_v32, %v3628_v32  ;;  %v7655_v12 = vcombine.high %v3628_v32, %v3628_v32  ;;  %3857 = vst [vmem:[#allocation2 + $0x80] sm:$0x1] %v7656_v54  ;;  %v7651_v51 = vcombine.low %v3627_v18, %v3627_v18  ;;  %v7652_v60 = vcombine.high %v3627_v18, %v3627_v18 }
 0x308   : > { %3854 = vst [vmem:[#allocation2 + $0x74] sm:$0x1] %v7653_v31  ;;  %v3552_v62 = vrot.slane %v3550_v29, 7  ;;  %v3412_v11 = vadd.f32 %v11618_v2, %v11756_v27  ;;  %6092 = vmatprep.mubr.bf16.mxu1 %v4255_v5  ;;  %v11786_v55 = vcombine.low %v3951_v22, %v3952_v58  ;;  %v3324_v48 = vadd.f32 %v11732_v28, %v11599_v53  ;;  %v11816_v58 = vld [vmem:[#allocation2 + $0x34] sm:$0xf]  ;;  %v9575_v5 = vld [vmem:[#allocation11 + $0x1b8] sm:$0xff]  }
 0x309   : > { %3855 = vst [vmem:[#allocation2 + $0x78] sm:$0xf] %v7654_v16  ;;  %3856 = vst [vmem:[#allocation2 + $0x7c] sm:$0xf] %v7655_v12  ;;  %v3316_v30 = vadd.f32 %v11738_v23, %v11593_v4  ;;  %v4481_v56 = vsel %vm972_vm1, %v4479_v10, %v4480_v50  ;;  %v3374_v27 = vmul.f32 %v11613_v57, %v3303_v41  ;;  %8879 = vmatpush3.bf16.msra.mxu0 %v9571_v25 }
 0x30a   : > { %3852 = vst [vmem:[#allocation2 + $0x6c] sm:$0xf] %v7651_v51  ;;  %3853 = vst [vmem:[#allocation2 + $0x70] sm:$0xf] %v7652_v60  ;;  %v3555_v52 = vor.u32 %v3553_v37, %v3552_v62  ;;  %v3646_v59 = vsel %vm11640_vm4, %v3552_v62, 0  ;;  %6246 = vmatmul.mubr.bf16.gmra.mrb[164].mxu0 %v4481_v56  ;;  %v3379_v53 = vmul.f32 %v11613_v57, %v3324_v48  ;;  %v3444_v49 = vmax.f32 %v3412_v11, 0.0 }
 0x30b   : > { %v7662_v9 = vcombine.low %v3646_v59, %v3646_v59  ;;  %v3377_v28 = vmul.f32 %v11613_v57, %v3316_v30  ;;  %v11800_v4 = vld [vmem:[#allocation2 + $0x2c] ss:$0 sps:$4 sm:$0x11]   ;;  %v3413_v21 = vadd.f32 %v11618_v2, %v3374_v27  ;;  %6253 = vmatprep.mubr.bf16.mxu0 %v11786_v55  ;;  %v3327_v50 = vadd.f32 %v11746_v44, %v11601_v14  ;;  %v9574_v37 = vld [vmem:[#allocation11 + $0x1f8] sm:$0xff]  }
 0x30c   : > { %v3630_v23 = vsel %vm11640_vm4, 0, %v3555_v52  ;;  %v7678_v20 = vcombine.low %v3889_v36, %v11792_v39  ;;  %v3418_v34 = vadd.f32 %v11618_v2, %v3379_v53  ;;  %v4264_v44 = vshll.u32 %v11800_v4, 16  ;;  %8880 = vmatprep.subr.bf16.mxu0 %v9574_v37  ;;  %v11826_v30 = vld [vmem:[#allocation11 + $0x200] sm:$0xff]  }
 0x30d   : > { %v7660_v61 = vcombine.low %v3630_v23, %v3630_v23  ;;  %v7661_v1 = vcombine.high %v3630_v23, %v3630_v23  ;;  %3863 = vst [vmem:[#allocation2 + $0x98] sm:$0x1] %v7662_v9  ;;  %6093 = vmatmul.mubr.bf16.gmra.mrb[136].mxu1 %v11744_v45  ;;  %v3445_v54 = vmax.f32 %v3413_v21, 0.0  ;;  %v3380_v31 = vmul.f32 %v11613_v57, %v3327_v50  ;;  %v11837_v9 = vld [vmem:[#allocation2 + $0x34] sm:$0xf] }
 0x30e   : > { %v4259_v29 = vshll.u32 %v7678_v20, 16  ;;  %v3416_v14 = vadd.f32 %v11618_v2, %v3377_v28  ;;  %v7709_v22 = vcombine.low %v3933_v7, %v11724_v6  ;;  %v4257_v0 = vshrl.u32 %v7678_v20, 16  ;;  %v11841_v23 = vld [vmem:[#allocation2 + $0x38] ss:$0 sps:$4 sm:$0x11]   ;;  %8881 = vmatpush3.bf16.msra.mxu0 %v9575_v5  ;;  %9050 = vmatprep.subr.bf16.mxu1 %v11826_v30 }
 0x30f   : > { %3861 = vst [vmem:[#allocation2 + $0x90] sm:$0xf] %v7660_v61  ;;  %3862 = vst [vmem:[#allocation2 + $0x94] sm:$0xf] %v7661_v1  ;;  %v3466_v32 = vpack.c.bf16 %v3445_v54, %v3444_v49  ;;  %v3419_v18 = vadd.f32 %v11618_v2, %v3380_v31  ;;  %v3450_v38 = vmax.f32 %v3418_v34, 0.0  ;;  %v4483_v12 = vrot.slane %v11753_v63, 1 }
 0x310   : > { %v4261_v45 = vrot.slane %v4259_v29, 1  ;;  %v4482_v16 = vrot.slane %v7709_v22, 1  ;;  %v3319_v51 = vadd.f32 %v11749_v17, %v11595_v40  ;;  %v4266_v6 = vrot.slane %v4264_v44, 1  ;;  %v3891_v17 = vld [vmem:[#allocation2 + $0x30] sm:$0xf] }
 0x311   : > { %v3543_v60 = vshrl.u32 %v3466_v32, 16  ;;  %v3451_v13 = vmax.f32 %v3419_v18, 0.0  ;;  %v3546_v10 = vshll.u32 %v3466_v32, 16  ;;  %v11824_v48 = vcombine.low %v3953_v42, %v11816_v58  ;;  %v3934_v18 = vld [vmem:[#allocation2 + $0x24] sm:$0xe] }
 0x312   : > { %v4262_v62 = vor.u32 %v4261_v45, %v4257_v0  ;;  %v4484_v41 = vsel %vm972_vm1, %v4482_v16, %v4483_v12  ;;  %v3378_v11 = vmul.f32 %v11613_v57, %v3319_v51  ;;  %v3340_v40 = vadd.f32 %v11761_v19, %v11611_v43 }
 0x313   : > { %v3545_v36 = vrot.slane %v3543_v60, 7  ;;  %v3469_v63 = vpack.c.bf16 %v3451_v13, %v3450_v38  ;;  %6254 = vmatmul.mubr.bf16.gmra.mrb[168].mxu0 %v4484_v41  ;;  %v3448_v59 = vmax.f32 %v3416_v14, 0.0  ;;  %v3332_v27 = vadd.f32 %v11764_v35, %v11605_v3  ;;  %v11866_v41 = vld [vmem:[#allocation2 + $0x40] sm:$0xf] }
 0x314   : > { %v4267_v52 = vsel %vm715_vm0, %v4262_v62, %v4266_v6  ;;  %v3417_v56 = vadd.f32 %v11618_v2, %v3378_v11  ;;  %6261 = vmatprep.mubr.bf16.mxu0 %v11824_v48  ;;  %v3343_v25 = vadd.f32 %v11769_v26, %v11615_v46  ;;  %v3383_v7 = vmul.f32 %v11613_v57, %v3340_v40  ;;  %v3893_v40 = vld [vmem:[#allocation2 + $0x3c] sm:$0xf] }
 0x315   : > { %6100 = vmatprep.mubr.bf16.mxu1 %v4267_v52  ;;  %v3548_v53 = vor.u32 %v3546_v10, %v3545_v36  ;;  %v3645_v28 = vsel %vm11640_vm4, %v3545_v36, 0  ;;  %v3564_v43 = vshrl.u32 %v3469_v63, 16  ;;  %v3567_v19 = vshll.u32 %v3469_v63, 16  ;;  %v3955_v10 = vld [vmem:[#allocation2 + $0x3c] sm:$0xf] }
 0x316   : > { %6101 = vmatmul.mubr.bf16.gmra.mrb[140].mxu1 %v7678_v20  ;;  %v7659_v21 = vcombine.low %v3645_v28, %v3645_v28  ;;  %v3449_v50 = vmax.f32 %v3417_v56, 0.0  ;;  %v3381_v3 = vmul.f32 %v11613_v57, %v3332_v27  ;;  %v3384_v26 = vmul.f32 %v11613_v57, %v3343_v25 }
 0x317   : > { %v3629_v46 = vsel %vm11640_vm4, 0, %v3548_v53  ;;  %v3566_v35 = vrot.slane %v3564_v43, 7  ;;  %v11850_v61 = vcombine.low %v3891_v17, %v11837_v9  ;;  %v3422_v49 = vadd.f32 %v11618_v2, %v3383_v7  ;;  %v11872_v17 = vld [vmem:[#allocation2 + $0x44] ss:$0 sps:$4 sm:$0x11]  }
 0x318   : > { %v7657_v20 = vcombine.low %v3629_v46, %v3629_v46  ;;  %v7658_v1 = vcombine.high %v3629_v46, %v3629_v46  ;;  %3860 = vst [vmem:[#allocation2 + $0x8c] sm:$0x1] %v7659_v21  ;;  %v3468_v34 = vpack.c.bf16 %v3449_v50, %v3448_v59  ;;  %v3423_v29 = vadd.f32 %v11618_v2, %v3384_v26  ;;  %v11880_v43 = vld [vmem:[#allocation2 + $0x40] sm:$0xf]  ;;  %v3935_v50 = vld [vmem:[#allocation2 + $0x30] sm:$0xe] }
 0x319   : > { %v3569_v54 = vor.u32 %v3567_v19, %v3566_v35  ;;  %v3648_v31 = vsel %vm11640_vm4, %v3566_v35, 0  ;;  %v4276_v37 = vshll.u32 %v11841_v23, 16  ;;  %v11858_v32 = vadd.f32 %v11618_v2, %v3381_v3 }
 0x31a   : > { %3858 = vst [vmem:[#allocation2 + $0x84] sm:$0xf] %v7657_v20  ;;  %3859 = vst [vmem:[#allocation2 + $0x88] sm:$0xf] %v7658_v1  ;;  %v7668_v14 = vcombine.low %v3648_v31, %v3648_v31  ;;  %v3557_v44 = vshrl.u32 %v3468_v34, 16  ;;  %v3560_v22 = vshll.u32 %v3468_v34, 16  ;;  %v7710_v6 = vcombine.low %v3934_v18, %v11792_v39 }
 0x31b   : > { %v3632_v0 = vsel %vm11640_vm4, 0, %v3569_v54  ;;  %v3454_v45 = vmax.f32 %v3422_v49, 0.0  ;;  %v3455_v42 = vmax.f32 %v3423_v29, 0.0  ;;  %v4269_v38 = vshrl.u32 %v11850_v61, 16  ;;  %v3957_v20 = vld [vmem:[#allocation2 + $0x48] sm:$0xf] }
 0x31c   : > { %v7666_v16 = vcombine.low %v3632_v0, %v3632_v0  ;;  %v7667_v12 = vcombine.high %v3632_v0, %v3632_v0  ;;  %3869 = vst [vmem:[#allocation2 + $0xb0] sm:$0x1] %v7668_v14  ;;  %v3559_v51 = vrot.slane %v3557_v44, 7  ;;  %v4271_v60 = vshll.u32 %v11850_v61, 16  ;;  %v11890_v1 = vld [vmem:[#allocation2 + $0x4c] sm:$0xf] }
 0x31d   : > { %v3471_v13 = vpack.c.bf16 %v3455_v42, %v3454_v45  ;;  %v4278_v62 = vrot.slane %v4276_v37, 1  ;;  %v4486_v5 = vrot.slane %v11800_v4, 1  ;;  %v3335_v52 = vadd.f32 %v11775_v15, %v11607_v24  ;;  %v3895_v34 = vld [vmem:[#allocation2 + $0x48] sm:$0xf]  ;;  %v11895_v29 = vld [vmem:[#allocation2 + $0x4c] sm:$0xf] }
 0x31e   : > { %3867 = vst [vmem:[#allocation2 + $0xa8] sm:$0xf] %v7666_v16  ;;  %3868 = vst [vmem:[#allocation2 + $0xac] sm:$0xf] %v7667_v12  ;;  %v3562_v11 = vor.u32 %v3560_v22, %v3559_v51  ;;  %v3647_v36 = vsel %vm11640_vm4, %v3559_v51, 0  ;;  %v4273_v63 = vrot.slane %v4271_v60, 1  ;;  %v11878_v28 = vcombine.low %v3955_v10, %v11866_v41 }
 0x31f   : > { %v7665_v59 = vcombine.low %v3647_v36, %v3647_v36  ;;  %v3578_v39 = vshrl.u32 %v3471_v13, 16  ;;  %v3581_v56 = vshll.u32 %v3471_v13, 16  ;;  %v4485_v4 = vrot.slane %v7710_v6, 1  ;;  %v11899_v44 = vld [vmem:[#allocation2 + $0x50] ss:$0 sps:$4 sm:$0x11]  }
 0x320   : > { %v3631_v27 = vsel %vm11640_vm4, 0, %v3562_v11  ;;  %v4274_v25 = vor.u32 %v4273_v63, %v4269_v38  ;;  %v3382_v53 = vmul.f32 %v11613_v57, %v3335_v52  ;;  %v3452_v57 = vmax.f32 %v11858_v32, 0.0  ;;  %v11908_v10 = vld [vmem:[#allocation2 + $0x58] sm:$0xf] }
 0x321   : > { %v7663_v19 = vcombine.low %v3631_v27, %v3631_v27  ;;  %v7664_v24 = vcombine.high %v3631_v27, %v3631_v27  ;;  %3866 = vst [vmem:[#allocation2 + $0xa4] sm:$0x1] %v7665_v59  ;;  %v3580_v15 = vrot.slane %v3578_v39, 7  ;;  %v4487_v21 = vsel %vm972_vm1, %v4485_v4, %v4486_v5  ;;  %v3897_v5 = vld [vmem:[#allocation2 + $0x54] sm:$0xf] }
 0x322   : > { %v4279_v7 = vsel %vm715_vm0, %v4274_v25, %v4278_v62  ;;  %6262 = vmatmul.mubr.bf16.gmra.mrb[172].mxu0 %v4487_v21  ;;  %v3421_v3 = vadd.f32 %v11618_v2, %v3382_v53  ;;  %v7680_v26 = vcombine.low %v3893_v40, %v11880_v43  ;;  %v4288_v2 = vshll.u32 %v11872_v17, 16  ;;  %v11913_v59 = vld [vmem:[#allocation2 + $0x5c] ss:$0 sps:$4 sm:$0x11]   ;;  %v3959_v4 = vld [vmem:[#allocation2 + $0x54] sm:$0xf] }
 0x323   : > { %3864 = vst [vmem:[#allocation2 + $0x9c] sm:$0xf] %v7663_v19  ;;  %3865 = vst [vmem:[#allocation2 + $0xa0] sm:$0xf] %v7664_v24  ;;  %v3583_v46 = vor.u32 %v3581_v56, %v3580_v15  ;;  %v3650_v35 = vsel %vm11640_vm4, %v3580_v15, 0  ;;  %6108 = vmatprep.mubr.bf16.mxu1 %v4279_v7  ;;  %6269 = vmatprep.mubr.bf16.mxu0 %v11878_v28  ;;  %v7711_v31 = vcombine.low %v3935_v50, %v11837_v9 }
 0x324   : > { %v7674_v49 = vcombine.low %v3650_v35, %v3650_v35  ;;  %v3453_v54 = vmax.f32 %v3421_v3, 0.0  ;;  %6109 = vmatmul.mubr.bf16.gmra.mrb[144].mxu1 %v11850_v61  ;;  %v4283_v14 = vshll.u32 %v7680_v26, 16  ;;  %v4281_v45 = vshrl.u32 %v7680_v26, 16  ;;  %v3936_v9 = vld [vmem:[#allocation2 + $0x3c] sm:$0xe] }
 0x325   : > { %v3634_v37 = vsel %vm11640_vm4, 0, %v3583_v46  ;;  %v4488_v0 = vrot.slane %v7711_v31, 1  ;;  %v4489_v61 = vrot.slane %v11841_v23, 1  ;;  %v7681_v38 = vcombine.low %v3895_v34, %v11895_v29  ;;  %v11917_v27 = vld [vmem:[#allocation2 + $0x58] sm:$0xf] }
 0x326   : > { %v7672_v22 = vcombine.low %v3634_v37, %v3634_v37  ;;  %v7673_v32 = vcombine.high %v3634_v37, %v3634_v37  ;;  %3875 = vst [vmem:[#allocation2 + $0xc8] sm:$0x1] %v7674_v49  ;;  %v3470_v18 = vpack.c.bf16 %v3453_v54, %v3452_v57  ;;  %v4285_v42 = vrot.slane %v4283_v14, 1  ;;  %v3937_v15 = vld [vmem:[#allocation2 + $0x48] sm:$0xe] }
 0x327   : > { %v4290_v12 = vrot.slane %v4288_v2, 1  ;;  %v11904_v51 = vcombine.low %v3957_v20, %v11890_v1  ;;  %v4490_v13 = vsel %vm972_vm1, %v4488_v0, %v4489_v61  ;;  %v4295_v62 = vshll.u32 %v7681_v38, 16  ;;  %v3899_v21 = vld [vmem:[#allocation2 + $0x60] sm:$0xf]  ;;  %v11923_v57 = vld [vmem:[#allocation2 + $0x64] sm:$0xf] }
 0x328   : > { %3873 = vst [vmem:[#allocation2 + $0xc0] sm:$0xf] %v7672_v22  ;;  %3874 = vst [vmem:[#allocation2 + $0xc4] sm:$0xf] %v7673_v32  ;;  %v3571_v16 = vshrl.u32 %v3470_v18, 16  ;;  %v4286_v60 = vor.u32 %v4285_v42, %v4281_v45  ;;  %v4300_v6 = vshll.u32 %v11899_v44, 16  ;;  %v7712_v36 = vcombine.low %v3936_v9, %v11880_v43 }
 0x329   : > { %v3574_v11 = vshll.u32 %v3470_v18, 16  ;;  %v4293_v52 = vshrl.u32 %v7681_v38, 16  ;;  %v4297_v40 = vrot.slane %v4295_v62, 1  ;;  %v7682_v25 = vcombine.low %v3897_v5, %v11908_v10  ;;  %v3901_v37 = vld [vmem:[#allocation2 + $0x6c] sm:$0xf] }
 0x32a   : > { %v3573_v23 = vrot.slane %v3571_v16, 7  ;;  %6270 = vmatmul.mubr.bf16.gmra.mrb[176].mxu0 %v4490_v13  ;;  %v4291_v63 = vsel %vm715_vm0, %v4286_v60, %v4290_v12  ;;  %v4302_v19 = vrot.slane %v4300_v6, 1  ;;  %v4491_v24 = vrot.slane %v7712_v36, 1  ;;  %v11933_v14 = vld [vmem:[#allocation2 + $0x70] sm:$0xf] }
 0x32b   : > { %6277 = vmatprep.mubr.bf16.mxu0 %v11904_v51  ;;  %6116 = vmatprep.mubr.bf16.mxu1 %v4291_v63  ;;  %v4298_v43 = vor.u32 %v4297_v40, %v4293_v52  ;;  %v4492_v7 = vrot.slane %v11872_v17, 1  ;;  %v4307_v3 = vshll.u32 %v7682_v25, 16  ;;  %v4305_v34 = vshrl.u32 %v7682_v25, 16  ;;  %v11936_v32 = vld [vmem:[#allocation2 + $0x68] ss:$0 sps:$4 sm:$0x11]  }
 0x32c   : > { %v3576_v39 = vor.u32 %v3574_v11, %v3573_v23  ;;  %v3649_v56 = vsel %vm11640_vm4, %v3573_v23, 0  ;;  %6117 = vmatmul.mubr.bf16.gmra.mrb[148].mxu1 %v7680_v26  ;;  %v4312_v26 = vshll.u32 %v11913_v59, 16  ;;  %v11929_v54 = vcombine.low %v3959_v4, %v11917_v27  ;;  %v3961_v42 = vld [vmem:[#allocation2 + $0x60] sm:$0xf]  ;;  %v11939_v61 = vld [vmem:[#allocation2 + $0x64] sm:$0xf] }
 0x32d   : > { %v7671_v53 = vcombine.low %v3649_v56, %v3649_v56  ;;  %v4303_v20 = vsel %vm715_vm0, %v4298_v43, %v4302_v19  ;;  %v4309_v49 = vrot.slane %v4307_v3, 1  ;;  %v4493_v33 = vsel %vm972_vm1, %v4491_v24, %v4492_v7  ;;  %v3938_v16 = vld [vmem:[#allocation2 + $0x54] sm:$0xe]  ;;  %v3903_v11 = vld [vmem:[#allocation2 + $0x78] sm:$0xf] }
 0x32e   : > { %v3633_v50 = vsel %vm11640_vm4, 0, %v3576_v39  ;;  %6124 = vmatprep.mubr.bf16.mxu1 %v4303_v20  ;;  %v7713_v17 = vcombine.low %v3937_v15, %v11895_v29  ;;  %v7683_v2 = vcombine.low %v3899_v21, %v11923_v57  ;;  %v4314_v22 = vrot.slane %v4312_v26, 1  ;;  %v11949_v36 = vld [vmem:[#allocation2 + $0x7c] sm:$0xf]  ;;  %v3963_v52 = vld [vmem:[#allocation2 + $0x6c] sm:$0xf] }
 0x32f   : > { %v7669_v46 = vcombine.low %v3633_v50, %v3633_v50  ;;  %v7670_v35 = vcombine.high %v3633_v50, %v3633_v50  ;;  %3872 = vst [vmem:[#allocation2 + $0xbc] sm:$0x1] %v7671_v53  ;;  %v4310_v31 = vor.u32 %v4309_v49, %v4305_v34  ;;  %v7684_v9 = vcombine.low %v3901_v37, %v11933_v14  ;;  %v11953_v56 = vld [vmem:[#allocation2 + $0x70] sm:$0xf]  ;;  %v3905_v3 = vld [vmem:[#allocation2 + $0x84] sm:$0xf] }
 0x330   : > { %v4319_v18 = vshll.u32 %v7683_v2, 16  ;;  %v4494_v45 = vrot.slane %v7713_v17, 1  ;;  %v4495_v12 = vrot.slane %v11899_v44, 1  ;;  %v4317_v60 = vshrl.u32 %v7683_v2, 16  ;;  %v3965_v20 = vld [vmem:[#allocation2 + $0x78] sm:$0xf] }
 0x331   : > { %3870 = vst [vmem:[#allocation2 + $0xb4] sm:$0xf] %v7669_v46  ;;  %3871 = vst [vmem:[#allocation2 + $0xb8] sm:$0xf] %v7670_v35  ;;  %v4315_v0 = vsel %vm715_vm0, %v4310_v31, %v4314_v22  ;;  %v4324_v13 = vshll.u32 %v11936_v32, 16  ;;  %v11945_v62 = vcombine.low %v3961_v42, %v11939_v61  ;;  %v7714_v5 = vcombine.low %v3938_v16, %v11908_v10 }
 0x332   : > { %6278 = vmatmul.mubr.bf16.gmra.mrb[180].mxu0 %v4493_v33  ;;  %v4321_v29 = vrot.slane %v4319_v18, 1  ;;  %v4331_v23 = vshll.u32 %v7684_v9, 16  ;;  %v9517_v44 = vld [vmem:[#allocation2 + $0x74] ss:$0 sps:$4 sm:$0x11]   ;;  %v11956_v53 = vcombine.low %v3903_v11, %v11949_v36  ;;  %v4498_v43 = vrot.slane %v11913_v59, 1 }
 0x333   : > { %6285 = vmatprep.mubr.bf16.mxu0 %v11929_v54  ;;  %v4326_v63 = vrot.slane %v4324_v13, 1  ;;  %v4497_v39 = vrot.slane %v7714_v5, 1  ;;  %v3939_v10 = vld [vmem:[#allocation2 + $0x60] sm:$0xe]  ;;  %v4329_v19 = vshrl.u32 %v7684_v9, 16  ;;  %v4336_v24 = vshll.u32 %v9517_v44, 16 }
 0x334   : > { %6125 = vmatmul.mubr.bf16.gmra.mrb[152].mxu1 %v7681_v38  ;;  %v4496_v38 = vsel %vm972_vm1, %v4494_v45, %v4495_v12  ;;  %v4322_v6 = vor.u32 %v4321_v29, %v4317_v60  ;;  %v4333_v4 = vrot.slane %v4331_v23, 1  ;;  %v11960_v15 = vcombine.low %v3963_v52, %v11953_v56  ;;  %v11965_v46 = vld [vmem:[#allocation2 + $0x88] sm:$0xf]  ;;  %v11968_v59 = vld [vmem:[#allocation2 + $0x80] ss:$0 sps:$4 sm:$0x11]  }
 0x335   : > { %6132 = vmatprep.mubr.bf16.mxu1 %v4315_v0  ;;  %v7715_v50 = vcombine.low %v3939_v10, %v11923_v57  ;;  %v4343_v7 = vshll.u32 %v11956_v53, 16  ;;  %v4338_v35 = vrot.slane %v4336_v24, 1  ;;  %v3966_v49 = vld [vmem:[#allocation2 + $0x7c] sm:$0xf]  ;;  %v11972_v57 = vcombine.low %v3905_v3, %v11965_v46  ;;  %v3940_v17 = vld [vmem:[#allocation2 + $0x6c] sm:$0xe] }
 0x336   : > { %v4327_v40 = vsel %vm715_vm0, %v4322_v6, %v4326_v63  ;;  %v4334_v21 = vor.u32 %v4333_v4, %v4329_v19  ;;  %v4501_v31 = vrot.slane %v11936_v32, 1  ;;  %v4341_v37 = vshrl.u32 %v11956_v53, 16  ;;  %v3907_v29 = vld [vmem:[#allocation2 + $0x90] sm:$0xf]  ;;  %v11982_v16 = vld [vmem:[#allocation2 + $0x94] sm:$0xf] }
 0x337   : > { %v4500_v34 = vrot.slane %v7715_v50, 1  ;;  %v4345_v33 = vrot.slane %v4343_v7, 1  ;;  %v4348_v22 = vshll.u32 %v11968_v59, 16  ;;  %v11977_v18 = vcombine.low %v3965_v20, %v3966_v49  ;;  %v11985_v12 = vld [vmem:[#allocation2 + $0x8c] ss:$0 sps:$4 sm:$0x11]  }
 0x338   : > { %v4339_v26 = vsel %vm715_vm0, %v4334_v21, %v4338_v35  ;;  %v7716_v45 = vcombine.low %v3940_v17, %v11933_v14  ;;  %v4355_v42 = vshll.u32 %v11972_v57, 16  ;;  %v3941_v6 = vld [vmem:[#allocation2 + $0x78] sm:$0xe]  ;;  %v11989_v5 = vcombine.low %v3907_v29, %v11982_v16  ;;  %v3967_v14 = vld [vmem:[#allocation2 + $0x84] sm:$0xf] }
 0x339   : > { %v4346_v0 = vor.u32 %v4345_v33, %v4341_v37  ;;  %v4350_v32 = vrot.slane %v4348_v22, 1  ;;  %v3968_v23 = vld [vmem:[#allocation2 + $0x88] sm:$0xf]  ;;  %v4504_v11 = vrot.slane %v9517_v44, 1  ;;  %v4353_v63 = vshrl.u32 %v11972_v57, 16 }
 0x33a   : > { %6286 = vmatmul.mubr.bf16.gmra.mrb[184].mxu0 %v4496_v38  ;;  %v4503_v13 = vrot.slane %v7716_v45, 1  ;;  %v4357_v38 = vrot.slane %v4355_v42, 1  ;;  %v4360_v52 = vshll.u32 %v11985_v12, 16  ;;  %v11997_v10 = vld [vmem:[#allocation2 + $0x98] ss:$0 sps:$4 sm:$0x11]  }
 0x33b   : > { %6293 = vmatprep.mubr.bf16.mxu0 %v11945_v62  ;;  %v4351_v60 = vsel %vm715_vm0, %v4346_v0, %v4350_v32  ;;  %v12000_v19 = vld [vmem:[#allocation2 + $0x28] sm:$0xf]  ;;  %v3909_v24 = vld [vmem:[#allocation2 + $0x9c] sm:$0xf]  ;;  %v12002_v44 = vld [vmem:[#allocation2 + $0xa0] sm:$0xf] }
 0x33c   : > { %6133 = vmatmul.mubr.bf16.gmra.mrb[156].mxu1 %v7682_v25  ;;  %v4499_v25 = vsel %vm972_vm1, %v4497_v39, %v4498_v43  ;;  %v11995_v39 = vcombine.low %v3967_v14, %v3968_v23  ;;  %v4358_v4 = vor.u32 %v4357_v38, %v4353_v63  ;;  %v4367_v43 = vshll.u32 %v11989_v5, 16  ;;  %v3969_v7 = vld [vmem:[#allocation2 + $0x90] sm:$0xf]  ;;  %v3970_v35 = vld [vmem:[#allocation2 + $0x94] sm:$0xf] }
 0x33d   : > { %6140 = vmatprep.mubr.bf16.mxu1 %v4327_v40  ;;  %v7717_v40 = vcombine.low %v3941_v6, %v11949_v36  ;;  %v4362_v21 = vrot.slane %v4360_v52, 1  ;;  %v12005_v36 = vld [vmem:[#allocation2 + $0x2c] ss:$0 sps:$4 sm:$0x11]   ;;  %v4507_v49 = vrot.slane %v11968_v59, 1  ;;  %v4365_v17 = vshrl.u32 %v11989_v5, 16 }
 0x33e   : > { %v4369_v20 = vrot.slane %v4367_v43, 1  ;;  %v3942_v33 = vld [vmem:[#allocation2 + $0x84] sm:$0xe]  ;;  %v3911_v29 = vld [vmem:[#allocation2 + $0xa8] sm:$0xf]  ;;  %v4510_v43 = vrot.slane %v11985_v12, 1 }
 0x33f   : > { %v4506_v50 = vrot.slane %v7717_v40, 1  ;;  %v4363_v3 = vsel %vm715_vm0, %v4358_v4, %v4362_v21  ;;  %v7718_v45 = vcombine.low %v3942_v33, %v11965_v46  ;;  %v12025_v32 = vld [vmem:[#allocation2 + $0xac] sm:$0xf]  ;;  %v12030_v38 = vld [vmem:[#allocation2 + $0xa4] ss:$0 sps:$4 sm:$0x11]  }
 0x340   : > { %v4370_v0 = vor.u32 %v4369_v20, %v4365_v17  ;;  %v3971_v14 = vld [vmem:[#allocation2 + $0x9c] sm:$0xf]  ;;  %v3972_v63 = vld [vmem:[#allocation2 + $0xa0] sm:$0xf]  ;;  %v12039_v40 = vcombine.low %v3911_v29, %v12025_v32  ;;  %v3943_v4 = vld [vmem:[#allocation2 + $0x90] sm:$0xe] }
 0x341   : > { %v4508_v22 = vsel %vm972_vm1, %v4506_v50, %v4507_v49  ;;  %v12046_v21 = vcombine.low %v3971_v14, %v3972_v63  ;;  %v12051_v20 = vld [vmem:[#allocation2 + $0xb8] sm:$0xf]  ;;  %v3973_v17 = vld [vmem:[#allocation2 + $0xa8] sm:$0xf] }
 0x342   : > { %6294 = vmatmul.mubr.bf16.gmra.mrb[188].mxu0 %v4499_v25  ;;  %v4061_v25 = vld [vmem:[#allocation2 + $0x24] sm:$0xe] }
 0x343   : > { %6301 = vmatprep.mubr.bf16.mxu0 %v11960_v15 }
 0x344   : > { %6141 = vmatmul.mubr.bf16.gmra.mrb[160].mxu1 %v7683_v2  ;;  %v4502_v2 = vsel %vm972_vm1, %v4500_v34, %v4501_v31  ;;  %v7804_v34 = vcombine.low %v4061_v25, %v12000_v19  ;;  %v4372_v31 = vshll.u32 %v11997_v10, 16  ;;  %v4384_v25 = vshll.u32 %v12030_v38, 16 }
 0x345   : > { %6148 = vmatprep.mubr.bf16.mxu1 %v4339_v26  ;;  %v12010_v26 = vcombine.low %v3909_v24, %v12002_v44 }
 0x346   : > { %v5407_v37 = vrot.slane %v7804_v34, 1  ;;  %v4386_v12 = vrot.slane %v4384_v25, 1  ;;  %v9551_v34 = vld [vmem:[#allocation2 + $0xb0] ss:$0 sps:$4 sm:$0x11]  }
 0x347   : > { %v4379_v42 = vshll.u32 %v12010_v26, 16  ;;  %v4377_v24 = vshrl.u32 %v12010_v26, 16  ;;  %v3976_v25 = vld [vmem:[#allocation2 + $0xb8] sm:$0xf] }
 0x349   : > { %v4381_v52 = vrot.slane %v4379_v42, 1 }
 0x34a   : > { %6302 = vmatmul.mubr.bf16.gmra.mrb[192].mxu0 %v4502_v2  ;;  %v12018_v2 = vcombine.low %v3969_v7, %v3970_v35  ;;  %v7719_v7 = vcombine.low %v3943_v4, %v11982_v16  ;;  %v3913_v35 = vld [vmem:[#allocation2 + $0xb4] sm:$0xf]  ;;  %v3945_v4 = vld [vmem:[#allocation2 + $0xa8] sm:$0xe] }
 0x34b   : > { %6309 = vmatprep.mubr.bf16.mxu0 %v11977_v18  ;;  %v4382_v50 = vor.u32 %v4381_v52, %v4377_v24  ;;  %v12059_v16 = vcombine.low %v3913_v35, %v12051_v20  ;;  %v3975_v24 = vld [vmem:[#allocation2 + $0xb4] sm:$0xf] }
 0x34c   : > { %6149 = vmatmul.mubr.bf16.gmra.mrb[164].mxu1 %v7684_v9  ;;  %v4505_v9 = vsel %vm972_vm1, %v4503_v13, %v4504_v11  ;;  %v4374_v13 = vrot.slane %v4372_v31, 1  ;;  %v4509_v11 = vrot.slane %v7718_v45, 1  ;;  %v4512_v33 = vrot.slane %v7719_v7, 1  ;;  %v12056_v31 = vld [vmem:[#allocation2 + $0xac] sm:$0xf] }
 0x34d   : > { %6156 = vmatprep.mubr.bf16.mxu1 %v4351_v60  ;;  %v12027_v60 = vpop.f32.mrb[128].mxu1  ;;  %v4387_v49 = vsel %vm715_vm0, %v4382_v50, %v4386_v12  ;;  %13008 = vst [vmem:[#allocation35_spill] sm:$0xff] %v12056_v31  ;;  %v4396_v45 = vshll.u32 %v9551_v34, 16  ;;  %v12064_v42 = vcombine.low %v3973_v17, %v12056_v31  ;;  %v4403_v14 = vshll.u32 %v12059_v16, 16  ;;  %v4013_v7 = vld [vmem:[#allocation2 + $0x1c] sm:$0xf] }
 0x34e   : > { %v12032_v6 = vpop.f32.mrb[129].mxu1  ;;  %v4375_v23 = vsel %vm715_vm0, %v4370_v0, %v4374_v13  ;;  %v4389_v0 = vshrl.u32 %v12039_v40, 16  ;;  %v12078_v35 = vcombine.low %v3975_v24, %v3976_v25  ;;  %v7721_v12 = vcombine.low %v3945_v4, %v12025_v32 }
 0x34f   : > { %v12034_v46 = vpop.f32.mrb[130].mxu1  ;;  %13009 = vst [vmem:[#allocation36_spill] sm:$0xff] %v12064_v42  ;;  %v4405_v52 = vrot.slane %v4403_v14, 1  ;;  %v4014_v14 = vld [vmem:[#allocation2 + $0x24] sm:$0xf] }
 0x350   : > { %13010 = vst [vmem:[#allocation39_spill] sm:$0xff] %v12078_v35  ;;  %v12093_v25 = vcombine.low %v4014_v14, %v12000_v19 }
 0x352   : > { %6310 = vmatmul.mubr.bf16.gmra.mrb[196].mxu0 %v4505_v9  ;;  %v12041_v9 = vpop.f32.mrb[131].mxu1 }
 0x353   : > { %6317 = vmatprep.mubr.bf16.mxu0 %v11995_v39 }
 0x354   : > { %6157 = vmatmul.mubr.bf16.gmra.mrb[168].mxu1 %v11956_v53  ;;  %v5408_v53 = vrot.slane %v12005_v36, 1 }
 0x355   : > { %6164 = vmatprep.mubr.bf16.mxu1 %v4363_v3  ;;  %v4391_v3 = vshll.u32 %v12039_v40, 16 }
 0x356   : > { %v12023_v59 = vsel %vm972_vm1, %v5407_v37, %v5408_v53  ;;  %v3944_v53 = vld [vmem:[#allocation2 + $0x9c] sm:$0xe] }
 0x357   : > { %13007 = vst [vmem:[#allocation34_spill] sm:$0xff] %v12023_v59  ;;  %v4393_v37 = vrot.slane %v4391_v3, 1  ;;  %v7720_v13 = vcombine.low %v3944_v53, %v12002_v44  ;;  %v4516_v44 = vrot.slane %v12030_v38, 1  ;;  %v9651_v38 = vld [vmem:[#allocation2 + $0x10] sm:$0xf] }
 0x358   : > { %v4066_v59 = vld [vmem:[#allocation2 + $0x60] sm:$0xe] }
 0x359   : > { %v4394_v29 = vor.u32 %v4393_v37, %v4389_v0  ;;  %v4515_v63 = vrot.slane %v7720_v13, 1  ;;  %v3977_v0 = vld [vmem:[#allocation2 + $0xc0] sm:$0xf]  ;;  %v9569_v13 = vld [vmem:[#allocation2 + $0x14] ss:$0 sps:$4 sm:$0x11]  }
 0x35a   : > { %6318 = vmatmul.mubr.bf16.gmra.mrb[200].mxu0 %v4508_v22  ;;  %v4513_v22 = vrot.slane %v11997_v10, 1 }
 0x35b   : > { %6325 = vmatprep.mubr.bf16.mxu0 %v12018_v2  ;;  %v4517_v3 = vsel %vm972_vm1, %v4515_v63, %v4516_v44 }
 0x35c   : > { %6165 = vmatmul.mubr.bf16.gmra.mrb[172].mxu1 %v11972_v57  ;;  %v4511_v57 = vsel %vm972_vm1, %v4509_v11, %v4510_v43  ;;  %v12070_v11 = vld [vmem:[#allocation2 + $0xbc] ss:$0 sps:$4 sm:$0x11]   ;;  %v4012_v43 = vld [vmem:[#allocation2 + $0x18] sm:$0xf] }
 0x35d   : > { %6172 = vmatprep.mubr.bf16.mxu1 %v4375_v23  ;;  %v4398_v23 = vrot.slane %v4396_v45, 1  ;;  %v4408_v50 = vshll.u32 %v12070_v11, 16  ;;  %v3978_v45 = vld [vmem:[#allocation2 + $0xc4] sm:$0xf] }
 0x35f   : > { %v4399_v10 = vsel %vm715_vm0, %v4394_v29, %v4398_v23  ;;  %v4410_v17 = vrot.slane %v4408_v50, 1  ;;  %v4519_v29 = vrot.slane %v9551_v34, 1  ;;  %v4687_v23 = vshll.u32 %v11680_v47, 16 }
 0x360   : > { %v4941_v34 = vrot.slane %v9569_v13, 1 }
 0x361   : > { %v4689_v44 = vrot.slane %v4687_v23, 1 }
 0x362   : > { %6326 = vmatmul.mubr.bf16.gmra.mrb[204].mxu0 %v4511_v57  ;;  %v4401_v57 = vshrl.u32 %v12059_v16, 16 }
 0x363   : > { %6333 = vmatprep.mubr.bf16.mxu0 %v12046_v21 }
 0x364   : > { %6173 = vmatmul.mubr.bf16.gmra.mrb[176].mxu1 %v11989_v5  ;;  %v4514_v5 = vsel %vm972_vm1, %v4512_v33, %v4513_v22  ;;  %v12081_v33 = vcombine.low %v4012_v43, %v4013_v7  ;;  %v4518_v22 = vrot.slane %v7721_v12, 1  ;;  %v3996_v43 = vld [vmem:[#allocation2 + $0x18] sm:$0xe]  ;;  %v4685_v7 = vshrl.u32 %v11680_v47, 16 }
 0x365   : > { %6180 = vmatprep.mubr.bf16.mxu1 %v4387_v49  ;;  %v3995_v49 = vld [vmem:[#allocation2 + $0xc] sm:$0xe] }
 0x366   : > { %v7755_v37 = vcombine.low %v3995_v49, %v9651_v38  ;;  %v5151_v32 = vshll.u32 %v12081_v33, 16  ;;  %v4520_v63 = vsel %vm972_vm1, %v4518_v22, %v4519_v29  ;;  %v4692_v49 = vshll.u32 %v9569_v13, 16  ;;  %v4016_v38 = vld [vmem:[#allocation2 + $0x30] sm:$0xf]  ;;  %v3997_v29 = vld [vmem:[#allocation2 + $0x24] sm:$0xe] }
 0x367   : > { %v9577_v22 = vld [vmem:[#allocation2 + $0x20] ss:$0 sps:$4 sm:$0x11]  }
 0x368   : > { %v4940_v4 = vrot.slane %v7755_v37, 1  ;;  %v5153_v24 = vrot.slane %v5151_v32, 1  ;;  %v4017_v37 = vld [vmem:[#allocation2 + $0x34] sm:$0xf]  ;;  %v4694_v14 = vrot.slane %v4692_v49, 1  ;;  %v4711_v49 = vshll.u32 %v11786_v55, 16 }
 0x369   : > { %v12104_v32 = vcombine.low %v4016_v38, %v4017_v37 }
 0x36a   : > { %6334 = vmatmul.mubr.bf16.gmra.mrb[208].mxu0 %v4514_v5  ;;  %v3946_v5 = vld [vmem:[#allocation2 + $0xb4] sm:$0xe]  ;;  %v4942_v12 = vsel %vm972_vm1, %v4940_v4, %v4941_v34 }
 0x36b   : > { %6341 = vmatprep.mubr.bf16.mxu0 %v12064_v42  ;;  %v12246_v42 = vld [vmem:[#allocation2 + $0xac] sm:$0xf] }
 0x36c   : > { %6181 = vmatmul.mubr.bf16.gmra.mrb[180].mxu1 %v12010_v26  ;;  %v4406_v26 = vor.u32 %v4405_v52, %v4401_v57  ;;  %v12089_v52 = vcombine.low %v3977_v0, %v3978_v45  ;;  %v5149_v57 = vshrl.u32 %v12081_v33, 16  ;;  %v4699_v0 = vshll.u32 %v11711_v8, 16 }
 0x36d   : > { %6188 = vmatprep.mubr.bf16.mxu1 %v4399_v10  ;;  %v9573_v10 = vld [vmem:[#allocation2 + $0x20] ss:$0 sps:$4 sm:$0x11]   ;;  %v4690_v45 = vor.u32 %v4689_v44, %v4685_v7  ;;  %v9653_v44 = vld [vmem:[#allocation2 + $0x28] sm:$0xf]  ;;  %v5175_v7 = vshll.u32 %v12104_v32, 16 }
 0x36e   : > { %v4411_v53 = vsel %vm715_vm0, %v4406_v26, %v4410_v17  ;;  %13011 = vst [vmem:[#allocation38_spill] sm:$0xff] %v12089_v52  ;;  %v5156_v50 = vshll.u32 %v9573_v10, 16  ;;  %v5154_v19 = vor.u32 %v5153_v24, %v5149_v57  ;;  %v5163_v17 = vshll.u32 %v12093_v25, 16 }
 0x36f   : > { %v4944_v10 = vrot.slane %v9577_v22, 1  ;;  %v4695_v4 = vsel %vm715_vm0, %v4690_v45, %v4694_v14  ;;  %v5168_v24 = vshll.u32 %v12005_v36, 16  ;;  %v4701_v34 = vrot.slane %v4699_v0, 1  ;;  %v12128_v0 = vld [vmem:[#allocation2 + $0x4c] sm:$0xf]  ;;  %v9600_v14 = vld [vmem:[#allocation11 + $0x218] sm:$0xff]  }
 0x370   : > { %v5158_v47 = vrot.slane %v5156_v50, 1  ;;  %v5165_v23 = vrot.slane %v5163_v17, 1  ;;  %v7757_v57 = vcombine.low %v3997_v29, %v9653_v44  ;;  %v12122_v36 = vadd.f32 %v12041_v9, %v12034_v46  ;;  %v9592_v17 = vld [vmem:[#allocation11 + $0x210] sm:$0xff]   ;;  %v12132_v46 = vld [vmem:[#allocation2 + $0x48] sm:$0xe] }
 0x371   : > { %v5170_v38 = vrot.slane %v5168_v24, 1  ;;  %v5177_v45 = vrot.slane %v5175_v7, 1  ;;  %v4063_v7 = vld [vmem:[#allocation2 + $0x3c] sm:$0xe] }
 0x372   : > { %6342 = vmatmul.mubr.bf16.gmra.mrb[212].mxu0 %v4517_v3  ;;  %v9652_v3 = vld [vmem:[#allocation2 + $0x1c] sm:$0xf]  ;;  %v5159_v13 = vsel %vm715_vm0, %v5154_v19, %v5158_v47  ;;  %v9581_v19 = vld [vmem:[#allocation2 + $0x2c] ss:$0 sps:$4 sm:$0x11]   ;;  %v4946_v9 = vrot.slane %v7757_v57, 1 }
 0x373   : > { %6349 = vmatprep.mubr.bf16.mxu0 %v12078_v35  ;;  %v7756_v26 = vcombine.low %v3996_v43, %v9652_v3  ;;  %v5161_v43 = vshrl.u32 %v12093_v25, 16  ;;  %v4018_v3 = vld [vmem:[#allocation2 + $0x3c] sm:$0xf]  ;;  %v4716_v24 = vshll.u32 %v9581_v19, 16  ;;  %v4709_v57 = vshrl.u32 %v11786_v55, 16 }
 0x374   : > { %6189 = vmatmul.mubr.bf16.gmra.mrb[184].mxu1 %v12039_v40  ;;  %v7722_v40 = vcombine.low %v3946_v5, %v12051_v20  ;;  %v3999_v47 = vld [vmem:[#allocation2 + $0x3c] sm:$0xe]  ;;  %v12226_v35 = vld [vmem:[#allocation2 + $0x94] sm:$0xf] }
 0x375   : > { %6196 = vmatprep.mubr.bf16.mxu1 %v4411_v53  ;;  %v4522_v53 = vrot.slane %v12070_v11, 1  ;;  %v12109_v11 = vadd.f32 %v12032_v6, %v12027_v60  ;;  %v5166_v60 = vor.u32 %v5165_v23, %v5161_v43  ;;  %v4697_v6 = vshrl.u32 %v11711_v8, 16 }
 0x376   : > { %v4521_v20 = vrot.slane %v7722_v40, 1  ;;  %v3998_v40 = vld [vmem:[#allocation2 + $0x30] sm:$0xe]  ;;  %v4723_v8 = vshll.u32 %v11824_v48, 16  ;;  %v4947_v23 = vrot.slane %v9581_v19, 1 }
 0x377   : > { %v4702_v37 = vor.u32 %v4701_v34, %v4697_v6 }
 0x378   : > { %v4523_v5 = vsel %vm972_vm1, %v4521_v20, %v4522_v53  ;;  %v4704_v20 = vshll.u32 %v9577_v22, 16  ;;  %v7758_v22 = vcombine.low %v3998_v40, %v11816_v58  ;;  %v4713_v58 = vrot.slane %v4711_v49, 1  ;;  %v12139_v40 = vld [vmem:[#allocation2 + $0x44] ss:$0 sps:$4 sm:$0x11]  }
 0x37a   : > { %6350 = vmatmul.mubr.bf16.gmra.mrb[216].mxu0 %v4520_v63  ;;  %v9584_v63 = vld [vmem:[#allocation11 + $0x208] sm:$0xff]   ;;  %v4714_v49 = vor.u32 %v4713_v58, %v4709_v57 }
 0x37b   : > { %6357 = vmatprep.mubr.bf16.mxu0 %v12089_v52 }
 0x37c   : > { %6197 = vmatmul.mubr.bf16.gmra.mrb[188].mxu1 %v12059_v16  ;;  %v4943_v16 = vrot.slane %v7756_v26, 1  ;;  %v12116_v26 = vld [vmem:[#allocation2 + $0x40] sm:$0xf] }
 0x37d   : > { %6398 = vmatprep.mubr.bf16.mxu1 %v4942_v12  ;;  %v9583_v12 = vld [vmem:[#allocation2 + $0x38] ss:$0 sps:$4 sm:$0x11]   ;;  %v12126_v53 = vcombine.low %v4018_v3, %v12116_v26  ;;  %v7759_v3 = vcombine.low %v3999_v47, %v11866_v41  ;;  %v4718_v41 = vrot.slane %v4716_v24, 1  ;;  %v4725_v47 = vrot.slane %v4723_v8, 1 }
 0x37e   : > { %v4945_v50 = vsel %vm972_vm1, %v4943_v16, %v4944_v10  ;;  %v4706_v16 = vrot.slane %v4704_v20, 1  ;;  %v5180_v29 = vshll.u32 %v9583_v12, 16  ;;  %v5173_v10 = vshrl.u32 %v12104_v32, 16  ;;  %v12153_v12 = vld [vmem:[#allocation2 + $0x50] ss:$0 sps:$4 sm:$0x11]  }
 0x37f   : > { %v5187_v34 = vshll.u32 %v12126_v53, 16  ;;  %v5204_v8 = vshll.u32 %v12153_v12, 16  ;;  %v4065_v24 = vld [vmem:[#allocation2 + $0x54] sm:$0xe] }
 0x380   : > { %v4707_v43 = vsel %vm715_vm0, %v4702_v37, %v4706_v16  ;;  %v5178_v44 = vor.u32 %v5177_v45, %v5173_v10  ;;  %v5182_v20 = vrot.slane %v5180_v29, 1  ;;  %v9608_v37 = vld [vmem:[#allocation11 + $0x220] sm:$0xff]   ;;  %v12159_v45 = vld [vmem:[#allocation2 + $0x54] sm:$0xe]  ;;  %v5185_v16 = vshrl.u32 %v12126_v53, 16 }
 0x381   : > { %v4721_v10 = vshrl.u32 %v11824_v48, 16  ;;  %v9616_v48 = vld [vmem:[#allocation11 + $0x228] sm:$0xff]  }
 0x382   : > { %6358 = vmatmul.mubr.bf16.gmra.mrb[220].mxu0 %v4523_v5  ;;  %v5171_v5 = vsel %vm715_vm0, %v5166_v60, %v5170_v38  ;;  %v5192_v38 = vshll.u32 %v12139_v40, 16  ;;  %v4071_v60 = vld [vmem:[#allocation2 + $0x9c] sm:$0xe] }
 0x383   : > { %6559 = vmatprep.mubr.bf16.mxu0 %v5159_v13  ;;  %v12136_v13 = vld [vmem:[#allocation2 + $0x38] ss:$0 sps:$4 sm:$0x11]  }
 0x384   : > { %6399 = vmatmul.mubr.bf16.vlgmr.msra.gmra.mrb[192].mxu1 %v4695_v4  ;;  %v4950_v19 = vrot.slane %v12136_v13, 1  ;;  %v4728_v58 = vshll.u32 %v12136_v13, 16 }
 0x385   : > { %6406 = vmatprep.mubr.bf16.mxu1 %v4945_v50  ;;  %9051 = vmatpush3.bf16.msra.mxu1 %v11826_v30  ;;  %v4020_v30 = vld [vmem:[#allocation2 + $0x48] sm:$0xf]  ;;  %v4949_v50 = vrot.slane %v7758_v22, 1  ;;  %v7806_v22 = vcombine.low %v4063_v7, %v12116_v26  ;;  %v4952_v26 = vrot.slane %v7759_v3, 1  ;;  %v12172_v7 = vld [vmem:[#allocation2 + $0x70] sm:$0xf]  ;;  %v4726_v3 = vor.u32 %v4725_v47, %v4721_v10 }
 0x386   : > { %9052 = vmatprep.subr.bf16.mxu1 %v9584_v63  ;;  %v12142_v4 = vcombine.low %v4020_v30, %v12128_v0  ;;  %v5189_v30 = vrot.slane %v5187_v34, 1  ;;  %v4719_v34 = vsel %vm715_vm0, %v4714_v49, %v4718_v41  ;;  %v4069_v41 = vld [vmem:[#allocation2 + $0x84] sm:$0xe]  ;;  %v12185_v10 = vld [vmem:[#allocation2 + $0xa0] sm:$0xf] }
 0x387   : > { %v12174_v13 = vrot.slane %v7806_v22, 1  ;;  %v4730_v22 = vrot.slane %v4728_v58, 1  ;;  %v4073_v58 = vld [vmem:[#allocation2 + $0xb4] sm:$0xe] }
 0x388   : > { %v5199_v55 = vshll.u32 %v12142_v4, 16  ;;  %v5197_v49 = vshrl.u32 %v12142_v4, 16 }
 0x389   : > { %9053 = vmatpush3.bf16.msra.mxu1 %v9584_v63  ;;  %v4948_v63 = vsel %vm972_vm1, %v4946_v9, %v4947_v23  ;;  %v9589_v9 = vld [vmem:[#allocation2 + $0x44] ss:$0 sps:$4 sm:$0x11]   ;;  %v4023_v23 = vld [vmem:[#allocation2 + $0x58] sm:$0xf] }
 0x38a   : > { %6560 = vmatmul.mubr.bf16.vlgmr.msra.gmra.mrb[224].mxu0 %v12081_v33  ;;  %9054 = vmatprep.subr.bf16.mxu1 %v9592_v17  ;;  %v4735_v33 = vshll.u32 %v11878_v28, 16 }
 0x38b   : > { %6567 = vmatprep.mubr.bf16.mxu0 %v5171_v5  ;;  %v5183_v5 = vsel %vm715_vm0, %v5178_v44, %v5182_v20  ;;  %v5201_v44 = vrot.slane %v5199_v55, 1  ;;  %v4953_v20 = vrot.slane %v9589_v9, 1  ;;  %v7808_v55 = vcombine.low %v4065_v24, %v4023_v23 }
 0x38c   : > { %6407 = vmatmul.mubr.bf16.gmra.mrb[196].mxu1 %v4707_v43  ;;  %v4022_v43 = vld [vmem:[#allocation2 + $0x54] sm:$0xf]  ;;  %v4737_v57 = vrot.slane %v4735_v33, 1  ;;  %v4733_v33 = vshrl.u32 %v11878_v28, 16  ;;  %v4024_v28 = vld [vmem:[#allocation2 + $0x60] sm:$0xf] }
 0x38d   : > { %6414 = vmatprep.mubr.bf16.mxu1 %v4948_v63  ;;  %9055 = vmatpush3.bf16.msra.mxu1 %v9592_v17  ;;  %v4951_v17 = vsel %vm972_vm1, %v4949_v50, %v4950_v19  ;;  %v5194_v63 = vrot.slane %v5192_v38, 1  ;;  %v12170_v50 = vld [vmem:[#allocation2 + $0x50] ss:$0 sps:$4 sm:$0x11]   ;;  %v4740_v38 = vshll.u32 %v9589_v9, 16  ;;  %v4954_v47 = vsel %vm972_vm1, %v4952_v26, %v4953_v20 }
 0x38e   : > { %9056 = vmatprep.subr.bf16.mxu1 %v9600_v14  ;;  %v12176_v19 = vld [vmem:[#allocation2 + $0x5c] ss:$0 sps:$4 sm:$0x11]   ;;  %v4738_v29 = vor.u32 %v4737_v57, %v4733_v33  ;;  %v12187_v6 = vcombine.low %v4022_v43, %v4023_v23  ;;  %v12189_v9 = vld [vmem:[#allocation2 + $0x74] ss:$0 sps:$4 sm:$0x11]  }
 0x38f   : > { %v4025_v23 = vld [vmem:[#allocation2 + $0x64] sm:$0xf]  ;;  %v12201_v43 = vld [vmem:[#allocation2 + $0x8c] ss:$0 sps:$4 sm:$0x11]   ;;  %v4742_v20 = vrot.slane %v4740_v38, 1 }
 0x390   : > { %v12205_v33 = vld [vmem:[#allocation2 + $0xa4] ss:$0 sps:$4 sm:$0x11]   ;;  %v12216_v38 = vld [vmem:[#allocation2 + $0xbc] ss:$0 sps:$4 sm:$0x11]   ;;  %v12224_v52 = vcombine.low %v4024_v28, %v4025_v23 }
 0x391   : > { %9057 = vmatpush3.bf16.msra.mxu1 %v9600_v14  ;;  %v4067_v14 = vld [vmem:[#allocation2 + $0x6c] sm:$0xe]  ;;  %v5444_v31 = vrot.slane %v12216_v38, 1 }
 0x392   : > { %6568 = vmatmul.mubr.bf16.gmra.mrb[228].mxu0 %v12093_v25  ;;  %9058 = vmatprep.subr.bf16.mxu1 %v9608_v37  ;;  %v5190_v25 = vor.u32 %v5189_v30, %v5185_v16  ;;  %v5206_v16 = vrot.slane %v5204_v8, 1  ;;  %v7810_v24 = vcombine.low %v4067_v14, %v12172_v7  ;;  %v9624_v30 = vld [vmem:[#allocation11 + $0x230] sm:$0xff]   ;;  %v13012_v8 = vcombine.low %v12132_v46, %v11890_v1 }
 0x393   : > { %6575 = vmatprep.mubr.bf16.mxu0 %v5183_v5  ;;  %v12178_v5 = vld [vmem:[#allocation2 + $0x88] sm:$0xf]  ;;  %v5420_v46 = vrot.slane %v12176_v19, 1  ;;  %v12222_v14 = vld [vmem:[#allocation2 + $0x80] ss:$0 sps:$4 sm:$0x11]  }
 0x394   : > { %6415 = vmatmul.mubr.bf16.gmra.mrb[200].mxu1 %v4719_v34  ;;  %v5202_v34 = vor.u32 %v5201_v44, %v5197_v49  ;;  %v5195_v26 = vsel %vm715_vm0, %v5190_v25, %v5194_v63  ;;  %v12199_v44 = vrot.slane %v13012_v8, 1  ;;  %v7812_v57 = vcombine.low %v4069_v41, %v12178_v5  ;;  %v4064_v25 = vld [vmem:[#allocation2 + $0x48] sm:$0xe]  ;;  %v12214_v41 = vld [vmem:[#allocation2 + $0x7c] sm:$0xf] }
 0x395   : > { %6422 = vmatprep.mubr.bf16.mxu1 %v4951_v17  ;;  %9059 = vmatpush3.bf16.msra.mxu1 %v9608_v37  ;;  %v12192_v17 = vld [vmem:[#allocation2 + $0xb8] sm:$0xf]  ;;  %v4731_v37 = vsel %vm715_vm0, %v4726_v3, %v4730_v22  ;;  %v5419_v49 = vrot.slane %v7808_v55, 1  ;;  %v7814_v63 = vcombine.low %v4071_v60, %v12185_v10  ;;  %v12212_v22 = vld [vmem:[#allocation2 + $0x68] ss:$0 sps:$4 sm:$0x11]  }
 0x396   : > { %9060 = vmatprep.subr.bf16.mxu1 %v9616_v48  ;;  %v7816_v55 = vcombine.low %v4073_v58, %v12192_v17  ;;  %v5207_v60 = vsel %vm715_vm0, %v5202_v34, %v5206_v16  ;;  %v5211_v8 = vshll.u32 %v12187_v6, 16  ;;  %v5425_v1 = vrot.slane %v7810_v24, 1  ;;  %v9632_v3 = vld [vmem:[#allocation11 + $0x238] sm:$0xff]   ;;  %v4068_v34 = vld [vmem:[#allocation2 + $0x78] sm:$0xe] }
 0x397   : > { %v13013_v58 = vrot.slane %v12139_v40, 1  ;;  %v5426_v24 = vrot.slane %v12189_v9, 1  ;;  %v5437_v28 = vrot.slane %v7814_v63, 1  ;;  %v12242_v40 = vld [vmem:[#allocation2 + $0xb0] ss:$0 sps:$4 sm:$0x11]  }
 0x398   : > { %v4072_v63 = vld [vmem:[#allocation2 + $0xa8] sm:$0xe] }
 0x399   : > { %9061 = vmatpush3.bf16.msra.mxu1 %v9616_v48  ;;  %v5431_v48 = vrot.slane %v7812_v57, 1  ;;  %v12232_v16 = vsel %vm972_vm1, %v12174_v13, %v13013_v58  ;;  %v12240_v57 = vsel %vm972_vm1, %v5419_v49, %v5420_v46  ;;  %v5443_v13 = vrot.slane %v7816_v55, 1  ;;  %v4074_v55 = vld [vmem:[#allocation2 + $0xc0] sm:$0xe] }
 0x39a   : > { %6576 = vmatmul.mubr.bf16.gmra.mrb[232].mxu0 %v12104_v32  ;;  %v4743_v32 = vsel %vm715_vm0, %v4738_v29, %v4742_v20  ;;  %9062 = vmatprep.subr.bf16.mxu1 %v9624_v30  ;;  %13014 = vst [vmem:[#allocation40_spill] sm:$0xff] %v12232_v16  ;;  %v7807_v29 = vcombine.low %v4064_v25, %v12128_v0  ;;  %v12237_v20 = vld [vmem:[#allocation2 + $0x98] ss:$0 sps:$4 sm:$0x11]   ;;  %13015 = vst [vmem:[#allocation42_spill] sm:$0xff] %v12240_v57  ;;  %v5417_v0 = vrot.slane %v12153_v12, 1 }
 0x39b   : > { %6583 = vmatprep.mubr.bf16.mxu0 %v5195_v26  ;;  %v5432_v26 = vrot.slane %v12201_v43, 1  ;;  %v7809_v25 = vcombine.low %v4066_v59, %v4025_v23  ;;  %v5438_v16 = vrot.slane %v12205_v33, 1  ;;  %v12250_v49 = vsel %vm972_vm1, %v5425_v1, %v5426_v24 }
 0x39c   : > { %6423 = vmatmul.mubr.bf16.gmra.mrb[204].mxu1 %v4731_v37  ;;  %v5416_v58 = vrot.slane %v7807_v29, 1  ;;  %v4070_v37 = vld [vmem:[#allocation2 + $0x90] sm:$0xe]  ;;  %v5423_v12 = vrot.slane %v12212_v22, 1  ;;  %v5429_v1 = vrot.slane %v12222_v14, 1 }
 0x39d   : > { %6430 = vmatprep.mubr.bf16.mxu1 %v4954_v47  ;;  %9063 = vmatpush3.bf16.msra.mxu1 %v9624_v30  ;;  %v7811_v47 = vcombine.low %v4068_v34, %v12214_v41  ;;  %v12253_v30 = vld [vmem:[#allocation2 + $0xc4] sm:$0xf]  ;;  %v5422_v59 = vrot.slane %v7809_v25, 1  ;;  %v12260_v23 = vsel %vm972_vm1, %v5431_v48, %v5432_v26  ;;  %v12262_v29 = vld [vmem:[#allocation2 + $0xc8] ss:$0 sps:$4 sm:$0x11]   ;;  %v7813_v34 = vcombine.low %v4070_v37, %v12226_v35 }
 0x39e   : > { %9064 = vmatprep.subr.bf16.mxu1 %v9632_v3  ;;  %v12256_v46 = vsel %vm972_vm1, %v5416_v58, %v5417_v0  ;;  %v12267_v24 = vsel %vm972_vm1, %v5437_v28, %v5438_v16  ;;  %v5213_v58 = vrot.slane %v5211_v8, 1  ;;  %v7815_v48 = vcombine.low %v4072_v63, %v12246_v42 }
 0x39f   : > { %v5428_v57 = vrot.slane %v7811_v47, 1  ;;  %v12271_v0 = vsel %vm972_vm1, %v5422_v59, %v5423_v12  ;;  %v12275_v26 = vsel %vm972_vm1, %v5443_v13, %v5444_v31  ;;  %v5434_v37 = vrot.slane %v7813_v34, 1 }
 0x3a0   : > { %v5435_v16 = vrot.slane %v12237_v20, 1  ;;  %v7817_v28 = vcombine.low %v4074_v55, %v12253_v30  ;;  %v5440_v47 = vrot.slane %v7815_v48, 1  ;;  %v5441_v63 = vrot.slane %v12242_v40, 1  ;;  %v4026_v48 = vld [vmem:[#allocation2 + $0x6c] sm:$0xf] }
 0x3a1   : > { %9065 = vmatpush3.bf16.msra.mxu1 %v9632_v3  ;;  %v12278_v25 = vsel %vm972_vm1, %v5428_v57, %v5429_v1  ;;  %v13016_v3 = vshll.u32 %v11904_v51, 16  ;;  %v13017_v31 = vrot.slane %v12170_v50, 1  ;;  %v5447_v59 = vrot.slane %v12262_v29, 1 }
 0x3a2   : > { %6584 = vmatmul.mubr.bf16.gmra.mrb[236].mxu0 %v12126_v53  ;;  %v5209_v53 = vshrl.u32 %v12187_v6, 16  ;;  %v12291_v57 = vsel %vm972_vm1, %v5434_v37, %v5435_v16  ;;  %v5446_v13 = vrot.slane %v7817_v28, 1  ;;  %v4752_v55 = vshll.u32 %v12170_v50, 16 }
 0x3a3   : > { %6591 = vmatprep.mubr.bf16.mxu0 %v5207_v60  ;;  %v4749_v8 = vrot.slane %v13016_v3, 1  ;;  %v4957_v60 = vsel %vm972_vm1, %v12199_v44, %v13017_v31  ;;  %v5223_v1 = vshll.u32 %v12224_v52, 16  ;;  %v12297_v34 = vsel %vm972_vm1, %v5440_v47, %v5441_v63  ;;  %v4002_v31 = vld [vmem:[#allocation2 + $0x60] sm:$0xe] }
 0x3a4   : > { %6431 = vmatmul.mubr.bf16.gmra.mrb[208].mxu1 %v4743_v32  ;;  %v5214_v12 = vor.u32 %v5213_v58, %v5209_v53  ;;  %v9597_v32 = vld [vmem:[#allocation2 + $0x5c] ss:$0 sps:$4 sm:$0x11]   ;;  %v12300_v3 = vsel %vm972_vm1, %v5446_v13, %v5447_v59  ;;  %v4759_v44 = vshll.u32 %v11929_v54, 16  ;;  %v13018_v37 = vshll.u32 %v12176_v19, 16 }
 0x3a5   : > { %6438 = vmatprep.mubr.bf16.mxu1 %v4957_v60  ;;  %v13019_v28 = vshrl.u32 %v11904_v51, 16  ;;  %v13020_v50 = vcombine.low %v12159_v45, %v11917_v27  ;;  %v4754_v63 = vrot.slane %v4752_v55, 1  ;;  %v5225_v60 = vrot.slane %v5223_v1, 1 }
 0x3a6   : > { %v5218_v16 = vrot.slane %v13018_v37, 1  ;;  %v12313_v13 = vcombine.low %v4026_v48, %v12172_v7  ;;  %v4959_v19 = vrot.slane %v9597_v32, 1  ;;  %v5221_v51 = vshrl.u32 %v12224_v52, 16  ;;  %v9601_v48 = vld [vmem:[#allocation2 + $0x68] ss:$0 sps:$4 sm:$0x11]  }
 0x3a7   : > { %v4750_v58 = vor.u32 %v4749_v8, %v13019_v28  ;;  %v4958_v53 = vrot.slane %v13020_v50, 1  ;;  %v5228_v8 = vshll.u32 %v12212_v22, 16  ;;  %v4761_v27 = vrot.slane %v4759_v44, 1  ;;  %v4028_v37 = vld [vmem:[#allocation2 + $0x78] sm:$0xf] }
 0x3a8   : > { %v5219_v47 = vsel %vm715_vm0, %v5214_v12, %v5218_v16  ;;  %v7762_v45 = vcombine.low %v4002_v31, %v11939_v61  ;;  %v5226_v12 = vor.u32 %v5225_v60, %v5221_v51  ;;  %v4757_v55 = vshrl.u32 %v11929_v54, 16  ;;  %v4003_v44 = vld [vmem:[#allocation2 + $0x6c] sm:$0xe] }
 0x3a9   : > { %v4755_v59 = vsel %vm715_vm0, %v4750_v58, %v4754_v63  ;;  %v4764_v7 = vshll.u32 %v9597_v32, 16  ;;  %v5235_v1 = vshll.u32 %v12313_v13, 16  ;;  %v4771_v16 = vshll.u32 %v11945_v62, 16 }
 0x3aa   : > { %6592 = vmatmul.mubr.bf16.gmra.mrb[240].mxu0 %v12142_v4  ;;  %v4960_v4 = vsel %vm972_vm1, %v4958_v53, %v4959_v19  ;;  %v5230_v28 = vrot.slane %v5228_v8, 1  ;;  %v4762_v58 = vor.u32 %v4761_v27, %v4757_v55  ;;  %v4961_v22 = vrot.slane %v7762_v45, 1  ;;  %v9605_v27 = vld [vmem:[#allocation2 + $0x74] ss:$0 sps:$4 sm:$0x11]  }
 0x3ab   : > { %6599 = vmatprep.mubr.bf16.mxu0 %v5219_v47  ;;  %v4766_v50 = vrot.slane %v4764_v7, 1  ;;  %v5237_v53 = vrot.slane %v5235_v1, 1  ;;  %v12326_v31 = vcombine.low %v4028_v37, %v12214_v41  ;;  %v4962_v54 = vrot.slane %v9601_v48, 1  ;;  %v4030_v45 = vld [vmem:[#allocation2 + $0x84] sm:$0xf] }
 0x3ac   : > { %6439 = vmatmul.mubr.bf16.gmra.mrb[212].mxu1 %v4755_v59  ;;  %v5231_v61 = vsel %vm715_vm0, %v5226_v12, %v5230_v28  ;;  %v5233_v47 = vshrl.u32 %v12313_v13, 16  ;;  %v5240_v63 = vshll.u32 %v12189_v9, 16  ;;  %v4773_v60 = vrot.slane %v4771_v16, 1  ;;  %v4075_v9 = vld [vmem:[#allocation2 + $0xcc] sm:$0xe] }
 0x3ad   : > { %6446 = vmatprep.mubr.bf16.mxu1 %v4960_v4  ;;  %v4767_v32 = vsel %vm715_vm0, %v4762_v58, %v4766_v50  ;;  %v7763_v19 = vcombine.low %v4003_v44, %v11953_v56  ;;  %v4769_v51 = vshrl.u32 %v11945_v62, 16  ;;  %v4776_v41 = vshll.u32 %v9601_v48, 16  ;;  %v4004_v1 = vld [vmem:[#allocation2 + $0x78] sm:$0xe]  ;;  %v12341_v48 = vld [vmem:[#allocation2 + $0xd0] sm:$0xf] }
 0x3ae   : > { %v5238_v59 = vor.u32 %v5237_v53, %v5233_v47  ;;  %v5247_v8 = vshll.u32 %v12326_v31, 16  ;;  %v4783_v4 = vshll.u32 %v11960_v15, 16  ;;  %v5242_v12 = vrot.slane %v5240_v63, 1  ;;  %v9654_v50 = vld [vmem:[#allocation2 + $0x7c] sm:$0xf] }
 0x3af   : > { %v4774_v55 = vor.u32 %v4773_v60, %v4769_v51  ;;  %v4964_v7 = vrot.slane %v7763_v19, 1  ;;  %v4778_v37 = vrot.slane %v4776_v41, 1  ;;  %v12339_v62 = vcombine.low %v4030_v45, %v12178_v5  ;;  %v9609_v5 = vld [vmem:[#allocation2 + $0x80] ss:$0 sps:$4 sm:$0x11]  }
 0x3b0   : > { %v5243_v56 = vsel %vm715_vm0, %v5238_v59, %v5242_v12  ;;  %v5249_v16 = vrot.slane %v5247_v8, 1  ;;  %v4965_v28 = vrot.slane %v9605_v27, 1  ;;  %v7818_v58 = vcombine.low %v4075_v9, %v12341_v48  ;;  %v12348_v47 = vld [vmem:[#allocation2 + $0xd4] ss:$0 sps:$4 sm:$0x11]  }
 0x3b1   : > { %v5245_v44 = vshrl.u32 %v12326_v31, 16  ;;  %v7764_v53 = vcombine.low %v4004_v1, %v9654_v50  ;;  %v4781_v60 = vshrl.u32 %v11960_v15, 16  ;;  %v4788_v19 = vshll.u32 %v9605_v27, 16  ;;  %v4032_v51 = vld [vmem:[#allocation2 + $0x90] sm:$0xf] }
 0x3b2   : > { %6600 = vmatmul.mubr.bf16.gmra.mrb[244].mxu0 %v12187_v6  ;;  %v4963_v6 = vsel %vm972_vm1, %v4961_v22, %v4962_v54  ;;  %v4779_v22 = vsel %vm715_vm0, %v4774_v55, %v4778_v37  ;;  %v4966_v54 = vsel %vm972_vm1, %v4964_v7, %v4965_v28  ;;  %v5449_v8 = vrot.slane %v7818_v58, 1  ;;  %v4005_v27 = vld [vmem:[#allocation2 + $0x84] sm:$0xe]  ;;  %v9655_v50 = vld [vmem:[#allocation2 + $0x88] sm:$0xf] }
 0x3b3   : > { %6607 = vmatprep.mubr.bf16.mxu0 %v5231_v61  ;;  %v5252_v61 = vshll.u32 %v12222_v14, 16  ;;  %v5250_v63 = vor.u32 %v5249_v16, %v5245_v44  ;;  %v5450_v45 = vrot.slane %v12348_v47, 1  ;;  %v4967_v7 = vrot.slane %v7764_v53, 1 }
 0x3b4   : > { %6447 = vmatmul.mubr.bf16.gmra.mrb[216].mxu1 %v4767_v32  ;;  %v4790_v37 = vrot.slane %v4788_v19, 1  ;;  %v12360_v28 = vcombine.low %v4032_v51, %v12226_v35  ;;  %v4968_v58 = vrot.slane %v9609_v5, 1  ;;  %v7765_v53 = vcombine.low %v4005_v27, %v9655_v50  ;;  %v4034_v19 = vld [vmem:[#allocation2 + $0x9c] sm:$0xf] }
 0x3b5   : > { %6454 = vmatprep.mubr.bf16.mxu1 %v4963_v6  ;;  %v5259_v6 = vshll.u32 %v12339_v62, 16  ;;  %v5254_v12 = vrot.slane %v5252_v61, 1  ;;  %v12366_v44 = vsel %vm972_vm1, %v5449_v8, %v5450_v45  ;;  %v5257_v61 = vshrl.u32 %v12339_v62, 16 }
 0x3b6   : > { %v4969_v35 = vsel %vm972_vm1, %v4967_v7, %v4968_v58  ;;  %v9656_v7 = vld [vmem:[#allocation2 + $0x94] sm:$0xf]  ;;  %v4036_v58 = vld [vmem:[#allocation2 + $0xa8] sm:$0xf] }
 0x3b7   : > { %v5261_v16 = vrot.slane %v5259_v6, 1  ;;  %v4807_v6 = vshll.u32 %v11995_v39, 16 }
 0x3ba   : > { %6608 = vmatmul.mubr.bf16.gmra.mrb[248].mxu0 %v12224_v52  ;;  %v4785_v52 = vrot.slane %v4783_v4, 1  ;;  %v4795_v4 = vshll.u32 %v11977_v18, 16 }
 0x3bb   : > { %6615 = vmatprep.mubr.bf16.mxu0 %v5243_v56  ;;  %v5255_v56 = vsel %vm715_vm0, %v5250_v63, %v5254_v12  ;;  %v5271_v63 = vshll.u32 %v12360_v28, 16  ;;  %v5269_v12 = vshrl.u32 %v12360_v28, 16 }
 0x3bc   : > { %6455 = vmatmul.mubr.bf16.gmra.mrb[220].mxu1 %v4779_v22  ;;  %v4786_v55 = vor.u32 %v4785_v52, %v4781_v60  ;;  %v4797_v52 = vrot.slane %v4795_v4, 1  ;;  %v9613_v60 = vld [vmem:[#allocation2 + $0x8c] ss:$0 sps:$4 sm:$0x11]   ;;  %v12378_v4 = vcombine.low %v4034_v19, %v12185_v10  ;;  %v9657_v19 = vld [vmem:[#allocation2 + $0xa0] sm:$0xf] }
 0x3bd   : > { %6462 = vmatprep.mubr.bf16.mxu1 %v4966_v54  ;;  %v5262_v54 = vor.u32 %v5261_v16, %v5257_v61  ;;  %v5273_v45 = vrot.slane %v5271_v63, 1  ;;  %v4812_v10 = vshll.u32 %v9613_v60, 16  ;;  %v9617_v16 = vld [vmem:[#allocation2 + $0x98] ss:$0 sps:$4 sm:$0x11]   ;;  %v5288_v63 = vshll.u32 %v12205_v33, 16 }
 0x3bf   : > { %v8658_v32 = vpop.f32.mrb[160].mxu0  ;;  %v5274_v27 = vor.u32 %v5273_v45, %v5269_v12  ;;  %v4831_v45 = vshll.u32 %v12046_v21, 16  ;;  %v5290_v33 = vrot.slane %v5288_v63, 1 }
 0x3c0   : > { %v8659_v59 = vpop.f32.mrb[161].mxu0 }
 0x3c1   : > { %v8660_v14 = vadd.f32 %v8659_v59, %v8658_v32  ;;  %v8661_v41 = vpop.f32.mrb[162].mxu0  ;;  %v4800_v32 = vshll.u32 %v9609_v5, 16 }
 0x3c2   : > { %v8662_v9 = vpop.f32.mrb[163].mxu0  ;;  %6616 = vmatmul.mubr.bf16.gmra.mrb[252].mxu0 %v12313_v13  ;;  %v5264_v13 = vshll.u32 %v12201_v43, 16  ;;  %v4970_v43 = vrot.slane %v7765_v53, 1  ;;  %v4814_v53 = vrot.slane %v4812_v10, 1  ;;  %v13021_v10 = vld [vmem:[#allocation35_spill] sm:$0xff] }
 0x3c3   : > { %v12355_v1 = vadd.f32 %v8660_v14, %v12109_v11  ;;  %v8663_v15 = vadd.f32 %v8662_v9, %v8661_v41  ;;  %6623 = vmatprep.mubr.bf16.mxu0 %v5255_v56  ;;  %v4791_v11 = vsel %vm715_vm0, %v4786_v55, %v4790_v37  ;;  %v4006_v14 = vld [vmem:[#allocation2 + $0x90] sm:$0xe]  ;;  %v4802_v8 = vrot.slane %v4800_v32, 1 }
 0x3c4   : > { %6463 = vmatmul.mubr.bf16.gmra.mrb[224].mxu1 %v4791_v11  ;;  %v5266_v59 = vrot.slane %v5264_v13, 1  ;;  %v5276_v55 = vshll.u32 %v12237_v20, 16  ;;  %v4809_v9 = vrot.slane %v4807_v6, 1  ;;  %v4805_v56 = vshrl.u32 %v11995_v39, 16 }
 0x3c5   : > { %v12363_v22 = vadd.f32 %v8663_v15, %v12122_v36  ;;  %6470 = vmatprep.mubr.bf16.mxu1 %v4969_v35  ;;  %v4793_v36 = vshrl.u32 %v11977_v18, 16  ;;  %v4971_v18 = vrot.slane %v9613_v60, 1  ;;  %v7766_v15 = vcombine.low %v4006_v14, %v9656_v7  ;;  %v4038_v14 = vld [vmem:[#allocation2 + $0xb4] sm:$0xf] }
 0x3c6   : > { %v5267_v41 = vsel %vm715_vm0, %v5262_v54, %v5266_v59  ;;  %v5283_v37 = vshll.u32 %v12378_v4, 16  ;;  %v4819_v11 = vshll.u32 %v12018_v2, 16  ;;  %v5278_v61 = vrot.slane %v5276_v55, 1 }
 0x3c7   : > { %v4798_v51 = vor.u32 %v4797_v52, %v4793_v36  ;;  %v4810_v13 = vor.u32 %v4809_v9, %v4805_v56  ;;  %v4973_v20 = vrot.slane %v7766_v15, 1  ;;  %v4007_v52 = vld [vmem:[#allocation2 + $0x9c] sm:$0xe]  ;;  %v12390_v54 = vcombine.low %v4036_v58, %v12246_v42 }
 0x3c8   : > { %v5279_v50 = vsel %vm715_vm0, %v5274_v27, %v5278_v61  ;;  %v5285_v35 = vrot.slane %v5283_v37, 1  ;;  %v4974_v39 = vrot.slane %v9617_v16, 1  ;;  %v5281_v32 = vshrl.u32 %v12378_v4, 16 }
 0x3c9   : > { %v4803_v5 = vsel %vm715_vm0, %v4798_v51, %v4802_v8  ;;  %v4815_v36 = vsel %vm715_vm0, %v4810_v13, %v4814_v53  ;;  %v4821_v60 = vrot.slane %v4819_v11, 1  ;;  %v7767_v6 = vcombine.low %v4007_v52, %v9657_v19  ;;  %v4040_v19 = vld [vmem:[#allocation2 + $0xc0] sm:$0xf] }
 0x3ca   : > { %6624 = vmatmul.mubr.bf16.gmra.mrb[0].mxu0 %v12326_v31  ;;  %v4972_v31 = vsel %vm972_vm1, %v4970_v43, %v4971_v18  ;;  %v5286_v59 = vor.u32 %v5285_v35, %v5281_v32  ;;  %v4817_v51 = vshrl.u32 %v12018_v2, 16  ;;  %v4824_v42 = vshll.u32 %v9617_v16, 16  ;;  %v4008_v18 = vld [vmem:[#allocation2 + $0xa8] sm:$0xe] }
 0x3cb   : > { %6631 = vmatprep.mubr.bf16.mxu0 %v5267_v41  ;;  %v5295_v43 = vshll.u32 %v12390_v54, 16  ;;  %v9621_v41 = vld [vmem:[#allocation2 + $0xa4] ss:$0 sps:$4 sm:$0x11]   ;;  %v4976_v55 = vrot.slane %v7767_v6, 1  ;;  %v12400_v15 = vcombine.low %v4038_v14, %v12192_v17  ;;  %v7768_v37 = vcombine.low %v4008_v18, %v13021_v10  ;;  %v13022_v6 = vld [vmem:[#allocation36_spill] sm:$0xff] }
 0x3cc   : > { %6471 = vmatmul.mubr.bf16.gmra.mrb[228].mxu1 %v4803_v5  ;;  %v4822_v5 = vor.u32 %v4821_v60, %v4817_v51  ;;  %v5291_v2 = vsel %vm715_vm0, %v5286_v59, %v5290_v33  ;;  %v4977_v16 = vrot.slane %v9621_v41, 1  ;;  %v5293_v61 = vshrl.u32 %v12390_v54, 16 }
 0x3cd   : > { %6478 = vmatprep.mubr.bf16.mxu1 %v4972_v31  ;;  %v4826_v31 = vrot.slane %v4824_v42, 1  ;;  %v5297_v27 = vrot.slane %v5295_v43, 1  ;;  %v5300_v13 = vshll.u32 %v12242_v40, 16  ;;  %v4833_v17 = vrot.slane %v4831_v45, 1 }
 0x3ce   : > { %v5307_v52 = vshll.u32 %v12400_v15, 16  ;;  %v4829_v35 = vshrl.u32 %v12046_v21, 16  ;;  %v4843_v40 = vshll.u32 %v13022_v6, 16  ;;  %v4979_v42 = vrot.slane %v7768_v37, 1  ;;  %v4009_v21 = vld [vmem:[#allocation2 + $0xb4] sm:$0xe] }
 0x3cf   : > { %v4827_v11 = vsel %vm715_vm0, %v4822_v5, %v4826_v31  ;;  %v5312_v31 = vshll.u32 %v12216_v38, 16 }
 0x3d0   : > { %v4834_v51 = vor.u32 %v4833_v17, %v4829_v35  ;;  %v5309_v45 = vrot.slane %v5307_v52, 1  ;;  %v4845_v10 = vrot.slane %v4843_v40, 1 }
 0x3d2   : > { %6632 = vmatmul.mubr.bf16.gmra.mrb[4].mxu0 %v12339_v62  ;;  %v4975_v62 = vsel %vm972_vm1, %v4973_v20, %v4974_v39  ;;  %v4836_v39 = vshll.u32 %v9621_v41, 16 }
 0x3d3   : > { %6639 = vmatprep.mubr.bf16.mxu0 %v5279_v50  ;;  %v5298_v50 = vor.u32 %v5297_v27, %v5293_v61 }
 0x3d4   : > { %6479 = vmatmul.mubr.bf16.gmra.mrb[232].mxu1 %v4815_v36  ;;  %v9625_v36 = vld [vmem:[#allocation2 + $0xb0] ss:$0 sps:$4 sm:$0x11]   ;;  %v4838_v5 = vrot.slane %v4836_v39, 1 }
 0x3d5   : > { %6486 = vmatprep.mubr.bf16.mxu1 %v4975_v62  ;;  %v5302_v62 = vrot.slane %v5300_v13, 1  ;;  %v4848_v61 = vshll.u32 %v9625_v36, 16 }
 0x3d7   : > { %v5303_v41 = vsel %vm715_vm0, %v5298_v50, %v5302_v62  ;;  %v9629_v50 = vld [vmem:[#allocation2 + $0xbc] ss:$0 sps:$4 sm:$0x11]   ;;  %v4010_v62 = vld [vmem:[#allocation2 + $0xc0] sm:$0xe] }
 0x3d8   : > { %v8552_v8 = vpop.f32.mrb[132].mxu1 }
 0x3d9   : > { %v8553_v12 = vpop.f32.mrb[133].mxu1 }
 0x3da   : > { %v8554_v9 = vadd.f32 %v8553_v12, %v8552_v8  ;;  %v8555_v7 = vpop.f32.mrb[134].mxu1  ;;  %6640 = vmatmul.mubr.bf16.gmra.mrb[8].mxu0 %v12360_v28  ;;  %v4978_v28 = vsel %vm972_vm1, %v4976_v55, %v4977_v16  ;;  %v4980_v12 = vrot.slane %v9625_v36, 1 }
 0x3db   : > { %v8556_v56 = vpop.f32.mrb[135].mxu1  ;;  %6647 = vmatprep.mubr.bf16.mxu0 %v5291_v2 }
 0x3dc   : > { %v8557_v58 = vadd.f32 %v8556_v56, %v8555_v7  ;;  %6487 = vmatmul.mubr.bf16.gmra.mrb[236].mxu1 %v4827_v11  ;;  %v12417_v7 = vcombine.low %v4040_v19, %v12253_v30  ;;  %v4839_v56 = vsel %vm715_vm0, %v4834_v51, %v4838_v5  ;;  %v4981_v16 = vsel %vm972_vm1, %v4979_v42, %v4980_v12  ;;  %v4042_v30 = vld [vmem:[#allocation2 + $0xcc] sm:$0xf] }
 0x3dd   : > { %v8664_v20 = vpop.f32.mrb[164].mxu0  ;;  %6494 = vmatprep.mubr.bf16.mxu1 %v4978_v28  ;;  %v13023_v28 = vld [vmem:[#allocation39_spill] sm:$0xff]  ;;  %v4850_v19 = vrot.slane %v4848_v61, 1 }
 0x3de   : > { %v8665_v53 = vpop.f32.mrb[165].mxu0  ;;  %v5319_v17 = vshll.u32 %v12417_v7, 16  ;;  %v4855_v38 = vshll.u32 %v13023_v28, 16 }
 0x3df   : > { %v8666_v32 = vadd.f32 %v8665_v53, %v8664_v20  ;;  %v8667_v63 = vpop.f32.mrb[166].mxu0  ;;  %v5314_v20 = vrot.slane %v5312_v31, 1 }
 0x3e0   : > { %v8558_v60 = vpop.f32.mrb[136].mxu1  ;;  %v8668_v59 = vpop.f32.mrb[167].mxu0  ;;  %v5321_v42 = vrot.slane %v5319_v17, 1 }
 0x3e1   : > { %v8559_v43 = vpop.f32.mrb[137].mxu1  ;;  %v12412_v14 = vadd.f32 %v8666_v32, %v8554_v9  ;;  %v8669_v8 = vadd.f32 %v8668_v59, %v8667_v63  ;;  %v5305_v9 = vshrl.u32 %v12400_v15, 16  ;;  %v12429_v63 = vcombine.low %v4042_v30, %v12341_v48 }
 0x3e2   : > { %v8560_v18 = vadd.f32 %v8559_v43, %v8558_v60  ;;  %v8561_v33 = vpop.f32.mrb[138].mxu1  ;;  %6648 = vmatmul.mubr.bf16.gmra.mrb[12].mxu0 %v12378_v4  ;;  %v9658_v4 = vld [vmem:[#allocation2 + $0xb8] sm:$0xf]  ;;  %v5317_v48 = vshrl.u32 %v12417_v7, 16 }
 0x3e3   : > { %v8562_v55 = vpop.f32.mrb[139].mxu1  ;;  %6655 = vmatprep.mubr.bf16.mxu0 %v5303_v41  ;;  %v12419_v2 = vadd.f32 %v8669_v8, %v8557_v58  ;;  %v7769_v37 = vcombine.low %v4009_v21, %v9658_v4  ;;  %v5310_v11 = vor.u32 %v5309_v45, %v5305_v9  ;;  %v4841_v58 = vshrl.u32 %v13022_v6, 16 }
 0x3e4   : > { %v8563_v27 = vadd.f32 %v8562_v55, %v8561_v33  ;;  %6495 = vmatmul.mubr.bf16.gmra.mrb[240].mxu1 %v4839_v56  ;;  %v4983_v45 = vrot.slane %v9629_v50, 1  ;;  %v5324_v33 = vshll.u32 %v12262_v29, 16  ;;  %v4857_v41 = vrot.slane %v4855_v38, 1  ;;  %v13024_v29 = vld [vmem:[#allocation38_spill] sm:$0xff] }
 0x3e5   : > { %6502 = vmatprep.mubr.bf16.mxu1 %v4981_v16  ;;  %v4846_v39 = vor.u32 %v4845_v10, %v4841_v58  ;;  %v5315_v36 = vsel %vm715_vm0, %v5310_v11, %v5314_v20  ;;  %v4982_v40 = vrot.slane %v7769_v37, 1  ;;  %v5322_v56 = vor.u32 %v5321_v42, %v5317_v48  ;;  %v4060_v20 = vld [vmem:[#allocation2 + $0x18] sm:$0xe] }
 0x3e6   : > { %v8670_v13 = vpop.f32.mrb[168].mxu0  ;;  %v4853_v10 = vshrl.u32 %v13023_v28, 16  ;;  %v4860_v4 = vshll.u32 %v9629_v50, 16  ;;  %v4867_v37 = vshll.u32 %v13024_v29, 16  ;;  %v5326_v16 = vrot.slane %v5324_v33, 1 }
 0x3e7   : > { %v8671_v52 = vpop.f32.mrb[169].mxu0  ;;  %v4851_v12 = vsel %vm715_vm0, %v4846_v39, %v4850_v19  ;;  %v4984_v31 = vsel %vm972_vm1, %v4982_v40, %v4983_v45  ;;  %v5329_v61 = vshrl.u32 %v12429_v63, 16 }
 0x3e8   : > { %v8672_v53 = vadd.f32 %v8671_v52, %v8670_v13  ;;  %v8673_v35 = vpop.f32.mrb[170].mxu0  ;;  %v4858_v11 = vor.u32 %v4857_v41, %v4853_v10  ;;  %v5336_v13 = vshll.u32 %v12348_v47, 16  ;;  %v5327_v17 = vsel %vm715_vm0, %v5322_v56, %v5326_v16  ;;  %v9661_v10 = vld [vmem:[#allocation2 + $0x20] ss:$0 sps:$4 sm:$0x11]  }
 0x3e9   : > { %v8564_v32 = vpop.f32.mrb[140].mxu1  ;;  %v8674_v60 = vpop.f32.mrb[171].mxu0  ;;  %v4862_v38 = vrot.slane %v4860_v4, 1  ;;  %v4869_v50 = vrot.slane %v4867_v37, 1  ;;  %v5405_v4 = vrot.slane %v9661_v10, 1 }
 0x3ea   : > { %v8565_v6 = vpop.f32.mrb[141].mxu1  ;;  %6656 = vmatmul.mubr.bf16.gmra.mrb[16].mxu0 %v12390_v54  ;;  %v12433_v59 = vadd.f32 %v8672_v53, %v8560_v18  ;;  %v8675_v51 = vadd.f32 %v8674_v60, %v8673_v35  ;;  %v5331_v54 = vshll.u32 %v12429_v63, 16  ;;  %v9659_v18 = vld [vmem:[#allocation2 + $0xc4] sm:$0xf]  ;;  %v5338_v35 = vrot.slane %v5336_v13, 1 }
 0x3eb   : > { %v8566_v43 = vadd.f32 %v8565_v6, %v8564_v32  ;;  %v8567_v8 = vpop.f32.mrb[142].mxu1  ;;  %6663 = vmatprep.mubr.bf16.mxu0 %v5315_v36  ;;  %v7770_v9 = vcombine.low %v4010_v62, %v9659_v18  ;;  %v4863_v52 = vsel %vm715_vm0, %v4858_v11, %v4862_v38  ;;  %v9660_v36 = vld [vmem:[#allocation2 + $0x1c] sm:$0xf]  ;;  %v9662_v16 = vld [vmem:[#allocation2 + $0x34] sm:$0xf] }
 0x3ec   : > { %v8568_v21 = vpop.f32.mrb[143].mxu1  ;;  %v12437_v5 = vadd.f32 %v8675_v51, %v8563_v27  ;;  %6503 = vmatmul.mubr.bf16.gmra.mrb[244].mxu1 %v4851_v12  ;;  %v9633_v27 = vld [vmem:[#allocation2 + $0xc8] ss:$0 sps:$4 sm:$0x11]   ;;  %v5333_v30 = vrot.slane %v5331_v54, 1  ;;  %v7803_v47 = vcombine.low %v4060_v20, %v9660_v36  ;;  %v13025_v36 = vld [vmem:[#allocation34_spill] sm:$0xff] }
 0x3ed   : > { %v8569_v55 = vadd.f32 %v8568_v21, %v8567_v8  ;;  %6510 = vmatprep.mubr.bf16.mxu1 %v4984_v31  ;;  %v4985_v58 = vrot.slane %v7770_v9, 1  ;;  %v4986_v28 = vrot.slane %v9633_v27, 1  ;;  %v4872_v19 = vshll.u32 %v9633_v27, 16  ;;  %v4062_v9 = vld [vmem:[#allocation2 + $0x30] sm:$0xe] }
 0x3ee   : > { %v5334_v53 = vor.u32 %v5333_v30, %v5329_v61  ;;  %v5404_v12 = vrot.slane %v7803_v47, 1  ;;  %v7805_v27 = vcombine.low %v4062_v9, %v9662_v16 }
 0x3ef   : > { %v4987_v32 = vsel %vm972_vm1, %v4985_v58, %v4986_v28  ;;  %v4874_v18 = vrot.slane %v4872_v19, 1 }
 0x3f0   : > { %v5339_v45 = vsel %vm715_vm0, %v5334_v53, %v5338_v35  ;;  %v5410_v38 = vrot.slane %v7805_v27, 1  ;;  %v9663_v53 = vld [vmem:[#allocation2 + $0x38] ss:$0 sps:$4 sm:$0x11]  }
 0x3f1   : > { %v5411_v35 = vrot.slane %v9663_v53, 1 }
 0x3f2   : > { %6664 = vmatmul.mubr.bf16.gmra.mrb[20].mxu0 %v12400_v15  ;;  %v4865_v15 = vshrl.u32 %v13024_v29, 16 }
 0x3f3   : > { %6671 = vmatprep.mubr.bf16.mxu0 %v5327_v17  ;;  %v5412_v47 = vsel %vm972_vm1, %v5410_v38, %v5411_v35 }
 0x3f4   : > { %6511 = vmatmul.mubr.bf16.gmra.mrb[248].mxu1 %v4863_v52  ;;  %v4870_v8 = vor.u32 %v4869_v50, %v4865_v15 }
 0x3f5   : > { %v8676_v39 = vpop.f32.mrb[172].mxu0  ;;  %6518 = vmatprep.mubr.bf16.mxu1 %v4987_v32 }
 0x3f6   : > { %v8677_v60 = vpop.f32.mrb[173].mxu0  ;;  %v4875_v29 = vsel %vm715_vm0, %v4870_v8, %v4874_v18 }
 0x3f7   : > { %v8678_v40 = vadd.f32 %v8677_v60, %v8676_v39  ;;  %v8679_v6 = vpop.f32.mrb[174].mxu0  ;;  %v8570_v62 = vpop.f32.mrb[144].mxu1 }
 0x3f8   : > { %v8680_v51 = vpop.f32.mrb[175].mxu0  ;;  %v8571_v42 = vpop.f32.mrb[145].mxu1 }
 0x3f9   : > { %v12452_v48 = vadd.f32 %v8678_v40, %v8566_v43  ;;  %v8681_v33 = vadd.f32 %v8680_v51, %v8679_v6  ;;  %v8572_v21 = vadd.f32 %v8571_v42, %v8570_v62  ;;  %v8573_v41 = vpop.f32.mrb[146].mxu1  ;;  %v5406_v43 = vsel %vm972_vm1, %v5404_v12, %v5405_v4  ;;  %v13026_v12 = vld [vmem:[#allocation40_spill] sm:$0xff] }
 0x3fa   : > { %6672 = vmatmul.mubr.bf16.gmra.mrb[24].mxu0 %v12417_v7  ;;  %v8574_v54 = vpop.f32.mrb[147].mxu1 }
 0x3fb   : > { %v12455_v31 = vadd.f32 %v8681_v33, %v8569_v55  ;;  %v8575_v56 = vadd.f32 %v8574_v54, %v8573_v41  ;;  %6679 = vmatprep.mubr.bf16.mxu0 %v5339_v45 }
 0x3fc   : > { %6519 = vmatmul.mubr.bf16.gmra.mrb[252].mxu1 %v4875_v29 }
 0x3fd   : > { %v8682_v37 = vpop.f32.mrb[176].mxu0  ;;  %9066 = vmatprep.mubr.bf16.mxu1 %v5406_v43 }
 0x3fe   : > { %v8683_v11 = vpop.f32.mrb[177].mxu0 }
 0x3ff   : > { %v8684_v7 = vadd.f32 %v8683_v11, %v8682_v37  ;;  %v8685_v61 = vpop.f32.mrb[178].mxu0  ;;  %v8576_v13 = vpop.f32.mrb[148].mxu1 }
 0x400   : > { %v8686_v30 = vpop.f32.mrb[179].mxu0  ;;  %v8577_v17 = vpop.f32.mrb[149].mxu1 }
 0x401   : > { %v12459_v55 = vadd.f32 %v8684_v7, %v8572_v21  ;;  %v8687_v58 = vadd.f32 %v8686_v30, %v8685_v61  ;;  %v8578_v20 = vadd.f32 %v8577_v17, %v8576_v13  ;;  %v8579_v28 = vpop.f32.mrb[150].mxu1  ;;  %v13027_v30 = vld [vmem:[#allocation42_spill] sm:$0xff] }
 0x402   : > { %6680 = vmatmul.mubr.bf16.gmra.mrb[28].mxu0 %v12429_v63  ;;  %v8580_v50 = vpop.f32.mrb[151].mxu1 }
 0x403   : > { %v12462_v52 = vadd.f32 %v8687_v58, %v8575_v56  ;;  %v8581_v39 = vadd.f32 %v8580_v50, %v8579_v28 }
 0x404   : > { %9067 = vmatmul.mubr.bf16.vlgmr.msra.gmra.mrb[0].mxu1 %v13025_v36 }
 0x405   : > { %v8688_v32 = vpop.f32.mrb[180].mxu0  ;;  %9070 = vmatprep.mubr.bf16.mxu1 %v5412_v47 }
 0x406   : > { %v8689_v60 = vpop.f32.mrb[181].mxu0 }
 0x407   : > { %v8690_v15 = vadd.f32 %v8689_v60, %v8688_v32  ;;  %v8691_v19 = vpop.f32.mrb[182].mxu0  ;;  %v8582_v6 = vpop.f32.mrb[152].mxu1 }
 0x408   : > { %v8692_v40 = vpop.f32.mrb[183].mxu0  ;;  %v8583_v51 = vpop.f32.mrb[153].mxu1 }
 0x409   : > { %v12466_v63 = vadd.f32 %v8690_v15, %v8578_v20  ;;  %v8693_v62 = vadd.f32 %v8692_v40, %v8691_v19  ;;  %v8584_v42 = vadd.f32 %v8583_v51, %v8582_v6  ;;  %v8585_v8 = vpop.f32.mrb[154].mxu1 }
 0x40a   : > { %v8586_v33 = vpop.f32.mrb[155].mxu1 }
 0x40b   : > { %v12468_v45 = vadd.f32 %v8693_v62, %v8581_v39  ;;  %v8587_v21 = vadd.f32 %v8586_v33, %v8585_v8 }
 0x40c   : > { %9071 = vmatmul.mubr.bf16.gmra.mrb[4].mxu1 %v13026_v12 }
 0x40d   : > { %v8694_v41 = vpop.f32.mrb[184].mxu0  ;;  %9074 = vmatprep.mubr.bf16.mxu1 %v12256_v46 }
 0x40e   : > { %v8695_v54 = vpop.f32.mrb[185].mxu0 }
 0x40f   : > { %v8696_v18 = vadd.f32 %v8695_v54, %v8694_v41  ;;  %v8697_v9 = vpop.f32.mrb[186].mxu0  ;;  %v8588_v10 = vpop.f32.mrb[156].mxu1 }
 0x410   : > { %v8698_v56 = vpop.f32.mrb[187].mxu0  ;;  %v8589_v37 = vpop.f32.mrb[157].mxu1 }
 0x411   : > { %v12472_v4 = vadd.f32 %v8696_v18, %v8584_v42  ;;  %v8699_v29 = vadd.f32 %v8698_v56, %v8697_v9  ;;  %v8590_v43 = vadd.f32 %v8589_v37, %v8588_v10  ;;  %v8591_v16 = vpop.f32.mrb[158].mxu1 }
 0x412   : > { %v8592_v11 = vpop.f32.mrb[159].mxu1 }
 0x413   : > { %v12474_v27 = vadd.f32 %v8699_v29, %v8587_v21  ;;  %v8593_v7 = vadd.f32 %v8592_v11, %v8591_v16 }
 0x414   : > { %9075 = vmatmul.mubr.bf16.gmra.mrb[8].mxu1 %v13027_v30 }
 0x415   : > { %v8700_v61 = vpop.f32.mrb[188].mxu0  ;;  %9078 = vmatprep.mubr.bf16.mxu1 %v12271_v0 }
 0x416   : > { %v8701_v13 = vpop.f32.mrb[189].mxu0 }
 0x417   : > { %v8702_v46 = vadd.f32 %v8701_v13, %v8700_v61  ;;  %v8703_v58 = vpop.f32.mrb[190].mxu0  ;;  %v8594_v38 = vpop.f32.mrb[160].mxu1 }
 0x418   : > { %v8704_v17 = vpop.f32.mrb[191].mxu0  ;;  %v8595_v50 = vpop.f32.mrb[161].mxu1 }
 0x419   : > { %v12478_v20 = vadd.f32 %v8702_v46, %v8590_v43  ;;  %v8705_v28 = vadd.f32 %v8704_v17, %v8703_v58  ;;  %v8596_v53 = vadd.f32 %v8595_v50, %v8594_v38  ;;  %v8597_v35 = vpop.f32.mrb[162].mxu1 }
 0x41a   : > { %v8598_v32 = vpop.f32.mrb[163].mxu1 }
 0x41b   : > { %v12480_v39 = vadd.f32 %v8705_v28, %v8593_v7  ;;  %v8599_v36 = vadd.f32 %v8598_v32, %v8597_v35 }
 0x41c   : > { %9079 = vmatmul.mubr.bf16.gmra.mrb[12].mxu1 %v12250_v49 }
 0x41d   : > { %v8706_v47 = vpop.f32.mrb[192].mxu0  ;;  %9082 = vmatprep.mubr.bf16.mxu1 %v12278_v25 }
 0x41e   : > { %v8707_v60 = vpop.f32.mrb[193].mxu0 }
 0x41f   : > { %v8708_v0 = vadd.f32 %v8707_v60, %v8706_v47  ;;  %v8709_v15 = vpop.f32.mrb[194].mxu0  ;;  %v8600_v40 = vpop.f32.mrb[164].mxu1 }
 0x420   : > { %v8710_v19 = vpop.f32.mrb[195].mxu0  ;;  %v8601_v51 = vpop.f32.mrb[165].mxu1 }
 0x421   : > { %v12484_v6 = vadd.f32 %v8708_v0, %v8596_v53  ;;  %v8711_v62 = vadd.f32 %v8710_v19, %v8709_v15  ;;  %v8602_v42 = vadd.f32 %v8601_v51, %v8600_v40  ;;  %v8603_v8 = vpop.f32.mrb[166].mxu1 }
 0x422   : > { %v8604_v21 = vpop.f32.mrb[167].mxu1 }
 0x423   : > { %v12486_v33 = vadd.f32 %v8711_v62, %v8599_v36  ;;  %v8605_v41 = vadd.f32 %v8604_v21, %v8603_v8 }
 0x424   : > { %9083 = vmatmul.mubr.bf16.gmra.mrb[16].mxu1 %v12260_v23 }
 0x425   : > { %v8712_v12 = vpop.f32.mrb[196].mxu0  ;;  %9086 = vmatprep.mubr.bf16.mxu1 %v12291_v57 }
 0x426   : > { %v8713_v49 = vpop.f32.mrb[197].mxu0 }
 0x427   : > { %v8714_v25 = vadd.f32 %v8713_v49, %v8712_v12  ;;  %v8715_v54 = vpop.f32.mrb[198].mxu0  ;;  %v8606_v9 = vpop.f32.mrb[168].mxu1 }
 0x428   : > { %v8716_v18 = vpop.f32.mrb[199].mxu0  ;;  %v8607_v29 = vpop.f32.mrb[169].mxu1 }
 0x429   : > { %v12490_v56 = vadd.f32 %v8714_v25, %v8602_v42  ;;  %v8717_v10 = vadd.f32 %v8716_v18, %v8715_v54  ;;  %v8608_v37 = vadd.f32 %v8607_v29, %v8606_v9  ;;  %v8609_v43 = vpop.f32.mrb[170].mxu1 }
 0x42a   : > { %v8610_v11 = vpop.f32.mrb[171].mxu1 }
 0x42b   : > { %v12492_v16 = vadd.f32 %v8717_v10, %v8605_v41  ;;  %v8611_v7 = vadd.f32 %v8610_v11, %v8609_v43 }
 0x42c   : > { %9087 = vmatmul.mubr.bf16.gmra.mrb[20].mxu1 %v12267_v24 }
 0x42d   : > { %v8718_v61 = vpop.f32.mrb[200].mxu0  ;;  %9090 = vmatprep.mubr.bf16.mxu1 %v12297_v34 }
 0x42e   : > { %v8719_v23 = vpop.f32.mrb[201].mxu0 }
 0x42f   : > { %v8720_v57 = vadd.f32 %v8719_v23, %v8718_v61  ;;  %v8721_v30 = vpop.f32.mrb[202].mxu0  ;;  %v8612_v46 = vpop.f32.mrb[172].mxu1 }
 0x430   : > { %v8722_v13 = vpop.f32.mrb[203].mxu0  ;;  %v8613_v38 = vpop.f32.mrb[173].mxu1 }
 0x431   : > { %v12496_v58 = vadd.f32 %v8720_v57, %v8608_v37  ;;  %v8723_v17 = vadd.f32 %v8722_v13, %v8721_v30  ;;  %v8614_v28 = vadd.f32 %v8613_v38, %v8612_v46  ;;  %v8615_v50 = vpop.f32.mrb[174].mxu1 }
 0x432   : > { %v8616_v35 = vpop.f32.mrb[175].mxu1 }
 0x433   : > { %v12498_v53 = vadd.f32 %v8723_v17, %v8611_v7  ;;  %v8617_v32 = vadd.f32 %v8616_v35, %v8615_v50 }
 0x434   : > { %9091 = vmatmul.mubr.bf16.gmra.mrb[24].mxu1 %v12275_v26 }
 0x435   : > { %v8724_v36 = vpop.f32.mrb[204].mxu0  ;;  %9094 = vmatprep.mubr.bf16.mxu1 %v12300_v3 }
 0x436   : > { %v8725_v24 = vpop.f32.mrb[205].mxu0 }
 0x437   : > { %v8726_v34 = vadd.f32 %v8725_v24, %v8724_v36  ;;  %v8727_v47 = vpop.f32.mrb[206].mxu0  ;;  %v8618_v0 = vpop.f32.mrb[176].mxu1 }
 0x438   : > { %v8728_v60 = vpop.f32.mrb[207].mxu0  ;;  %v8619_v40 = vpop.f32.mrb[177].mxu1 }
 0x439   : > { %v12502_v15 = vadd.f32 %v8726_v34, %v8614_v28  ;;  %v8729_v19 = vadd.f32 %v8728_v60, %v8727_v47  ;;  %v8620_v62 = vadd.f32 %v8619_v40, %v8618_v0  ;;  %v8621_v51 = vpop.f32.mrb[178].mxu1 }
 0x43a   : > { %v8622_v8 = vpop.f32.mrb[179].mxu1 }
 0x43b   : > { %v12504_v42 = vadd.f32 %v8729_v19, %v8617_v32  ;;  %v8623_v21 = vadd.f32 %v8622_v8, %v8621_v51 }
 0x43c   : > { %9095 = vmatmul.mubr.bf16.gmra.mrb[28].mxu1 %v12366_v44 }
 0x43d   : > { %v8730_v41 = vpop.f32.mrb[208].mxu0 }
 0x43e   : > { %v8731_v26 = vpop.f32.mrb[209].mxu0 }
 0x43f   : > { %v8732_v12 = vadd.f32 %v8731_v26, %v8730_v41  ;;  %v8733_v3 = vpop.f32.mrb[210].mxu0  ;;  %v8624_v25 = vpop.f32.mrb[180].mxu1 }
 0x440   : > { %v8734_v49 = vpop.f32.mrb[211].mxu0  ;;  %v8625_v9 = vpop.f32.mrb[181].mxu1 }
 0x441   : > { %v12507_v54 = vadd.f32 %v8732_v12, %v8620_v62  ;;  %v8735_v18 = vadd.f32 %v8734_v49, %v8733_v3  ;;  %v8626_v10 = vadd.f32 %v8625_v9, %v8624_v25  ;;  %v8627_v29 = vpop.f32.mrb[182].mxu1 }
 0x442   : > { %v8628_v43 = vpop.f32.mrb[183].mxu1 }
 0x443   : > { %v12509_v37 = vadd.f32 %v8735_v18, %v8623_v21  ;;  %v8629_v11 = vadd.f32 %v8628_v43, %v8627_v29 }
 0x445   : > { %v8736_v7 = vpop.f32.mrb[212].mxu0 }
 0x446   : > { %v8737_v61 = vpop.f32.mrb[213].mxu0 }
 0x447   : > { %v8738_v23 = vadd.f32 %v8737_v61, %v8736_v7  ;;  %v8739_v57 = vpop.f32.mrb[214].mxu0  ;;  %v8630_v30 = vpop.f32.mrb[184].mxu1 }
 0x448   : > { %v8740_v44 = vpop.f32.mrb[215].mxu0  ;;  %v8631_v17 = vpop.f32.mrb[185].mxu1 }
 0x449   : > { %v12511_v13 = vadd.f32 %v8738_v23, %v8626_v10  ;;  %v8741_v46 = vadd.f32 %v8740_v44, %v8739_v57  ;;  %v8632_v38 = vadd.f32 %v8631_v17, %v8630_v30  ;;  %v8633_v28 = vpop.f32.mrb[186].mxu1 }
 0x44a   : > { %v8634_v35 = vpop.f32.mrb[187].mxu1 }
 0x44b   : > { %v12513_v50 = vadd.f32 %v8741_v46, %v8629_v11  ;;  %v8635_v32 = vadd.f32 %v8634_v35, %v8633_v28 }
 0x44d   : > { %v8742_v36 = vpop.f32.mrb[216].mxu0 }
 0x44e   : > { %v8743_v24 = vpop.f32.mrb[217].mxu0 }
 0x44f   : > { %v8744_v34 = vadd.f32 %v8743_v24, %v8742_v36  ;;  %v8745_v47 = vpop.f32.mrb[218].mxu0  ;;  %v8636_v0 = vpop.f32.mrb[188].mxu1 }
 0x450   : > { %v8746_v60 = vpop.f32.mrb[219].mxu0  ;;  %v8637_v62 = vpop.f32.mrb[189].mxu1 }
 0x451   : > { %v12515_v19 = vadd.f32 %v8744_v34, %v8632_v38  ;;  %v8747_v40 = vadd.f32 %v8746_v60, %v8745_v47  ;;  %v8638_v51 = vadd.f32 %v8637_v62, %v8636_v0  ;;  %v8639_v8 = vpop.f32.mrb[190].mxu1 }
 0x452   : > { %v8640_v41 = vpop.f32.mrb[191].mxu1 }
 0x453   : > { %v12517_v21 = vadd.f32 %v8747_v40, %v8635_v32  ;;  %v8641_v26 = vadd.f32 %v8640_v41, %v8639_v8 }
 0x455   : > { %v8748_v12 = vpop.f32.mrb[220].mxu0 }
 0x456   : > { %v8749_v3 = vpop.f32.mrb[221].mxu0 }
 0x457   : > { %v8750_v49 = vadd.f32 %v8749_v3, %v8748_v12  ;;  %v8751_v25 = vpop.f32.mrb[222].mxu0  ;;  %v8770_v9 = vpop.f32.mrb[192].mxu1 }
 0x458   : > { %v8752_v18 = vpop.f32.mrb[223].mxu0  ;;  %v8771_v43 = vpop.f32.mrb[193].mxu1 }
 0x459   : > { %v12519_v10 = vadd.f32 %v8750_v49, %v8638_v51  ;;  %v8753_v29 = vadd.f32 %v8752_v18, %v8751_v25  ;;  %v8772_v11 = vadd.f32 %v8771_v43, %v8770_v9  ;;  %v8773_v7 = vpop.f32.mrb[194].mxu1 }
 0x45a   : > { %v8774_v23 = vpop.f32.mrb[195].mxu1 }
 0x45b   : > { %v12521_v61 = vadd.f32 %v8753_v29, %v8641_v26  ;;  %v6401_v57 = vadd.f32 %v8772_v11, %v12355_v1  ;;  %v8775_v44 = vadd.f32 %v8774_v23, %v8773_v7 }
 0x45d   : > { %v8882_v30 = vpop.f32.mrb[224].mxu0  ;;  %v6404_v17 = vadd.f32 %v8775_v44, %v12363_v22 }
 0x45e   : > { %v8883_v46 = vpop.f32.mrb[225].mxu0 }
 0x45f   : > { %v8884_v38 = vadd.f32 %v8883_v46, %v8882_v30  ;;  %v8885_v28 = vpop.f32.mrb[226].mxu0  ;;  %v8776_v32 = vpop.f32.mrb[196].mxu1 }
 0x460   : > { %v8886_v35 = vpop.f32.mrb[227].mxu0  ;;  %v8777_v24 = vpop.f32.mrb[197].mxu1 }
 0x461   : > { %v8887_v36 = vadd.f32 %v8886_v35, %v8885_v28  ;;  %v12525_v34 = vadd.f32 %v8884_v38, %v6401_v57  ;;  %v8778_v47 = vadd.f32 %v8777_v24, %v8776_v32  ;;  %v8779_v60 = vpop.f32.mrb[198].mxu1 }
 0x462   : > { %v8780_v0 = vpop.f32.mrb[199].mxu1 }
 0x463   : > { %v6409_v40 = vadd.f32 %v8778_v47, %v12412_v14  ;;  %v8781_v62 = vadd.f32 %v8780_v0, %v8779_v60  ;;  %v12528_v51 = vadd.f32 %v8887_v36, %v6404_v17 }
 0x465   : > { %v8888_v1 = vpop.f32.mrb[228].mxu0  ;;  %v6412_v22 = vadd.f32 %v8781_v62, %v12419_v2 }
 0x466   : > { %v8889_v8 = vpop.f32.mrb[229].mxu0 }
 0x467   : > { %v8890_v41 = vadd.f32 %v8889_v8, %v8888_v1  ;;  %v8891_v26 = vpop.f32.mrb[230].mxu0  ;;  %v8782_v3 = vpop.f32.mrb[200].mxu1 }
 0x468   : > { %v8892_v12 = vpop.f32.mrb[231].mxu0  ;;  %v8783_v25 = vpop.f32.mrb[201].mxu1 }
 0x469   : > { %v8893_v49 = vadd.f32 %v8892_v12, %v8891_v26  ;;  %v12531_v18 = vadd.f32 %v8890_v41, %v6409_v40  ;;  %v8784_v9 = vadd.f32 %v8783_v25, %v8782_v3  ;;  %v8785_v29 = vpop.f32.mrb[202].mxu1 }
 0x46a   : > { %v8786_v43 = vpop.f32.mrb[203].mxu1 }
 0x46b   : > { %v12533_v11 = vadd.f32 %v8893_v49, %v6412_v22  ;;  %v6417_v14 = vadd.f32 %v8784_v9, %v12433_v59  ;;  %v8787_v7 = vadd.f32 %v8786_v43, %v8785_v29 }
 0x46d   : > { %v8894_v23 = vpop.f32.mrb[232].mxu0  ;;  %v6420_v2 = vadd.f32 %v8787_v7, %v12437_v5 }
 0x46e   : > { %v8895_v57 = vpop.f32.mrb[233].mxu0 }
 0x46f   : > { %v8896_v44 = vadd.f32 %v8895_v57, %v8894_v23  ;;  %v8897_v30 = vpop.f32.mrb[234].mxu0  ;;  %v8788_v17 = vpop.f32.mrb[204].mxu1 }
 0x470   : > { %v8898_v46 = vpop.f32.mrb[235].mxu0  ;;  %v8789_v28 = vpop.f32.mrb[205].mxu1 }
 0x471   : > { %v8899_v38 = vadd.f32 %v8898_v46, %v8897_v30  ;;  %v12537_v35 = vadd.f32 %v8896_v44, %v6417_v14  ;;  %v8790_v32 = vadd.f32 %v8789_v28, %v8788_v17  ;;  %v8791_v36 = vpop.f32.mrb[206].mxu1 }
 0x472   : > { %v8792_v24 = vpop.f32.mrb[207].mxu1 }
 0x473   : > { %v12539_v47 = vadd.f32 %v8899_v38, %v6420_v2  ;;  %v6425_v59 = vadd.f32 %v8790_v32, %v12452_v48  ;;  %v8793_v60 = vadd.f32 %v8792_v24, %v8791_v36 }
 0x475   : > { %v8900_v0 = vpop.f32.mrb[236].mxu0  ;;  %v6428_v5 = vadd.f32 %v8793_v60, %v12455_v31 }
 0x476   : > { %v8901_v40 = vpop.f32.mrb[237].mxu0 }
 0x477   : > { %v8902_v62 = vadd.f32 %v8901_v40, %v8900_v0  ;;  %v8903_v1 = vpop.f32.mrb[238].mxu0  ;;  %v8794_v22 = vpop.f32.mrb[208].mxu1 }
 0x478   : > { %v8904_v8 = vpop.f32.mrb[239].mxu0  ;;  %v8795_v26 = vpop.f32.mrb[209].mxu1 }
 0x479   : > { %v8905_v41 = vadd.f32 %v8904_v8, %v8903_v1  ;;  %v12543_v12 = vadd.f32 %v8902_v62, %v6425_v59  ;;  %v8796_v3 = vadd.f32 %v8795_v26, %v8794_v22  ;;  %v8797_v49 = vpop.f32.mrb[210].mxu1 }
 0x47a   : > { %v8798_v25 = vpop.f32.mrb[211].mxu1 }
 0x47b   : > { %v12545_v9 = vadd.f32 %v8905_v41, %v6428_v5  ;;  %v6433_v48 = vadd.f32 %v8796_v3, %v12459_v55  ;;  %v8799_v29 = vadd.f32 %v8798_v25, %v8797_v49 }
 0x47d   : > { %v8906_v43 = vpop.f32.mrb[240].mxu0  ;;  %v6436_v31 = vadd.f32 %v8799_v29, %v12462_v52 }
 0x47e   : > { %v8907_v14 = vpop.f32.mrb[241].mxu0 }
 0x47f   : > { %v8908_v7 = vadd.f32 %v8907_v14, %v8906_v43  ;;  %v8909_v23 = vpop.f32.mrb[242].mxu0  ;;  %v8800_v2 = vpop.f32.mrb[212].mxu1 }
 0x480   : > { %v8910_v57 = vpop.f32.mrb[243].mxu0  ;;  %v8801_v30 = vpop.f32.mrb[213].mxu1 }
 0x481   : > { %v8911_v44 = vadd.f32 %v8910_v57, %v8909_v23  ;;  %v12549_v46 = vadd.f32 %v8908_v7, %v6433_v48  ;;  %v8802_v17 = vadd.f32 %v8801_v30, %v8800_v2  ;;  %v8803_v38 = vpop.f32.mrb[214].mxu1 }
 0x482   : > { %v8804_v28 = vpop.f32.mrb[215].mxu1 }
 0x483   : > { %v12551_v32 = vadd.f32 %v8911_v44, %v6436_v31  ;;  %v6441_v55 = vadd.f32 %v8802_v17, %v12466_v63  ;;  %v8805_v36 = vadd.f32 %v8804_v28, %v8803_v38 }
 0x485   : > { %v8912_v24 = vpop.f32.mrb[244].mxu0  ;;  %v6444_v52 = vadd.f32 %v8805_v36, %v12468_v45 }
 0x486   : > { %v8913_v59 = vpop.f32.mrb[245].mxu0 }
 0x487   : > { %v8914_v60 = vadd.f32 %v8913_v59, %v8912_v24  ;;  %v8915_v0 = vpop.f32.mrb[246].mxu0  ;;  %v8806_v5 = vpop.f32.mrb[216].mxu1 }
 0x488   : > { %v8916_v40 = vpop.f32.mrb[247].mxu0  ;;  %v8807_v1 = vpop.f32.mrb[217].mxu1 }
 0x489   : > { %v8917_v62 = vadd.f32 %v8916_v40, %v8915_v0  ;;  %v12555_v8 = vadd.f32 %v8914_v60, %v6441_v55  ;;  %v8808_v22 = vadd.f32 %v8807_v1, %v8806_v5  ;;  %v8809_v41 = vpop.f32.mrb[218].mxu1 }
 0x48a   : > { %v8810_v26 = vpop.f32.mrb[219].mxu1 }
 0x48b   : > { %v12557_v3 = vadd.f32 %v8917_v62, %v6444_v52  ;;  %v6449_v63 = vadd.f32 %v8808_v22, %v12472_v4  ;;  %v8811_v49 = vadd.f32 %v8810_v26, %v8809_v41 }
 0x48d   : > { %v8918_v25 = vpop.f32.mrb[248].mxu0  ;;  %v6452_v45 = vadd.f32 %v8811_v49, %v12474_v27 }
 0x48e   : > { %v8919_v48 = vpop.f32.mrb[249].mxu0 }
 0x48f   : > { %v8920_v29 = vadd.f32 %v8919_v48, %v8918_v25  ;;  %v8921_v43 = vpop.f32.mrb[250].mxu0  ;;  %v8812_v31 = vpop.f32.mrb[220].mxu1 }
 0x490   : > { %v8922_v14 = vpop.f32.mrb[251].mxu0  ;;  %v8813_v23 = vpop.f32.mrb[221].mxu1 }
 0x491   : > { %v8923_v7 = vadd.f32 %v8922_v14, %v8921_v43  ;;  %v12561_v57 = vadd.f32 %v8920_v29, %v6449_v63  ;;  %v8814_v2 = vadd.f32 %v8813_v23, %v8812_v31  ;;  %v8815_v44 = vpop.f32.mrb[222].mxu1 }
 0x492   : > { %v8816_v30 = vpop.f32.mrb[223].mxu1 }
 0x493   : > { %v12563_v17 = vadd.f32 %v8923_v7, %v6452_v45  ;;  %v6457_v4 = vadd.f32 %v8814_v2, %v12478_v20  ;;  %v8817_v38 = vadd.f32 %v8816_v30, %v8815_v44 }
 0x495   : > { %v8924_v28 = vpop.f32.mrb[252].mxu0  ;;  %v6460_v27 = vadd.f32 %v8817_v38, %v12480_v39 }
 0x496   : > { %v8925_v55 = vpop.f32.mrb[253].mxu0 }
 0x497   : > { %v8926_v36 = vadd.f32 %v8925_v55, %v8924_v28  ;;  %v8927_v24 = vpop.f32.mrb[254].mxu0  ;;  %v8818_v52 = vpop.f32.mrb[224].mxu1 }
 0x498   : > { %v8928_v59 = vpop.f32.mrb[255].mxu0  ;;  %v8819_v0 = vpop.f32.mrb[225].mxu1 }
 0x499   : > { %v8929_v60 = vadd.f32 %v8928_v59, %v8927_v24  ;;  %v12567_v40 = vadd.f32 %v8926_v36, %v6457_v4  ;;  %v8820_v5 = vadd.f32 %v8819_v0, %v8818_v52  ;;  %v8821_v62 = vpop.f32.mrb[226].mxu1 }
 0x49a   : > { %v8822_v1 = vpop.f32.mrb[227].mxu1 }
 0x49b   : > { %v12569_v22 = vadd.f32 %v8929_v60, %v6460_v27  ;;  %v6465_v20 = vadd.f32 %v8820_v5, %v12484_v6  ;;  %v8823_v41 = vadd.f32 %v8822_v1, %v8821_v62 }
 0x49d   : > { %v8930_v26 = vpop.f32.mrb[0].mxu0  ;;  %v6468_v39 = vadd.f32 %v8823_v41, %v12486_v33 }
 0x49e   : > { %v8931_v63 = vpop.f32.mrb[1].mxu0 }
 0x49f   : > { %v8932_v49 = vadd.f32 %v8931_v63, %v8930_v26  ;;  %v8933_v25 = vpop.f32.mrb[2].mxu0  ;;  %v8824_v45 = vpop.f32.mrb[228].mxu1 }
 0x4a0   : > { %v8934_v48 = vpop.f32.mrb[3].mxu0  ;;  %v8825_v43 = vpop.f32.mrb[229].mxu1 }
 0x4a1   : > { %v8935_v29 = vadd.f32 %v8934_v48, %v8933_v25  ;;  %v12573_v14 = vadd.f32 %v8932_v49, %v6465_v20  ;;  %v8826_v31 = vadd.f32 %v8825_v43, %v8824_v45  ;;  %v8827_v7 = vpop.f32.mrb[230].mxu1 }
 0x4a2   : > { %v8828_v23 = vpop.f32.mrb[231].mxu1 }
 0x4a3   : > { %v12575_v2 = vadd.f32 %v8935_v29, %v6468_v39  ;;  %v6473_v6 = vadd.f32 %v8826_v31, %v12490_v56  ;;  %v8829_v44 = vadd.f32 %v8828_v23, %v8827_v7 }
 0x4a5   : > { %v8936_v30 = vpop.f32.mrb[4].mxu0  ;;  %v6476_v33 = vadd.f32 %v8829_v44, %v12492_v16 }
 0x4a6   : > { %v8937_v4 = vpop.f32.mrb[5].mxu0 }
 0x4a7   : > { %v8938_v38 = vadd.f32 %v8937_v4, %v8936_v30  ;;  %v8939_v28 = vpop.f32.mrb[6].mxu0  ;;  %v8830_v27 = vpop.f32.mrb[232].mxu1 }
 0x4a8   : > { %v8940_v55 = vpop.f32.mrb[7].mxu0  ;;  %v8831_v24 = vpop.f32.mrb[233].mxu1 }
 0x4a9   : > { %v8941_v36 = vadd.f32 %v8940_v55, %v8939_v28  ;;  %v12579_v59 = vadd.f32 %v8938_v38, %v6473_v6  ;;  %v8832_v52 = vadd.f32 %v8831_v24, %v8830_v27  ;;  %v8833_v60 = vpop.f32.mrb[234].mxu1 }
 0x4aa   : > { %v8834_v0 = vpop.f32.mrb[235].mxu1 }
 0x4ab   : > { %v12581_v5 = vadd.f32 %v8941_v36, %v6476_v33  ;;  %v6481_v56 = vadd.f32 %v8832_v52, %v12496_v58  ;;  %v8835_v62 = vadd.f32 %v8834_v0, %v8833_v60 }
 0x4ad   : > { %v8942_v1 = vpop.f32.mrb[8].mxu0  ;;  %v6484_v16 = vadd.f32 %v8835_v62, %v12498_v53 }
 0x4ae   : > { %v8943_v20 = vpop.f32.mrb[9].mxu0 }
 0x4af   : > { %v8944_v41 = vadd.f32 %v8943_v20, %v8942_v1  ;;  %v8945_v26 = vpop.f32.mrb[10].mxu0  ;;  %v8836_v39 = vpop.f32.mrb[236].mxu1 }
 0x4b0   : > { %v8946_v63 = vpop.f32.mrb[11].mxu0  ;;  %v8837_v25 = vpop.f32.mrb[237].mxu1 }
 0x4b1   : > { %v8947_v49 = vadd.f32 %v8946_v63, %v8945_v26  ;;  %v12585_v48 = vadd.f32 %v8944_v41, %v6481_v56  ;;  %v8838_v45 = vadd.f32 %v8837_v25, %v8836_v39  ;;  %v8839_v29 = vpop.f32.mrb[238].mxu1 }
 0x4b2   : > { %v8840_v43 = vpop.f32.mrb[239].mxu1 }
 0x4b3   : > { %v12587_v31 = vadd.f32 %v8947_v49, %v6484_v16  ;;  %v6489_v58 = vadd.f32 %v8838_v45, %v12502_v15  ;;  %v8841_v7 = vadd.f32 %v8840_v43, %v8839_v29 }
 0x4b5   : > { %v8948_v23 = vpop.f32.mrb[12].mxu0  ;;  %v6492_v53 = vadd.f32 %v8841_v7, %v12504_v42 }
 0x4b6   : > { %v8949_v6 = vpop.f32.mrb[13].mxu0 }
 0x4b7   : > { %v8950_v44 = vadd.f32 %v8949_v6, %v8948_v23  ;;  %v8951_v30 = vpop.f32.mrb[14].mxu0  ;;  %v8842_v33 = vpop.f32.mrb[240].mxu1 }
 0x4b8   : > { %v8952_v4 = vpop.f32.mrb[15].mxu0  ;;  %v8843_v28 = vpop.f32.mrb[241].mxu1 }
 0x4b9   : > { %v8953_v38 = vadd.f32 %v8952_v4, %v8951_v30  ;;  %v12591_v55 = vadd.f32 %v8950_v44, %v6489_v58  ;;  %v8844_v27 = vadd.f32 %v8843_v28, %v8842_v33  ;;  %v8845_v36 = vpop.f32.mrb[242].mxu1 }
 0x4ba   : > { %v8846_v24 = vpop.f32.mrb[243].mxu1 }
 0x4bb   : > { %v12593_v52 = vadd.f32 %v8953_v38, %v6492_v53  ;;  %v6497_v15 = vadd.f32 %v8844_v27, %v12507_v54  ;;  %v8847_v60 = vadd.f32 %v8846_v24, %v8845_v36 }
 0x4bd   : > { %v8954_v0 = vpop.f32.mrb[16].mxu0  ;;  %v6500_v42 = vadd.f32 %v8847_v60, %v12509_v37 }
 0x4be   : > { %v8955_v56 = vpop.f32.mrb[17].mxu0 }
 0x4bf   : > { %v8956_v62 = vadd.f32 %v8955_v56, %v8954_v0  ;;  %v8957_v1 = vpop.f32.mrb[18].mxu0  ;;  %v8848_v16 = vpop.f32.mrb[244].mxu1 }
 0x4c0   : > { %v8958_v20 = vpop.f32.mrb[19].mxu0  ;;  %v8849_v26 = vpop.f32.mrb[245].mxu1 }
 0x4c1   : > { %v8959_v41 = vadd.f32 %v8958_v20, %v8957_v1  ;;  %v12597_v63 = vadd.f32 %v8956_v62, %v6497_v15  ;;  %v8850_v39 = vadd.f32 %v8849_v26, %v8848_v16  ;;  %v8851_v49 = vpop.f32.mrb[246].mxu1 }
 0x4c2   : > { %v8852_v25 = vpop.f32.mrb[247].mxu1 }
 0x4c3   : > { %v12599_v45 = vadd.f32 %v8959_v41, %v6500_v42  ;;  %v6505_v54 = vadd.f32 %v8850_v39, %v12511_v13  ;;  %v8853_v29 = vadd.f32 %v8852_v25, %v8851_v49 }
 0x4c5   : > { %v8960_v43 = vpop.f32.mrb[20].mxu0  ;;  %v6508_v37 = vadd.f32 %v8853_v29, %v12513_v50 }
 0x4c6   : > { %v8961_v58 = vpop.f32.mrb[21].mxu0 }
 0x4c7   : > { %v8962_v7 = vadd.f32 %v8961_v58, %v8960_v43  ;;  %v8963_v23 = vpop.f32.mrb[22].mxu0  ;;  %v8854_v53 = vpop.f32.mrb[248].mxu1 }
 0x4c8   : > { %v8964_v6 = vpop.f32.mrb[23].mxu0  ;;  %v8855_v30 = vpop.f32.mrb[249].mxu1 }
 0x4c9   : > { %v8965_v44 = vadd.f32 %v8964_v6, %v8963_v23  ;;  %v12603_v4 = vadd.f32 %v8962_v7, %v6505_v54  ;;  %v8856_v33 = vadd.f32 %v8855_v30, %v8854_v53  ;;  %v8857_v38 = vpop.f32.mrb[250].mxu1  ;;  %v12615_v7 = vld [vmem:[#allocation12] ss:$0 sm:$0xff]  ;;  %v12620_v30 = vld [vmem:[#allocation14] ss:$0 sm:$0xff] }
 0x4ca   : > { %v8858_v28 = vpop.f32.mrb[251].mxu1 }
 0x4cb   : > { %v12605_v27 = vadd.f32 %v8965_v44, %v6508_v37  ;;  %v6513_v13 = vadd.f32 %v8856_v33, %v12515_v19  ;;  %v8859_v36 = vadd.f32 %v8858_v28, %v8857_v38 }
 0x4cd   : > { %v8966_v24 = vpop.f32.mrb[24].mxu0  ;;  %v6516_v50 = vadd.f32 %v8859_v36, %v12517_v21 }
 0x4ce   : > { %v8967_v15 = vpop.f32.mrb[25].mxu0 }
 0x4cf   : > { %v8968_v60 = vadd.f32 %v8967_v15, %v8966_v24  ;;  %v8969_v0 = vpop.f32.mrb[26].mxu0  ;;  %v8860_v42 = vpop.f32.mrb[252].mxu1 }
 0x4d0   : > { %v8970_v56 = vpop.f32.mrb[27].mxu0  ;;  %v8861_v1 = vpop.f32.mrb[253].mxu1 }
 0x4d1   : > { %v8971_v62 = vadd.f32 %v8970_v56, %v8969_v0  ;;  %v12609_v20 = vadd.f32 %v8968_v60, %v6513_v13  ;;  %v8862_v16 = vadd.f32 %v8861_v1, %v8860_v42  ;;  %v8863_v41 = vpop.f32.mrb[254].mxu1 }
 0x4d2   : > { %v8864_v26 = vpop.f32.mrb[255].mxu1 }
 0x4d3   : > { %v12611_v39 = vadd.f32 %v8971_v62, %v6516_v50  ;;  %v6521_v19 = vadd.f32 %v8862_v16, %v12519_v10  ;;  %v8865_v49 = vadd.f32 %v8864_v26, %v8863_v41 }
 0x4d5   : > { %v8972_v25 = vpop.f32.mrb[28].mxu0  ;;  %v6524_v54 = vadd.f32 %v8865_v49, %v12521_v61 }
 0x4d6   : > { %v8973_v21 = vpop.f32.mrb[29].mxu0 }
 0x4d7   : > { %v8974_v29 = vadd.f32 %v8973_v21, %v8972_v25  ;;  %v8975_v43 = vpop.f32.mrb[30].mxu0  ;;  %v9068_v37 = vpop.f32.mrb[0].mxu1 }
 0x4d8   : > { %v8976_v58 = vpop.f32.mrb[31].mxu0  ;;  %v6731_v6 = vadd.f32 %v9068_v37, %v12531_v18  ;;  %v6722_v53 = vpop.f32.mrb[1].mxu1 }
 0x4d9   : > { %v8977_v23 = vadd.f32 %v8976_v58, %v8975_v43  ;;  %v12618_v44 = vadd.f32 %v8974_v29, %v6521_v19  ;;  %v6723_v10 = vadd.f32 %v6722_v53, %v12525_v34  ;;  %v9069_v33 = vpop.f32.mrb[2].mxu1 }
 0x4da   : > { %v6858_v61 = vmul.f32 %v12615_v7, %v6731_v6  ;;  %v6734_v38 = vadd.f32 %v9069_v33, %v12533_v11  ;;  %v6725_v28 = vpop.f32.mrb[3].mxu1 }
 0x4db   : > { %v12625_v13 = vadd.f32 %v8977_v23, %v6524_v54  ;;  %v6856_v36 = vmul.f32 %v12615_v7, %v6723_v10  ;;  %v6726_v18 = vadd.f32 %v6725_v28, %v12528_v51 }
 0x4dc   : > { %v6897_v24 = vadd.f32 %v12620_v30, %v6858_v61  ;;  %v6859_v15 = vmul.f32 %v12615_v7, %v6734_v38 }
 0x4dd   : > { %v6895_v50 = vadd.f32 %v12620_v30, %v6856_v36  ;;  %v6857_v34 = vmul.f32 %v12615_v7, %v6726_v18 }
 0x4de   : > { %v6898_v60 = vadd.f32 %v12620_v30, %v6859_v15  ;;  %v6929_v56 = vmax.f32 %v6897_v24, 0.0 }
 0x4df   : > { %v6896_v11 = vadd.f32 %v12620_v30, %v6857_v34  ;;  %v9072_v0 = vpop.f32.mrb[4].mxu1  ;;  %v6927_v51 = vmax.f32 %v6895_v50, 0.0 }
 0x4e0   : > { %v6930_v42 = vmax.f32 %v6898_v60, 0.0  ;;  %v6747_v62 = vadd.f32 %v9072_v0, %v12543_v12  ;;  %v6738_v1 = vpop.f32.mrb[5].mxu1 }
 0x4e1   : > { %v6928_v16 = vmax.f32 %v6896_v11, 0.0  ;;  %v6739_v41 = vadd.f32 %v6738_v1, %v12537_v35  ;;  %v9073_v26 = vpop.f32.mrb[6].mxu1 }
 0x4e2   : > { %v7971_v19 = vpack.c.bf16 %v6930_v42, %v6929_v56  ;;  %v6862_v49 = vmul.f32 %v12615_v7, %v6747_v62  ;;  %v6750_v25 = vadd.f32 %v9073_v26, %v12545_v9  ;;  %v6741_v54 = vpop.f32.mrb[7].mxu1 }
 0x4e3   : > { %v7966_v21 = vpack.c.bf16 %v6928_v16, %v6927_v51  ;;  %v6860_v29 = vmul.f32 %v12615_v7, %v6739_v41  ;;  %v6742_v43 = vadd.f32 %v6741_v54, %v12539_v47 }
 0x4e4   : > { %8043 = vst [vmem:[%s12642_s20 + $0x8] sm:$0xff] %v7971_v19   ;;  %v6901_v12 = vadd.f32 %v12620_v30, %v6862_v49  ;;  %v6863_v35 = vmul.f32 %v12615_v7, %v6750_v25 }
 0x4e5   : > { %7967 = vst [vmem:[%s12642_s20] sm:$0xff] %v7966_v21   ;;  %v6899_v58 = vadd.f32 %v12620_v30, %v6860_v29  ;;  %v6861_v9 = vmul.f32 %v12615_v7, %v6742_v43 }
 0x4e6   : > { %v6902_v37 = vadd.f32 %v12620_v30, %v6863_v35  ;;  %v6933_v47 = vmax.f32 %v6901_v12, 0.0 }
 0x4e7   : > { %v6900_v23 = vadd.f32 %v12620_v30, %v6861_v9  ;;  %v9076_v6 = vpop.f32.mrb[8].mxu1  ;;  %v6931_v61 = vmax.f32 %v6899_v58, 0.0 }
 0x4e8   : > { %v6934_v53 = vmax.f32 %v6902_v37, 0.0  ;;  %v6763_v10 = vadd.f32 %v9076_v6, %v12555_v8  ;;  %v6754_v33 = vpop.f32.mrb[9].mxu1 }
 0x4e9   : > { %v6932_v38 = vmax.f32 %v6900_v23, 0.0  ;;  %v6755_v28 = vadd.f32 %v6754_v33, %v12549_v46  ;;  %v9077_v36 = vpop.f32.mrb[10].mxu1 }
 0x4ea   : > { %v7981_v18 = vpack.c.bf16 %v6934_v53, %v6933_v47  ;;  %v6866_v24 = vmul.f32 %v12615_v7, %v6763_v10  ;;  %v6766_v15 = vadd.f32 %v9077_v36, %v12557_v3  ;;  %v6757_v50 = vpop.f32.mrb[11].mxu1 }
 0x4eb   : > { %v7976_v34 = vpack.c.bf16 %v6932_v38, %v6931_v61  ;;  %v6864_v60 = vmul.f32 %v12615_v7, %v6755_v28  ;;  %v6758_v11 = vadd.f32 %v6757_v50, %v12551_v32 }
 0x4ec   : > { %8045 = vst [vmem:[%s12642_s20 + $0x18] sm:$0xff] %v7981_v18   ;;  %v6905_v8 = vadd.f32 %v12620_v30, %v6866_v24  ;;  %v6867_v0 = vmul.f32 %v12615_v7, %v6766_v15 }
 0x4ed   : > { %8044 = vst [vmem:[%s12642_s20 + $0x10] sm:$0xff] %v7976_v34   ;;  %v6903_v46 = vadd.f32 %v12620_v30, %v6864_v60  ;;  %v6865_v56 = vmul.f32 %v12615_v7, %v6758_v11 }
 0x4ee   : > { %v6906_v42 = vadd.f32 %v12620_v30, %v6867_v0  ;;  %v6937_v1 = vmax.f32 %v6905_v8, 0.0 }
 0x4ef   : > { %v6904_v3 = vadd.f32 %v12620_v30, %v6865_v56  ;;  %v9080_v62 = vpop.f32.mrb[12].mxu1  ;;  %v6935_v41 = vmax.f32 %v6903_v46, 0.0 }
 0x4f0   : > { %v6938_v51 = vmax.f32 %v6906_v42, 0.0  ;;  %v6779_v32 = vadd.f32 %v9080_v62, %v12567_v40  ;;  %v6770_v16 = vpop.f32.mrb[13].mxu1 }
 0x4f1   : > { %v6936_v26 = vmax.f32 %v6904_v3, 0.0  ;;  %v6771_v19 = vadd.f32 %v6770_v16, %v12561_v57  ;;  %v9081_v49 = vpop.f32.mrb[14].mxu1 }
 0x4f2   : > { %v7991_v25 = vpack.c.bf16 %v6938_v51, %v6937_v1  ;;  %v6870_v54 = vmul.f32 %v12615_v7, %v6779_v32  ;;  %v6782_v21 = vadd.f32 %v9081_v49, %v12569_v22  ;;  %v6773_v29 = vpop.f32.mrb[15].mxu1 }
 0x4f3   : > { %v7986_v43 = vpack.c.bf16 %v6936_v26, %v6935_v41  ;;  %v6868_v12 = vmul.f32 %v12615_v7, %v6771_v19  ;;  %v6774_v35 = vadd.f32 %v6773_v29, %v12563_v17 }
 0x4f4   : > { %8047 = vst [vmem:[%s12642_s20 + $0x28] sm:$0xff] %v7991_v25   ;;  %v6909_v40 = vadd.f32 %v12620_v30, %v6870_v54  ;;  %v6871_v58 = vmul.f32 %v12615_v7, %v6782_v21 }
 0x4f5   : > { %8046 = vst [vmem:[%s12642_s20 + $0x20] sm:$0xff] %v7986_v43   ;;  %v6907_v57 = vadd.f32 %v12620_v30, %v6868_v12  ;;  %v6869_v9 = vmul.f32 %v12615_v7, %v6774_v35 }
 0x4f6   : > { %v6910_v37 = vadd.f32 %v12620_v30, %v6871_v58  ;;  %v6941_v6 = vmax.f32 %v6909_v40, 0.0 }
 0x4f7   : > { %v6908_v22 = vadd.f32 %v12620_v30, %v6869_v9  ;;  %v9084_v23 = vpop.f32.mrb[16].mxu1  ;;  %v6939_v10 = vmax.f32 %v6907_v57, 0.0 }
 0x4f8   : > { %v6942_v47 = vmax.f32 %v6910_v37, 0.0  ;;  %v6795_v17 = vadd.f32 %v9084_v23, %v12579_v59  ;;  %v6786_v53 = vpop.f32.mrb[17].mxu1 }
 0x4f9   : > { %v6940_v33 = vmax.f32 %v6908_v22, 0.0  ;;  %v6787_v61 = vadd.f32 %v6786_v53, %v12573_v14  ;;  %v9085_v38 = vpop.f32.mrb[18].mxu1 }
 0x4fa   : > { %v8001_v28 = vpack.c.bf16 %v6942_v47, %v6941_v6  ;;  %v6874_v36 = vmul.f32 %v12615_v7, %v6795_v17  ;;  %v6798_v18 = vadd.f32 %v9085_v38, %v12581_v5  ;;  %v6789_v24 = vpop.f32.mrb[19].mxu1 }
 0x4fb   : > { %v7996_v15 = vpack.c.bf16 %v6940_v33, %v6939_v10  ;;  %v6872_v50 = vmul.f32 %v12615_v7, %v6787_v61  ;;  %v6790_v34 = vadd.f32 %v6789_v24, %v12575_v2 }
 0x4fc   : > { %8049 = vst [vmem:[%s12642_s20 + $0x38] sm:$0xff] %v8001_v28   ;;  %v6913_v59 = vadd.f32 %v12620_v30, %v6874_v36  ;;  %v6875_v60 = vmul.f32 %v12615_v7, %v6798_v18 }
 0x4fd   : > { %8048 = vst [vmem:[%s12642_s20 + $0x30] sm:$0xff] %v7996_v15   ;;  %v6911_v14 = vadd.f32 %v12620_v30, %v6872_v50  ;;  %v6873_v11 = vmul.f32 %v12615_v7, %v6790_v34 }
 0x4fe   : > { %v6914_v8 = vadd.f32 %v12620_v30, %v6875_v60  ;;  %v6945_v46 = vmax.f32 %v6913_v59, 0.0 }
 0x4ff   : > { %v6912_v5 = vadd.f32 %v12620_v30, %v6873_v11  ;;  %v9088_v0 = vpop.f32.mrb[20].mxu1  ;;  %v6943_v3 = vmax.f32 %v6911_v14, 0.0 }
 0x500   : > { %v6946_v56 = vmax.f32 %v6914_v8, 0.0  ;;  %v6811_v2 = vadd.f32 %v9088_v0, %v12591_v55  ;;  %v6802_v42 = vpop.f32.mrb[21].mxu1 }
 0x501   : > { %v6944_v62 = vmax.f32 %v6912_v5, 0.0  ;;  %v6803_v1 = vadd.f32 %v6802_v42, %v12585_v48  ;;  %v9089_v51 = vpop.f32.mrb[22].mxu1 }
 0x502   : > { %v8011_v32 = vpack.c.bf16 %v6946_v56, %v6945_v46  ;;  %v6878_v16 = vmul.f32 %v12615_v7, %v6811_v2  ;;  %v6814_v41 = vadd.f32 %v9089_v51, %v12593_v52  ;;  %v6805_v26 = vpop.f32.mrb[23].mxu1 }
 0x503   : > { %v8006_v19 = vpack.c.bf16 %v6944_v62, %v6943_v3  ;;  %v6876_v49 = vmul.f32 %v12615_v7, %v6803_v1  ;;  %v6806_v25 = vadd.f32 %v6805_v26, %v12587_v31 }
 0x504   : > { %8051 = vst [vmem:[%s12642_s20 + $0x48] sm:$0xff] %v8011_v32   ;;  %v6917_v55 = vadd.f32 %v12620_v30, %v6878_v16  ;;  %v6879_v54 = vmul.f32 %v12615_v7, %v6814_v41 }
 0x505   : > { %8050 = vst [vmem:[%s12642_s20 + $0x40] sm:$0xff] %v8006_v19   ;;  %v6915_v48 = vadd.f32 %v12620_v30, %v6876_v49  ;;  %v6877_v21 = vmul.f32 %v12615_v7, %v6806_v25 }
 0x506   : > { %v6918_v29 = vadd.f32 %v12620_v30, %v6879_v54  ;;  %v6949_v12 = vmax.f32 %v6917_v55, 0.0 }
 0x507   : > { %v6916_v52 = vadd.f32 %v12620_v30, %v6877_v21  ;;  %v9092_v43 = vpop.f32.mrb[24].mxu1  ;;  %v6947_v58 = vmax.f32 %v6915_v48, 0.0 }
 0x508   : > { %v6950_v35 = vmax.f32 %v6918_v29, 0.0  ;;  %v6827_v31 = vadd.f32 %v9092_v43, %v12603_v4  ;;  %v6818_v40 = vpop.f32.mrb[25].mxu1 }
 0x509   : > { %v6948_v57 = vmax.f32 %v6916_v52, 0.0  ;;  %v6819_v9 = vadd.f32 %v6818_v40, %v12597_v63  ;;  %v9093_v37 = vpop.f32.mrb[26].mxu1 }
 0x50a   : > { %v8021_v22 = vpack.c.bf16 %v6950_v35, %v6949_v12  ;;  %v6882_v23 = vmul.f32 %v12615_v7, %v6827_v31  ;;  %v6830_v6 = vadd.f32 %v9093_v37, %v12605_v27  ;;  %v6821_v47 = vpop.f32.mrb[27].mxu1 }
 0x50b   : > { %v8016_v17 = vpack.c.bf16 %v6948_v57, %v6947_v58  ;;  %v6880_v53 = vmul.f32 %v12615_v7, %v6819_v9  ;;  %v6822_v10 = vadd.f32 %v6821_v47, %v12599_v45 }
 0x50c   : > { %8053 = vst [vmem:[%s12642_s20 + $0x58] sm:$0xff] %v8021_v22   ;;  %v6921_v4 = vadd.f32 %v12620_v30, %v6882_v23  ;;  %v6883_v33 = vmul.f32 %v12615_v7, %v6830_v6 }
 0x50d   : > { %8052 = vst [vmem:[%s12642_s20 + $0x50] sm:$0xff] %v8016_v17   ;;  %v6919_v63 = vadd.f32 %v12620_v30, %v6880_v53  ;;  %v6881_v61 = vmul.f32 %v12615_v7, %v6822_v10 }
 0x50e   : > { %v6922_v38 = vadd.f32 %v12620_v30, %v6883_v33  ;;  %v6953_v36 = vmax.f32 %v6921_v4, 0.0 }
 0x50f   : > { %v6920_v27 = vadd.f32 %v12620_v30, %v6881_v61  ;;  %v9096_v28 = vpop.f32.mrb[28].mxu1  ;;  %v6951_v15 = vmax.f32 %v6919_v63, 0.0 }
 0x510   : > { %v6954_v18 = vmax.f32 %v6922_v38, 0.0  ;;  %v6843_v45 = vadd.f32 %v9096_v28, %v12618_v44  ;;  %v6834_v24 = vpop.f32.mrb[29].mxu1 }
 0x511   : > { %v6952_v50 = vmax.f32 %v6920_v27, 0.0  ;;  %v6835_v34 = vadd.f32 %v6834_v24, %v12609_v20  ;;  %v9097_v59 = vpop.f32.mrb[30].mxu1 }
 0x512   : > { %v8031_v60 = vpack.c.bf16 %v6954_v18, %v6953_v36  ;;  %v6886_v14 = vmul.f32 %v12615_v7, %v6843_v45  ;;  %v6846_v11 = vadd.f32 %v9097_v59, %v12625_v13  ;;  %v6837_v8 = vpop.f32.mrb[31].mxu1 }
 0x513   : > { %v8026_v5 = vpack.c.bf16 %v6952_v50, %v6951_v15  ;;  %v6884_v0 = vmul.f32 %v12615_v7, %v6835_v34  ;;  %v6838_v44 = vadd.f32 %v6837_v8, %v12611_v39 }
 0x514   : > { %8055 = vst [vmem:[%s12642_s20 + $0x68] sm:$0xff] %v8031_v60   ;;  %v6925_v46 = vadd.f32 %v12620_v30, %v6886_v14  ;;  %v6887_v56 = vmul.f32 %v12615_v7, %v6846_v11 }
 0x515   : > { %8054 = vst [vmem:[%s12642_s20 + $0x60] sm:$0xff] %v8026_v5   ;;  %v6923_v20 = vadd.f32 %v12620_v30, %v6884_v0  ;;  %v6885_v2 = vmul.f32 %v12615_v7, %v6838_v44 }
 0x516   : > { %v6926_v13 = vadd.f32 %v12620_v30, %v6887_v56  ;;  %v6957_v39 = vmax.f32 %v6925_v46, 0.0 }
 0x517   : > { %v6924_v42 = vadd.f32 %v12620_v30, %v6885_v2  ;;  %v6955_v62 = vmax.f32 %v6923_v20, 0.0 }
 0x518   : > { %v6958_v3 = vmax.f32 %v6926_v13, 0.0 }
 0x519   : > { %v6956_v1 = vmax.f32 %v6924_v42, 0.0 }
 0x51a   : > { %v8041_v51 = vpack.c.bf16 %v6958_v3, %v6957_v39 }
 0x51b   : > { %v8036_v7 = vpack.c.bf16 %v6956_v1, %v6955_v62 }
 0x51c   : > { %8057 = vst [vmem:[%s12642_s20 + $0x78] sm:$0xff] %v8041_v51  }
 0x51d   : > { %8056 = vst [vmem:[%s12642_s20 + $0x70] sm:$0xff] %v8036_v7  }
 0x51e   : > { %9875 = shalt.err (!%p9872_p8)
}
 0x51f   : > { %s9876_s13 = scalar_lea.hbm %s12741_s29, 2048  ;;  %s9880_s8 = scalar_lea.hbm %s12796_s7, 4096 }
 0x520   : > { %p9877_p4 = scmp.ne.s32.totalorder %s12741_s29, %s9876_s13  ;;  %p9881_p0 = scmp.lt.u32.totalorder %s12741_s29, %s12796_s7 }
 0x521   : > { %p9882_p6 = scmp.lt.u32.totalorder %s9880_s8, %s9876_s13  ;;  %p9884_p5 = scmp.lt.u32.totalorder %s9876_s13, %s12741_s29 }
 0x522   : > { %p9878_p10 = pnand %p9877_p4, %p13028_p9 }
 0x523   : > { %p9883_p7 = por %p9882_p6, %p9881_p0 }
 0x524   : > { %p9879_p11 = pneg %p9878_p10 }
 0x525   : > { %p9885_p12 = por %p9884_p5, %p9883_p7 }
 0x527   : > { %p9886_p13 = pnand %p9885_p12, %p9879_p11 }
 0x529   : > { %9889 = shalt.err (!%p9886_p13)
}
 0x52a   : > { %s9953_s12 = smov 64   ;;  %s9954_s17 = smov 4  }
 0x52b   : > { %9127 = dma.vmem_to_hbm [thread:$0]  (%p13028_p9), %s12743_s9, 2048, %s12741_s29, %s7120_s30, %s9953_s12, %s9953_s12, %s9954_s17  }
 0x52c PF: > { %s7148_s19 = sand.u32 1, %s9928_s24   ;;  %p13029_p1 = scmp.ne.s32.totalorder %s12849_s10, 0 }
 0x52d   : > { %p13030_p3 = scmp.ge.s32.totalorder %s9940_s27, 2  ;;  %s7149_s1 = scalar_lea.sflag [#allocation5], %s7148_s19 }
 0x52f   : > { %p9153_p2 = pnand %p13030_p3, %p13029_p1 }
 0x531   : > { %9923 = dma.done.wait (!%p9153_p2), %s7149_s1, 2048  }
 0x532   : > { %9925 = vsyncadd (!%p9153_p2), %s7149_s1, 4294965248  ;;  %p23_p8 = scmp.ge.s32.totalorder %s10179_s11, 4   ;;  %s13031_s24 = smov %s9932_s25 }
 0x533   : > { %s13032_s25 = smov %s9936_s26  ;;  %s13033_s26 = smov %s10190_s18 }
 0x534   : > { %s13034_s27 = smov %s10179_s11  ;;  %25 = sbr.rel (!%p23_p8) target bundleno = 10 (0xa), region = 122 }
 0x53b   :  { %7154 = vsyncpa [#allocation4], 1 }
 0x53c   :  { %7156 = vsyncpa [#allocation4 + $0x1], 1 }
 0x53d   :  { %7157 = vsyncpa [#allocation7], 1 }
 0x53e   :  { %7158 = vsyncpa [#allocation10], 1 }
 0x53f   :  { %7159 = vsyncpa [#allocation13], 1 }
 0x540   :  { %7160 = vsyncpa [#allocation5], 1 }
 0x541   :  { %7162 = vsyncpa [#allocation5 + $0x1], 1 }

</bundles_post_ra>
